<compile_context>
chip_gen: v5e
topology: v5e:2x2
jax: 0.10.0
libtpu: 0.0.40
codegen_flags: <defaults>
</compile_context>

<pallas_src>
import jax
import jax.numpy as jnp
from jax.experimental import pallas as pl
from jax.experimental.pallas import tpu as pltpu

H1, H2, H3 = 512, 1024, 2048   # fixed hidden widths of the Generator


def _generator_kernel(x_ref, w1_ref, b1_ref, w2_ref, b2_ref,
                      w3_ref, b3_ref, w4_ref, b4_ref, o_ref):
    """Single fused step: all four Linear(+ReLU) layers, bf16 MXU dots, f32 acc."""
    x = x_ref[...].astype(jnp.bfloat16)
    h1 = jnp.dot(x, w1_ref[...], preferred_element_type=jnp.float32) + b1_ref[...]
    h1 = jnp.maximum(h1, 0.0).astype(jnp.bfloat16)
    h2 = jnp.dot(h1, w2_ref[...], preferred_element_type=jnp.float32) + b2_ref[...]
    h2 = jnp.maximum(h2, 0.0).astype(jnp.bfloat16)
    h3 = jnp.dot(h2, w3_ref[...], preferred_element_type=jnp.float32) + b3_ref[...]
    h3 = jnp.maximum(h3, 0.0).astype(jnp.bfloat16)
    y = jnp.dot(h3, w4_ref[...], preferred_element_type=jnp.float32) + b4_ref[...]
    o_ref[...] = y.astype(o_ref.dtype)


def generator_forward(params, x):
    """Forward pass of Generator: 3x (Linear+ReLU) then Linear, fused in one kernel.

    `params` weights are expected in bf16 (see cast_params_for_tpu); biases f32.
    """
    (w1, b1), (w2, b2), (w3, b3), (w4, b4) = params
    M, I = x.shape
    O = w4.shape[1]
    assert w1.shape == (I, H1) and w2.shape == (H1, H2)
    assert w3.shape == (H2, H3) and w4.shape == (H3, O)

    out = pl.pallas_call(
        _generator_kernel,
        out_shape=jax.ShapeDtypeStruct((M, O), jnp.float32),
        grid_spec=pltpu.PrefetchScalarGridSpec(
            num_scalar_prefetch=0,
            grid=(1,),
            in_specs=[
                pl.BlockSpec((M, I),    lambda j: (0, 0)),   # x
                pl.BlockSpec((I, H1),   lambda j: (0, 0)),   # W1 (bf16)
                pl.BlockSpec((1, H1),   lambda j: (0, 0)),   # b1 (f32)
                pl.BlockSpec((H1, H2),  lambda j: (0, 0)),   # W2 (bf16)
                pl.BlockSpec((1, H2),   lambda j: (0, 0)),   # b2 (f32)
                pl.BlockSpec((H2, H3),  lambda j: (0, 0)),   # W3 (bf16)
                pl.BlockSpec((1, H3),   lambda j: (0, 0)),   # b3 (f32)
                pl.BlockSpec((H3, O),   lambda j: (0, 0)),   # W4 (bf16)
                pl.BlockSpec((1, O),    lambda j: (0, 0)),   # b4 (f32)
            ],
            out_specs=pl.BlockSpec((M, O), lambda j: (0, 0)),
        ),
        compiler_params=pltpu.CompilerParams(
            dimension_semantics=("arbitrary",),
            vmem_limit_bytes=32 * 1024 * 1024,
        ),
    )(x, w1, b1.reshape(1, H1), w2, b2.reshape(1, H2),
      w3, b3.reshape(1, H3), w4, b4.reshape(1, O))

    return out.astype(x.dtype)


def init_generator_params(key, input_size, output_size, dtype=jnp.float32):
    """Deterministic synthetic f32 parameters matching nn.Linear's init scheme/shapes."""
    dims = [input_size, H1, H2, H3, output_size]
    params = []
    for i in range(4):
        key, kw, kb = jax.random.split(key, 3)
        fan_in = dims[i]
        bound = 1.0 / jnp.sqrt(fan_in)
        w = jax.random.uniform(
            kw, (dims[i], dims[i + 1]), dtype=dtype, minval=-bound, maxval=bound
        )
        b = jax.random.uniform(
            kb, (dims[i + 1],), dtype=dtype, minval=-bound, maxval=bound
        )
        params.append((w, b))
    return params


def cast_params_for_tpu(params_f32):
    """One-time cast: weights -> bf16 (halves HBM traffic on this bandwidth-bound
    kernel, MXU-native with f32 accumulate), biases stay f32 (negligible bytes)."""
    return [(w.astype(jnp.bfloat16), b.astype(jnp.float32)) for (w, b) in params_f32]


if __name__ == "__main__":
    batch = 8          # sublane-aligned small batch
    input_size = 32
    output_size = 64

    key = jax.random.PRNGKey(0)
    kp, kx = jax.random.split(key)
    params_f32 = init_generator_params(kp, input_size, output_size)
    params = cast_params_for_tpu(params_f32)
    x = jax.random.normal(kx, (batch, input_size), dtype=jnp.float32)

    out = generator_forward(params, x)
    out = jax.block_until_ready(out)

    # Reference check in plain JAX using the identical bf16-weight / f32-accumulate
    # numerics as the kernel (the bf16 cast is an intentional, reviewed precision
    # relaxation vs. the f32 PyTorch module).
    ref = x
    for i, (w, b) in enumerate(params):
        ref = jnp.dot(ref.astype(jnp.bfloat16), w,
                      preferred_element_type=jnp.float32) + b
        if i < 3:
            ref = jnp.maximum(ref, 0.0)

    assert out.shape == (batch, output_size)
    assert jnp.allclose(out, ref.astype(out.dtype), atol=2e-2, rtol=2e-2)

    print("KERNEL_OK")
</pallas_src>

<mosaic_0001>
module attributes {stable_mosaic.version = 11 : i64} {
  func.func @_generator_kernel(%arg0: i32, %arg1: memref<8x32xf32, #tpu.memory_space<vmem>>, %arg2: memref<32x512xbf16, #tpu.memory_space<vmem>>, %arg3: memref<1x512xf32, #tpu.memory_space<vmem>>, %arg4: memref<512x1024xbf16, #tpu.memory_space<vmem>>, %arg5: memref<1x1024xf32, #tpu.memory_space<vmem>>, %arg6: memref<1024x2048xbf16, #tpu.memory_space<vmem>>, %arg7: memref<1x2048xf32, #tpu.memory_space<vmem>>, %arg8: memref<2048x64xbf16, #tpu.memory_space<vmem>>, %arg9: memref<1x64xf32, #tpu.memory_space<vmem>>, %arg10: memref<8x64xf32, #tpu.memory_space<vmem>>) attributes {dimension_semantics = [#tpu.dimension_semantics<arbitrary>], iteration_bounds = array<i64: 1>, scalar_prefetch = 0 : i64, scratch_operands = 0 : i64, tpu.core_type = #tpu.core_type<tc>, window_params = [{pipeline_mode = #tpu.pipeline_mode<synchronous>, transform_indices = @transform_0, window_bounds = array<i64: 8, 32>}, {pipeline_mode = #tpu.pipeline_mode<synchronous>, transform_indices = @transform_1, window_bounds = array<i64: 32, 512>}, {pipeline_mode = #tpu.pipeline_mode<synchronous>, transform_indices = @transform_2, window_bounds = array<i64: 1, 512>}, {pipeline_mode = #tpu.pipeline_mode<synchronous>, transform_indices = @transform_3, window_bounds = array<i64: 512, 1024>}, {pipeline_mode = #tpu.pipeline_mode<synchronous>, transform_indices = @transform_4, window_bounds = array<i64: 1, 1024>}, {pipeline_mode = #tpu.pipeline_mode<synchronous>, transform_indices = @transform_5, window_bounds = array<i64: 1024, 2048>}, {pipeline_mode = #tpu.pipeline_mode<synchronous>, transform_indices = @transform_6, window_bounds = array<i64: 1, 2048>}, {pipeline_mode = #tpu.pipeline_mode<synchronous>, transform_indices = @transform_7, window_bounds = array<i64: 2048, 64>}, {pipeline_mode = #tpu.pipeline_mode<synchronous>, transform_indices = @transform_8, window_bounds = array<i64: 1, 64>}, {pipeline_mode = #tpu.pipeline_mode<synchronous>, transform_indices = @transform_9, window_bounds = array<i64: 8, 64>}]} {
    %c0 = arith.constant 0 : index
    %c0_0 = arith.constant 0 : index
    %0 = vector.load %arg1[%c0, %c0_0] : memref<8x32xf32, #tpu.memory_space<vmem>>, vector<8x32xf32>
    %1 = arith.truncf %0 : vector<8x32xf32> to vector<8x32xbf16>
    %c0_1 = arith.constant 0 : index
    %c0_2 = arith.constant 0 : index
    %2 = vector.load %arg2[%c0_1, %c0_2] : memref<32x512xbf16, #tpu.memory_space<vmem>>, vector<32x512xbf16>
    %cst = arith.constant dense<0.000000e+00> : vector<8x512xf32>
    %3 = tpu.matmul %1, %2, %cst {dimension_numbers = #tpu.dot_dimension_numbers<[1], [0], [0], [1], [0, 0, 1, 1], [], []>} : vector<8x32xbf16>, vector<32x512xbf16>, vector<8x512xf32> -> vector<8x512xf32>
    %c0_3 = arith.constant 0 : index
    %c0_4 = arith.constant 0 : index
    %4 = vector.load %arg3[%c0_3, %c0_4] : memref<1x512xf32, #tpu.memory_space<vmem>>, vector<1x512xf32>
    %5 = vector.broadcast %4 : vector<1x512xf32> to vector<8x512xf32>
    %6 = arith.addf %3, %5 : vector<8x512xf32>
    %cst_5 = arith.constant 0.000000e+00 : f32
    %7 = vector.broadcast %cst_5 : f32 to vector<8x512xf32>
    %8 = arith.maximumf %6, %7 : vector<8x512xf32>
    %9 = arith.truncf %8 : vector<8x512xf32> to vector<8x512xbf16>
    %c0_6 = arith.constant 0 : index
    %c0_7 = arith.constant 0 : index
    %10 = vector.load %arg4[%c0_6, %c0_7] : memref<512x1024xbf16, #tpu.memory_space<vmem>>, vector<512x1024xbf16>
    %cst_8 = arith.constant dense<0.000000e+00> : vector<8x1024xf32>
    %11 = tpu.matmul %9, %10, %cst_8 {dimension_numbers = #tpu.dot_dimension_numbers<[1], [0], [0], [1], [0, 0, 1, 1], [], []>} : vector<8x512xbf16>, vector<512x1024xbf16>, vector<8x1024xf32> -> vector<8x1024xf32>
    %c0_9 = arith.constant 0 : index
    %c0_10 = arith.constant 0 : index
    %12 = vector.load %arg5[%c0_9, %c0_10] : memref<1x1024xf32, #tpu.memory_space<vmem>>, vector<1x1024xf32>
    %13 = vector.broadcast %12 : vector<1x1024xf32> to vector<8x1024xf32>
    %14 = arith.addf %11, %13 : vector<8x1024xf32>
    %cst_11 = arith.constant 0.000000e+00 : f32
    %15 = vector.broadcast %cst_11 : f32 to vector<8x1024xf32>
    %16 = arith.maximumf %14, %15 : vector<8x1024xf32>
    %17 = arith.truncf %16 : vector<8x1024xf32> to vector<8x1024xbf16>
    %c0_12 = arith.constant 0 : index
    %c0_13 = arith.constant 0 : index
    %18 = vector.load %arg6[%c0_12, %c0_13] : memref<1024x2048xbf16, #tpu.memory_space<vmem>>, vector<1024x2048xbf16>
    %cst_14 = arith.constant dense<0.000000e+00> : vector<8x2048xf32>
    %19 = tpu.matmul %17, %18, %cst_14 {dimension_numbers = #tpu.dot_dimension_numbers<[1], [0], [0], [1], [0, 0, 1, 1], [], []>} : vector<8x1024xbf16>, vector<1024x2048xbf16>, vector<8x2048xf32> -> vector<8x2048xf32>
    %c0_15 = arith.constant 0 : index
    %c0_16 = arith.constant 0 : index
    %20 = vector.load %arg7[%c0_15, %c0_16] : memref<1x2048xf32, #tpu.memory_space<vmem>>, vector<1x2048xf32>
    %21 = vector.broadcast %20 : vector<1x2048xf32> to vector<8x2048xf32>
    %22 = arith.addf %19, %21 : vector<8x2048xf32>
    %cst_17 = arith.constant 0.000000e+00 : f32
    %23 = vector.broadcast %cst_17 : f32 to vector<8x2048xf32>
    %24 = arith.maximumf %22, %23 : vector<8x2048xf32>
    %25 = arith.truncf %24 : vector<8x2048xf32> to vector<8x2048xbf16>
    %c0_18 = arith.constant 0 : index
    %c0_19 = arith.constant 0 : index
    %26 = vector.load %arg8[%c0_18, %c0_19] : memref<2048x64xbf16, #tpu.memory_space<vmem>>, vector<2048x64xbf16>
    %cst_20 = arith.constant dense<0.000000e+00> : vector<8x64xf32>
    %27 = tpu.matmul %25, %26, %cst_20 {dimension_numbers = #tpu.dot_dimension_numbers<[1], [0], [0], [1], [0, 0, 1, 1], [], []>} : vector<8x2048xbf16>, vector<2048x64xbf16>, vector<8x64xf32> -> vector<8x64xf32>
    %c0_21 = arith.constant 0 : index
    %c0_22 = arith.constant 0 : index
    %28 = vector.load %arg9[%c0_21, %c0_22] : memref<1x64xf32, #tpu.memory_space<vmem>>, vector<1x64xf32>
    %29 = vector.broadcast %28 : vector<1x64xf32> to vector<8x64xf32>
    %30 = arith.addf %27, %29 : vector<8x64xf32>
    %c0_23 = arith.constant 0 : index
    %c0_24 = arith.constant 0 : index
    %31 = vector.load %arg10[%c0_23, %c0_24] : memref<8x64xf32, #tpu.memory_space<vmem>>, vector<8x64xf32>
    tpu.vector_store %arg10[%c0_23, %c0_24], %30 {strides = array<i32>} : memref<8x64xf32, #tpu.memory_space<vmem>>, vector<8x64xf32>,
    return
  }
  func.func @transform_0(%arg0: i32) -> (i32, i32) {
    %c0_i32 = arith.constant 0 : i32
    %c0_i32_0 = arith.constant 0 : i32
    %c0_i32_1 = arith.constant 0 : i32
    return %c0_i32, %c0_i32_0 : i32, i32
  }
  func.func @transform_1(%arg0: i32) -> (i32, i32) {
    %c0_i32 = arith.constant 0 : i32
    %c0_i32_0 = arith.constant 0 : i32
    %c0_i32_1 = arith.constant 0 : i32
    return %c0_i32, %c0_i32_0 : i32, i32
  }
  func.func @transform_2(%arg0: i32) -> (i32, i32) {
    %c0_i32 = arith.constant 0 : i32
    %c0_i32_0 = arith.constant 0 : i32
    %c0_i32_1 = arith.constant 0 : i32
    return %c0_i32, %c0_i32_0 : i32, i32
  }
  func.func @transform_3(%arg0: i32) -> (i32, i32) {
    %c0_i32 = arith.constant 0 : i32
    %c0_i32_0 = arith.constant 0 : i32
    %c0_i32_1 = arith.constant 0 : i32
    return %c0_i32, %c0_i32_0 : i32, i32
  }
  func.func @transform_4(%arg0: i32) -> (i32, i32) {
    %c0_i32 = arith.constant 0 : i32
    %c0_i32_0 = arith.constant 0 : i32
    %c0_i32_1 = arith.constant 0 : i32
    return %c0_i32, %c0_i32_0 : i32, i32
  }
  func.func @transform_5(%arg0: i32) -> (i32, i32) {
    %c0_i32 = arith.constant 0 : i32
    %c0_i32_0 = arith.constant 0 : i32
    %c0_i32_1 = arith.constant 0 : i32
    return %c0_i32, %c0_i32_0 : i32, i32
  }
  func.func @transform_6(%arg0: i32) -> (i32, i32) {
    %c0_i32 = arith.constant 0 : i32
    %c0_i32_0 = arith.constant 0 : i32
    %c0_i32_1 = arith.constant 0 : i32
    return %c0_i32, %c0_i32_0 : i32, i32
  }
  func.func @transform_7(%arg0: i32) -> (i32, i32) {
    %c0_i32 = arith.constant 0 : i32
    %c0_i32_0 = arith.constant 0 : i32
    %c0_i32_1 = arith.constant 0 : i32
    return %c0_i32, %c0_i32_0 : i32, i32
  }
  func.func @transform_8(%arg0: i32) -> (i32, i32) {
    %c0_i32 = arith.constant 0 : i32
    %c0_i32_0 = arith.constant 0 : i32
    %c0_i32_1 = arith.constant 0 : i32
    return %c0_i32, %c0_i32_0 : i32, i32
  }
  func.func @transform_9(%arg0: i32) -> (i32, i32) {
    %c0_i32 = arith.constant 0 : i32
    %c0_i32_0 = arith.constant 0 : i32
    %c0_i32_1 = arith.constant 0 : i32
    return %c0_i32, %c0_i32_0 : i32, i32
  }
}

</mosaic_0001>

<bundles_post_ra>
// kernel: tpu_custom_call.1
= control target key start
LH: loop header
LB: loop body
LE: loop exit
PB: predicated region body
PF: predicated region fallthrough
CT: control target
= control target key end

     0   :  { %14 = vsyncpa [#allocation3], 0  ;;  %s19746_s0 = inlined_call_operand.hbm [shape: f32[8,32], index: 0, kind: input, shape index: {}]   ;;  %s19747_s1 = inlined_call_operand.hbm [shape: bf16[32,512], index: 1, kind: input, shape index: {}]   ;;  %s19748_s2 = inlined_call_operand.hbm [shape: f32[1,512], index: 2, kind: input, shape index: {}]   ;;  %s19749_s3 = inlined_call_operand.hbm [shape: bf16[512,1024], index: 3, kind: input, shape index: {}]   ;;  %s19750_s4 = inlined_call_operand.hbm [shape: f32[1,1024], index: 4, kind: input, shape index: {}]   ;;  %s19751_s5 = inlined_call_operand.hbm [shape: bf16[1024,2048], index: 5, kind: input, shape index: {}]   ;;  %s19752_s6 = inlined_call_operand.hbm [shape: f32[1,2048], index: 6, kind: input, shape index: {}]   ;;  %s19753_s7 = inlined_call_operand.vmem [shape: bf16[2048,64], index: 7, kind: input, shape index: {}]   ;;  %s19754_s8 = inlined_call_operand.hbm [shape: f32[1,64], index: 8, kind: input, shape index: {}]   ;;  %s19755_s9 = inlined_call_operand.hbm [shape: f32[8,64], index: 9, kind: output, shape index: {}]  }
   0x1   :  { %15 = vsyncpa [#allocation6], 0 }
   0x2   :  { %16 = vsyncpa [#allocation9], 0 }
   0x3   :  { %17 = vsyncpa [#allocation12], 0 }
   0x4   :  { %18 = vsyncpa [#allocation15], 0  ;;  %s35_s11 = sshll.u32 %s19747_s1, 4  ;;  %s36_s11 = int_to_ptr.hbm [resolvable:$true] %s35_s11 }
   0x5   :  { %19 = vsyncpa [#allocation4], 0  ;;  %s18729_s12 = smov [#allocation5]   ;;  %s59_s16 = sshll.u32 %s19749_s3, 4  ;;  %s60_s16 = int_to_ptr.hbm [resolvable:$true] %s59_s16 }
   0x6   :  { %s37_s13 = sshll.u32 %s18729_s12, 4  ;;  %s18730_s17 = smov 256   ;;  %s38_s13 = int_to_ptr.vmem [resolvable:$true] %s37_s13 }
   0x7   :  { %s18731_s18 = smov 16   ;;  %s18732_s19 = smov [#allocation8]  }
   0x8   :  { %43 = dma.hbm_to_vmem [thread:$0]  %s36_s11, 1024, %s38_s13, [#allocation6], %s18730_s17, %s18730_s17, %s18731_s18  }
   0x9   :  { %s61_s20 = sshll.u32 %s18732_s19, 4  ;;  %s18733_s21 = smov 512   ;;  %s62_s20 = int_to_ptr.vmem [resolvable:$true] %s61_s20 }
   0xa   :  { %s18734_s22 = smov 32   ;;  %s83_s24 = sshll.u32 %s19751_s5, 4  ;;  %s84_s24 = int_to_ptr.hbm [resolvable:$true] %s83_s24 }
   0xb   :  { %67 = dma.hbm_to_vmem [thread:$0]  %s60_s16, 32768, %s62_s20, [#allocation9], %s18733_s21, %s18733_s21, %s18734_s22  }
   0xc   :  { %s18735_s25 = smov [#allocation11]   ;;  %s25_s28 = sshll.u32 %s19746_s0, 4  ;;  %s26_s28 = int_to_ptr.hbm [resolvable:$true] %s25_s28 }
   0xd   :  { %s85_s26 = sshll.u32 %s18735_s25, 4  ;;  %s18736_s29 = smov 1024   ;;  %s86_s26 = int_to_ptr.vmem [resolvable:$true] %s85_s26 }
   0xe   :  { %s18737_s30 = smov 64   ;;  %s18738_s10 = smov [#allocation2]  }
   0xf   :  { %91 = dma.hbm_to_vmem [thread:$0]  %s84_s24, 131072, %s86_s26, [#allocation12], %s18736_s29, %s18736_s29, %s18737_s30  }
  0x10   :  { %s27_s11 = sshll.u32 %s18738_s10, 4  ;;  %s49_s14 = sshll.u32 %s19748_s2, 4  ;;  %s28_s11 = int_to_ptr.vmem [resolvable:$true] %s27_s11  ;;  %s50_s14 = int_to_ptr.hbm [resolvable:$true] %s49_s14 }
  0x11   :  { %30 = dma.hbm_to_vmem [thread:$0]  %s26_s28, 128, %s28_s11, [#allocation3]  }
  0x12   :  { %s73_s16 = sshll.u32 %s19750_s4, 4  ;;  %s18739_s17 = smov [#allocation7]   ;;  %s74_s16 = int_to_ptr.hbm [resolvable:$true] %s73_s16 }
  0x13   :  { %s51_s18 = sshll.u32 %s18739_s17, 4  ;;  %s18740_s0 = smov [#allocation10]   ;;  %s52_s18 = int_to_ptr.vmem [resolvable:$true] %s51_s18 }
  0x14   :  { %54 = dma.hbm_to_vmem [thread:$0]  %s50_s14, 64, %s52_s18, [#allocation6]  }
  0x15   :  { %s75_s19 = sshll.u32 %s18740_s0, 4  ;;  %s97_s22 = sshll.u32 %s19752_s6, 4  ;;  %s76_s19 = int_to_ptr.vmem [resolvable:$true] %s75_s19  ;;  %s98_s22 = int_to_ptr.hbm [resolvable:$true] %s97_s22 }
  0x16   :  { %78 = dma.hbm_to_vmem [thread:$0]  %s74_s16, 128, %s76_s19, [#allocation9]  }
  0x17   :  { %s110_s23 = sshll.u32 %s19754_s8, 4  ;;  %s18741_s24 = smov [#allocation13]   ;;  %s111_s23 = int_to_ptr.hbm [resolvable:$true] %s110_s23 }
  0x18   :  { %s99_s4 = sshll.u32 %s18741_s24, 4  ;;  %s18742_s25 = smov [#allocation14]   ;;  %s100_s4 = int_to_ptr.vmem [resolvable:$true] %s99_s4 }
  0x19   :  { %102 = dma.hbm_to_vmem [thread:$0]  %s98_s22, 256, %s100_s4, [#allocation12]  }
  0x1a   :  { %s112_s26 = sshll.u32 %s18742_s25, 4  ;;  %s113_s26 = int_to_ptr.vmem [resolvable:$true] %s112_s26 }
  0x1b   :  { %115 = dma.hbm_to_vmem [thread:$0]  %s111_s23, 16, %s113_s26, [#allocation15]  }
  0x1c   :  { %18717 = dma.done.wait [#allocation3], 128  }
  0x1d   :  { %18718 = vsyncadd [#allocation3], 4294967168 }
  0x1e   :  { %18719 = dma.done.wait [#allocation6], 1088  }
  0x1f   :  { %18720 = vsyncadd [#allocation6], 4294966208 }
  0x20   :  { %18721 = dma.done.wait [#allocation9], 32896  }
  0x21   :  { %18722 = vsyncadd [#allocation9], 4294934400 }
  0x22   :  { %18723 = dma.done.wait [#allocation12], 131328  }
  0x23   :  { %18724 = vsyncadd [#allocation12], 4294835968 }
  0x24   :  { %18725 = dma.done.wait [#allocation15], 16  }
  0x25   :  { %18726 = vsyncadd [#allocation15], 4294967280  ;;  %v11412_v0 = vld [vmem:[#allocation5 + $0x20] sm:$0xf]  ;;  %v17068_v1 = vld [vmem:[#allocation5 + $0x2c] sm:$0xf0] }
  0x26   :  { %v17066_v2 = vld [vmem:[#allocation5 + $0x24] sm:$0xf]  ;;  %v11413_v3 = vor.u32 %v17068_v1, %v11412_v0  ;;  %v11414_v4 = vld [vmem:[#allocation5 + $0x30] sm:$0xf0]  ;;  %v11420_v5 = vld [vmem:[#allocation5 + $0x28] sm:$0xf] }
  0x27   :  { %v17069_v6 = vld [vmem:[#allocation5 + $0x34] sm:$0xf0]  ;;  %v11417_v7 = vor.u32 %v17066_v2, %v11414_v4  ;;  %v17067_v9 = vld [vmem:[#allocation5 + $0x2c] sm:$0xf]  ;;  %v11422_v10 = vld [vmem:[#allocation5 + $0x38] sm:$0xf0] }
  0x28   :  { %v11421_v8 = vor.u32 %v17069_v6, %v11420_v5  ;;  %v11396_v11 = vld [vmem:[#allocation5] sm:$0xf]  ;;  %219 = vmatpush.bf16.msra.mxu0 %v11413_v3  ;;  %v11425_v12 = vor.u32 %v17067_v9, %v11422_v10  ;;  %v17064_v13 = vld [vmem:[#allocation5 + $0xc] sm:$0xf0]  ;;  %v17062_v14 = vld [vmem:[#allocation5 + $0x4] sm:$0xf] }
  0x29   :  { %v11398_v15 = vld [vmem:[#allocation5 + $0x10] sm:$0xf0]  ;;  %232 = vmatpush.bf16.msra.mxu1 %v11417_v7  ;;  %v11397_v16 = vor.u32 %v17064_v13, %v11396_v11  ;;  %v11404_v18 = vld [vmem:[#allocation5 + $0x8] sm:$0xf]  ;;  %v17065_v19 = vld [vmem:[#allocation5 + $0x14] sm:$0xf0] }
  0x2a   :  { %245 = vmatpush.bf16.msra.mxu2 %v11421_v8  ;;  %v11401_v17 = vor.u32 %v17062_v14, %v11398_v15  ;;  %v17063_v20 = vld [vmem:[#allocation5 + $0xc] sm:$0xf]  ;;  %258 = vmatpush.bf16.msra.mxu3 %v11425_v12  ;;  %v11405_v21 = vor.u32 %v17065_v19, %v11404_v18  ;;  %v11406_v22 = vld [vmem:[#allocation5 + $0x18] sm:$0xf0]  ;;  %vm209_vm0 = vcmask 261120   ;;  %s11380_s25 = sshll.u32 %s19755_s9, 4  ;;  %s11381_s25 = int_to_ptr.hbm [resolvable:$true] %s11380_s25 }
  0x2b   :  { %v149_v23 = vld [vmem:[#allocation2] sm:$0xff]  ;;  %v11656_v24 = vld [vmem:[#allocation8 + $0x1c0] sm:$0xf]  ;;  %v11409_v25 = vor.u32 %v17063_v20, %v11406_v22  ;;  %vm11371_vm1 = vcmask 523264  }
  0x2c   :  { %v150_v26 = vpack.c.bf16 %v149_v23, %v149_v23  ;;  %v17130_v27 = vld [vmem:[#allocation8 + $0x1dc] sm:$0xf0]  ;;  %220 = vmatpush.bf16.msra.mxu0 %v11397_v16 }
  0x2d   :  { %v11912_v28 = vld [vmem:[#allocation8 + $0x3c0] sm:$0xf]  ;;  %v11657_v30 = vor.u32 %v17130_v27, %v11656_v24  ;;  %233 = vmatpush.bf16.msra.mxu1 %v11401_v17 }
  0x2e   :  { %v17194_v29 = vld [vmem:[#allocation8 + $0x3dc] sm:$0xf0]  ;;  %246 = vmatpush.bf16.msra.mxu2 %v11405_v21  ;;  %259 = vmatpush.bf16.msra.mxu3 %v11409_v25 }
  0x2f   :  { %v11913_v31 = vor.u32 %v17194_v29, %v11912_v28  ;;  %v11624_v32 = vld [vmem:[#allocation8 + $0x180] sm:$0xf]  ;;  %11426 = vmatmul.msk.bf16.vlgmr.msra.gmra.mxu0 %vm209_vm0, %v150_v26 }
  0x30   :  { %v17122_v33 = vld [vmem:[#allocation8 + $0x19c] sm:$0xf0]  ;;  %1827 = vmatpush.bf16.msrb.mxu0 %v11657_v30  ;;  %11427 = vmatmul.msk.bf16.vlgmr.msra.gmra.mxu1 %vm209_vm0, %v150_v26 }
  0x31   :  { %v11880_v34 = vld [vmem:[#allocation8 + $0x380] sm:$0xf]  ;;  %v11625_v38 = vor.u32 %v17122_v33, %v11624_v32  ;;  %1840 = vmatpush.bf16.msrb.mxu1 %v11913_v31  ;;  %11428 = vmatmul.msk.bf16.vlgmr.msra.gmra.mxu2 %vm209_vm0, %v150_v26 }
  0x32   :  { %v17186_v35 = vld [vmem:[#allocation8 + $0x39c] sm:$0xf0]  ;;  %11429 = vmatmul.msk.bf16.vlgmr.msra.gmra.mxu3 %vm209_vm0, %v150_v26 }
  0x33   :  { %v12168_v36 = vld [vmem:[#allocation8 + $0x5c0] sm:$0xf]  ;;  %v11881_v43 = vor.u32 %v17186_v35, %v11880_v34 }
  0x34   :  { %v17258_v37 = vld [vmem:[#allocation8 + $0x5dc] sm:$0xf0]  ;;  %1828 = vmatpush.bf16.msrb.mxu0 %v11625_v38 }
  0x35   :  { %v12169_v39 = vor.u32 %v17258_v37, %v12168_v36  ;;  %v12424_v40 = vld [vmem:[#allocation8 + $0x7c0] sm:$0xf]  ;;  %1841 = vmatpush.bf16.msrb.mxu1 %v11881_v43 }
  0x36   :  { %v17322_v41 = vld [vmem:[#allocation8 + $0x7dc] sm:$0xf0] }
  0x37   :  { %v11592_v42 = vld [vmem:[#allocation8 + $0x140] sm:$0xf]  ;;  %v12425_v44 = vor.u32 %v17322_v41, %v12424_v40  ;;  %1853 = vmatpush.bf16.msrb.mxu2 %v12169_v39 }
  0x38   :  { %v17114_v45 = vld [vmem:[#allocation8 + $0x15c] sm:$0xf0] }
  0x39   :  { %v11848_v46 = vld [vmem:[#allocation8 + $0x340] sm:$0xf]  ;;  %1866 = vmatpush.bf16.msrb.mxu3 %v12425_v44  ;;  %v11593_v53 = vor.u32 %v17114_v45, %v11592_v42 }
  0x3a   :  { %v17178_v47 = vld [vmem:[#allocation8 + $0x35c] sm:$0xf0] }
  0x3b   :  { %v12136_v48 = vld [vmem:[#allocation8 + $0x580] sm:$0xf]  ;;  %v11849_v58 = vor.u32 %v17178_v47, %v11848_v46  ;;  %1829 = vmatpush.bf16.msrb.mxu0 %v11593_v53 }
  0x3c   :  { %v17250_v49 = vld [vmem:[#allocation8 + $0x59c] sm:$0xf0] }
  0x3d   :  { %v12392_v50 = vld [vmem:[#allocation8 + $0x780] sm:$0xf]  ;;  %v12137_v51 = vor.u32 %v17250_v49, %v12136_v48  ;;  %1842 = vmatpush.bf16.msrb.mxu1 %v11849_v58  ;;  %v17126_v48 = vld [vmem:[#allocation8 + $0x1c4] sm:$0xf] }
  0x3e   :  { %v17314_v52 = vld [vmem:[#allocation8 + $0x79c] sm:$0xf0]  ;;  %v11658_v49 = vld [vmem:[#allocation8 + $0x1e0] sm:$0xf0] }
  0x3f   :  { %v12393_v54 = vor.u32 %v17314_v52, %v12392_v50  ;;  %v11560_v55 = vld [vmem:[#allocation8 + $0x100] sm:$0xf]  ;;  %1854 = vmatpush.bf16.msrb.mxu2 %v12137_v51  ;;  %v17190_v50 = vld [vmem:[#allocation8 + $0x3c4] sm:$0xf] }
  0x40   :  { %v17106_v56 = vld [vmem:[#allocation8 + $0x11c] sm:$0xf0]  ;;  %v11914_v51 = vld [vmem:[#allocation8 + $0x3e0] sm:$0xf0] }
  0x41   :  { %v12104_v57 = vld [vmem:[#allocation8 + $0x540] sm:$0xf]  ;;  %1867 = vmatpush.bf16.msrb.mxu3 %v12393_v54  ;;  %v11561_v1 = vor.u32 %v17106_v56, %v11560_v55  ;;  %v17118_v55 = vld [vmem:[#allocation8 + $0x184] sm:$0xf] }
  0x42   :  { %v17242_v59 = vld [vmem:[#allocation8 + $0x55c] sm:$0xf0] }
  0x43   :  { %v12360_v60 = vld [vmem:[#allocation8 + $0x740] sm:$0xf]  ;;  %v12105_v0 = vor.u32 %v17242_v59, %v12104_v57  ;;  %1830 = vmatpush.bf16.msrb.mxu0 %v11561_v1  ;;  %v11626_v1 = vld [vmem:[#allocation8 + $0x1a0] sm:$0xf0] }
  0x44   :  { %v17306_v61 = vld [vmem:[#allocation8 + $0x75c] sm:$0xf0] }
  0x45   :  { %v11816_v62 = vld [vmem:[#allocation8 + $0x300] sm:$0xf]  ;;  %v12361_v2 = vor.u32 %v17306_v61, %v12360_v60  ;;  %1855 = vmatpush.bf16.msrb.mxu2 %v12105_v0  ;;  %v11661_v60 = vor.u32 %v17126_v48, %v11658_v49  ;;  %v11917_v0 = vor.u32 %v17190_v50, %v11914_v51  ;;  %v17086_v48 = vld [vmem:[#allocation8 + $0x84] sm:$0xf] }
  0x46   :  { %v17170_v63 = vld [vmem:[#allocation8 + $0x31c] sm:$0xf0]  ;;  %v11498_v49 = vld [vmem:[#allocation8 + $0xa0] sm:$0xf0] }
  0x47   :  { %v11528_v3 = vld [vmem:[#allocation8 + $0xc0] sm:$0xf]  ;;  %v11817_v6 = vor.u32 %v17170_v63, %v11816_v62  ;;  %1868 = vmatpush.bf16.msrb.mxu3 %v12361_v2  ;;  %v17254_v62 = vld [vmem:[#allocation8 + $0x5c4] sm:$0xf] }
  0x48   :  { %v12072_v4 = vld [vmem:[#allocation8 + $0x500] sm:$0xf]  ;;  %v12170_v63 = vld [vmem:[#allocation8 + $0x5e0] sm:$0xf0] }
  0x49   :  { %v17234_v5 = vld [vmem:[#allocation8 + $0x51c] sm:$0xf0]  ;;  %1843 = vmatpush.bf16.msrb.mxu1 %v11817_v6  ;;  %v17318_v2 = vld [vmem:[#allocation8 + $0x7c4] sm:$0xf] }
  0x4a   :  { %v17098_v7 = vld [vmem:[#allocation8 + $0xdc] sm:$0xf0]  ;;  %v12073_v12 = vor.u32 %v17234_v5, %v12072_v4  ;;  %v17182_v4 = vld [vmem:[#allocation8 + $0x384] sm:$0xf] }
  0x4b   :  { %v12328_v8 = vld [vmem:[#allocation8 + $0x700] sm:$0xf]  ;;  %v11529_v13 = vor.u32 %v17098_v7, %v11528_v3  ;;  %v12426_v3 = vld [vmem:[#allocation8 + $0x7e0] sm:$0xf0] }
  0x4c   :  { %v17298_v9 = vld [vmem:[#allocation8 + $0x71c] sm:$0xf0]  ;;  %1856 = vmatpush.bf16.msrb.mxu2 %v12073_v12  ;;  %v11882_v5 = vld [vmem:[#allocation8 + $0x3a0] sm:$0xf0] }
  0x4d   :  { %v11784_v10 = vld [vmem:[#allocation8 + $0x2c0] sm:$0xf]  ;;  %v12329_v14 = vor.u32 %v17298_v9, %v12328_v8  ;;  %1831 = vmatpush.bf16.msrb.mxu0 %v11529_v13  ;;  %v12173_v8 = vor.u32 %v17254_v62, %v12170_v63  ;;  %v11629_v9 = vor.u32 %v17118_v55, %v11626_v1  ;;  %v17246_v12 = vld [vmem:[#allocation8 + $0x584] sm:$0xf] }
  0x4e   :  { %v17162_v11 = vld [vmem:[#allocation8 + $0x2dc] sm:$0xf0]  ;;  %v12138_v13 = vld [vmem:[#allocation8 + $0x5a0] sm:$0xf0] }
  0x4f   :  { %v11496_v15 = vld [vmem:[#allocation8 + $0x80] sm:$0xf]  ;;  %v11785_v18 = vor.u32 %v17162_v11, %v11784_v10  ;;  %1869 = vmatpush.bf16.msrb.mxu3 %v12329_v14  ;;  %v12429_v10 = vor.u32 %v17318_v2, %v12426_v3  ;;  %v17110_v11 = vld [vmem:[#allocation8 + $0x144] sm:$0xf]  ;;  %v11885_v14 = vor.u32 %v17182_v4, %v11882_v5 }
  0x50   :  { %v12040_v16 = vld [vmem:[#allocation8 + $0x4c0] sm:$0xf]  ;;  %v17150_v50 = vld [vmem:[#allocation8 + $0x284] sm:$0xf] }
  0x51   :  { %v17226_v17 = vld [vmem:[#allocation8 + $0x4dc] sm:$0xf0]  ;;  %1844 = vmatpush.bf16.msrb.mxu1 %v11785_v18  ;;  %v17174_v18 = vld [vmem:[#allocation8 + $0x344] sm:$0xf] }
  0x52   :  { %v17090_v19 = vld [vmem:[#allocation8 + $0x9c] sm:$0xf0]  ;;  %v12041_v24 = vor.u32 %v17226_v17, %v12040_v16  ;;  %v17310_v16 = vld [vmem:[#allocation8 + $0x784] sm:$0xf] }
  0x53   :  { %v12296_v20 = vld [vmem:[#allocation8 + $0x6c0] sm:$0xf]  ;;  %v11497_v25 = vor.u32 %v17090_v19, %v11496_v15  ;;  %v11594_v15 = vld [vmem:[#allocation8 + $0x160] sm:$0xf0] }
  0x54   :  { %v17290_v21 = vld [vmem:[#allocation8 + $0x6dc] sm:$0xf0]  ;;  %1857 = vmatpush.bf16.msrb.mxu2 %v12041_v24  ;;  %v12394_v17 = vld [vmem:[#allocation8 + $0x7a0] sm:$0xf0] }
  0x55   :  { %v11752_v22 = vld [vmem:[#allocation8 + $0x280] sm:$0xf]  ;;  %v12297_v26 = vor.u32 %v17290_v21, %v12296_v20  ;;  %1832 = vmatpush.bf16.msrb.mxu0 %v11497_v25  ;;  %v11850_v19 = vld [vmem:[#allocation8 + $0x360] sm:$0xf0]  ;;  %v12141_v20 = vor.u32 %v17246_v12, %v12138_v13  ;;  %v11597_v21 = vor.u32 %v17110_v11, %v11594_v15 }
  0x56   :  { %v17154_v23 = vld [vmem:[#allocation8 + $0x29c] sm:$0xf0]  ;;  %v17238_v24 = vld [vmem:[#allocation8 + $0x544] sm:$0xf] }
  0x57   :  { %v11464_v27 = vld [vmem:[#allocation8 + $0x40] sm:$0xf]  ;;  %v11753_v30 = vor.u32 %v17154_v23, %v11752_v22  ;;  %1870 = vmatpush.bf16.msrb.mxu3 %v12297_v26  ;;  %v12397_v22 = vor.u32 %v17310_v16, %v12394_v17  ;;  %v17102_v23 = vld [vmem:[#allocation8 + $0x104] sm:$0xf]  ;;  %v11853_v26 = vor.u32 %v17174_v18, %v11850_v19 }
  0x58   :  { %v12008_v28 = vld [vmem:[#allocation8 + $0x480] sm:$0xf]  ;;  %v12106_v25 = vld [vmem:[#allocation8 + $0x560] sm:$0xf0] }
  0x59   :  { %v17218_v29 = vld [vmem:[#allocation8 + $0x49c] sm:$0xf0]  ;;  %1845 = vmatpush.bf16.msrb.mxu1 %v11753_v30  ;;  %v17166_v30 = vld [vmem:[#allocation8 + $0x304] sm:$0xf] }
  0x5a   :  { %v17082_v31 = vld [vmem:[#allocation8 + $0x5c] sm:$0xf0]  ;;  %v12009_v36 = vor.u32 %v17218_v29, %v12008_v28  ;;  %v17302_v28 = vld [vmem:[#allocation8 + $0x744] sm:$0xf] }
  0x5b   :  { %v12264_v32 = vld [vmem:[#allocation8 + $0x680] sm:$0xf]  ;;  %v11465_v38 = vor.u32 %v17082_v31, %v11464_v27  ;;  %v11562_v27 = vld [vmem:[#allocation8 + $0x120] sm:$0xf0] }
  0x5c   :  { %v17282_v33 = vld [vmem:[#allocation8 + $0x69c] sm:$0xf0]  ;;  %1858 = vmatpush.bf16.msrb.mxu2 %v12009_v36  ;;  %v12362_v29 = vld [vmem:[#allocation8 + $0x760] sm:$0xf0] }
  0x5d   :  { %v11720_v34 = vld [vmem:[#allocation8 + $0x240] sm:$0xf]  ;;  %v12265_v39 = vor.u32 %v17282_v33, %v12264_v32  ;;  %1833 = vmatpush.bf16.msrb.mxu0 %v11465_v38  ;;  %v11818_v31 = vld [vmem:[#allocation8 + $0x320] sm:$0xf0]  ;;  %v12109_v32 = vor.u32 %v17238_v24, %v12106_v25  ;;  %v11565_v33 = vor.u32 %v17102_v23, %v11562_v27 }
  0x5e   :  { %v17146_v35 = vld [vmem:[#allocation8 + $0x25c] sm:$0xf0]  ;;  %v17230_v36 = vld [vmem:[#allocation8 + $0x504] sm:$0xf]  ;;  %v11821_v38 = vor.u32 %v17166_v30, %v11818_v31 }
  0x5f   :  { %v11432_v37 = vld [vmem:[#allocation8] sm:$0xf]  ;;  %v11721_v43 = vor.u32 %v17146_v35, %v11720_v34  ;;  %1871 = vmatpush.bf16.msrb.mxu3 %v12265_v39  ;;  %v12365_v34 = vor.u32 %v17302_v28, %v12362_v29  ;;  %v17094_v35 = vld [vmem:[#allocation8 + $0xc4] sm:$0xf] }
  0x60   :  { %v17074_v40 = vld [vmem:[#allocation8 + $0x1c] sm:$0xf0]  ;;  %v11530_v39 = vld [vmem:[#allocation8 + $0xe0] sm:$0xf0] }
  0x61   :  { %v11976_v41 = vld [vmem:[#allocation8 + $0x440] sm:$0xf]  ;;  %v11433_v53 = vor.u32 %v17074_v40, %v11432_v37  ;;  %1846 = vmatpush.bf16.msrb.mxu1 %v11721_v43  ;;  %v12074_v37 = vld [vmem:[#allocation8 + $0x520] sm:$0xf0] }
  0x62   :  { %v17210_v42 = vld [vmem:[#allocation8 + $0x45c] sm:$0xf0]  ;;  %v17294_v40 = vld [vmem:[#allocation8 + $0x704] sm:$0xf] }
  0x63   :  { %v11688_v44 = vld [vmem:[#allocation8 + $0x200] sm:$0xf]  ;;  %v11977_v52 = vor.u32 %v17210_v42, %v11976_v41  ;;  %1834 = vmatpush.bf16.msrb.mxu0 %v11433_v53  ;;  %v12330_v41 = vld [vmem:[#allocation8 + $0x720] sm:$0xf0] }
  0x64   :  { %v12232_v45 = vld [vmem:[#allocation8 + $0x640] sm:$0xf]  ;;  %v17158_v42 = vld [vmem:[#allocation8 + $0x2c4] sm:$0xf] }
  0x65   :  { %v17274_v46 = vld [vmem:[#allocation8 + $0x65c] sm:$0xf0]  ;;  %1859 = vmatpush.bf16.msrb.mxu2 %v11977_v52  ;;  %v11786_v43 = vld [vmem:[#allocation8 + $0x2e0] sm:$0xf0]  ;;  %v11501_v52 = vor.u32 %v17086_v48, %v11498_v49  ;;  %v17187_v48 = vld [vmem:[#allocation8 + $0x3a4] sm:$0xf0] }
  0x66   :  { %v17138_v47 = vld [vmem:[#allocation8 + $0x21c] sm:$0xf0]  ;;  %v12233_v54 = vor.u32 %v17274_v46, %v12232_v45  ;;  %v11533_v45 = vor.u32 %v17094_v35, %v11530_v39  ;;  %v12333_v46 = vor.u32 %v17294_v40, %v12330_v41  ;;  %v11754_v51 = vld [vmem:[#allocation8 + $0x2a0] sm:$0xf0]  ;;  %v11920_v35 = vld [vmem:[#allocation8 + $0x3c8] sm:$0xf] }
  0x67   :  { %v11944_v56 = vld [vmem:[#allocation8 + $0x400] sm:$0xf]  ;;  %v11689_v59 = vor.u32 %v17138_v47, %v11688_v44  ;;  %1879 = vmatpush.bf16.msra.mxu0 %v11661_v60  ;;  %v12077_v44 = vor.u32 %v17230_v36, %v12074_v37  ;;  %v11789_v47 = vor.u32 %v17158_v42, %v11786_v43  ;;  %v11757_v53 = vor.u32 %v17150_v50, %v11754_v51  ;;  %v12042_v55 = vld [vmem:[#allocation8 + $0x4e0] sm:$0xf0]  ;;  %v17195_v36 = vld [vmem:[#allocation8 + $0x3e4] sm:$0xf0] }
  0x68   :  { %v17202_v57 = vld [vmem:[#allocation8 + $0x41c] sm:$0xf0]  ;;  %1872 = vmatpush.bf16.msrb.mxu3 %v12233_v54  ;;  %v17222_v54 = vld [vmem:[#allocation8 + $0x4c4] sm:$0xf]  ;;  %v11921_v43 = vor.u32 %v17195_v36, %v11920_v35 }
  0x69   :  { %v12200_v58 = vld [vmem:[#allocation8 + $0x600] sm:$0xf]  ;;  %v11945_v6 = vor.u32 %v17202_v57, %v11944_v56  ;;  %1847 = vmatpush.bf16.msrb.mxu1 %v11689_v59  ;;  %v17286_v56 = vld [vmem:[#allocation8 + $0x6c4] sm:$0xf]  ;;  %v12045_v57 = vor.u32 %v17222_v54, %v12042_v55  ;;  %v12176_v54 = vld [vmem:[#allocation8 + $0x5c8] sm:$0xf] }
  0x6a   :  { %v17266_v61 = vld [vmem:[#allocation8 + $0x61c] sm:$0xf0]  ;;  %v17078_v60 = vld [vmem:[#allocation8 + $0x44] sm:$0xf]  ;;  %v17259_v55 = vld [vmem:[#allocation8 + $0x5e4] sm:$0xf0] }
  0x6b   :  { %v12201_v7 = vor.u32 %v17266_v61, %v12200_v58  ;;  %1860 = vmatpush.bf16.msrb.mxu2 %v11945_v6  ;;  %1880 = vmatpush.bf16.msra.mxu0 %v11629_v9  ;;  %v12298_v58 = vld [vmem:[#allocation8 + $0x6e0] sm:$0xf0] }
  0x6c   :  { %v12301_v59 = vor.u32 %v17286_v56, %v12298_v58  ;;  %v11466_v61 = vld [vmem:[#allocation8 + $0x60] sm:$0xf0]  ;;  %v12432_v56 = vld [vmem:[#allocation8 + $0x7c8] sm:$0xf] }
  0x6d   :  { %1892 = vmatpush.bf16.msra.mxu1 %v11917_v0  ;;  %1873 = vmatpush.bf16.msrb.mxu3 %v12201_v7  ;;  %v11469_v62 = vor.u32 %v17078_v60, %v11466_v61  ;;  %v17142_v63 = vld [vmem:[#allocation8 + $0x244] sm:$0xf]  ;;  %v17323_v60 = vld [vmem:[#allocation8 + $0x7e4] sm:$0xf0] }
  0x6e   :  { %v11722_v0 = vld [vmem:[#allocation8 + $0x260] sm:$0xf0]  ;;  %v11600_v61 = vld [vmem:[#allocation8 + $0x148] sm:$0xf] }
  0x6f   :  { %1905 = vmatpush.bf16.msra.mxu2 %v12173_v8  ;;  %1881 = vmatpush.bf16.msra.mxu0 %v11597_v21  ;;  %v11725_v1 = vor.u32 %v17142_v63, %v11722_v0  ;;  %v17214_v2 = vld [vmem:[#allocation8 + $0x484] sm:$0xf]  ;;  %v11856_v0 = vld [vmem:[#allocation8 + $0x348] sm:$0xf] }
  0x70   :  { %v12010_v3 = vld [vmem:[#allocation8 + $0x4a0] sm:$0xf0] }
  0x71   :  { %1918 = vmatpush.bf16.msra.mxu3 %v12429_v10  ;;  %1893 = vmatpush.bf16.msra.mxu1 %v11885_v14  ;;  %v17278_v4 = vld [vmem:[#allocation8 + $0x684] sm:$0xf]  ;;  %v12013_v5 = vor.u32 %v17214_v2, %v12010_v3  ;;  %v12177_v3 = vor.u32 %v17259_v55, %v12176_v54  ;;  %v17083_v54 = vld [vmem:[#allocation8 + $0x64] sm:$0xf0] }
  0x72   :  { %v12266_v6 = vld [vmem:[#allocation8 + $0x6a0] sm:$0xf0]  ;;  %v11728_v55 = vld [vmem:[#allocation8 + $0x248] sm:$0xf] }
  0x73   :  { %1906 = vmatpush.bf16.msra.mxu2 %v12141_v20  ;;  %1882 = vmatpush.bf16.msra.mxu0 %v11565_v33  ;;  %v12269_v7 = vor.u32 %v17278_v4, %v12266_v6  ;;  %v17070_v8 = vld [vmem:[#allocation8 + $0x4] sm:$0xf]  ;;  %v17131_v33 = vld [vmem:[#allocation8 + $0x1e4] sm:$0xf0] }
  0x74   :  { %v11434_v9 = vld [vmem:[#allocation8 + $0x20] sm:$0xf0] }
  0x75   :  { %1919 = vmatpush.bf16.msra.mxu3 %v12397_v22  ;;  %1894 = vmatpush.bf16.msra.mxu1 %v11853_v26  ;;  %v17134_v10 = vld [vmem:[#allocation8 + $0x204] sm:$0xf]  ;;  %v11437_v11 = vor.u32 %v17070_v8, %v11434_v9  ;;  %v159_v26 = vld [vmem:[#allocation7] sm:$0xf]  ;;  %v17251_v8 = vld [vmem:[#allocation8 + $0x5a4] sm:$0xf0] }
  0x76   :  { %v11690_v12 = vld [vmem:[#allocation8 + $0x220] sm:$0xf0]  ;;  %v161_v27 = vperm.slane %v159_v26, 0  ;;  %v162_v28 = vperm.slane %v159_v26, 1  ;;  %v163_v39 = vperm.slane %v159_v26, 2  ;;  %v164_v42 = vperm.slane %v159_v26, 3 }
  0x77   :  { %1907 = vmatpush.bf16.msra.mxu2 %v12109_v32  ;;  %1883 = vmatpush.bf16.msra.mxu0 %v11533_v45  ;;  %v11693_v13 = vor.u32 %v17134_v10, %v11690_v12  ;;  %v17206_v14 = vld [vmem:[#allocation8 + $0x444] sm:$0xf]  ;;  %v11664_v32 = vld [vmem:[#allocation8 + $0x1c8] sm:$0xf] }
  0x78   :  { %v11978_v15 = vld [vmem:[#allocation8 + $0x460] sm:$0xf0]  ;;  %v11665_v40 = vor.u32 %v17131_v33, %v11664_v32  ;;  %v17123_v45 = vld [vmem:[#allocation8 + $0x1a4] sm:$0xf0] }
  0x79   :  { %1920 = vmatpush.bf16.msra.mxu3 %v12365_v34  ;;  %1895 = vmatpush.bf16.msra.mxu1 %v11821_v38  ;;  %v11981_v16 = vor.u32 %v17206_v14, %v11978_v15  ;;  %v17270_v17 = vld [vmem:[#allocation8 + $0x644] sm:$0xf]  ;;  %v12400_v9 = vld [vmem:[#allocation8 + $0x788] sm:$0xf] }
  0x7a   :  { %v12234_v18 = vld [vmem:[#allocation8 + $0x660] sm:$0xf0]  ;;  %v17315_v12 = vld [vmem:[#allocation8 + $0x7a4] sm:$0xf0] }
  0x7b   :  { %1908 = vmatpush.bf16.msra.mxu2 %v12077_v44  ;;  %1884 = vmatpush.bf16.msra.mxu0 %v11501_v52  ;;  %v12237_v19 = vor.u32 %v17270_v17, %v12234_v18  ;;  %v17198_v20 = vld [vmem:[#allocation8 + $0x404] sm:$0xf]  ;;  %v11632_v44 = vld [vmem:[#allocation8 + $0x188] sm:$0xf] }
  0x7c   :  { %v11946_v21 = vld [vmem:[#allocation8 + $0x420] sm:$0xf0]  ;;  %v17107_v14 = vld [vmem:[#allocation8 + $0x124] sm:$0xf0] }
  0x7d   :  { %1921 = vmatpush.bf16.msra.mxu3 %v12333_v46  ;;  %1896 = vmatpush.bf16.msra.mxu1 %v11789_v47  ;;  %v11949_v22 = vor.u32 %v17198_v20, %v11946_v21  ;;  %v17262_v23 = vld [vmem:[#allocation8 + $0x604] sm:$0xf]  ;;  %v11888_v47 = vld [vmem:[#allocation8 + $0x388] sm:$0xf]  ;;  %v12401_v20 = vor.u32 %v17315_v12, %v12400_v9  ;;  %v17191_v9 = vld [vmem:[#allocation8 + $0x3cc] sm:$0xf] }
  0x7e   :  { %v12202_v24 = vld [vmem:[#allocation8 + $0x620] sm:$0xf0]  ;;  %v11824_v15 = vld [vmem:[#allocation8 + $0x308] sm:$0xf] }
  0x7f   :  { %1909 = vmatpush.bf16.msra.mxu2 %v12045_v57  ;;  %1885 = vmatpush.bf16.msra.mxu0 %v11469_v62  ;;  %v12205_v25 = vor.u32 %v17262_v23, %v12202_v24  ;;  %v17115_v62 = vld [vmem:[#allocation8 + $0x164] sm:$0xf0] }
  0x80   :  { %v11601_v6 = vor.u32 %v17115_v62, %v11600_v61  ;;  %v17243_v23 = vld [vmem:[#allocation8 + $0x564] sm:$0xf0] }
  0x81   :  { %1897 = vmatpush.bf16.msra.mxu1 %v11757_v53  ;;  %1922 = vmatpush.bf16.msra.mxu3 %v12301_v59  ;;  %v11633_v53 = vor.u32 %v17123_v45, %v11632_v44  ;;  %v11889_v59 = vor.u32 %v17187_v48, %v11888_v47  ;;  %v17307_v26 = vld [vmem:[#allocation8 + $0x764] sm:$0xf0] }
  0x82   :  { %v12080_v33 = vld [vmem:[#allocation8 + $0x508] sm:$0xf] }
  0x83   :  { %1910 = vmatpush.bf16.msra.mxu2 %v12013_v5  ;;  %1886 = vmatpush.bf16.msra.mxu0 %v11437_v11  ;;  %v12433_v5 = vor.u32 %v17323_v60, %v12432_v56  ;;  %v12048_v47 = vld [vmem:[#allocation8 + $0x4c8] sm:$0xf] }
  0x84   :  { %v17227_v48 = vld [vmem:[#allocation8 + $0x4e4] sm:$0xf0] }
  0x85   :  { %1898 = vmatpush.bf16.msra.mxu1 %v11725_v1  ;;  %1923 = vmatpush.bf16.msra.mxu3 %v12269_v7  ;;  %v17179_v1 = vld [vmem:[#allocation8 + $0x364] sm:$0xf0] }
  0x86   :  { %v12144_v7 = vld [vmem:[#allocation8 + $0x588] sm:$0xf]  ;;  %v11857_v11 = vor.u32 %v17179_v1, %v11856_v0 }
  0x87   :  { %1911 = vmatpush.bf16.msra.mxu2 %v11981_v16  ;;  %v17171_v16 = vld [vmem:[#allocation8 + $0x324] sm:$0xf0]  ;;  %v12145_v18 = vor.u32 %v17251_v8, %v12144_v7  ;;  %v11666_v8 = vld [vmem:[#allocation8 + $0x1e8] sm:$0xf0] }
  0x88   :  { %v11825_v24 = vor.u32 %v17171_v16, %v11824_v15  ;;  %v17147_v56 = vld [vmem:[#allocation8 + $0x264] sm:$0xf0] }
  0x89   :  { %1899 = vmatpush.bf16.msra.mxu1 %v11693_v13  ;;  %1924 = vmatpush.bf16.msra.mxu3 %v12237_v19  ;;  %v11568_v13 = vld [vmem:[#allocation8 + $0x108] sm:$0xf] }
  0x8a   :  { %v11569_v21 = vor.u32 %v17107_v14, %v11568_v13  ;;  %v17219_v60 = vld [vmem:[#allocation8 + $0x4a4] sm:$0xf0] }
  0x8b   :  { %1912 = vmatpush.bf16.msra.mxu2 %v11949_v22  ;;  %v12112_v22 = vld [vmem:[#allocation8 + $0x548] sm:$0xf] }
  0x8c   :  { %v12272_v61 = vld [vmem:[#allocation8 + $0x688] sm:$0xf] }
  0x8d   :  { %1925 = vmatpush.bf16.msra.mxu3 %v12205_v25  ;;  %v12368_v25 = vld [vmem:[#allocation8 + $0x748] sm:$0xf] }
  0x8e   :  { %v12369_v32 = vor.u32 %v17307_v26, %v12368_v25  ;;  %v17283_v0 = vld [vmem:[#allocation8 + $0x6a4] sm:$0xf0]  ;;  %v11890_v25 = vld [vmem:[#allocation8 + $0x3a8] sm:$0xf0] }
  0x8f   :  { %v11440_v1 = vld [vmem:[#allocation8 + $0x8] sm:$0xf]  ;;  %v12273_v12 = vor.u32 %v17283_v0, %v12272_v61  ;;  %v12370_v0 = vld [vmem:[#allocation8 + $0x768] sm:$0xf0] }
  0x90   :  { %v11984_v13 = vld [vmem:[#allocation8 + $0x448] sm:$0xf] }
  0x91   :  { %v17211_v14 = vld [vmem:[#allocation8 + $0x464] sm:$0xf0] }
  0xac   :  { %v222_v29 = vpop.f32.mrf.mxu0 }
  0xad   :  { %v223_v30 = vadd.f32 %v222_v29, %v161_v27  ;;  %v235_v31 = vpop.f32.mrf.mxu1  ;;  %v11536_v27 = vld [vmem:[#allocation8 + $0xc8] sm:$0xf] }
  0xae   :  { %v236_v34 = vadd.f32 %v235_v31, %v162_v28  ;;  %v17099_v28 = vld [vmem:[#allocation8 + $0xe4] sm:$0xf0]  ;;  %v12113_v31 = vor.u32 %v17243_v23, %v12112_v22  ;;  %v11985_v22 = vor.u32 %v17211_v14, %v11984_v13  ;;  %v11634_v23 = vld [vmem:[#allocation8 + $0x1a8] sm:$0xf0] }
  0xaf   :  { %v265_v37 = vmax.f32 %v223_v30, 0.0  ;;  %v11792_v29 = vld [vmem:[#allocation8 + $0x2c8] sm:$0xf]  ;;  %v11537_v35 = vor.u32 %v17099_v28, %v11536_v27  ;;  %v17295_v13 = vld [vmem:[#allocation8 + $0x70c] sm:$0xf] }
  0xb0   :  { %v266_v38 = vmax.f32 %v236_v34, 0.0  ;;  %v17163_v30 = vld [vmem:[#allocation8 + $0x2e4] sm:$0xf0]  ;;  %v12338_v14 = vld [vmem:[#allocation8 + $0x728] sm:$0xf0] }
  0xb1   :  { %v18822_v41 = vpack.c.bf16 %v265_v37, %v265_v37  ;;  %v17235_v34 = vld [vmem:[#allocation8 + $0x524] sm:$0xf0]  ;;  %v11793_v36 = vor.u32 %v17163_v30, %v11792_v29 }
  0xb2   :  { %v18824_v46 = vpack.c.bf16 %v266_v38, %v266_v38  ;;  %v12336_v37 = vld [vmem:[#allocation8 + $0x708] sm:$0xf]  ;;  %v12081_v44 = vor.u32 %v17235_v34, %v12080_v33 }
  0xb3   :  { %1835 = vmatmul.bf16.vlgmr.msrb.gmra.mxu0 %v18822_v41  ;;  %v17299_v38 = vld [vmem:[#allocation8 + $0x724] sm:$0xf0] }
  0xb4   :  { %v248_v49 = vpop.f32.mrf.mxu2  ;;  %1848 = vmatmul.bf16.vlgmr.msrb.gmra.mxu1 %v18824_v46  ;;  %1931 = vmatpush.bf16.msrb.mxu0 %v11665_v40  ;;  %v224_v52 = vpop.f32.mrf.mxu0  ;;  %v17091_v40 = vld [vmem:[#allocation8 + $0xa4] sm:$0xf0]  ;;  %v12337_v45 = vor.u32 %v17299_v38, %v12336_v37  ;;  %v17111_v37 = vld [vmem:[#allocation8 + $0x14c] sm:$0xf] }
  0xb5   :  { %v249_v50 = vadd.f32 %v248_v49, %v163_v39  ;;  %v261_v51 = vpop.f32.mrf.mxu3  ;;  %1944 = vmatpush.bf16.msrb.mxu1 %v11921_v43  ;;  %v237_v58 = vpop.f32.mrf.mxu1  ;;  %v11504_v39 = vld [vmem:[#allocation8 + $0x88] sm:$0xf] }
  0xb6   :  { %v262_v57 = vadd.f32 %v261_v51, %v164_v42  ;;  %v11760_v42 = vld [vmem:[#allocation8 + $0x288] sm:$0xf]  ;;  %v11505_v49 = vor.u32 %v17091_v40, %v11504_v39  ;;  %v11602_v39 = vld [vmem:[#allocation8 + $0x168] sm:$0xf0] }
  0xb7   :  { %v267_v63 = vmax.f32 %v249_v50, 0.0  ;;  %v17155_v43 = vld [vmem:[#allocation8 + $0x2a4] sm:$0xf0]  ;;  %v17175_v40 = vld [vmem:[#allocation8 + $0x34c] sm:$0xf] }
  0xb8   :  { %v268_v2 = vmax.f32 %v262_v57, 0.0  ;;  %1932 = vmatpush.bf16.msrb.mxu0 %v11633_v53  ;;  %v11761_v50 = vor.u32 %v17155_v43, %v11760_v42  ;;  %v12304_v51 = vld [vmem:[#allocation8 + $0x6c8] sm:$0xf]  ;;  %v12049_v57 = vor.u32 %v17227_v48, %v12048_v47  ;;  %v11858_v42 = vld [vmem:[#allocation8 + $0x368] sm:$0xf0] }
  0xb9   :  { %v18828_v4 = vpack.c.bf16 %v267_v63, %v267_v63  ;;  %1945 = vmatpush.bf16.msrb.mxu1 %v11889_v59  ;;  %v17291_v52 = vld [vmem:[#allocation8 + $0x6e4] sm:$0xf0]  ;;  %v11729_v63 = vor.u32 %v17147_v56, %v11728_v55  ;;  %v17247_v47 = vld [vmem:[#allocation8 + $0x58c] sm:$0xf] }
  0xba   :  { %v18830_v10 = vpack.c.bf16 %v268_v2, %v268_v2  ;;  %v11472_v53 = vld [vmem:[#allocation8 + $0x48] sm:$0xf]  ;;  %v12305_v58 = vor.u32 %v17291_v52, %v12304_v51  ;;  %v12146_v48 = vld [vmem:[#allocation8 + $0x5a8] sm:$0xf0] }
  0xbb   :  { %1861 = vmatmul.bf16.vlgmr.msrb.gmra.mxu2 %v18828_v4  ;;  %v12016_v59 = vld [vmem:[#allocation8 + $0x488] sm:$0xf]  ;;  %v11473_v62 = vor.u32 %v17083_v54, %v11472_v53  ;;  %v17311_v51 = vld [vmem:[#allocation8 + $0x78c] sm:$0xf] }
  0xbc   :  { %1874 = vmatmul.bf16.vlgmr.msrb.gmra.mxu3 %v18830_v10  ;;  %1957 = vmatpush.bf16.msrb.mxu2 %v12177_v3  ;;  %v250_v17 = vpop.f32.mrf.mxu2  ;;  %v17075_v2 = vld [vmem:[#allocation8 + $0x24] sm:$0xf0]  ;;  %v12017_v7 = vor.u32 %v17219_v60, %v12016_v59  ;;  %v12402_v52 = vld [vmem:[#allocation8 + $0x7a8] sm:$0xf0] }
  0xbd   :  { %1970 = vmatpush.bf16.msrb.mxu3 %v12433_v5  ;;  %v263_v19 = vpop.f32.mrf.mxu3  ;;  %1933 = vmatpush.bf16.msrb.mxu0 %v11601_v6  ;;  %v11696_v3 = vld [vmem:[#allocation8 + $0x208] sm:$0xf]  ;;  %v17127_v6 = vld [vmem:[#allocation8 + $0x1cc] sm:$0xf]  ;;  %v11441_v15 = vor.u32 %v17075_v2, %v11440_v1 }
  0xbe   :  { %1946 = vmatpush.bf16.msrb.mxu1 %v11857_v11  ;;  %v17139_v5 = vld [vmem:[#allocation8 + $0x224] sm:$0xf0]  ;;  %v11922_v11 = vld [vmem:[#allocation8 + $0x3e8] sm:$0xf0]  ;;  %v11669_v19 = vor.u32 %v17127_v6, %v11666_v8 }
  0xbf   :  { %v11697_v16 = vor.u32 %v17139_v5, %v11696_v3  ;;  %v12240_v17 = vld [vmem:[#allocation8 + $0x648] sm:$0xf]  ;;  %v17103_v53 = vld [vmem:[#allocation8 + $0x10c] sm:$0xf] }
  0xc0   :  { %1958 = vmatpush.bf16.msrb.mxu2 %v12145_v18  ;;  %v17275_v18 = vld [vmem:[#allocation8 + $0x664] sm:$0xf0]  ;;  %v11570_v54 = vld [vmem:[#allocation8 + $0x128] sm:$0xf0] }
  0xc1   :  { %1971 = vmatpush.bf16.msrb.mxu3 %v12401_v20  ;;  %1934 = vmatpush.bf16.msrb.mxu0 %v11569_v21  ;;  %v11925_v20 = vor.u32 %v17191_v9, %v11922_v11  ;;  %v17119_v21 = vld [vmem:[#allocation8 + $0x18c] sm:$0xf]  ;;  %v12241_v26 = vor.u32 %v17275_v18, %v12240_v17  ;;  %v11952_v27 = vld [vmem:[#allocation8 + $0x408] sm:$0xf]  ;;  %v11573_v61 = vor.u32 %v17103_v53, %v11570_v54 }
  0xc2   :  { %1947 = vmatpush.bf16.msrb.mxu1 %v11825_v24  ;;  %v17183_v24 = vld [vmem:[#allocation8 + $0x38c] sm:$0xf]  ;;  %v17203_v28 = vld [vmem:[#allocation8 + $0x424] sm:$0xf0]  ;;  %v11637_v33 = vor.u32 %v17119_v21, %v11634_v23 }
  0xc3   :  { %1887 = vmatmul.bf16.vlgmr.msra.gmra.mxu0 %v18822_v41  ;;  %v12208_v29 = vld [vmem:[#allocation8 + $0x608] sm:$0xf]  ;;  %v11893_v34 = vor.u32 %v17183_v24, %v11890_v25  ;;  %v11953_v38 = vor.u32 %v17203_v28, %v11952_v27  ;;  %v17167_v55 = vld [vmem:[#allocation8 + $0x30c] sm:$0xf] }
  0xc4   :  { %1959 = vmatpush.bf16.msrb.mxu2 %v12113_v31  ;;  %1900 = vmatmul.bf16.vlgmr.msra.gmra.mxu1 %v18824_v46  ;;  %v17267_v30 = vld [vmem:[#allocation8 + $0x624] sm:$0xf0]  ;;  %v17255_v31 = vld [vmem:[#allocation8 + $0x5cc] sm:$0xf] }
  0xc5   :  { %1972 = vmatpush.bf16.msrb.mxu3 %v12369_v32  ;;  %1935 = vmatpush.bf16.msrb.mxu0 %v11537_v35  ;;  %v12178_v32 = vld [vmem:[#allocation8 + $0x5e8] sm:$0xf0]  ;;  %v12209_v43 = vor.u32 %v17267_v30, %v12208_v29 }
  0xc6   :  { %1948 = vmatpush.bf16.msrb.mxu1 %v11793_v36  ;;  %v17319_v35 = vld [vmem:[#allocation8 + $0x7cc] sm:$0xf] }
  0xc7   :  { %v12434_v36 = vld [vmem:[#allocation8 + $0x7e8] sm:$0xf0] }
  0xc8   :  { %1960 = vmatpush.bf16.msrb.mxu2 %v12081_v44  ;;  %v12181_v44 = vor.u32 %v17255_v31, %v12178_v32  ;;  %v11826_v56 = vld [vmem:[#allocation8 + $0x328] sm:$0xf0] }
  0xc9   :  { %1973 = vmatpush.bf16.msrb.mxu3 %v12337_v45  ;;  %1936 = vmatpush.bf16.msrb.mxu0 %v11505_v49  ;;  %v12437_v45 = vor.u32 %v17319_v35, %v12434_v36  ;;  %v11605_v49 = vor.u32 %v17111_v37, %v11602_v39  ;;  %v17239_v59 = vld [vmem:[#allocation8 + $0x54c] sm:$0xf] }
  0xca   :  { %1949 = vmatpush.bf16.msrb.mxu1 %v11761_v50  ;;  %v11861_v50 = vor.u32 %v17175_v40, %v11858_v42  ;;  %v12114_v60 = vld [vmem:[#allocation8 + $0x568] sm:$0xf0] }
  0xcb   :  { %1913 = vmatmul.bf16.vlgmr.msra.gmra.mxu2 %v18828_v4  ;;  %v17095_v1 = vld [vmem:[#allocation8 + $0xcc] sm:$0xf]  ;;  %v12117_v6 = vor.u32 %v17239_v59, %v12114_v60  ;;  %v11640_v59 = vld [vmem:[#allocation8 + $0x190] sm:$0xf] }
  0xcc   :  { %1926 = vmatmul.bf16.vlgmr.msra.gmra.mxu3 %v18830_v10  ;;  %1961 = vmatpush.bf16.msrb.mxu2 %v12049_v57  ;;  %v12149_v57 = vor.u32 %v17247_v47, %v12146_v48  ;;  %v11538_v2 = vld [vmem:[#allocation8 + $0xe8] sm:$0xf0]  ;;  %v17132_v47 = vld [vmem:[#allocation8 + $0x1ec] sm:$0xf0] }
  0xcd   :  { %1974 = vmatpush.bf16.msrb.mxu3 %v12305_v58  ;;  %1937 = vmatpush.bf16.msrb.mxu0 %v11473_v62  ;;  %v12405_v58 = vor.u32 %v17311_v51, %v12402_v52  ;;  %v11829_v62 = vor.u32 %v17167_v55, %v11826_v56  ;;  %v17159_v3 = vld [vmem:[#allocation8 + $0x2cc] sm:$0xf]  ;;  %v11541_v11 = vor.u32 %v17095_v1, %v11538_v2  ;;  %v11928_v48 = vld [vmem:[#allocation8 + $0x3d0] sm:$0xf] }
  0xce   :  { %1950 = vmatpush.bf16.msrb.mxu1 %v11729_v63  ;;  %v17303_v63 = vld [vmem:[#allocation8 + $0x74c] sm:$0xf] }
  0xcf   :  { %v11794_v5 = vld [vmem:[#allocation8 + $0x2e8] sm:$0xf0] }
  0xd0   :  { %1962 = vmatpush.bf16.msrb.mxu2 %v12017_v7  ;;  %v12373_v7 = vor.u32 %v17303_v63, %v12370_v0  ;;  %v17231_v8 = vld [vmem:[#allocation8 + $0x50c] sm:$0xf]  ;;  %v17188_v63 = vld [vmem:[#allocation8 + $0x3ac] sm:$0xf0] }
  0xd1   :  { %1975 = vmatpush.bf16.msrb.mxu3 %v12273_v12  ;;  %1938 = vmatpush.bf16.msrb.mxu0 %v11441_v15  ;;  %v12082_v9 = vld [vmem:[#allocation8 + $0x528] sm:$0xf0]  ;;  %v11797_v12 = vor.u32 %v17159_v3, %v11794_v5 }
  0xd2   :  { %1951 = vmatpush.bf16.msrb.mxu1 %v11697_v16  ;;  %v17087_v15 = vld [vmem:[#allocation8 + $0x8c] sm:$0xf] }
  0xd3   :  { %v11506_v16 = vld [vmem:[#allocation8 + $0xa8] sm:$0xf0] }
  0xd4   :  { %1963 = vmatpush.bf16.msrb.mxu2 %v11985_v22  ;;  %1939 = vmatmul.bf16.vlgmr.msrb.gmra.mxu0 %v18822_v41  ;;  %v17151_v17 = vld [vmem:[#allocation8 + $0x28c] sm:$0xf]  ;;  %v11509_v23 = vor.u32 %v17087_v15, %v11506_v16  ;;  %v17116_v15 = vld [vmem:[#allocation8 + $0x16c] sm:$0xf0] }
  0xd5   :  { %1983 = vmatpush.bf16.msra.mxu0 %v11669_v19  ;;  %1976 = vmatpush.bf16.msrb.mxu3 %v12241_v26  ;;  %v11762_v18 = vld [vmem:[#allocation8 + $0x2a8] sm:$0xf0]  ;;  %v12085_v19 = vor.u32 %v17231_v8, %v12082_v9 }
  0xd6   :  { %1996 = vmatpush.bf16.msra.mxu1 %v11925_v20  ;;  %v12341_v20 = vor.u32 %v17295_v13, %v12338_v14  ;;  %v17223_v21 = vld [vmem:[#allocation8 + $0x4cc] sm:$0xf]  ;;  %v11765_v24 = vor.u32 %v17151_v17, %v11762_v18  ;;  %v11608_v14 = vld [vmem:[#allocation8 + $0x150] sm:$0xf] }
  0xd7   :  { %1952 = vmatmul.bf16.vlgmr.msrb.gmra.mxu1 %v18824_v46  ;;  %v12050_v22 = vld [vmem:[#allocation8 + $0x4e8] sm:$0xf0]  ;;  %v11864_v18 = vld [vmem:[#allocation8 + $0x350] sm:$0xf] }
  0xd8   :  { %1964 = vmatpush.bf16.msrb.mxu2 %v11953_v38  ;;  %v17287_v25 = vld [vmem:[#allocation8 + $0x6cc] sm:$0xf]  ;;  %v12053_v31 = vor.u32 %v17223_v21, %v12050_v22  ;;  %v12152_v21 = vld [vmem:[#allocation8 + $0x590] sm:$0xf] }
  0xd9   :  { %1984 = vmatpush.bf16.msra.mxu0 %v11637_v33  ;;  %1977 = vmatpush.bf16.msrb.mxu3 %v12209_v43  ;;  %v12306_v26 = vld [vmem:[#allocation8 + $0x6e8] sm:$0xf0]  ;;  %v17252_v22 = vld [vmem:[#allocation8 + $0x5ac] sm:$0xf0] }
  0xda   :  { %1997 = vmatpush.bf16.msra.mxu1 %v11893_v34  ;;  %v17079_v27 = vld [vmem:[#allocation8 + $0x4c] sm:$0xf]  ;;  %v12309_v32 = vor.u32 %v17287_v25, %v12306_v26  ;;  %v17316_v25 = vld [vmem:[#allocation8 + $0x7ac] sm:$0xf0] }
  0xdb   :  { %1965 = vmatmul.bf16.vlgmr.msrb.gmra.mxu2 %v18828_v4  ;;  %v11474_v28 = vld [vmem:[#allocation8 + $0x68] sm:$0xf0] }
  0xdc   :  { %2009 = vmatpush.bf16.msra.mxu2 %v12181_v44  ;;  %1978 = vmatmul.bf16.vlgmr.msrb.gmra.mxu3 %v18830_v10  ;;  %v17143_v29 = vld [vmem:[#allocation8 + $0x24c] sm:$0xf]  ;;  %v11477_v36 = vor.u32 %v17079_v27, %v11474_v28  ;;  %v11672_v44 = vld [vmem:[#allocation8 + $0x1d0] sm:$0xf] }
  0xdd   :  { %2022 = vmatpush.bf16.msra.mxu3 %v12437_v45  ;;  %1985 = vmatpush.bf16.msra.mxu0 %v11605_v49  ;;  %v11730_v30 = vld [vmem:[#allocation8 + $0x268] sm:$0xf0]  ;;  %v17196_v49 = vld [vmem:[#allocation8 + $0x3ec] sm:$0xf0] }
  0xde   :  { %1998 = vmatpush.bf16.msra.mxu1 %v11861_v50  ;;  %v17215_v33 = vld [vmem:[#allocation8 + $0x48c] sm:$0xf]  ;;  %v11733_v37 = vor.u32 %v17143_v29, %v11730_v30  ;;  %v11576_v27 = vld [vmem:[#allocation8 + $0x110] sm:$0xf]  ;;  %v12153_v29 = vor.u32 %v17252_v22, %v12152_v21  ;;  %v11674_v21 = vld [vmem:[#allocation8 + $0x1f0] sm:$0xf0] }
  0xdf   :  { %v12018_v34 = vld [vmem:[#allocation8 + $0x4a8] sm:$0xf0]  ;;  %v17108_v28 = vld [vmem:[#allocation8 + $0x12c] sm:$0xf0]  ;;  %v17192_v22 = vld [vmem:[#allocation8 + $0x3d4] sm:$0xf] }
  0xe0   :  { %2010 = vmatpush.bf16.msra.mxu2 %v12149_v57  ;;  %v17279_v35 = vld [vmem:[#allocation8 + $0x68c] sm:$0xf]  ;;  %v12021_v45 = vor.u32 %v17215_v33, %v12018_v34  ;;  %v11673_v57 = vor.u32 %v17132_v47, %v11672_v44  ;;  %v11832_v30 = vld [vmem:[#allocation8 + $0x310] sm:$0xf] }
  0xe1   :  { %2023 = vmatpush.bf16.msra.mxu3 %v12405_v58  ;;  %1986 = vmatpush.bf16.msra.mxu0 %v11573_v61  ;;  %v12274_v38 = vld [vmem:[#allocation8 + $0x6a8] sm:$0xf0]  ;;  %v11929_v58 = vor.u32 %v17196_v49, %v11928_v48  ;;  %v17124_v61 = vld [vmem:[#allocation8 + $0x1ac] sm:$0xf0] }
  0xe2   :  { %1999 = vmatpush.bf16.msra.mxu1 %v11829_v62  ;;  %v17071_v39 = vld [vmem:[#allocation8 + $0xc] sm:$0xf]  ;;  %v12277_v50 = vor.u32 %v17279_v35, %v12274_v38  ;;  %v11896_v62 = vld [vmem:[#allocation8 + $0x390] sm:$0xf]  ;;  %v11641_v8 = vor.u32 %v17124_v61, %v11640_v59  ;;  %v11577_v35 = vor.u32 %v17108_v28, %v11576_v27 }
  0xe3   :  { %v11442_v40 = vld [vmem:[#allocation8 + $0x28] sm:$0xf0]  ;;  %v11897_v9 = vor.u32 %v17188_v63, %v11896_v62  ;;  %v12120_v33 = vld [vmem:[#allocation8 + $0x550] sm:$0xf] }
  0xe4   :  { %2011 = vmatpush.bf16.msra.mxu2 %v12117_v6  ;;  %v17135_v42 = vld [vmem:[#allocation8 + $0x20c] sm:$0xf]  ;;  %v11445_v53 = vor.u32 %v17071_v39, %v11442_v40  ;;  %v12184_v6 = vld [vmem:[#allocation8 + $0x5d0] sm:$0xf] }
  0xe5   :  { %2024 = vmatpush.bf16.msra.mxu3 %v12373_v7  ;;  %1987 = vmatpush.bf16.msra.mxu0 %v11541_v11  ;;  %v11698_v43 = vld [vmem:[#allocation8 + $0x228] sm:$0xf0]  ;;  %v17260_v7 = vld [vmem:[#allocation8 + $0x5ec] sm:$0xf0] }
  0xe6   :  { %2000 = vmatpush.bf16.msra.mxu1 %v11797_v12  ;;  %v17207_v51 = vld [vmem:[#allocation8 + $0x44c] sm:$0xf]  ;;  %v11701_v54 = vor.u32 %v17135_v42, %v11698_v43  ;;  %v12440_v11 = vld [vmem:[#allocation8 + $0x7d0] sm:$0xf]  ;;  %v12185_v17 = vor.u32 %v17260_v7, %v12184_v6 }
  0xe7   :  { %v11986_v52 = vld [vmem:[#allocation8 + $0x468] sm:$0xf0]  ;;  %v17324_v12 = vld [vmem:[#allocation8 + $0x7ec] sm:$0xf0] }
  0xe8   :  { %2012 = vmatpush.bf16.msra.mxu2 %v12085_v19  ;;  %v17271_v55 = vld [vmem:[#allocation8 + $0x64c] sm:$0xf]  ;;  %v11989_v60 = vor.u32 %v17207_v51, %v11986_v52  ;;  %v17180_v19 = vld [vmem:[#allocation8 + $0x36c] sm:$0xf0] }
  0xe9   :  { %2025 = vmatpush.bf16.msra.mxu3 %v12341_v20  ;;  %1988 = vmatpush.bf16.msra.mxu0 %v11509_v23  ;;  %v12242_v56 = vld [vmem:[#allocation8 + $0x668] sm:$0xf0]  ;;  %v12441_v20 = vor.u32 %v17324_v12, %v12440_v11  ;;  %v11609_v23 = vor.u32 %v17116_v15, %v11608_v14  ;;  %v11865_v26 = vor.u32 %v17180_v19, %v11864_v18  ;;  %v17244_v34 = vld [vmem:[#allocation8 + $0x56c] sm:$0xf0] }
  0xea   :  { %2001 = vmatpush.bf16.msra.mxu1 %v11765_v24  ;;  %v12245_v0 = vor.u32 %v17271_v55, %v12242_v56  ;;  %v17199_v1 = vld [vmem:[#allocation8 + $0x40c] sm:$0xf]  ;;  %v12408_v24 = vld [vmem:[#allocation8 + $0x790] sm:$0xf]  ;;  %v12121_v42 = vor.u32 %v17244_v34, %v12120_v33 }
  0xeb   :  { %v11954_v2 = vld [vmem:[#allocation8 + $0x428] sm:$0xf0]  ;;  %v11544_v39 = vld [vmem:[#allocation8 + $0xd0] sm:$0xf] }
  0xec   :  { %2013 = vmatpush.bf16.msra.mxu2 %v12053_v31  ;;  %v17263_v3 = vld [vmem:[#allocation8 + $0x60c] sm:$0xf]  ;;  %v11957_v13 = vor.u32 %v17199_v1, %v11954_v2  ;;  %v17172_v31 = vld [vmem:[#allocation8 + $0x32c] sm:$0xf0] }
  0xed   :  { %2026 = vmatpush.bf16.msra.mxu3 %v12309_v32  ;;  %1989 = vmatpush.bf16.msra.mxu0 %v11477_v36  ;;  %v12210_v5 = vld [vmem:[#allocation8 + $0x628] sm:$0xf0]  ;;  %v12409_v32 = vor.u32 %v17316_v25, %v12408_v24  ;;  %v12376_v36 = vld [vmem:[#allocation8 + $0x750] sm:$0xf]  ;;  %v11833_v38 = vor.u32 %v17172_v31, %v11832_v30  ;;  %v11930_v24 = vld [vmem:[#allocation8 + $0x3f0] sm:$0xf0] }
  0xee   :  { %2002 = vmatpush.bf16.msra.mxu1 %v11733_v37  ;;  %v12213_v16 = vor.u32 %v17263_v3, %v12210_v5  ;;  %v17308_v37 = vld [vmem:[#allocation8 + $0x76c] sm:$0xf0]  ;;  %v11933_v33 = vor.u32 %v17192_v22, %v11930_v24  ;;  %v12090_v22 = vld [vmem:[#allocation8 + $0x530] sm:$0xf0] }
  0xef   :  { %v17100_v40 = vld [vmem:[#allocation8 + $0xec] sm:$0xf0]  ;;  %v17296_v24 = vld [vmem:[#allocation8 + $0x714] sm:$0xf] }
  0xf0   :  { %2014 = vmatpush.bf16.msra.mxu2 %v12021_v45  ;;  %v11800_v43 = vld [vmem:[#allocation8 + $0x2d0] sm:$0xf]  ;;  %v12377_v45 = vor.u32 %v17308_v37, %v12376_v36  ;;  %v11545_v49 = vor.u32 %v17100_v40, %v11544_v39  ;;  %v17184_v36 = vld [vmem:[#allocation8 + $0x394] sm:$0xf] }
  0xf1   :  { %2027 = vmatpush.bf16.msra.mxu3 %v12277_v50  ;;  %1990 = vmatpush.bf16.msra.mxu0 %v11445_v53  ;;  %v17164_v44 = vld [vmem:[#allocation8 + $0x2ec] sm:$0xf0]  ;;  %v11898_v37 = vld [vmem:[#allocation8 + $0x3b0] sm:$0xf0] }
  0xf2   :  { %2003 = vmatpush.bf16.msra.mxu1 %v11701_v54  ;;  %v12088_v47 = vld [vmem:[#allocation8 + $0x510] sm:$0xf]  ;;  %v11801_v52 = vor.u32 %v17164_v44, %v11800_v43  ;;  %v17256_v44 = vld [vmem:[#allocation8 + $0x5d4] sm:$0xf] }
  0xf3   :  { %v17236_v48 = vld [vmem:[#allocation8 + $0x52c] sm:$0xf0] }
  0xf4   :  { %2015 = vmatpush.bf16.msra.mxu2 %v11989_v60  ;;  %1991 = vmatmul.bf16.vlgmr.msra.gmra.mxu0 %v18822_v41  ;;  %v12344_v50 = vld [vmem:[#allocation8 + $0x710] sm:$0xf]  ;;  %v12089_v55 = vor.u32 %v17236_v48, %v12088_v47  ;;  %v17320_v48 = vld [vmem:[#allocation8 + $0x7d4] sm:$0xf] }
  0xf5   :  { %2035 = vmatpush.bf16.msrb.mxu0 %v11673_v57  ;;  %2028 = vmatpush.bf16.msra.mxu3 %v12245_v0  ;;  %v17300_v51 = vld [vmem:[#allocation8 + $0x72c] sm:$0xf0] }
  0xf6   :  { %2048 = vmatpush.bf16.msrb.mxu1 %v11929_v58  ;;  %v11512_v53 = vld [vmem:[#allocation8 + $0x90] sm:$0xf]  ;;  %v12345_v58 = vor.u32 %v17300_v51, %v12344_v50  ;;  %v11901_v50 = vor.u32 %v17184_v36, %v11898_v37  ;;  %v17288_v36 = vld [vmem:[#allocation8 + $0x6d4] sm:$0xf] }
  0xf7   :  { %2004 = vmatmul.bf16.vlgmr.msra.gmra.mxu1 %v18824_v46  ;;  %v17092_v54 = vld [vmem:[#allocation8 + $0xac] sm:$0xf0]  ;;  %v12314_v37 = vld [vmem:[#allocation8 + $0x6f0] sm:$0xf0] }
  0xf8   :  { %2016 = vmatpush.bf16.msra.mxu2 %v11957_v13  ;;  %v11768_v56 = vld [vmem:[#allocation8 + $0x290] sm:$0xf]  ;;  %v11513_v61 = vor.u32 %v17092_v54, %v11512_v53  ;;  %v11610_v53 = vld [vmem:[#allocation8 + $0x170] sm:$0xf0] }
  0xf9   :  { %2036 = vmatpush.bf16.msrb.mxu0 %v11641_v8  ;;  %2029 = vmatpush.bf16.msra.mxu3 %v12213_v16  ;;  %v17156_v57 = vld [vmem:[#allocation8 + $0x2ac] sm:$0xf0] }
  0xfa   :  { %2049 = vmatpush.bf16.msrb.mxu1 %v11897_v9  ;;  %v12056_v59 = vld [vmem:[#allocation8 + $0x4d0] sm:$0xf]  ;;  %v11769_v0 = vor.u32 %v17156_v57, %v11768_v56  ;;  %v17176_v56 = vld [vmem:[#allocation8 + $0x354] sm:$0xf] }
  0xfb   :  { %2017 = vmatmul.bf16.vlgmr.msra.gmra.mxu2 %v18828_v4  ;;  %v17228_v60 = vld [vmem:[#allocation8 + $0x4ec] sm:$0xf0]  ;;  %v11866_v57 = vld [vmem:[#allocation8 + $0x370] sm:$0xf0] }
  0xfc   :  { %2061 = vmatpush.bf16.msrb.mxu2 %v12185_v17  ;;  %2030 = vmatmul.bf16.vlgmr.msra.gmra.mxu3 %v18830_v10  ;;  %v12312_v62 = vld [vmem:[#allocation8 + $0x6d0] sm:$0xf]  ;;  %v12057_v3 = vor.u32 %v17228_v60, %v12056_v59  ;;  %v17248_v59 = vld [vmem:[#allocation8 + $0x594] sm:$0xf] }
  0xfd   :  { %2074 = vmatpush.bf16.msrb.mxu3 %v12441_v20  ;;  %2037 = vmatpush.bf16.msrb.mxu0 %v11609_v23  ;;  %v17292_v63 = vld [vmem:[#allocation8 + $0x6ec] sm:$0xf0]  ;;  %v17128_v20 = vld [vmem:[#allocation8 + $0x1d4] sm:$0xf] }
  0xfe   :  { %2050 = vmatpush.bf16.msrb.mxu1 %v11865_v26  ;;  %v11480_v1 = vld [vmem:[#allocation8 + $0x50] sm:$0xf]  ;;  %v12313_v7 = vor.u32 %v17292_v63, %v12312_v62  ;;  %v11677_v31 = vor.u32 %v17128_v20, %v11674_v21  ;;  %v12154_v60 = vld [vmem:[#allocation8 + $0x5b0] sm:$0xf0] }
  0xff   :  { %v17084_v2 = vld [vmem:[#allocation8 + $0x6c] sm:$0xf0]  ;;  %v17312_v62 = vld [vmem:[#allocation8 + $0x794] sm:$0xf] }
 0x100   :  { %2062 = vmatpush.bf16.msrb.mxu2 %v12153_v29  ;;  %v11736_v5 = vld [vmem:[#allocation8 + $0x250] sm:$0xf]  ;;  %v11481_v11 = vor.u32 %v17084_v2, %v11480_v1  ;;  %v12410_v63 = vld [vmem:[#allocation8 + $0x7b0] sm:$0xf0] }
 0x101   :  { %2075 = vmatpush.bf16.msrb.mxu3 %v12409_v32  ;;  %2038 = vmatpush.bf16.msrb.mxu0 %v11577_v35  ;;  %v17148_v6 = vld [vmem:[#allocation8 + $0x26c] sm:$0xf0]  ;;  %v17120_v32 = vld [vmem:[#allocation8 + $0x194] sm:$0xf] }
 0x102   :  { %2051 = vmatpush.bf16.msrb.mxu1 %v11833_v38  ;;  %v12024_v8 = vld [vmem:[#allocation8 + $0x490] sm:$0xf]  ;;  %v11737_v15 = vor.u32 %v17148_v6, %v11736_v5  ;;  %v11642_v35 = vld [vmem:[#allocation8 + $0x1b0] sm:$0xf0] }
 0x103   :  { %v17220_v9 = vld [vmem:[#allocation8 + $0x4ac] sm:$0xf0]  ;;  %v11645_v47 = vor.u32 %v17120_v32, %v11642_v35  ;;  %v17104_v1 = vld [vmem:[#allocation8 + $0x114] sm:$0xf] }
 0x104   :  { %2063 = vmatpush.bf16.msrb.mxu2 %v12121_v42  ;;  %v12280_v12 = vld [vmem:[#allocation8 + $0x690] sm:$0xf]  ;;  %v12025_v19 = vor.u32 %v17220_v9, %v12024_v8  ;;  %v11578_v2 = vld [vmem:[#allocation8 + $0x130] sm:$0xf0] }
 0x105   :  { %2076 = vmatpush.bf16.msrb.mxu3 %v12377_v45  ;;  %2039 = vmatpush.bf16.msrb.mxu0 %v11545_v49  ;;  %v17284_v13 = vld [vmem:[#allocation8 + $0x6ac] sm:$0xf0]  ;;  %v12186_v45 = vld [vmem:[#allocation8 + $0x5f0] sm:$0xf0] }
 0x106   :  { %2052 = vmatpush.bf16.msrb.mxu1 %v11801_v52  ;;  %v11448_v14 = vld [vmem:[#allocation8 + $0x10] sm:$0xf]  ;;  %v12281_v23 = vor.u32 %v17284_v13, %v12280_v12  ;;  %v12442_v49 = vld [vmem:[#allocation8 + $0x7f0] sm:$0xf0] }
 0x107   :  { %v17076_v16 = vld [vmem:[#allocation8 + $0x2c] sm:$0xf0]  ;;  %v17112_v52 = vld [vmem:[#allocation8 + $0x154] sm:$0xf] }
 0x108   :  { %2064 = vmatpush.bf16.msrb.mxu2 %v12089_v55  ;;  %v11704_v17 = vld [vmem:[#allocation8 + $0x210] sm:$0xf]  ;;  %v11449_v27 = vor.u32 %v17076_v16, %v11448_v14  ;;  %v12189_v55 = vor.u32 %v17256_v44, %v12186_v45  ;;  %v17168_v5 = vld [vmem:[#allocation8 + $0x314] sm:$0xf]  ;;  %v12317_v45 = vor.u32 %v17288_v36, %v12314_v37 }
 0x109   :  { %2077 = vmatpush.bf16.msrb.mxu3 %v12345_v58  ;;  %2040 = vmatpush.bf16.msrb.mxu0 %v11513_v61  ;;  %v17140_v18 = vld [vmem:[#allocation8 + $0x22c] sm:$0xf0]  ;;  %v12445_v58 = vor.u32 %v17320_v48, %v12442_v49  ;;  %v11613_v61 = vor.u32 %v17112_v52, %v11610_v53  ;;  %v11834_v6 = vld [vmem:[#allocation8 + $0x330] sm:$0xf0] }
 0x10a   :  { %2053 = vmatpush.bf16.msrb.mxu1 %v11769_v0  ;;  %v11992_v25 = vld [vmem:[#allocation8 + $0x450] sm:$0xf]  ;;  %v11705_v30 = vor.u32 %v17140_v18, %v11704_v17  ;;  %v11869_v0 = vor.u32 %v17176_v56, %v11866_v57  ;;  %v17240_v8 = vld [vmem:[#allocation8 + $0x554] sm:$0xf]  ;;  %v11837_v14 = vor.u32 %v17168_v5, %v11834_v6 }
 0x10b   :  { %v17212_v26 = vld [vmem:[#allocation8 + $0x46c] sm:$0xf0]  ;;  %v12122_v9 = vld [vmem:[#allocation8 + $0x570] sm:$0xf0] }
 0x10c   :  { %2065 = vmatpush.bf16.msrb.mxu2 %v12057_v3  ;;  %v12248_v28 = vld [vmem:[#allocation8 + $0x650] sm:$0xf]  ;;  %v11993_v34 = vor.u32 %v17212_v26, %v11992_v25  ;;  %v12157_v3 = vor.u32 %v17248_v59, %v12154_v60  ;;  %v17304_v12 = vld [vmem:[#allocation8 + $0x754] sm:$0xf]  ;;  %v12125_v17 = vor.u32 %v17240_v8, %v12122_v9  ;;  %v17133_v59 = vld [vmem:[#allocation8 + $0x1f4] sm:$0xf0] }
 0x10d   :  { %2078 = vmatpush.bf16.msrb.mxu3 %v12313_v7  ;;  %2041 = vmatpush.bf16.msrb.mxu0 %v11481_v11  ;;  %v17276_v29 = vld [vmem:[#allocation8 + $0x66c] sm:$0xf0]  ;;  %v12413_v7 = vor.u32 %v17312_v62, %v12410_v63  ;;  %v11581_v11 = vor.u32 %v17104_v1, %v11578_v2  ;;  %v12378_v13 = vld [vmem:[#allocation8 + $0x770] sm:$0xf0]  ;;  %v11936_v60 = vld [vmem:[#allocation8 + $0x3d8] sm:$0xf] }
 0x10e   :  { %2054 = vmatpush.bf16.msrb.mxu1 %v11737_v15  ;;  %v12249_v38 = vor.u32 %v17276_v29, %v12248_v28  ;;  %v11960_v39 = vld [vmem:[#allocation8 + $0x410] sm:$0xf]  ;;  %v17096_v15 = vld [vmem:[#allocation8 + $0xd4] sm:$0xf]  ;;  %v12381_v20 = vor.u32 %v17304_v12, %v12378_v13  ;;  %v17197_v62 = vld [vmem:[#allocation8 + $0x3f4] sm:$0xf0] }
 0x10f   :  { %v17204_v40 = vld [vmem:[#allocation8 + $0x42c] sm:$0xf0]  ;;  %v11546_v16 = vld [vmem:[#allocation8 + $0xf0] sm:$0xf0]  ;;  %v11937_v8 = vor.u32 %v17197_v62, %v11936_v60  ;;  %v11904_v12 = vld [vmem:[#allocation8 + $0x398] sm:$0xf] }
 0x110   :  { %2066 = vmatpush.bf16.msrb.mxu2 %v12025_v19  ;;  %v12216_v42 = vld [vmem:[#allocation8 + $0x610] sm:$0xf]  ;;  %v11961_v51 = vor.u32 %v17204_v40, %v11960_v39  ;;  %v17160_v18 = vld [vmem:[#allocation8 + $0x2d4] sm:$0xf]  ;;  %v17189_v13 = vld [vmem:[#allocation8 + $0x3b4] sm:$0xf0] }
 0x111   :  { %2079 = vmatpush.bf16.msrb.mxu3 %v12281_v23  ;;  %2042 = vmatpush.bf16.msrb.mxu0 %v11449_v27  ;;  %v17268_v43 = vld [vmem:[#allocation8 + $0x62c] sm:$0xf0]  ;;  %v11802_v19 = vld [vmem:[#allocation8 + $0x2f0] sm:$0xf0]  ;;  %v11549_v23 = vor.u32 %v17096_v15, %v11546_v16  ;;  %v11808_v62 = vld [vmem:[#allocation8 + $0x2d8] sm:$0xf] }
 0x112   :  { %2055 = vmatpush.bf16.msrb.mxu1 %v11705_v30  ;;  %v12217_v54 = vor.u32 %v17268_v43, %v12216_v42  ;;  %v17232_v21 = vld [vmem:[#allocation8 + $0x514] sm:$0xf]  ;;  %v11805_v26 = vor.u32 %v17160_v18, %v11802_v19  ;;  %v12192_v19 = vld [vmem:[#allocation8 + $0x5d8] sm:$0xf] }
 0x113   :  { %v12346_v25 = vld [vmem:[#allocation8 + $0x730] sm:$0xf0]  ;;  %v12093_v29 = vor.u32 %v17232_v21, %v12090_v22  ;;  %v12448_v22 = vld [vmem:[#allocation8 + $0x7d8] sm:$0xf] }
 0x114   :  { %2067 = vmatpush.bf16.msrb.mxu2 %v11993_v34  ;;  %2043 = vmatmul.bf16.vlgmr.msrb.gmra.mxu0 %v18822_v41  ;;  %v17088_v27 = vld [vmem:[#allocation8 + $0x94] sm:$0xf]  ;;  %v12349_v32 = vor.u32 %v17296_v24, %v12346_v25  ;;  %v11905_v24 = vor.u32 %v17189_v13, %v11904_v12  ;;  %v11776_v12 = vld [vmem:[#allocation8 + $0x298] sm:$0xf] }
 0x115   :  { %2087 = vmatpush.bf16.msra.mxu0 %v11677_v31  ;;  %2080 = vmatpush.bf16.msrb.mxu3 %v12249_v38  ;;  %v11514_v28 = vld [vmem:[#allocation8 + $0xb0] sm:$0xf0]  ;;  %v17157_v13 = vld [vmem:[#allocation8 + $0x2b4] sm:$0xf0] }
 0x116   :  { %2100 = vmatpush.bf16.msra.mxu1 %v11933_v33  ;;  %v17152_v30 = vld [vmem:[#allocation8 + $0x294] sm:$0xf]  ;;  %v11517_v35 = vor.u32 %v17088_v27, %v11514_v28  ;;  %v17117_v27 = vld [vmem:[#allocation8 + $0x174] sm:$0xf0]  ;;  %v18850_v28 = vld [vmem:[#allocation10] sm:$0xff] }
 0x117   :  { %2056 = vmatmul.bf16.vlgmr.msrb.gmra.mxu1 %v18824_v46  ;;  %v11770_v31 = vld [vmem:[#allocation8 + $0x2b0] sm:$0xf0]  ;;  %v531_v37 = vperm.slane %v18850_v28, 0 }
 0x118   :  { %2068 = vmatpush.bf16.msrb.mxu2 %v11961_v51  ;;  %v17224_v33 = vld [vmem:[#allocation8 + $0x4d4] sm:$0xf]  ;;  %v11773_v38 = vor.u32 %v17152_v30, %v11770_v31  ;;  %v11872_v31 = vld [vmem:[#allocation8 + $0x358] sm:$0xf] }
 0x119   :  { %2088 = vmatpush.bf16.msra.mxu0 %v11645_v47  ;;  %2081 = vmatpush.bf16.msrb.mxu3 %v12217_v54  ;;  %v12058_v34 = vld [vmem:[#allocation8 + $0x4f0] sm:$0xf0] }
 0x11a   :  { %2101 = vmatpush.bf16.msra.mxu1 %v11901_v50  ;;  %v17080_v39 = vld [vmem:[#allocation8 + $0x54] sm:$0xf]  ;;  %v12061_v42 = vor.u32 %v17224_v33, %v12058_v34  ;;  %v12160_v34 = vld [vmem:[#allocation8 + $0x598] sm:$0xf] }
 0x11b   :  { %2069 = vmatmul.bf16.vlgmr.msrb.gmra.mxu2 %v18828_v4  ;;  %v11482_v40 = vld [vmem:[#allocation8 + $0x70] sm:$0xf0] }
 0x11c   :  { %2113 = vmatpush.bf16.msra.mxu2 %v12189_v55  ;;  %2082 = vmatmul.bf16.vlgmr.msrb.gmra.mxu3 %v18830_v10  ;;  %v17144_v43 = vld [vmem:[#allocation8 + $0x254] sm:$0xf]  ;;  %v11485_v49 = vor.u32 %v17080_v39, %v11482_v40  ;;  %v17317_v39 = vld [vmem:[#allocation8 + $0x7b4] sm:$0xf0] }
 0x11d   :  { %2126 = vmatpush.bf16.msra.mxu3 %v12445_v58  ;;  %2089 = vmatpush.bf16.msra.mxu0 %v11613_v61  ;;  %v11738_v44 = vld [vmem:[#allocation8 + $0x270] sm:$0xf0]  ;;  %v11680_v58 = vld [vmem:[#allocation8 + $0x1d8] sm:$0xf] }
 0x11e   :  { %2102 = vmatpush.bf16.msra.mxu1 %v11869_v0  ;;  %v17216_v47 = vld [vmem:[#allocation8 + $0x494] sm:$0xf]  ;;  %v11741_v53 = vor.u32 %v17144_v43, %v11738_v44  ;;  %v11681_v6 = vor.u32 %v17133_v59, %v11680_v58  ;;  %v17109_v43 = vld [vmem:[#allocation8 + $0x134] sm:$0xf0] }
 0x11f   :  { %v12026_v48 = vld [vmem:[#allocation8 + $0x4b0] sm:$0xf0]  ;;  %v11552_v58 = vld [vmem:[#allocation8 + $0xd8] sm:$0xf] }
 0x120   :  { %2114 = vmatpush.bf16.msra.mxu2 %v12157_v3  ;;  %v17280_v50 = vld [vmem:[#allocation8 + $0x694] sm:$0xf]  ;;  %v12029_v57 = vor.u32 %v17216_v47, %v12026_v48  ;;  %v17173_v47 = vld [vmem:[#allocation8 + $0x334] sm:$0xf0] }
 0x121   :  { %2127 = vmatpush.bf16.msra.mxu3 %v12413_v7  ;;  %2090 = vmatpush.bf16.msra.mxu0 %v11581_v11  ;;  %v12282_v51 = vld [vmem:[#allocation8 + $0x6b0] sm:$0xf0]  ;;  %v11648_v7 = vld [vmem:[#allocation8 + $0x198] sm:$0xf] }
 0x122   :  { %2103 = vmatpush.bf16.msra.mxu1 %v11837_v14  ;;  %v17072_v52 = vld [vmem:[#allocation8 + $0x14] sm:$0xf]  ;;  %v12285_v61 = vor.u32 %v17280_v50, %v12282_v51  ;;  %v17125_v11 = vld [vmem:[#allocation8 + $0x1b4] sm:$0xf0] }
 0x123   :  { %v11450_v54 = vld [vmem:[#allocation8 + $0x30] sm:$0xf0]  ;;  %v11649_v21 = vor.u32 %v17125_v11, %v11648_v7  ;;  %v12128_v50 = vld [vmem:[#allocation8 + $0x558] sm:$0xf] }
 0x124   :  { %2115 = vmatpush.bf16.msra.mxu2 %v12125_v17  ;;  %v17136_v55 = vld [vmem:[#allocation8 + $0x214] sm:$0xf]  ;;  %v11453_v1 = vor.u32 %v17072_v52, %v11450_v54  ;;  %v17245_v51 = vld [vmem:[#allocation8 + $0x574] sm:$0xf0] }
 0x125   :  { %2128 = vmatpush.bf16.msra.mxu3 %v12381_v20  ;;  %2091 = vmatpush.bf16.msra.mxu0 %v11549_v23  ;;  %v11706_v56 = vld [vmem:[#allocation8 + $0x230] sm:$0xf0]  ;;  %v17261_v20 = vld [vmem:[#allocation8 + $0x5f4] sm:$0xf0] }
 0x126   :  { %2104 = vmatpush.bf16.msra.mxu1 %v11805_v26  ;;  %v17208_v63 = vld [vmem:[#allocation8 + $0x454] sm:$0xf]  ;;  %v11709_v5 = vor.u32 %v17136_v55, %v11706_v56  ;;  %v17325_v23 = vld [vmem:[#allocation8 + $0x7f4] sm:$0xf0]  ;;  %v12193_v30 = vor.u32 %v17261_v20, %v12192_v19 }
 0x127   :  { %v11994_v0 = vld [vmem:[#allocation8 + $0x470] sm:$0xf0]  ;;  %v11616_v26 = vld [vmem:[#allocation8 + $0x158] sm:$0xf]  ;;  %v12449_v33 = vor.u32 %v17325_v23, %v12448_v22  ;;  %v11777_v22 = vor.u32 %v17157_v13, %v11776_v12 }
 0x128   :  { %2116 = vmatpush.bf16.msra.mxu2 %v12093_v29  ;;  %v17272_v2 = vld [vmem:[#allocation8 + $0x654] sm:$0xf]  ;;  %v11997_v9 = vor.u32 %v17208_v63, %v11994_v0  ;;  %v11617_v36 = vor.u32 %v17117_v27, %v11616_v26  ;;  %v12384_v55 = vld [vmem:[#allocation8 + $0x758] sm:$0xf] }
 0x129   :  { %2129 = vmatpush.bf16.msra.mxu3 %v12349_v32  ;;  %2092 = vmatpush.bf16.msra.mxu0 %v11517_v35  ;;  %v12250_v3 = vld [vmem:[#allocation8 + $0x670] sm:$0xf0]  ;;  %v17181_v32 = vld [vmem:[#allocation8 + $0x374] sm:$0xf0] }
 0x12a   :  { %2105 = vmatpush.bf16.msra.mxu1 %v11773_v38  ;;  %v12253_v14 = vor.u32 %v17272_v2, %v12250_v3  ;;  %v17200_v15 = vld [vmem:[#allocation8 + $0x414] sm:$0xf]  ;;  %v17253_v35 = vld [vmem:[#allocation8 + $0x5b4] sm:$0xf0]  ;;  %v11873_v40 = vor.u32 %v17181_v32, %v11872_v31 }
 0x12b   :  { %v11962_v16 = vld [vmem:[#allocation8 + $0x430] sm:$0xf0]  ;;  %v12416_v38 = vld [vmem:[#allocation8 + $0x798] sm:$0xf]  ;;  %v12161_v44 = vor.u32 %v17253_v35, %v12160_v34 }
 0x12c   :  { %2117 = vmatpush.bf16.msra.mxu2 %v12061_v42  ;;  %v17264_v17 = vld [vmem:[#allocation8 + $0x614] sm:$0xf]  ;;  %v11965_v25 = vor.u32 %v17200_v15, %v11962_v16  ;;  %v11584_v42 = vld [vmem:[#allocation8 + $0x118] sm:$0xf] }
 0x12d   :  { %2130 = vmatpush.bf16.msra.mxu3 %v12317_v45  ;;  %2093 = vmatpush.bf16.msra.mxu0 %v11485_v49  ;;  %v12218_v18 = vld [vmem:[#allocation8 + $0x630] sm:$0xf0]  ;;  %v11840_v45 = vld [vmem:[#allocation8 + $0x318] sm:$0xf]  ;;  %v12417_v49 = vor.u32 %v17317_v39, %v12416_v38  ;;  %v11585_v54 = vor.u32 %v17109_v43, %v11584_v42 }
 0x12e   :  { %2106 = vmatpush.bf16.msra.mxu1 %v11741_v53  ;;  %v12221_v29 = vor.u32 %v17264_v17, %v12218_v18  ;;  %v17309_v56 = vld [vmem:[#allocation8 + $0x774] sm:$0xf0] }
 0x12f   :  { %v17101_v59 = vld [vmem:[#allocation8 + $0xf4] sm:$0xf0]  ;;  %v12385_v0 = vor.u32 %v17309_v56, %v12384_v55 }
 0x130   :  { %2118 = vmatpush.bf16.msra.mxu2 %v12029_v57  ;;  %v1836_v48 = vpop.f32.mrf.mxu0  ;;  %v11841_v57 = vor.u32 %v17173_v47, %v11840_v45  ;;  %v17165_v63 = vld [vmem:[#allocation8 + $0x2f4] sm:$0xf0]  ;;  %v11553_v3 = vor.u32 %v17101_v59, %v11552_v58  ;;  %v11682_v45 = vld [vmem:[#allocation8 + $0x1f8] sm:$0xf0] }
 0x131   :  { %2131 = vmatpush.bf16.msra.mxu3 %v12285_v61  ;;  %2094 = vmatpush.bf16.msra.mxu0 %v11453_v1  ;;  %v1837_v52 = vadd.f32 %v1836_v48, %v531_v37  ;;  %v1849_v53 = vpop.f32.mrf.mxu1  ;;  %v12129_v61 = vor.u32 %v17245_v51, %v12128_v50  ;;  %v12096_v1 = vld [vmem:[#allocation8 + $0x518] sm:$0xf]  ;;  %v11809_v7 = vor.u32 %v17165_v63, %v11808_v62  ;;  %v17193_v47 = vld [vmem:[#allocation8 + $0x3dc] sm:$0xf] }
 0x132   :  { %2107 = vmatpush.bf16.msra.mxu1 %v11709_v5  ;;  %v17237_v2 = vld [vmem:[#allocation8 + $0x534] sm:$0xf0]  ;;  %v11938_v50 = vld [vmem:[#allocation8 + $0x3f8] sm:$0xf0] }
 0x133   :  { %v18857_v60 = vadd.f32 %v1849_v53, %v1837_v52  ;;  %v12352_v5 = vld [vmem:[#allocation8 + $0x718] sm:$0xf]  ;;  %v12097_v11 = vor.u32 %v17237_v2, %v12096_v1  ;;  %v17121_v59 = vld [vmem:[#allocation8 + $0x19c] sm:$0xf] }
 0x134   :  { %2119 = vmatpush.bf16.msra.mxu2 %v11997_v9  ;;  %2095 = vmatmul.bf16.vlgmr.msra.gmra.mxu0 %v18822_v41  ;;  %v17093_v9 = vld [vmem:[#allocation8 + $0xb4] sm:$0xf0]  ;;  %v11650_v63 = vld [vmem:[#allocation8 + $0x1b8] sm:$0xf0] }
 0x135   :  { %2139 = vmatpush.bf16.msrb.mxu0 %v11681_v6  ;;  %2132 = vmatpush.bf16.msra.mxu3 %v12253_v14  ;;  %v17301_v6 = vld [vmem:[#allocation8 + $0x734] sm:$0xf0]  ;;  %v11906_v1 = vld [vmem:[#allocation8 + $0x3b8] sm:$0xf0]  ;;  %v11653_v13 = vor.u32 %v17121_v59, %v11650_v63 }
 0x136   :  { %2152 = vmatpush.bf16.msrb.mxu1 %v11937_v8  ;;  %v11520_v8 = vld [vmem:[#allocation8 + $0x98] sm:$0xf]  ;;  %v12353_v15 = vor.u32 %v17301_v6, %v12352_v5  ;;  %v12098_v63 = vld [vmem:[#allocation8 + $0x538] sm:$0xf0] }
 0x137   :  { %2108 = vmatmul.bf16.vlgmr.msra.gmra.mxu1 %v18824_v46  ;;  %v12064_v16 = vld [vmem:[#allocation8 + $0x4d8] sm:$0xf]  ;;  %v11521_v19 = vor.u32 %v17093_v9, %v11520_v8  ;;  %v17257_v9 = vld [vmem:[#allocation8 + $0x5dc] sm:$0xf] }
 0x138   :  { %2120 = vmatpush.bf16.msra.mxu2 %v11965_v25  ;;  %v1838_v14 = vpop.f32.mrf.mxu0  ;;  %v17229_v17 = vld [vmem:[#allocation8 + $0x4f4] sm:$0xf0] }
 0x139   :  { %2140 = vmatpush.bf16.msrb.mxu0 %v11649_v21  ;;  %2133 = vmatpush.bf16.msra.mxu3 %v12221_v29  ;;  %v1851_v18 = vpop.f32.mrf.mxu1  ;;  %v12320_v20 = vld [vmem:[#allocation8 + $0x6d8] sm:$0xf]  ;;  %v12065_v25 = vor.u32 %v17229_v17, %v12064_v16  ;;  %v17321_v14 = vld [vmem:[#allocation8 + $0x7dc] sm:$0xf] }
 0x13a   :  { %2153 = vmatpush.bf16.msrb.mxu1 %v11905_v24  ;;  %v17293_v21 = vld [vmem:[#allocation8 + $0x6f4] sm:$0xf0]  ;;  %v17113_v18 = vld [vmem:[#allocation8 + $0x15c] sm:$0xf] }
 0x13b   :  { %2121 = vmatmul.bf16.vlgmr.msra.gmra.mxu2 %v18828_v4  ;;  %v11488_v23 = vld [vmem:[#allocation8 + $0x58] sm:$0xf]  ;;  %v12321_v29 = vor.u32 %v17293_v21, %v12320_v20 }
 0x13c   :  { %2165 = vmatpush.bf16.msrb.mxu2 %v12193_v30  ;;  %2134 = vmatmul.bf16.vlgmr.msra.gmra.mxu3 %v18830_v10  ;;  %v17085_v24 = vld [vmem:[#allocation8 + $0x74] sm:$0xf0] }
 0x13d   :  { %2178 = vmatpush.bf16.msrb.mxu3 %v12449_v33  ;;  %2141 = vmatpush.bf16.msrb.mxu0 %v11617_v36  ;;  %v11744_v26 = vld [vmem:[#allocation8 + $0x258] sm:$0xf]  ;;  %v11489_v33 = vor.u32 %v17085_v24, %v11488_v23  ;;  %v17177_v23 = vld [vmem:[#allocation8 + $0x35c] sm:$0xf] }
 0x13e   :  { %2154 = vmatpush.bf16.msrb.mxu1 %v11873_v40  ;;  %v17149_v27 = vld [vmem:[#allocation8 + $0x274] sm:$0xf0]  ;;  %v18859_v32 = vpop.f32.mrf.mxu2  ;;  %v11874_v24 = vld [vmem:[#allocation8 + $0x378] sm:$0xf0] }
 0x13f   :  { %v12032_v30 = vld [vmem:[#allocation8 + $0x498] sm:$0xf]  ;;  %v18861_v37 = vpop.f32.mrf.mxu3  ;;  %v11745_v38 = vor.u32 %v17149_v27, %v11744_v26  ;;  %v17249_v27 = vld [vmem:[#allocation8 + $0x59c] sm:$0xf] }
 0x140   :  { %2166 = vmatpush.bf16.msrb.mxu2 %v12161_v44  ;;  %v17221_v31 = vld [vmem:[#allocation8 + $0x4b4] sm:$0xf0]  ;;  %v17129_v44 = vld [vmem:[#allocation8 + $0x1dc] sm:$0xf]  ;;  %v18863_v48 = vpop.f32.mrf.mxu0 }
 0x141   :  { %2179 = vmatpush.bf16.msrb.mxu3 %v12417_v49  ;;  %2142 = vmatpush.bf16.msrb.mxu0 %v11585_v54  ;;  %v12288_v34 = vld [vmem:[#allocation8 + $0x698] sm:$0xf]  ;;  %v12033_v43 = vor.u32 %v17221_v31, %v12032_v30  ;;  %v18865_v53 = vpop.f32.mrf.mxu1  ;;  %v11685_v58 = vor.u32 %v17129_v44, %v11682_v45  ;;  %v17313_v31 = vld [vmem:[#allocation8 + $0x79c] sm:$0xf] }
 0x142   :  { %2155 = vmatpush.bf16.msrb.mxu1 %v11841_v57  ;;  %v17285_v35 = vld [vmem:[#allocation8 + $0x6b4] sm:$0xf0]  ;;  %v17241_v44 = vld [vmem:[#allocation8 + $0x55c] sm:$0xf] }
 0x143   :  { %v11456_v36 = vld [vmem:[#allocation8 + $0x18] sm:$0xf]  ;;  %v12289_v49 = vor.u32 %v17285_v35, %v12288_v34  ;;  %v11877_v34 = vor.u32 %v17177_v23, %v11874_v24  ;;  %v17105_v35 = vld [vmem:[#allocation8 + $0x11c] sm:$0xf] }
 0x144   :  { %2167 = vmatpush.bf16.msrb.mxu2 %v12129_v61  ;;  %v17077_v39 = vld [vmem:[#allocation8 + $0x34] sm:$0xf0]  ;;  %v11941_v61 = vor.u32 %v17193_v47, %v11938_v50  ;;  %v12130_v45 = vld [vmem:[#allocation8 + $0x578] sm:$0xf0] }
 0x145   :  { %2180 = vmatpush.bf16.msrb.mxu3 %v12385_v0  ;;  %2143 = vmatpush.bf16.msrb.mxu0 %v11553_v3  ;;  %v11712_v40 = vld [vmem:[#allocation8 + $0x218] sm:$0xf]  ;;  %v11457_v54 = vor.u32 %v17077_v39, %v11456_v36  ;;  %v17185_v0 = vld [vmem:[#allocation8 + $0x39c] sm:$0xf] }
 0x146   :  { %2156 = vmatpush.bf16.msrb.mxu1 %v11809_v7  ;;  %v17141_v42 = vld [vmem:[#allocation8 + $0x234] sm:$0xf0]  ;;  %v1864_v7 = vpop.f32.mrf.mxu2  ;;  %v11909_v16 = vor.u32 %v17185_v0, %v11906_v1  ;;  %v11586_v36 = vld [vmem:[#allocation8 + $0x138] sm:$0xf0] }
 0x147   :  { %v12000_v51 = vld [vmem:[#allocation8 + $0x458] sm:$0xf]  ;;  %v11713_v57 = vor.u32 %v17141_v42, %v11712_v40  ;;  %v1877_v12 = vpop.f32.mrf.mxu3  ;;  %v17169_v39 = vld [vmem:[#allocation8 + $0x31c] sm:$0xf] }
 0x148   :  { %2168 = vmatpush.bf16.msrb.mxu2 %v12097_v11  ;;  %v17213_v52 = vld [vmem:[#allocation8 + $0x474] sm:$0xf0]  ;;  %v12194_v11 = vld [vmem:[#allocation8 + $0x5f8] sm:$0xf0]  ;;  %v1890_v20 = vpop.f32.mrf.mxu0 }
 0x149   :  { %2181 = vmatpush.bf16.msrb.mxu3 %v12353_v15  ;;  %2144 = vmatpush.bf16.msrb.mxu0 %v11521_v19  ;;  %v12256_v55 = vld [vmem:[#allocation8 + $0x658] sm:$0xf]  ;;  %v12001_v62 = vor.u32 %v17213_v52, %v12000_v51  ;;  %v12450_v15 = vld [vmem:[#allocation8 + $0x7f8] sm:$0xf0] }
 0x14a   :  { %2157 = vmatpush.bf16.msrb.mxu1 %v11777_v22  ;;  %v17277_v56 = vld [vmem:[#allocation8 + $0x674] sm:$0xf0]  ;;  %v11618_v19 = vld [vmem:[#allocation8 + $0x178] sm:$0xf0]  ;;  %v12197_v22 = vor.u32 %v17257_v9, %v12194_v11  ;;  %v12453_v26 = vor.u32 %v17321_v14, %v12450_v15 }
 0x14b   :  { %v12257_v2 = vor.u32 %v17277_v56, %v12256_v55  ;;  %v11968_v3 = vld [vmem:[#allocation8 + $0x418] sm:$0xf]  ;;  %v11621_v30 = vor.u32 %v17113_v18, %v11618_v19  ;;  %v11842_v40 = vld [vmem:[#allocation8 + $0x338] sm:$0xf0]  ;;  %v12133_v56 = vor.u32 %v17241_v44, %v12130_v45  ;;  %v12904_v45 = vld [vmem:[#allocation11 + $0x380] sm:$0xf] }
 0x14c   :  { %2169 = vmatpush.bf16.msrb.mxu2 %v12065_v25  ;;  %v17205_v5 = vld [vmem:[#allocation8 + $0x434] sm:$0xf0]  ;;  %v1903_v25 = vpop.f32.mrf.mxu1  ;;  %v17305_v50 = vld [vmem:[#allocation8 + $0x75c] sm:$0xf]  ;;  %v11845_v52 = vor.u32 %v17169_v39, %v11842_v40 }
 0x14d   :  { %2182 = vmatpush.bf16.msrb.mxu3 %v12321_v29  ;;  %2145 = vmatpush.bf16.msrb.mxu0 %v11489_v33  ;;  %v12224_v6 = vld [vmem:[#allocation8 + $0x618] sm:$0xf]  ;;  %v11969_v17 = vor.u32 %v17205_v5, %v11968_v3  ;;  %v12162_v29 = vld [vmem:[#allocation8 + $0x5b8] sm:$0xf0] }
 0x14e   :  { %2158 = vmatpush.bf16.msrb.mxu1 %v11745_v38  ;;  %v17269_v8 = vld [vmem:[#allocation8 + $0x634] sm:$0xf0]  ;;  %v12418_v33 = vld [vmem:[#allocation8 + $0x7b8] sm:$0xf0]  ;;  %v12165_v38 = vor.u32 %v17249_v27, %v12162_v29  ;;  %v18869_v42 = vpop.f32.mrf.mxu2 }
 0x14f   :  { %v12225_v21 = vor.u32 %v17269_v8, %v12224_v6  ;;  %v18871_v47 = vpop.f32.mrf.mxu3  ;;  %v12386_v51 = vld [vmem:[#allocation8 + $0x778] sm:$0xf0] }
 0x150   :  { %2170 = vmatpush.bf16.msrb.mxu2 %v12033_v43  ;;  %v12421_v43 = vor.u32 %v17313_v31, %v12418_v33  ;;  %v11554_v55 = vld [vmem:[#allocation8 + $0xf8] sm:$0xf0] }
 0x151   :  { %2183 = vmatpush.bf16.msrb.mxu3 %v12289_v49  ;;  %2146 = vmatpush.bf16.msrb.mxu0 %v11457_v54  ;;  %v11589_v49 = vor.u32 %v17105_v35, %v11586_v36  ;;  %v17097_v54 = vld [vmem:[#allocation8 + $0xdc] sm:$0xf]  ;;  %v18875_v59 = vpop.f32.mrf.mxu0 }
 0x152   :  { %2159 = vmatpush.bf16.msrb.mxu1 %v11713_v57  ;;  %v17161_v57 = vld [vmem:[#allocation8 + $0x2dc] sm:$0xf]  ;;  %v11557_v1 = vor.u32 %v17097_v54, %v11554_v55 }
 0x153   :  { %v12354_v3 = vld [vmem:[#allocation8 + $0x738] sm:$0xf0] }
 0x154   :  { %2171 = vmatpush.bf16.msrb.mxu2 %v12001_v62  ;;  %2147 = vmatmul.bf16.vlgmr.msrb.gmra.mxu0 %v18822_v41  ;;  %v17233_v62 = vld [vmem:[#allocation8 + $0x51c] sm:$0xf]  ;;  %v18877_v0 = vpop.f32.mrf.mxu1 }
 0x155   :  { %2191 = vmatpush.bf16.msra.mxu0 %v11685_v58  ;;  %2184 = vmatpush.bf16.msrb.mxu3 %v12257_v2  ;;  %v11810_v58 = vld [vmem:[#allocation8 + $0x2f8] sm:$0xf0]  ;;  %v12101_v8 = vor.u32 %v17233_v62, %v12098_v63 }
 0x156   :  { %2204 = vmatpush.bf16.msra.mxu1 %v11941_v61  ;;  %v12389_v61 = vor.u32 %v17305_v50, %v12386_v51  ;;  %v17297_v2 = vld [vmem:[#allocation8 + $0x71c] sm:$0xf]  ;;  %v11813_v5 = vor.u32 %v17161_v57, %v11810_v58  ;;  %v1916_v12 = vpop.f32.mrf.mxu2  ;;  %v13416_v50 = vld [vmem:[#allocation11 + $0x780] sm:$0xf] }
 0x157   :  { %2160 = vmatmul.bf16.vlgmr.msrb.gmra.mxu1 %v18824_v46  ;;  %v17089_v6 = vld [vmem:[#allocation8 + $0x9c] sm:$0xf] }
 0x158   :  { %2172 = vmatpush.bf16.msrb.mxu2 %v11969_v17  ;;  %v11522_v7 = vld [vmem:[#allocation8 + $0xb8] sm:$0xf0] }
 0x159   :  { %2192 = vmatpush.bf16.msra.mxu0 %v11653_v13  ;;  %2185 = vmatpush.bf16.msrb.mxu3 %v12225_v21  ;;  %v17153_v9 = vld [vmem:[#allocation8 + $0x29c] sm:$0xf]  ;;  %v12357_v13 = vor.u32 %v17297_v2, %v12354_v3  ;;  %v11525_v17 = vor.u32 %v17089_v6, %v11522_v7  ;;  %v12840_v2 = vld [vmem:[#allocation11 + $0x300] sm:$0xf] }
 0x15a   :  { %2205 = vmatpush.bf16.msra.mxu1 %v11909_v16  ;;  %v11778_v11 = vld [vmem:[#allocation8 + $0x2b8] sm:$0xf0]  ;;  %v1929_v16 = vpop.f32.mrf.mxu3  ;;  %v17430_v6 = vld [vmem:[#allocation11 + $0x33c] sm:$0xf0] }
 0x15b   :  { %2173 = vmatmul.bf16.vlgmr.msrb.gmra.mxu2 %v18828_v4  ;;  %v17225_v14 = vld [vmem:[#allocation8 + $0x4dc] sm:$0xf]  ;;  %v11781_v20 = vor.u32 %v17153_v9, %v11778_v11  ;;  %v13352_v7 = vld [vmem:[#allocation11 + $0x700] sm:$0xf] }
 0x15c   :  { %2217 = vmatpush.bf16.msra.mxu2 %v12197_v22  ;;  %2186 = vmatmul.bf16.vlgmr.msrb.gmra.mxu3 %v18830_v10  ;;  %v12066_v15 = vld [vmem:[#allocation8 + $0x4f8] sm:$0xf0]  ;;  %v1955_v31 = vpop.f32.mrf.mxu1  ;;  %v17702_v16 = vld [vmem:[#allocation11 + $0xbbc] sm:$0xf0] }
 0x15d   :  { %2230 = vmatpush.bf16.msra.mxu3 %v12453_v26  ;;  %2193 = vmatpush.bf16.msra.mxu0 %v11621_v30  ;;  %v17289_v18 = vld [vmem:[#allocation8 + $0x6dc] sm:$0xf]  ;;  %v12069_v23 = vor.u32 %v17225_v14, %v12066_v15  ;;  %v1942_v26 = vpop.f32.mrf.mxu0  ;;  %v13928_v15 = vld [vmem:[#allocation11 + $0xb80] sm:$0xf] }
 0x15e   :  { %2206 = vmatpush.bf16.msra.mxu1 %v11877_v34  ;;  %v12322_v19 = vld [vmem:[#allocation8 + $0x6f8] sm:$0xf0]  ;;  %v13288_v26 = vld [vmem:[#allocation11 + $0x680] sm:$0xf] }
 0x15f   :  { %v17081_v21 = vld [vmem:[#allocation8 + $0x5c] sm:$0xf]  ;;  %v12325_v27 = vor.u32 %v17289_v18, %v12322_v19  ;;  %v14440_v18 = vld [vmem:[#allocation11 + $0xf80] sm:$0xf] }
 0x160   :  { %2218 = vmatpush.bf16.msra.mxu2 %v12165_v38  ;;  %v11490_v22 = vld [vmem:[#allocation8 + $0x78] sm:$0xf0]  ;;  %v17830_v19 = vld [vmem:[#allocation11 + $0xfbc] sm:$0xf0] }
 0x161   :  { %2231 = vmatpush.bf16.msra.mxu3 %v12421_v43  ;;  %2194 = vmatpush.bf16.msra.mxu0 %v11589_v49  ;;  %v17145_v24 = vld [vmem:[#allocation8 + $0x25c] sm:$0xf]  ;;  %v11493_v33 = vor.u32 %v17081_v21, %v11490_v22  ;;  %v17446_v49 = vld [vmem:[#allocation11 + $0x3bc] sm:$0xf0]  ;;  %v14441_v31 = vor.u32 %v17830_v19, %v14440_v18 }
 0x162   :  { %2207 = vmatpush.bf16.msra.mxu1 %v11845_v52  ;;  %v11746_v25 = vld [vmem:[#allocation8 + $0x278] sm:$0xf0]  ;;  %v17574_v52 = vld [vmem:[#allocation11 + $0x7bc] sm:$0xf0]  ;;  %v18881_v57 = vpop.f32.mrf.mxu3 }
 0x163   :  { %v17217_v29 = vld [vmem:[#allocation8 + $0x49c] sm:$0xf]  ;;  %v11749_v38 = vor.u32 %v17145_v24, %v11746_v25  ;;  %v13417_v3 = vor.u32 %v17574_v52, %v13416_v50  ;;  %v12776_v22 = vld [vmem:[#allocation11 + $0x280] sm:$0xf]  ;;  %v13929_v25 = vor.u32 %v17702_v16, %v13928_v15  ;;  %v534_v16 = vperm.slane %v18850_v28, 3 }
 0x164   :  { %2219 = vmatpush.bf16.msra.mxu2 %v12133_v56  ;;  %v12034_v30 = vld [vmem:[#allocation8 + $0x4b8] sm:$0xf0]  ;;  %v18879_v56 = vpop.f32.mrf.mxu2  ;;  %v13800_v50 = vld [vmem:[#allocation11 + $0xa80] sm:$0xf] }
 0x165   :  { %2232 = vmatpush.bf16.msra.mxu3 %v12389_v61  ;;  %2195 = vmatpush.bf16.msra.mxu0 %v11557_v1  ;;  %v17281_v34 = vld [vmem:[#allocation8 + $0x69c] sm:$0xf]  ;;  %v12037_v44 = vor.u32 %v17217_v29, %v12034_v30  ;;  %v12905_v1 = vor.u32 %v17446_v49, %v12904_v45  ;;  %v17526_v45 = vld [vmem:[#allocation11 + $0x63c] sm:$0xf0] }
 0x166   :  { %2208 = vmatpush.bf16.msra.mxu1 %v11813_v5  ;;  %v12290_v35 = vld [vmem:[#allocation8 + $0x6b8] sm:$0xf0]  ;;  %v17366_v15 = vld [vmem:[#allocation11 + $0x13c] sm:$0xf0] }
 0x167   :  { %v17073_v36 = vld [vmem:[#allocation8 + $0x1c] sm:$0xf]  ;;  %v12293_v51 = vor.u32 %v17281_v34, %v12290_v35  ;;  %v17686_v34 = vld [vmem:[#allocation11 + $0xb3c] sm:$0xf0] }
 0x168   :  { %2220 = vmatpush.bf16.msra.mxu2 %v12101_v8  ;;  %v11458_v39 = vld [vmem:[#allocation8 + $0x38] sm:$0xf0]  ;;  %v17558_v8 = vld [vmem:[#allocation11 + $0x73c] sm:$0xf0] }
 0x169   :  { %2233 = vmatpush.bf16.msra.mxu3 %v12357_v13  ;;  %2196 = vmatpush.bf16.msra.mxu0 %v11525_v17  ;;  %v17137_v40 = vld [vmem:[#allocation8 + $0x21c] sm:$0xf]  ;;  %v11461_v58 = vor.u32 %v17073_v36, %v11458_v39  ;;  %v12841_v17 = vor.u32 %v17430_v6, %v12840_v2  ;;  %v14376_v36 = vld [vmem:[#allocation11 + $0xf00] sm:$0xf] }
 0x16a   :  { %2209 = vmatpush.bf16.msra.mxu1 %v11781_v20  ;;  %v11714_v43 = vld [vmem:[#allocation8 + $0x238] sm:$0xf0]  ;;  %v13353_v20 = vor.u32 %v17558_v8, %v13352_v7  ;;  %v1981_v30 = vpop.f32.mrf.mxu3  ;;  %v17510_v2 = vld [vmem:[#allocation11 + $0x5bc] sm:$0xf0] }
 0x16b   :  { %v17209_v54 = vld [vmem:[#allocation8 + $0x45c] sm:$0xf]  ;;  %v11717_v63 = vor.u32 %v17137_v40, %v11714_v43  ;;  %v12712_v40 = vld [vmem:[#allocation11 + $0x200] sm:$0xf] }
 0x16c   :  { %2221 = vmatpush.bf16.msra.mxu2 %v12069_v23  ;;  %v12002_v55 = vld [vmem:[#allocation8 + $0x478] sm:$0xf0]  ;;  %v17414_v23 = vld [vmem:[#allocation11 + $0x2bc] sm:$0xf0]  ;;  %v1968_v29 = vpop.f32.mrf.mxu2 }
 0x16d   :  { %2234 = vmatpush.bf16.msra.mxu3 %v12325_v27  ;;  %2197 = vmatpush.bf16.msra.mxu0 %v11493_v33  ;;  %v17273_v61 = vld [vmem:[#allocation8 + $0x65c] sm:$0xf]  ;;  %v12005_v5 = vor.u32 %v17209_v54, %v12002_v55  ;;  %v17542_v27 = vld [vmem:[#allocation11 + $0x6bc] sm:$0xf0]  ;;  %v12777_v35 = vor.u32 %v17414_v23, %v12776_v22 }
 0x16e   :  { %v12258_v62 = vld [vmem:[#allocation8 + $0x678] sm:$0xf0]  ;;  %2210 = vmatpush.bf16.msra.mxu1 %v11749_v38  ;;  %v13864_v33 = vld [vmem:[#allocation11 + $0xb00] sm:$0xf]  ;;  %v13289_v39 = vor.u32 %v17542_v27, %v13288_v26  ;;  %v1863_v26 = vadd.f32 %v18859_v32, %v18857_v60 }
 0x16f   :  { %v12261_v9 = vor.u32 %v17273_v61, %v12258_v62  ;;  %v17201_v11 = vld [vmem:[#allocation8 + $0x41c] sm:$0xf]  ;;  %v17814_v38 = vld [vmem:[#allocation11 + $0xf3c] sm:$0xf0]  ;;  %v13865_v43 = vor.u32 %v17686_v34, %v13864_v33 }
 0x170   :  { %2222 = vmatpush.bf16.msra.mxu2 %v12037_v44  ;;  %v11970_v12 = vld [vmem:[#allocation8 + $0x438] sm:$0xf0]  ;;  %v13224_v44 = vld [vmem:[#allocation11 + $0x600] sm:$0xf]  ;;  %v14377_v49 = vor.u32 %v17814_v38, %v14376_v36 }
 0x171   :  { %2235 = vmatpush.bf16.msra.mxu3 %v12293_v51  ;;  %v17265_v13 = vld [vmem:[#allocation8 + $0x61c] sm:$0xf]  ;;  %2198 = vmatpush.bf16.msra.mxu0 %v11461_v58  ;;  %v11973_v21 = vor.u32 %v17201_v11, %v11970_v12  ;;  %v17670_v51 = vld [vmem:[#allocation11 + $0xabc] sm:$0xf0]  ;;  %v13225_v58 = vor.u32 %v17526_v45, %v13224_v44  ;;  %v533_v12 = vperm.slane %v18850_v28, 2  ;;  %v1876_v44 = vadd.f32 %v18861_v37, %v1863_v26 }
 0x172   :  { %v12226_v14 = vld [vmem:[#allocation8 + $0x638] sm:$0xf0]  ;;  %2211 = vmatpush.bf16.msra.mxu1 %v11717_v63  ;;  %v14312_v54 = vld [vmem:[#allocation11 + $0xe80] sm:$0xf]  ;;  %v13801_v63 = vor.u32 %v17670_v51, %v13800_v50 }
 0x173   :  { %v12229_v24 = vor.u32 %v17265_v13, %v12226_v14  ;;  %v17798_v55 = vld [vmem:[#allocation11 + $0xebc] sm:$0xf0]  ;;  %v1941_v29 = vadd.f32 %v18875_v59, %v533_v12 }
 0x174   :  { %2223 = vmatpush.bf16.msra.mxu2 %v12005_v5  ;;  %2199 = vmatmul.bf16.vlgmr.msra.gmra.mxu0 %v18822_v41  ;;  %v17398_v41 = vld [vmem:[#allocation11 + $0x23c] sm:$0xf0]  ;;  %v1992_v5 = vpop.f32.mrf.mxu0  ;;  %v14313_v6 = vor.u32 %v17798_v55, %v14312_v54  ;;  %v2005_v8 = vpop.f32.mrf.mxu1 }
 0x175   :  { %8439 = vmatpush.bf16.msrb.mxu0 %v12905_v1  ;;  %2236 = vmatpush.bf16.msra.mxu3 %v12261_v9  ;;  %v12713_v52 = vor.u32 %v17398_v41, %v12712_v40  ;;  %v12648_v61 = vld [vmem:[#allocation11 + $0x180] sm:$0xf] }
 0x176   :  { %8452 = vmatpush.bf16.msrb.mxu1 %v13417_v3  ;;  %v17382_v62 = vld [vmem:[#allocation11 + $0x1bc] sm:$0xf0] }
 0x177   :  { %2212 = vmatmul.bf16.vlgmr.msra.gmra.mxu1 %v18824_v46  ;;  %v532_v46 = vperm.slane %v18850_v28, 1  ;;  %v13160_v1 = vld [vmem:[#allocation11 + $0x580] sm:$0xf]  ;;  %v12649_v9 = vor.u32 %v17382_v62, %v12648_v61 }
 0x178   :  { %2224 = vmatpush.bf16.msra.mxu2 %v11973_v21  ;;  %v17654_v7 = vld [vmem:[#allocation11 + $0xa3c] sm:$0xf0]  ;;  %v13161_v13 = vor.u32 %v17510_v2, %v13160_v1 }
 0x179   :  { %8440 = vmatpush.bf16.msrb.mxu0 %v12841_v17  ;;  %2237 = vmatpush.bf16.msra.mxu3 %v12229_v24  ;;  %v1889_v3 = vadd.f32 %v18863_v48, %v532_v46  ;;  %v14248_v11 = vld [vmem:[#allocation11 + $0xe00] sm:$0xf]  ;;  %v1954_v46 = vadd.f32 %v18877_v0, %v1941_v29 }
 0x17a   :  { %8453 = vmatpush.bf16.msrb.mxu1 %v13353_v20  ;;  %v12584_v14 = vld [vmem:[#allocation11 + $0x100] sm:$0xf] }
 0x17b   :  { %2225 = vmatmul.bf16.vlgmr.msra.gmra.mxu2 %v18828_v4  ;;  %v13736_v4 = vld [vmem:[#allocation11 + $0xa00] sm:$0xf]  ;;  %v1902_v19 = vadd.f32 %v18865_v53, %v1889_v3  ;;  %v12585_v23 = vor.u32 %v17366_v15, %v12584_v14  ;;  %v1993_v53 = vadd.f32 %v1992_v5, %v534_v16 }
 0x17c   :  { %8465 = vmatpush.bf16.msrb.mxu2 %v13929_v25  ;;  %2238 = vmatmul.bf16.vlgmr.msra.gmra.mxu3 %v18830_v10  ;;  %v17782_v10 = vld [vmem:[#allocation11 + $0xe3c] sm:$0xf0]  ;;  %v13737_v48 = vor.u32 %v17654_v7, %v13736_v4  ;;  %v1994_v38 = vpop.f32.mrf.mxu0 }
 0x17d   :  { %8478 = vmatpush.bf16.msrb.mxu3 %v14441_v31  ;;  %8441 = vmatpush.bf16.msrb.mxu0 %v12777_v35  ;;  %v13096_v17 = vld [vmem:[#allocation11 + $0x500] sm:$0xf]  ;;  %v14249_v20 = vor.u32 %v17782_v10, %v14248_v11  ;;  %v1915_v27 = vadd.f32 %v18869_v42, %v1902_v19  ;;  %v2006_v54 = vadd.f32 %v2005_v8, %v1993_v53  ;;  %v2243_v8 = vmax.f32 %v1876_v44, 0.0 }
 0x17e   :  { %8454 = vmatpush.bf16.msrb.mxu1 %v13289_v39  ;;  %v17494_v18 = vld [vmem:[#allocation11 + $0x53c] sm:$0xf0]  ;;  %v2018_v1 = vpop.f32.mrf.mxu2 }
 0x17f   :  { %v13672_v21 = vld [vmem:[#allocation11 + $0x980] sm:$0xf]  ;;  %v13097_v30 = vor.u32 %v17494_v18, %v13096_v17  ;;  %v1928_v45 = vadd.f32 %v18871_v47, %v1915_v27  ;;  %v2019_v0 = vadd.f32 %v2018_v1, %v2006_v54  ;;  %v2031_v5 = vpop.f32.mrf.mxu3 }
 0x180   :  { %8466 = vmatpush.bf16.msrb.mxu2 %v13865_v43  ;;  %v17638_v22 = vld [vmem:[#allocation11 + $0x9bc] sm:$0xf0]  ;;  %v2007_v43 = vpop.f32.mrf.mxu1 }
 0x181   :  { %8479 = vmatpush.bf16.msrb.mxu3 %v14377_v49  ;;  %8442 = vmatpush.bf16.msrb.mxu0 %v12713_v52  ;;  %v14184_v24 = vld [vmem:[#allocation11 + $0xd80] sm:$0xf]  ;;  %v13673_v34 = vor.u32 %v17638_v22, %v13672_v21  ;;  %v2032_v21 = vadd.f32 %v2031_v5, %v2019_v0 }
 0x182   :  { %8455 = vmatpush.bf16.msrb.mxu1 %v13225_v58  ;;  %v17766_v25 = vld [vmem:[#allocation11 + $0xdbc] sm:$0xf0] }
 0x183   :  { %v12520_v31 = vld [vmem:[#allocation11 + $0x80] sm:$0xf]  ;;  %v14185_v39 = vor.u32 %v17766_v25, %v14184_v24  ;;  %v18901_v25 = vpack.c.bf16 %v2243_v8, %v2243_v8 }
 0x184   :  { %8467 = vmatpush.bf16.msrb.mxu2 %v13801_v63  ;;  %v17350_v33 = vld [vmem:[#allocation11 + $0xbc] sm:$0xf0]  ;;  %v1967_v63 = vadd.f32 %v18879_v56, %v1954_v46 }
 0x185   :  { %8480 = vmatpush.bf16.msrb.mxu3 %v14313_v6  ;;  %8443 = vmatpush.bf16.msrb.mxu0 %v12649_v9  ;;  %v13032_v35 = vld [vmem:[#allocation11 + $0x480] sm:$0xf]  ;;  %v12521_v60 = vor.u32 %v17350_v33, %v12520_v31  ;;  %v2244_v9 = vmax.f32 %v1928_v45, 0.0 }
 0x186   :  { %8456 = vmatpush.bf16.msrb.mxu1 %v13161_v13  ;;  %v17478_v36 = vld [vmem:[#allocation11 + $0x4bc] sm:$0xf0]  ;;  %v2020_v53 = vpop.f32.mrf.mxu2 }
 0x187   :  { %v13608_v40 = vld [vmem:[#allocation11 + $0x900] sm:$0xf]  ;;  %v13033_v49 = vor.u32 %v17478_v36, %v13032_v35  ;;  %v18903_v27 = vpack.c.bf16 %v2244_v9, %v2244_v9  ;;  %v17566_v53 = vld [vmem:[#allocation11 + $0x784] sm:$0xf] }
 0x188   :  { %8468 = vmatpush.bf16.msrb.mxu2 %v13737_v48  ;;  %v17622_v41 = vld [vmem:[#allocation11 + $0x93c] sm:$0xf0]  ;;  %v1980_v48 = vadd.f32 %v18881_v57, %v1967_v63 }
 0x189   :  { %8481 = vmatpush.bf16.msrb.mxu3 %v14249_v20  ;;  %8444 = vmatpush.bf16.msrb.mxu0 %v12585_v23  ;;  %v14120_v32 = vld [vmem:[#allocation11 + $0xd00] sm:$0xf]  ;;  %v13609_v55 = vor.u32 %v17622_v41, %v13608_v40  ;;  %v2033_v40 = vpop.f32.mrf.mxu3 }
 0x18a   :  { %v17750_v42 = vld [vmem:[#allocation11 + $0xd3c] sm:$0xf0]  ;;  %8457 = vmatpush.bf16.msrb.mxu1 %v13097_v30  ;;  %v2245_v33 = vmax.f32 %v1980_v48, 0.0 }
 0x18b   :  { %v12456_v59 = vld [vmem:[#allocation11] sm:$0xf]  ;;  %v14121_v37 = vor.u32 %v17750_v42, %v14120_v32 }
 0x18c   :  { %v17334_v50 = vld [vmem:[#allocation11 + $0x3c] sm:$0xf0]  ;;  %8469 = vmatpush.bf16.msrb.mxu2 %v13673_v34  ;;  %v18907_v44 = vpack.c.bf16 %v2245_v33, %v2245_v33 }
 0x18d   :  { %v12968_v51 = vld [vmem:[#allocation11 + $0x400] sm:$0xf]  ;;  %8482 = vmatpush.bf16.msrb.mxu3 %v14185_v39  ;;  %8445 = vmatpush.bf16.msrb.mxu0 %v12521_v60  ;;  %v12457_v6 = vor.u32 %v17334_v50, %v12456_v59  ;;  %v2246_v39 = vmax.f32 %v2032_v21, 0.0 }
 0x18e   :  { %v17462_v52 = vld [vmem:[#allocation11 + $0x43c] sm:$0xf0]  ;;  %8458 = vmatpush.bf16.msrb.mxu1 %v13033_v49 }
 0x18f   :  { %v14952_v58 = vld [vmem:[#allocation11 + $0x1380] sm:$0xf]  ;;  %v12969_v11 = vor.u32 %v17462_v52, %v12968_v51  ;;  %v18909_v50 = vpack.c.bf16 %v2246_v39, %v2246_v39 }
 0x190   :  { %v17958_v61 = vld [vmem:[#allocation11 + $0x13bc] sm:$0xf0]  ;;  %8470 = vmatpush.bf16.msrb.mxu2 %v13609_v55 }
 0x191   :  { %v13544_v62 = vld [vmem:[#allocation11 + $0x880] sm:$0xf]  ;;  %v14953_v10 = vor.u32 %v17958_v61, %v14952_v58  ;;  %8483 = vmatpush.bf16.msrb.mxu3 %v14121_v37  ;;  %8446 = vmatpush.bf16.msrb.mxu0 %v12457_v6  ;;  %v2044_v37 = vpop.f32.mrf.mxu0 }
 0x192   :  { %v17606_v2 = vld [vmem:[#allocation11 + $0x8bc] sm:$0xf0]  ;;  %8459 = vmatpush.bf16.msrb.mxu1 %v12969_v11 }
 0x193   :  { %v15464_v47 = vld [vmem:[#allocation11 + $0x1780] sm:$0xf]  ;;  %v13545_v56 = vor.u32 %v17606_v2, %v13544_v62 }
 0x194   :  { %v18086_v3 = vld [vmem:[#allocation11 + $0x17bc] sm:$0xf0]  ;;  %8447 = vmatmul.bf16.vlgmr.msrb.gmra.mxu0 %v18901_v25 }
 0x195   :  { %v14056_v4 = vld [vmem:[#allocation11 + $0xc80] sm:$0xf]  ;;  %v15465_v13 = vor.u32 %v18086_v3, %v15464_v47  ;;  %8491 = vmatpush.bf16.msra.mxu0 %v14953_v10  ;;  %8471 = vmatpush.bf16.msrb.mxu2 %v13545_v56  ;;  %v2057_v3 = vpop.f32.mrf.mxu1 }
 0x196   :  { %v17734_v7 = vld [vmem:[#allocation11 + $0xcbc] sm:$0xf0]  ;;  %8460 = vmatmul.bf16.vlgmr.msrb.gmra.mxu1 %v18903_v27 }
 0x197   :  { %v14888_v12 = vld [vmem:[#allocation11 + $0x1300] sm:$0xf]  ;;  %v14057_v17 = vor.u32 %v17734_v7, %v14056_v4  ;;  %8504 = vmatpush.bf16.msra.mxu1 %v15465_v13  ;;  %v535_v7 = vperm.slane %v18850_v28, 4 }
 0x198   :  { %v17942_v14 = vld [vmem:[#allocation11 + $0x133c] sm:$0xf0] }
 0x199   :  { %v13480_v15 = vld [vmem:[#allocation11 + $0x800] sm:$0xf]  ;;  %v14889_v26 = vor.u32 %v17942_v14, %v14888_v12  ;;  %8484 = vmatpush.bf16.msrb.mxu3 %v14057_v17 }
 0x19a   :  { %v17590_v16 = vld [vmem:[#allocation11 + $0x83c] sm:$0xf0] }
 0x19b   :  { %v13992_v18 = vld [vmem:[#allocation11 + $0xc00] sm:$0xf]  ;;  %v13481_v57 = vor.u32 %v17590_v16, %v13480_v15  ;;  %8492 = vmatpush.bf16.msra.mxu0 %v14889_v26  ;;  %v2045_v16 = vadd.f32 %v2044_v37, %v535_v7  ;;  %v13930_v37 = vld [vmem:[#allocation11 + $0xbc0] sm:$0xf0] }
 0x19c   :  { %v15400_v19 = vld [vmem:[#allocation11 + $0x1700] sm:$0xf] }
 0x19d   :  { %v18070_v20 = vld [vmem:[#allocation11 + $0x173c] sm:$0xf0]  ;;  %8472 = vmatpush.bf16.msrb.mxu2 %v13481_v57  ;;  %v2059_v21 = vpop.f32.mrf.mxu1  ;;  %v17438_v57 = vld [vmem:[#allocation11 + $0x384] sm:$0xf] }
 0x19e   :  { %v17718_v22 = vld [vmem:[#allocation11 + $0xc3c] sm:$0xf0]  ;;  %v15401_v29 = vor.u32 %v18070_v20, %v15400_v19  ;;  %v2046_v19 = vpop.f32.mrf.mxu0 }
 0x19f   :  { %v15976_v23 = vld [vmem:[#allocation11 + $0x1b80] sm:$0xf]  ;;  %v13993_v34 = vor.u32 %v17718_v22, %v13992_v18  ;;  %v13226_v19 = vld [vmem:[#allocation11 + $0x640] sm:$0xf0] }
 0x1a0   :  { %v18214_v24 = vld [vmem:[#allocation11 + $0x1bbc] sm:$0xf0]  ;;  %8505 = vmatpush.bf16.msra.mxu1 %v15401_v29  ;;  %8473 = vmatmul.bf16.vlgmr.msrb.gmra.mxu2 %v18907_v44  ;;  %v12906_v29 = vld [vmem:[#allocation11 + $0x3c0] sm:$0xf0] }
 0x1a1   :  { %v14824_v30 = vld [vmem:[#allocation11 + $0x1280] sm:$0xf]  ;;  %v15977_v38 = vor.u32 %v18214_v24, %v15976_v23  ;;  %8485 = vmatpush.bf16.msrb.mxu3 %v13993_v34 }
 0x1a2   :  { %v17926_v31 = vld [vmem:[#allocation11 + $0x12bc] sm:$0xf0] }
 0x1a3   :  { %v15336_v35 = vld [vmem:[#allocation11 + $0x1680] sm:$0xf]  ;;  %v14825_v60 = vor.u32 %v17926_v31, %v14824_v30  ;;  %8517 = vmatpush.bf16.msra.mxu2 %v15977_v38  ;;  %v2058_v30 = vadd.f32 %v2057_v3, %v2045_v16 }
 0x1a4   :  { %v18054_v36 = vld [vmem:[#allocation11 + $0x16bc] sm:$0xf0]  ;;  %8486 = vmatmul.bf16.vlgmr.msrb.gmra.mxu3 %v18909_v50 }
 0x1a5   :  { %v15912_v41 = vld [vmem:[#allocation11 + $0x1b00] sm:$0xf]  ;;  %v15337_v32 = vor.u32 %v18054_v36, %v15336_v35  ;;  %8493 = vmatpush.bf16.msra.mxu0 %v14825_v60  ;;  %v2070_v35 = vpop.f32.mrf.mxu2  ;;  %v13418_v36 = vld [vmem:[#allocation11 + $0x7c0] sm:$0xf0]  ;;  %v12909_v60 = vor.u32 %v17438_v57, %v12906_v29 }
 0x1a6   :  { %v18198_v43 = vld [vmem:[#allocation11 + $0x1b3c] sm:$0xf0]  ;;  %v2071_v40 = vadd.f32 %v2070_v35, %v2058_v30  ;;  %v17374_v29 = vld [vmem:[#allocation11 + $0x184] sm:$0xf] }
 0x1a7   :  { %v14760_v42 = vld [vmem:[#allocation11 + $0x1200] sm:$0xf]  ;;  %v15913_v49 = vor.u32 %v18198_v43, %v15912_v41  ;;  %8506 = vmatpush.bf16.msra.mxu1 %v15337_v32  ;;  %v2083_v41 = vpop.f32.mrf.mxu3  ;;  %v12650_v30 = vld [vmem:[#allocation11 + $0x1c0] sm:$0xf0] }
 0x1a8   :  { %v17910_v59 = vld [vmem:[#allocation11 + $0x123c] sm:$0xf0] }
 0x1a9   :  { %v15272_v45 = vld [vmem:[#allocation11 + $0x1600] sm:$0xf]  ;;  %v14761_v54 = vor.u32 %v17910_v59, %v14760_v42  ;;  %8518 = vmatpush.bf16.msra.mxu2 %v15913_v49  ;;  %v17422_v42 = vld [vmem:[#allocation11 + $0x304] sm:$0xf] }
 0x1aa   :  { %v18038_v46 = vld [vmem:[#allocation11 + $0x163c] sm:$0xf0]  ;;  %v12842_v59 = vld [vmem:[#allocation11 + $0x340] sm:$0xf0] }
 0x1ab   :  { %v15848_v51 = vld [vmem:[#allocation11 + $0x1a80] sm:$0xf]  ;;  %v15273_v55 = vor.u32 %v18038_v46, %v15272_v45  ;;  %8494 = vmatpush.bf16.msra.mxu0 %v14761_v54  ;;  %v2084_v45 = vadd.f32 %v2083_v41, %v2071_v40  ;;  %v13421_v46 = vor.u32 %v17566_v53, %v13418_v36  ;;  %v17550_v49 = vld [vmem:[#allocation11 + $0x704] sm:$0xf]  ;;  %v18917_v41 = vld [vmem:[#allocation10] sm:$0xff] }
 0x1ac   :  { %v18182_v52 = vld [vmem:[#allocation11 + $0x1abc] sm:$0xf0]  ;;  %v13738_v40 = vld [vmem:[#allocation11 + $0xa40] sm:$0xf0] }
 0x1ad   :  { %v14696_v58 = vld [vmem:[#allocation11 + $0x1180] sm:$0xf]  ;;  %v15849_v1 = vor.u32 %v18182_v52, %v15848_v51  ;;  %8507 = vmatpush.bf16.msra.mxu1 %v15273_v55  ;;  %v13354_v51 = vld [vmem:[#allocation11 + $0x740] sm:$0xf0] }
 0x1ae   :  { %v17894_v61 = vld [vmem:[#allocation11 + $0x11bc] sm:$0xf0] }
 0x1af   :  { %v15208_v62 = vld [vmem:[#allocation11 + $0x1580] sm:$0xf]  ;;  %v14697_v0 = vor.u32 %v17894_v61, %v14696_v58  ;;  %8519 = vmatpush.bf16.msra.mxu2 %v15849_v1  ;;  %v17694_v1 = vld [vmem:[#allocation11 + $0xb84] sm:$0xf] }
 0x1b0   :  { %v18022_v63 = vld [vmem:[#allocation11 + $0x15bc] sm:$0xf0] }
 0x1b1   :  { %v15784_v2 = vld [vmem:[#allocation11 + $0x1a00] sm:$0xf]  ;;  %v15209_v5 = vor.u32 %v18022_v63, %v15208_v62  ;;  %8495 = vmatpush.bf16.msra.mxu0 %v14697_v0  ;;  %v2247_v62 = vmax.f32 %v2084_v45, 0.0  ;;  %v13357_v0 = vor.u32 %v17550_v49, %v13354_v51  ;;  %v2096_v36 = vpop.f32.mrf.mxu0  ;;  %v12586_v45 = vld [vmem:[#allocation11 + $0x140] sm:$0xf0] }
 0x1b2   :  { %v18166_v47 = vld [vmem:[#allocation11 + $0x1a3c] sm:$0xf0]  ;;  %v13098_v49 = vld [vmem:[#allocation11 + $0x540] sm:$0xf0] }
 0x1b3   :  { %v14632_v6 = vld [vmem:[#allocation11 + $0x1100] sm:$0xf]  ;;  %v15785_v11 = vor.u32 %v18166_v47, %v15784_v2  ;;  %8508 = vmatpush.bf16.msra.mxu1 %v15209_v5  ;;  %v12845_v2 = vor.u32 %v17422_v42, %v12842_v59  ;;  %v17406_v47 = vld [vmem:[#allocation11 + $0x284] sm:$0xf]  ;;  %v18914_v3 = vpack.c.bf16 %v2247_v62, %v2247_v62 }
 0x1b4   :  { %v17878_v4 = vld [vmem:[#allocation11 + $0x113c] sm:$0xf0]  ;;  %v12778_v5 = vld [vmem:[#allocation11 + $0x2c0] sm:$0xf0] }
 0x1b5   :  { %v15144_v8 = vld [vmem:[#allocation11 + $0x1500] sm:$0xf]  ;;  %v14633_v56 = vor.u32 %v17878_v4, %v14632_v6  ;;  %8520 = vmatpush.bf16.msra.mxu2 %v15785_v11  ;;  %v13290_v11 = vld [vmem:[#allocation11 + $0x6c0] sm:$0xf0] }
 0x1b6   :  { %v18006_v9 = vld [vmem:[#allocation11 + $0x153c] sm:$0xf0]  ;;  %v17358_v59 = vld [vmem:[#allocation11 + $0x104] sm:$0xf] }
 0x1b7   :  { %v15720_v10 = vld [vmem:[#allocation11 + $0x1980] sm:$0xf]  ;;  %v15145_v13 = vor.u32 %v18006_v9, %v15144_v8  ;;  %8496 = vmatpush.bf16.msra.mxu0 %v14633_v56  ;;  %v2072_v8 = vpop.f32.mrf.mxu2  ;;  %v17534_v9 = vld [vmem:[#allocation11 + $0x684] sm:$0xf]  ;;  %v2085_v56 = vpop.f32.mrf.mxu3  ;;  %v12589_v62 = vor.u32 %v17358_v59, %v12586_v45 }
 0x1b8   :  { %v18150_v12 = vld [vmem:[#allocation11 + $0x19bc] sm:$0xf0]  ;;  %v13293_v16 = vor.u32 %v17534_v9, %v13290_v11  ;;  %v17614_v9 = vld [vmem:[#allocation11 + $0x904] sm:$0xf] }
 0x1b9   :  { %v14568_v14 = vld [vmem:[#allocation11 + $0x1080] sm:$0xf]  ;;  %v15721_v18 = vor.u32 %v18150_v12, %v15720_v10  ;;  %8509 = vmatpush.bf16.msra.mxu1 %v15145_v13  ;;  %v13933_v10 = vor.u32 %v17694_v1, %v13930_v37  ;;  %v17678_v13 = vld [vmem:[#allocation11 + $0xb04] sm:$0xf] }
 0x1ba   :  { %v17862_v15 = vld [vmem:[#allocation11 + $0x10bc] sm:$0xf0]  ;;  %v17342_v1 = vld [vmem:[#allocation11 + $0x84] sm:$0xf] }
 0x1bb   :  { %v15080_v48 = vld [vmem:[#allocation11 + $0x1480] sm:$0xf]  ;;  %v14569_v22 = vor.u32 %v17862_v15, %v14568_v14  ;;  %8521 = vmatpush.bf16.msra.mxu2 %v15721_v18  ;;  %v13866_v14 = vld [vmem:[#allocation11 + $0xb40] sm:$0xf0]  ;;  %v12781_v15 = vor.u32 %v17406_v47, %v12778_v5 }
 0x1bc   :  { %v17990_v17 = vld [vmem:[#allocation11 + $0x14bc] sm:$0xf0]  ;;  %v17518_v18 = vld [vmem:[#allocation11 + $0x604] sm:$0xf] }
 0x1bd   :  { %v15656_v20 = vld [vmem:[#allocation11 + $0x1900] sm:$0xf]  ;;  %v15081_v24 = vor.u32 %v17990_v17, %v15080_v48  ;;  %8497 = vmatpush.bf16.msra.mxu0 %v14569_v22  ;;  %v17390_v48 = vld [vmem:[#allocation11 + $0x204] sm:$0xf]  ;;  %v13229_v57 = vor.u32 %v17518_v18, %v13226_v19 }
 0x1be   :  { %v18134_v28 = vld [vmem:[#allocation11 + $0x193c] sm:$0xf0]  ;;  %v12714_v17 = vld [vmem:[#allocation11 + $0x240] sm:$0xf0] }
 0x1bf   :  { %v14504_v23 = vld [vmem:[#allocation11 + $0x1000] sm:$0xf]  ;;  %v15657_v34 = vor.u32 %v18134_v28, %v15656_v20  ;;  %8510 = vmatpush.bf16.msra.mxu1 %v15081_v24  ;;  %v13869_v20 = vor.u32 %v17678_v13, %v13866_v14  ;;  %v13802_v24 = vld [vmem:[#allocation11 + $0xac0] sm:$0xf0] }
 0x1c0   :  { %v17846_v26 = vld [vmem:[#allocation11 + $0x103c] sm:$0xf0]  ;;  %v12522_v37 = vld [vmem:[#allocation11 + $0xc0] sm:$0xf0] }
 0x1c1   :  { %v15016_v31 = vld [vmem:[#allocation11 + $0x1400] sm:$0xf]  ;;  %v14505_v43 = vor.u32 %v17846_v26, %v14504_v23  ;;  %8522 = vmatpush.bf16.msra.mxu2 %v15657_v34  ;;  %v17662_v23 = vld [vmem:[#allocation11 + $0xa84] sm:$0xf]  ;;  %v12717_v26 = vor.u32 %v17390_v48, %v12714_v17 }
 0x1c2   :  { %v17974_v33 = vld [vmem:[#allocation11 + $0x143c] sm:$0xf0]  ;;  %v13805_v53 = vor.u32 %v17662_v23, %v13802_v24  ;;  %v13610_v11 = vld [vmem:[#allocation11 + $0x940] sm:$0xf0] }
 0x1c3   :  { %v15592_v38 = vld [vmem:[#allocation11 + $0x1880] sm:$0xf]  ;;  %v15017_v32 = vor.u32 %v17974_v33, %v15016_v31  ;;  %8498 = vmatpush.bf16.msra.mxu0 %v14505_v43  ;;  %v17502_v31 = vld [vmem:[#allocation11 + $0x584] sm:$0xf]  ;;  %v536_v43 = vperm.slane %v18917_v41, 5  ;;  %v13613_v19 = vor.u32 %v17614_v9, %v13610_v11 }
 0x1c4   :  { %v18118_v39 = vld [vmem:[#allocation11 + $0x18bc] sm:$0xf0]  ;;  %v13162_v33 = vld [vmem:[#allocation11 + $0x5c0] sm:$0xf0] }
 0x1c5   :  { %v15593_v52 = vor.u32 %v18118_v39, %v15592_v38  ;;  %v15528_v54 = vld [vmem:[#allocation11 + $0x1800] sm:$0xf]  ;;  %8511 = vmatpush.bf16.msra.mxu1 %v15017_v32  ;;  %v17646_v39 = vld [vmem:[#allocation11 + $0xa04] sm:$0xf]  ;;  %v12653_v32 = vor.u32 %v17374_v29, %v12650_v30  ;;  %v13165_v42 = vor.u32 %v17502_v31, %v13162_v33  ;;  %v2097_v47 = vadd.f32 %v2096_v36, %v536_v43 }
 0x1c6   :  { %v18102_v55 = vld [vmem:[#allocation11 + $0x183c] sm:$0xf0]  ;;  %8499 = vmatmul.bf16.vlgmr.msra.gmra.mxu0 %v18914_v3  ;;  %v13741_v51 = vor.u32 %v17646_v39, %v13738_v40  ;;  %v17326_v56 = vld [vmem:[#allocation11 + $0x4] sm:$0xf] }
 0x1c7   :  { %v16488_v58 = vld [vmem:[#allocation11 + $0x1f80] sm:$0xf]  ;;  %8543 = vmatpush.bf16.msrb.mxu0 %v12909_v60  ;;  %8523 = vmatpush.bf16.msra.mxu2 %v15593_v52  ;;  %v15529_v6 = vor.u32 %v18102_v55, %v15528_v54  ;;  %v2109_v60 = vpop.f32.mrf.mxu1  ;;  %v12458_v13 = vld [vmem:[#allocation11 + $0x40] sm:$0xf0] }
 0x1c8   :  { %v18342_v61 = vld [vmem:[#allocation11 + $0x1fbc] sm:$0xf0]  ;;  %v17454_v48 = vld [vmem:[#allocation11 + $0x404] sm:$0xf]  ;;  %v2110_v17 = vadd.f32 %v2109_v60, %v2097_v47  ;;  %v12461_v29 = vor.u32 %v17326_v56, %v12458_v13 }
 0x1c9   :  { %v16489_v63 = vor.u32 %v18342_v61, %v16488_v58  ;;  %8556 = vmatpush.bf16.msrb.mxu1 %v13421_v46  ;;  %v16424_v4 = vld [vmem:[#allocation11 + $0x1f00] sm:$0xf]  ;;  %v17486_v46 = vld [vmem:[#allocation11 + $0x504] sm:$0xf] }
 0x1ca   :  { %v18326_v7 = vld [vmem:[#allocation11 + $0x1f3c] sm:$0xf0]  ;;  %v17630_v58 = vld [vmem:[#allocation11 + $0x984] sm:$0xf] }
 0x1cb   :  { %8530 = vmatpush.bf16.msra.mxu3 %v16489_v63  ;;  %v16425_v12 = vor.u32 %v18326_v7, %v16424_v4  ;;  %8544 = vmatpush.bf16.msrb.mxu0 %v12845_v2  ;;  %v16360_v28 = vld [vmem:[#allocation11 + $0x1e80] sm:$0xf]  ;;  %v13674_v61 = vld [vmem:[#allocation11 + $0x9c0] sm:$0xf0]  ;;  %v13101_v63 = vor.u32 %v17486_v46, %v13098_v49  ;;  %v2098_v7 = vpop.f32.mrf.mxu0 }
 0x1cc   :  { %8524 = vmatpush.bf16.msra.mxu2 %v15529_v6  ;;  %v18310_v21 = vld [vmem:[#allocation11 + $0x1ebc] sm:$0xf0]  ;;  %v17470_v2 = vld [vmem:[#allocation11 + $0x484] sm:$0xf]  ;;  %v13677_v5 = vor.u32 %v17630_v58, %v13674_v61 }
 0x1cd   :  { %8557 = vmatpush.bf16.msrb.mxu1 %v13357_v0  ;;  %v16361_v22 = vor.u32 %v18310_v21, %v16360_v28  ;;  %v16296_v34 = vld [vmem:[#allocation11 + $0x1e00] sm:$0xf]  ;;  %v13034_v0 = vld [vmem:[#allocation11 + $0x4c0] sm:$0xf0]  ;;  %v2122_v21 = vpop.f32.mrf.mxu2 }
 0x1ce   :  { %v18294_v35 = vld [vmem:[#allocation11 + $0x1e3c] sm:$0xf0]  ;;  %v13037_v14 = vor.u32 %v17470_v2, %v13034_v0  ;;  %v12970_v18 = vld [vmem:[#allocation11 + $0x440] sm:$0xf0] }
 0x1cf   :  { %8531 = vmatpush.bf16.msra.mxu3 %v16425_v12  ;;  %8545 = vmatpush.bf16.msrb.mxu0 %v12781_v15  ;;  %v16297_v38 = vor.u32 %v18294_v35, %v16296_v34  ;;  %v16232_v52 = vld [vmem:[#allocation11 + $0x1d80] sm:$0xf]  ;;  %v12525_v12 = vor.u32 %v17342_v1, %v12522_v37  ;;  %v17950_v15 = vld [vmem:[#allocation11 + $0x1384] sm:$0xf]  ;;  %v12973_v31 = vor.u32 %v17454_v48, %v12970_v18 }
 0x1d0   :  { %8569 = vmatpush.bf16.msrb.mxu2 %v13933_v10  ;;  %v18278_v54 = vld [vmem:[#allocation11 + $0x1dbc] sm:$0xf0]  ;;  %v2111_v10 = vpop.f32.mrf.mxu1  ;;  %v17598_v23 = vld [vmem:[#allocation11 + $0x884] sm:$0xf] }
 0x1d1   :  { %8558 = vmatpush.bf16.msrb.mxu1 %v13293_v16  ;;  %v16233_v55 = vor.u32 %v18278_v54, %v16232_v52  ;;  %v16168_v6 = vld [vmem:[#allocation11 + $0x1d00] sm:$0xf]  ;;  %v14954_v16 = vld [vmem:[#allocation11 + $0x13c0] sm:$0xf0] }
 0x1d2   :  { %v18262_v4 = vld [vmem:[#allocation11 + $0x1d3c] sm:$0xf0]  ;;  %v13546_v24 = vld [vmem:[#allocation11 + $0x8c0] sm:$0xf0]  ;;  %v14957_v30 = vor.u32 %v17950_v15, %v14954_v16 }
 0x1d3   :  { %8532 = vmatpush.bf16.msra.mxu3 %v16361_v22  ;;  %8546 = vmatpush.bf16.msrb.mxu0 %v12717_v26  ;;  %v16169_v8 = vor.u32 %v18262_v4, %v16168_v6  ;;  %v18246_v28 = vld [vmem:[#allocation11 + $0x1cbc] sm:$0xf0]  ;;  %v2123_v26 = vadd.f32 %v2122_v21, %v2110_v17  ;;  %v18078_v33 = vld [vmem:[#allocation11 + $0x1784] sm:$0xf]  ;;  %v2148_v18 = vpop.f32.mrf.mxu0 }
 0x1d4   :  { %8570 = vmatpush.bf16.msrb.mxu2 %v13869_v20  ;;  %v16104_v20 = vld [vmem:[#allocation11 + $0x1c80] sm:$0xf]  ;;  %v17934_v34 = vld [vmem:[#allocation11 + $0x1304] sm:$0xf] }
 0x1d5   :  { %8559 = vmatpush.bf16.msrb.mxu1 %v13229_v57  ;;  %v16105_v22 = vor.u32 %v18246_v28, %v16104_v20  ;;  %v2135_v57 = vpop.f32.mrf.mxu3  ;;  %v14890_v36 = vld [vmem:[#allocation11 + $0x1340] sm:$0xf0]  ;;  %v16040_v39 = vld [vmem:[#allocation11 + $0x1c00] sm:$0xf] }
 0x1d6   :  { %v2136_v35 = vadd.f32 %v2135_v57, %v2123_v26  ;;  %v18230_v40 = vld [vmem:[#allocation11 + $0x1c3c] sm:$0xf0]  ;;  %v17582_v60 = vld [vmem:[#allocation11 + $0x804] sm:$0xf]  ;;  %v14893_v49 = vor.u32 %v17934_v34, %v14890_v36  ;;  %v537_v57 = vperm.slane %v18917_v41, 6 }
 0x1d7   :  { %8533 = vmatpush.bf16.msra.mxu3 %v16297_v38  ;;  %8547 = vmatpush.bf16.msrb.mxu0 %v12653_v32  ;;  %v13549_v38 = vor.u32 %v17598_v23, %v13546_v24  ;;  %v16041_v43 = vor.u32 %v18230_v40, %v16040_v39  ;;  %v13482_v32 = vld [vmem:[#allocation11 + $0x840] sm:$0xf0] }
 0x1d8   :  { %8571 = vmatpush.bf16.msrb.mxu2 %v13805_v53  ;;  %v15466_v53 = vld [vmem:[#allocation11 + $0x17c0] sm:$0xf0]  ;;  %v2161_v20 = vpop.f32.mrf.mxu1  ;;  %v2149_v39 = vadd.f32 %v2148_v18, %v537_v57  ;;  %v12784_v57 = vld [vmem:[#allocation11 + $0x288] sm:$0xf] }
 0x1d9   :  { %8560 = vmatpush.bf16.msrb.mxu1 %v13165_v42  ;;  %v2248_v42 = vmax.f32 %v2136_v35, 0.0  ;;  %v17822_v59 = vld [vmem:[#allocation11 + $0xf84] sm:$0xf]  ;;  %v15469_v46 = vor.u32 %v18078_v33, %v15466_v53 }
 0x1da   :  { %v14442_v45 = vld [vmem:[#allocation11 + $0xfc0] sm:$0xf0] }
 0x1db   :  { %8534 = vmatpush.bf16.msra.mxu3 %v16233_v55  ;;  %8548 = vmatpush.bf16.msrb.mxu0 %v12589_v62  ;;  %v14445_v52 = vor.u32 %v17822_v59, %v14442_v45  ;;  %v18920_v54 = vpack.c.bf16 %v2248_v42, %v2248_v42  ;;  %v15402_v55 = vld [vmem:[#allocation11 + $0x1740] sm:$0xf0]  ;;  %v13485_v62 = vor.u32 %v17582_v60, %v13482_v32  ;;  %v2150_v60 = vpop.f32.mrf.mxu0 }
 0x1dc   :  { %8572 = vmatpush.bf16.msrb.mxu2 %v13741_v51  ;;  %v18062_v51 = vld [vmem:[#allocation11 + $0x1704] sm:$0xf] }
 0x1dd   :  { %8561 = vmatpush.bf16.msrb.mxu1 %v13101_v63  ;;  %v17918_v58 = vld [vmem:[#allocation11 + $0x1284] sm:$0xf]  ;;  %v2124_v63 = vpop.f32.mrf.mxu2  ;;  %v2137_v2 = vpop.f32.mrf.mxu3  ;;  %v15405_v0 = vor.u32 %v18062_v51, %v15402_v55  ;;  %v12912_v55 = vld [vmem:[#allocation11 + $0x388] sm:$0xf] }
 0x1de   :  { %v14826_v61 = vld [vmem:[#allocation11 + $0x12c0] sm:$0xf0]  ;;  %8512 = vmatmul.bf16.vlgmr.msra.gmra.mxu1 %v18920_v54 }
 0x1df   :  { %8535 = vmatpush.bf16.msra.mxu3 %v16169_v8  ;;  %8549 = vmatpush.bf16.msrb.mxu0 %v12525_v12  ;;  %v17806_v1 = vld [vmem:[#allocation11 + $0xf04] sm:$0xf] }
 0x1e0   :  { %8573 = vmatpush.bf16.msrb.mxu2 %v13677_v5  ;;  %v14378_v37 = vld [vmem:[#allocation11 + $0xf40] sm:$0xf0]  ;;  %v14829_v5 = vor.u32 %v17918_v58, %v14826_v61  ;;  %v2163_v42 = vpop.f32.mrf.mxu1  ;;  %v2162_v58 = vadd.f32 %v2161_v20, %v2149_v39  ;;  %v17447_v61 = vld [vmem:[#allocation11 + $0x3c4] sm:$0xf0] }
 0x1e1   :  { %8562 = vmatpush.bf16.msrb.mxu1 %v13037_v14  ;;  %v14381_v47 = vor.u32 %v17806_v1, %v14378_v37  ;;  %v18046_v6 = vld [vmem:[#allocation11 + $0x1684] sm:$0xf]  ;;  %v12720_v39 = vld [vmem:[#allocation11 + $0x208] sm:$0xf] }
 0x1e2   :  { %v15338_v4 = vld [vmem:[#allocation11 + $0x16c0] sm:$0xf0] }
 0x1e3   :  { %8536 = vmatpush.bf16.msra.mxu3 %v16105_v22  ;;  %8550 = vmatpush.bf16.msrb.mxu0 %v12461_v29  ;;  %v17902_v7 = vld [vmem:[#allocation11 + $0x1204] sm:$0xf]  ;;  %v15341_v12 = vor.u32 %v18046_v6, %v15338_v4 }
 0x1e4   :  { %8574 = vmatpush.bf16.msrb.mxu2 %v13613_v19  ;;  %v14762_v8 = vld [vmem:[#allocation11 + $0x1240] sm:$0xf0] }
 0x1e5   :  { %8563 = vmatpush.bf16.msrb.mxu1 %v12973_v31  ;;  %v17790_v9 = vld [vmem:[#allocation11 + $0xe84] sm:$0xf]  ;;  %v14765_v56 = vor.u32 %v17902_v7, %v14762_v8  ;;  %v2174_v1 = vpop.f32.mrf.mxu2  ;;  %v12913_v7 = vor.u32 %v17447_v61, %v12912_v55 }
 0x1e6   :  { %8551 = vmatmul.bf16.vlgmr.msrb.gmra.mxu0 %v18901_v25  ;;  %v14314_v11 = vld [vmem:[#allocation11 + $0xec0] sm:$0xf0]  ;;  %v2175_v2 = vadd.f32 %v2174_v1, %v2162_v58 }
 0x1e7   :  { %8595 = vmatpush.bf16.msra.mxu0 %v14957_v30  ;;  %8537 = vmatpush.bf16.msra.mxu3 %v16041_v43  ;;  %v14317_v10 = vor.u32 %v17790_v9, %v14314_v11  ;;  %v18030_v13 = vld [vmem:[#allocation11 + $0x1604] sm:$0xf]  ;;  %v13424_v11 = vld [vmem:[#allocation11 + $0x788] sm:$0xf] }
 0x1e8   :  { %8575 = vmatpush.bf16.msrb.mxu2 %v13549_v38  ;;  %v15274_v14 = vld [vmem:[#allocation11 + $0x1640] sm:$0xf0] }
 0x1e9   :  { %8608 = vmatpush.bf16.msra.mxu1 %v15469_v46  ;;  %v17886_v15 = vld [vmem:[#allocation11 + $0x1184] sm:$0xf]  ;;  %v15277_v28 = vor.u32 %v18030_v13, %v15274_v14  ;;  %v12848_v14 = vld [vmem:[#allocation11 + $0x308] sm:$0xf] }
 0x1ea   :  { %v14698_v16 = vld [vmem:[#allocation11 + $0x11c0] sm:$0xf0] }
 0x1eb   :  { %8582 = vmatpush.bf16.msrb.mxu3 %v14445_v52  ;;  %8596 = vmatpush.bf16.msra.mxu0 %v14893_v49  ;;  %v17774_v48 = vld [vmem:[#allocation11 + $0xe04] sm:$0xf]  ;;  %v14701_v21 = vor.u32 %v17886_v15, %v14698_v16  ;;  %v17431_v15 = vld [vmem:[#allocation11 + $0x344] sm:$0xf0] }
 0x1ec   :  { %8576 = vmatpush.bf16.msrb.mxu2 %v13485_v62  ;;  %v14250_v17 = vld [vmem:[#allocation11 + $0xe40] sm:$0xf0] }
 0x1ed   :  { %8609 = vmatpush.bf16.msra.mxu1 %v15405_v0  ;;  %v14253_v19 = vor.u32 %v17774_v48, %v14250_v17  ;;  %v18014_v22 = vld [vmem:[#allocation11 + $0x1584] sm:$0xf] }
 0x1ee   :  { %v15210_v23 = vld [vmem:[#allocation11 + $0x15c0] sm:$0xf0]  ;;  %8564 = vmatmul.bf16.vlgmr.msrb.gmra.mxu1 %v18903_v27 }
 0x1ef   :  { %8583 = vmatpush.bf16.msrb.mxu3 %v14381_v47  ;;  %8597 = vmatpush.bf16.msra.mxu0 %v14829_v5  ;;  %v17870_v24 = vld [vmem:[#allocation11 + $0x1104] sm:$0xf]  ;;  %v15213_v33 = vor.u32 %v18014_v22, %v15210_v23  ;;  %v2187_v47 = vpop.f32.mrf.mxu3  ;;  %v13360_v23 = vld [vmem:[#allocation11 + $0x708] sm:$0xf] }
 0x1f0   :  { %v14634_v26 = vld [vmem:[#allocation11 + $0x1140] sm:$0xf0] }
 0x1f1   :  { %8610 = vmatpush.bf16.msra.mxu1 %v15341_v12  ;;  %v17758_v29 = vld [vmem:[#allocation11 + $0xd84] sm:$0xf]  ;;  %v14637_v53 = vor.u32 %v17870_v24, %v14634_v26  ;;  %v17575_v12 = vld [vmem:[#allocation11 + $0x7c4] sm:$0xf0]  ;;  %v2176_v26 = vpop.f32.mrf.mxu2 }
 0x1f2   :  { %v14186_v30 = vld [vmem:[#allocation11 + $0xdc0] sm:$0xf0]  ;;  %v17559_v24 = vld [vmem:[#allocation11 + $0x744] sm:$0xf0] }
 0x1f3   :  { %8584 = vmatpush.bf16.msrb.mxu3 %v14317_v10  ;;  %8598 = vmatpush.bf16.msra.mxu0 %v14765_v56  ;;  %v14189_v31 = vor.u32 %v17758_v29, %v14186_v30  ;;  %v17998_v34 = vld [vmem:[#allocation11 + $0x1504] sm:$0xf]  ;;  %v2188_v10 = vadd.f32 %v2187_v47, %v2175_v2  ;;  %v17415_v29 = vld [vmem:[#allocation11 + $0x2c4] sm:$0xf0]  ;;  %v538_v47 = vperm.slane %v18917_v41, 7 }
 0x1f4   :  { %v15146_v35 = vld [vmem:[#allocation11 + $0x1540] sm:$0xf0]  ;;  %v2213_v55 = vpop.f32.mrf.mxu1  ;;  %v17511_v2 = vld [vmem:[#allocation11 + $0x5c4] sm:$0xf0] }
 0x1f5   :  { %8611 = vmatpush.bf16.msra.mxu1 %v15277_v28  ;;  %v17854_v36 = vld [vmem:[#allocation11 + $0x1084] sm:$0xf]  ;;  %v15149_v59 = vor.u32 %v17998_v34, %v15146_v35  ;;  %v2249_v48 = vmax.f32 %v2188_v10, 0.0  ;;  %v12785_v34 = vor.u32 %v17415_v29, %v12784_v57  ;;  %v17495_v10 = vld [vmem:[#allocation11 + $0x544] sm:$0xf0] }
 0x1f6   :  { %v14570_v38 = vld [vmem:[#allocation11 + $0x10c0] sm:$0xf0]  ;;  %v14960_v26 = vld [vmem:[#allocation11 + $0x1388] sm:$0xf] }
 0x1f7   :  { %8585 = vmatpush.bf16.msrb.mxu3 %v14253_v19  ;;  %8599 = vmatpush.bf16.msra.mxu0 %v14701_v21  ;;  %v17742_v40 = vld [vmem:[#allocation11 + $0xd04] sm:$0xf]  ;;  %v14573_v45 = vor.u32 %v17854_v36, %v14570_v38  ;;  %v13425_v19 = vor.u32 %v17575_v12, %v13424_v11  ;;  %v18926_v28 = vpack.c.bf16 %v2249_v48, %v2249_v48  ;;  %v2189_v30 = vpop.f32.mrf.mxu3  ;;  %v13296_v36 = vld [vmem:[#allocation11 + $0x688] sm:$0xf] }
 0x1f8   :  { %v14122_v43 = vld [vmem:[#allocation11 + $0xd40] sm:$0xf0]  ;;  %v12849_v21 = vor.u32 %v17431_v15, %v12848_v14  ;;  %v17543_v38 = vld [vmem:[#allocation11 + $0x6c4] sm:$0xf0] }
 0x1f9   :  { %v14125_v32 = vor.u32 %v17742_v40, %v14122_v43  ;;  %8612 = vmatpush.bf16.msra.mxu1 %v15213_v33  ;;  %v17982_v46 = vld [vmem:[#allocation11 + $0x1484] sm:$0xf]  ;;  %8525 = vmatmul.bf16.vlgmr.msra.gmra.mxu2 %v18926_v28  ;;  %v13361_v33 = vor.u32 %v17559_v24, %v13360_v23  ;;  %v17399_v40 = vld [vmem:[#allocation11 + $0x244] sm:$0xf0]  ;;  %v13297_v60 = vor.u32 %v17543_v38, %v13296_v36 }
 0x1fa   :  { %v15082_v49 = vld [vmem:[#allocation11 + $0x14c0] sm:$0xf0]  ;;  %v12721_v42 = vor.u32 %v17399_v40, %v12720_v39  ;;  %v13104_v11 = vld [vmem:[#allocation11 + $0x508] sm:$0xf] }
 0x1fb   :  { %8586 = vmatpush.bf16.msrb.mxu3 %v14189_v31  ;;  %8600 = vmatpush.bf16.msra.mxu0 %v14637_v53  ;;  %v17838_v51 = vld [vmem:[#allocation11 + $0x1004] sm:$0xf]  ;;  %v15085_v0 = vor.u32 %v17982_v46, %v15082_v49  ;;  %v17527_v46 = vld [vmem:[#allocation11 + $0x644] sm:$0xf0] }
 0x1fc   :  { %v14506_v52 = vld [vmem:[#allocation11 + $0x1040] sm:$0xf0]  ;;  %v12656_v49 = vld [vmem:[#allocation11 + $0x188] sm:$0xf]  ;;  %v2215_v15 = vpop.f32.mrf.mxu1 }
 0x1fd   :  { %v17726_v62 = vld [vmem:[#allocation11 + $0xc84] sm:$0xf]  ;;  %8613 = vmatpush.bf16.msra.mxu1 %v15149_v59  ;;  %v14509_v5 = vor.u32 %v17838_v51, %v14506_v52  ;;  %v17383_v51 = vld [vmem:[#allocation11 + $0x1c4] sm:$0xf0]  ;;  %v2200_v52 = vpop.f32.mrf.mxu0 }
 0x1fe   :  { %v14058_v63 = vld [vmem:[#allocation11 + $0xcc0] sm:$0xf0]  ;;  %v2201_v12 = vadd.f32 %v2200_v52, %v538_v47  ;;  %v17335_v23 = vld [vmem:[#allocation11 + $0x44] sm:$0xf0]  ;;  %v2226_v24 = vpop.f32.mrf.mxu2 }
 0x1ff   :  { %8587 = vmatpush.bf16.msrb.mxu3 %v14125_v32  ;;  %v14061_v37 = vor.u32 %v17726_v62, %v14058_v63  ;;  %8601 = vmatpush.bf16.msra.mxu0 %v14573_v45  ;;  %v17966_v6 = vld [vmem:[#allocation11 + $0x1404] sm:$0xf]  ;;  %v13232_v45 = vld [vmem:[#allocation11 + $0x608] sm:$0xf]  ;;  %v12657_v63 = vor.u32 %v17383_v51, %v12656_v49  ;;  %v2239_v30 = vpop.f32.mrf.mxu3 }
 0x200   :  { %v15018_v4 = vld [vmem:[#allocation11 + $0x1440] sm:$0xf0]  ;;  %v13233_v61 = vor.u32 %v17527_v46, %v13232_v45  ;;  %v17959_v57 = vld [vmem:[#allocation11 + $0x13c4] sm:$0xf0] }
 0x201   :  { %v18206_v8 = vld [vmem:[#allocation11 + $0x1b84] sm:$0xf]  ;;  %8614 = vmatpush.bf16.msra.mxu1 %v15085_v0  ;;  %v15021_v17 = vor.u32 %v17966_v6, %v15018_v4  ;;  %v12592_v0 = vld [vmem:[#allocation11 + $0x108] sm:$0xf]  ;;  %v14961_v40 = vor.u32 %v17959_v57, %v14960_v26 }
 0x202   :  { %v15978_v9 = vld [vmem:[#allocation11 + $0x1bc0] sm:$0xf0]  ;;  %v12976_v36 = vld [vmem:[#allocation11 + $0x408] sm:$0xf] }
 0x203   :  { %8588 = vmatpush.bf16.msrb.mxu3 %v14061_v37  ;;  %v17710_v56 = vld [vmem:[#allocation11 + $0xc04] sm:$0xf]  ;;  %8602 = vmatpush.bf16.msra.mxu0 %v14509_v5  ;;  %v15981_v18 = vor.u32 %v18206_v8, %v15978_v9  ;;  %v13168_v37 = vld [vmem:[#allocation11 + $0x588] sm:$0xf] }
 0x204   :  { %v13994_v13 = vld [vmem:[#allocation11 + $0xc40] sm:$0xf0]  ;;  %v17367_v5 = vld [vmem:[#allocation11 + $0x144] sm:$0xf0]  ;;  %v13169_v4 = vor.u32 %v17511_v2, %v13168_v37 }
 0x205   :  { %v13997_v16 = vor.u32 %v17710_v56, %v13994_v13  ;;  %v18190_v20 = vld [vmem:[#allocation11 + $0x1b04] sm:$0xf]  ;;  %8615 = vmatpush.bf16.msra.mxu1 %v15021_v17  ;;  %8621 = vmatpush.bf16.msra.mxu2 %v15981_v18  ;;  %v12593_v8 = vor.u32 %v17367_v5, %v12592_v0  ;;  %v12528_v56 = vld [vmem:[#allocation11 + $0x88] sm:$0xf]  ;;  %v2202_v14 = vpop.f32.mrf.mxu0 }
 0x206   :  { %v15914_v22 = vld [vmem:[#allocation11 + $0x1b40] sm:$0xf0]  ;;  %8603 = vmatmul.bf16.vlgmr.msra.gmra.mxu0 %v18914_v3  ;;  %v17351_v13 = vld [vmem:[#allocation11 + $0xc4] sm:$0xf0]  ;;  %v2228_v37 = vpop.f32.mrf.mxu2 }
 0x207   :  { %8647 = vmatpush.bf16.msrb.mxu0 %v12913_v7  ;;  %8589 = vmatpush.bf16.msrb.mxu3 %v13997_v16  ;;  %v15917_v31 = vor.u32 %v18190_v20, %v15914_v22  ;;  %v18174_v53 = vld [vmem:[#allocation11 + $0x1a84] sm:$0xf]  ;;  %v13105_v16 = vor.u32 %v17495_v10, %v13104_v11  ;;  %v12529_v17 = vor.u32 %v17351_v13, %v12528_v56  ;;  %v17479_v20 = vld [vmem:[#allocation11 + $0x4c4] sm:$0xf0] }
 0x208   :  { %v15850_v35 = vld [vmem:[#allocation11 + $0x1ac0] sm:$0xf0]  ;;  %8616 = vmatmul.bf16.vlgmr.msra.gmra.mxu1 %v18920_v54  ;;  %v12464_v22 = vld [vmem:[#allocation11 + $0x8] sm:$0xf] }
 0x209   :  { %8660 = vmatpush.bf16.msrb.mxu1 %v13425_v19  ;;  %8622 = vmatpush.bf16.msra.mxu2 %v15917_v31  ;;  %v15853_v43 = vor.u32 %v18174_v53, %v15850_v35  ;;  %v18158_v32 = vld [vmem:[#allocation11 + $0x1a04] sm:$0xf]  ;;  %v13040_v19 = vld [vmem:[#allocation11 + $0x488] sm:$0xf] }
 0x20a   :  { %v15786_v59 = vld [vmem:[#allocation11 + $0x1a40] sm:$0xf0]  ;;  %8577 = vmatmul.bf16.vlgmr.msrb.gmra.mxu2 %v18907_v44  ;;  %v17463_v38 = vld [vmem:[#allocation11 + $0x444] sm:$0xf0] }
 0x20b   :  { %8648 = vmatpush.bf16.msrb.mxu0 %v12849_v21  ;;  %v15789_v58 = vor.u32 %v18158_v32, %v15786_v59  ;;  %v18142_v62 = vld [vmem:[#allocation11 + $0x1984] sm:$0xf]  ;;  %v2214_v21 = vadd.f32 %v2213_v55, %v2201_v12  ;;  %v13936_v32 = vld [vmem:[#allocation11 + $0xb88] sm:$0xf]  ;;  %v12977_v55 = vor.u32 %v17463_v38, %v12976_v36 }
 0x20c   :  { %v15722_v1 = vld [vmem:[#allocation11 + $0x19c0] sm:$0xf0]  ;;  %v15472_v59 = vld [vmem:[#allocation11 + $0x1788] sm:$0xf] }
 0x20d   :  { %8661 = vmatpush.bf16.msrb.mxu1 %v13361_v33  ;;  %8623 = vmatpush.bf16.msra.mxu2 %v15853_v43  ;;  %v15725_v6 = vor.u32 %v18142_v62, %v15722_v1  ;;  %v18126_v7 = vld [vmem:[#allocation11 + $0x1904] sm:$0xf]  ;;  %v2227_v29 = vadd.f32 %v2226_v24, %v2214_v21  ;;  %v13041_v33 = vor.u32 %v17479_v20, %v13040_v19  ;;  %v18087_v45 = vld [vmem:[#allocation11 + $0x17c4] sm:$0xf0] }
 0x20e   :  { %v15658_v9 = vld [vmem:[#allocation11 + $0x1940] sm:$0xf0]  ;;  %v14896_v51 = vld [vmem:[#allocation11 + $0x1308] sm:$0xf]  ;;  %v15473_v2 = vor.u32 %v18087_v45, %v15472_v59 }
 0x20f   :  { %8649 = vmatpush.bf16.msrb.mxu0 %v12785_v34  ;;  %v15661_v41 = vor.u32 %v18126_v7, %v15658_v9  ;;  %v18110_v48 = vld [vmem:[#allocation11 + $0x1884] sm:$0xf]  ;;  %v12465_v34 = vor.u32 %v17335_v23, %v12464_v22  ;;  %v2240_v39 = vadd.f32 %v2239_v30, %v2227_v29  ;;  %v17943_v52 = vld [vmem:[#allocation11 + $0x1344] sm:$0xf0] }
 0x210   :  { %v15594_v18 = vld [vmem:[#allocation11 + $0x18c0] sm:$0xf0]  ;;  %v14897_v47 = vor.u32 %v17943_v52, %v14896_v51  ;;  %v13872_v0 = vld [vmem:[#allocation11 + $0xb08] sm:$0xf] }
 0x211   :  { %8662 = vmatpush.bf16.msrb.mxu1 %v13297_v60  ;;  %8624 = vmatpush.bf16.msra.mxu2 %v15789_v58  ;;  %v15597_v31 = vor.u32 %v18110_v48, %v15594_v18  ;;  %v18094_v53 = vld [vmem:[#allocation11 + $0x1804] sm:$0xf]  ;;  %v2250_v46 = vmax.f32 %v2240_v39, 0.0  ;;  %v17687_v5 = vld [vmem:[#allocation11 + $0xb44] sm:$0xf0] }
 0x212   :  { %v15530_v35 = vld [vmem:[#allocation11 + $0x1840] sm:$0xf0]  ;;  %v18071_v7 = vld [vmem:[#allocation11 + $0x1744] sm:$0xf0]  ;;  %v13873_v10 = vor.u32 %v17687_v5, %v13872_v0 }
 0x213   :  { %8650 = vmatpush.bf16.msrb.mxu0 %v12721_v42  ;;  %v18334_v43 = vld [vmem:[#allocation11 + $0x1f84] sm:$0xf]  ;;  %v17703_v42 = vld [vmem:[#allocation11 + $0xbc4] sm:$0xf0]  ;;  %v15533_v49 = vor.u32 %v18094_v53, %v15530_v35  ;;  %v18933_v58 = vpack.c.bf16 %v2250_v46, %v2250_v46  ;;  %v8461_v38 = vpop.f32.mrf.mxu1 }
 0x214   :  { %v16490_v60 = vld [vmem:[#allocation11 + $0x1fc0] sm:$0xf0]  ;;  %v13937_v62 = vor.u32 %v17703_v42, %v13936_v32  ;;  %v17927_v9 = vld [vmem:[#allocation11 + $0x12c4] sm:$0xf0] }
 0x215   :  { %8663 = vmatpush.bf16.msrb.mxu1 %v13233_v61  ;;  %8625 = vmatpush.bf16.msra.mxu2 %v15725_v6  ;;  %v16493_v61 = vor.u32 %v18334_v43, %v16490_v60  ;;  %v16426_v1 = vld [vmem:[#allocation11 + $0x1f40] sm:$0xf0]  ;;  %v15408_v6 = vld [vmem:[#allocation11 + $0x1708] sm:$0xf] }
 0x216   :  { %8538 = vmatmul.bf16.vlgmr.msra.gmra.mxu3 %v18933_v58  ;;  %v18937_v12 = vld [vmem:[#allocation13] sm:$0xff]  ;;  %v15409_v14 = vor.u32 %v18071_v7, %v15408_v6  ;;  %v15344_v48 = vld [vmem:[#allocation11 + $0x1688] sm:$0xf] }
 0x217   :  { %8651 = vmatpush.bf16.msrb.mxu0 %v12657_v63  ;;  %v18318_v63 = vld [vmem:[#allocation11 + $0x1f04] sm:$0xf]  ;;  %8634 = vmatpush.bf16.msra.mxu3 %v16493_v61  ;;  %v14768_v18 = vld [vmem:[#allocation11 + $0x1208] sm:$0xf]  ;;  %v3287_v20 = vperm.slane %v18937_v12, 0 }
 0x218   :  { %v16429_v11 = vor.u32 %v18318_v63, %v16426_v1  ;;  %v18302_v56 = vld [vmem:[#allocation11 + $0x1e84] sm:$0xf]  ;;  %v17911_v19 = vld [vmem:[#allocation11 + $0x1244] sm:$0xf0] }
 0x219   :  { %8664 = vmatpush.bf16.msrb.mxu1 %v13169_v4  ;;  %8626 = vmatpush.bf16.msra.mxu2 %v15661_v41  ;;  %v2241_v4 = vpop.f32.mrf.mxu3  ;;  %v16362_v13 = vld [vmem:[#allocation11 + $0x1ec0] sm:$0xf0]  ;;  %v13808_v41 = vld [vmem:[#allocation11 + $0xa88] sm:$0xf]  ;;  %v14769_v57 = vor.u32 %v17911_v19, %v14768_v18 }
 0x21a   :  { %v16365_v21 = vor.u32 %v18302_v56, %v16362_v13  ;;  %v18286_v23 = vld [vmem:[#allocation11 + $0x1e04] sm:$0xf]  ;;  %v13744_v29 = vld [vmem:[#allocation11 + $0xa08] sm:$0xf] }
 0x21b   :  { %8652 = vmatpush.bf16.msrb.mxu0 %v12593_v8  ;;  %v14832_v8 = vld [vmem:[#allocation11 + $0x1288] sm:$0xf]  ;;  %8635 = vmatpush.bf16.msra.mxu3 %v16429_v11  ;;  %v16298_v24 = vld [vmem:[#allocation11 + $0x1e40] sm:$0xf0] }
 0x21c   :  { %v14833_v15 = vor.u32 %v17927_v9, %v14832_v8  ;;  %v17655_v30 = vld [vmem:[#allocation11 + $0xa44] sm:$0xf0]  ;;  %v16301_v39 = vor.u32 %v18286_v23, %v16298_v24  ;;  %v18270_v43 = vld [vmem:[#allocation11 + $0x1d84] sm:$0xf]  ;;  %v8463_v9 = vpop.f32.mrf.mxu1  ;;  %v17439_v23 = vld [vmem:[#allocation11 + $0x38c] sm:$0xf] }
 0x21d   :  { %8665 = vmatpush.bf16.msrb.mxu1 %v13105_v16  ;;  %8627 = vmatpush.bf16.msra.mxu2 %v15597_v31  ;;  %v17671_v16 = vld [vmem:[#allocation11 + $0xac4] sm:$0xf0]  ;;  %v16234_v60 = vld [vmem:[#allocation11 + $0x1dc0] sm:$0xf0]  ;;  %v12914_v24 = vld [vmem:[#allocation11 + $0x3c8] sm:$0xf0] }
 0x21e   :  { %v13809_v22 = vor.u32 %v17671_v16, %v13808_v41  ;;  %v15280_v31 = vld [vmem:[#allocation11 + $0x1608] sm:$0xf]  ;;  %v16237_v61 = vor.u32 %v18270_v43, %v16234_v60  ;;  %v18254_v63 = vld [vmem:[#allocation11 + $0x1d04] sm:$0xf] }
 0x21f   :  { %8653 = vmatpush.bf16.msrb.mxu0 %v12529_v17  ;;  %v18055_v17 = vld [vmem:[#allocation11 + $0x16c4] sm:$0xf0]  ;;  %8636 = vmatpush.bf16.msra.mxu3 %v16365_v21  ;;  %v16170_v1 = vld [vmem:[#allocation11 + $0x1d40] sm:$0xf0] }
 0x220   :  { %v15345_v26 = vor.u32 %v18055_v17, %v15344_v48  ;;  %v18039_v53 = vld [vmem:[#allocation11 + $0x1644] sm:$0xf0]  ;;  %v16173_v11 = vor.u32 %v18254_v63, %v16170_v1  ;;  %v18238_v56 = vld [vmem:[#allocation11 + $0x1c84] sm:$0xf] }
 0x221   :  { %8666 = vmatpush.bf16.msrb.mxu1 %v13041_v33  ;;  %8628 = vmatpush.bf16.msra.mxu2 %v15533_v49  ;;  %v8448_v33 = vpop.f32.mrf.mxu0  ;;  %v17895_v35 = vld [vmem:[#allocation11 + $0x11c4] sm:$0xf0]  ;;  %v15281_v42 = vor.u32 %v18039_v53, %v15280_v31  ;;  %v16106_v13 = vld [vmem:[#allocation11 + $0x1cc0] sm:$0xf0] }
 0x222   :  { %v8449_v36 = vadd.f32 %v8448_v33, %v3287_v20  ;;  %v13680_v45 = vld [vmem:[#allocation11 + $0x988] sm:$0xf] }
 0x223   :  { %8654 = vmatpush.bf16.msrb.mxu0 %v12465_v34  ;;  %v14704_v34 = vld [vmem:[#allocation11 + $0x1188] sm:$0xf]  ;;  %8637 = vmatpush.bf16.msra.mxu3 %v16301_v39  ;;  %v8474_v17 = vpop.f32.mrf.mxu2 }
 0x224   :  { %8629 = vmatmul.bf16.vlgmr.msra.gmra.mxu2 %v18926_v28  ;;  %v8462_v32 = vadd.f32 %v8461_v38, %v8449_v36  ;;  %v14705_v59 = vor.u32 %v17895_v35, %v14704_v34  ;;  %v17639_v46 = vld [vmem:[#allocation11 + $0x9c4] sm:$0xf0]  ;;  %v12917_v38 = vor.u32 %v17439_v23, %v12914_v24 }
 0x225   :  { %8667 = vmatpush.bf16.msrb.mxu1 %v12977_v55  ;;  %8673 = vmatpush.bf16.msrb.mxu2 %v13937_v62  ;;  %v15216_v49 = vld [vmem:[#allocation11 + $0x1588] sm:$0xf]  ;;  %v13681_v62 = vor.u32 %v17639_v46, %v13680_v45  ;;  %v13426_v46 = vld [vmem:[#allocation11 + $0x7c8] sm:$0xf0] }
 0x226   :  { %8655 = vmatmul.bf16.vlgmr.msrb.gmra.mxu0 %v18901_v25  ;;  %v18023_v51 = vld [vmem:[#allocation11 + $0x15c4] sm:$0xf0]  ;;  %8590 = vmatmul.bf16.vlgmr.msrb.gmra.mxu3 %v18909_v50  ;;  %v8475_v21 = vadd.f32 %v8474_v17, %v8462_v32  ;;  %v17391_v17 = vld [vmem:[#allocation11 + $0x20c] sm:$0xf] }
 0x227   :  { %8699 = vmatpush.bf16.msra.mxu0 %v14961_v40  ;;  %v13745_v40 = vor.u32 %v17655_v30, %v13744_v29  ;;  %v14640_v52 = vld [vmem:[#allocation11 + $0x1108] sm:$0xf]  ;;  %v15217_v37 = vor.u32 %v18023_v51, %v15216_v49  ;;  %8638 = vmatpush.bf16.msra.mxu3 %v16237_v61  ;;  %v18222_v29 = vld [vmem:[#allocation11 + $0x1c04] sm:$0xf]  ;;  %v17423_v49 = vld [vmem:[#allocation11 + $0x30c] sm:$0xf] }
 0x228   :  { %8668 = vmatmul.bf16.vlgmr.msrb.gmra.mxu1 %v18903_v27  ;;  %v17879_v55 = vld [vmem:[#allocation11 + $0x1144] sm:$0xf0]  ;;  %v16042_v30 = vld [vmem:[#allocation11 + $0x1c40] sm:$0xf0]  ;;  %v12850_v51 = vld [vmem:[#allocation11 + $0x348] sm:$0xf0] }
 0x229   :  { %8712 = vmatpush.bf16.msra.mxu1 %v15473_v2  ;;  %8674 = vmatpush.bf16.msrb.mxu2 %v13873_v10  ;;  %v14641_v2 = vor.u32 %v17879_v55, %v14640_v52  ;;  %v17623_v0 = vld [vmem:[#allocation11 + $0x944] sm:$0xf0]  ;;  %v8450_v6 = vpop.f32.mrf.mxu0 }
 0x22a   :  { %v15152_v5 = vld [vmem:[#allocation11 + $0x1508] sm:$0xf]  ;;  %v17551_v6 = vld [vmem:[#allocation11 + $0x70c] sm:$0xf] }
 0x22b   :  { %8700 = vmatpush.bf16.msra.mxu0 %v14897_v47  ;;  %v13616_v47 = vld [vmem:[#allocation11 + $0x908] sm:$0xf]  ;;  %8639 = vmatpush.bf16.msra.mxu3 %v16173_v11  ;;  %v8476_v55 = vpop.f32.mrf.mxu2 }
 0x22c   :  { %v18007_v4 = vld [vmem:[#allocation11 + $0x1544] sm:$0xf0]  ;;  %v13617_v10 = vor.u32 %v17623_v0, %v13616_v47  ;;  %v12853_v47 = vor.u32 %v17423_v49, %v12850_v51  ;;  %v12594_v49 = vld [vmem:[#allocation11 + $0x148] sm:$0xf0] }
 0x22d   :  { %8713 = vmatpush.bf16.msra.mxu1 %v15409_v14  ;;  %8675 = vmatpush.bf16.msrb.mxu2 %v13809_v22  ;;  %v14576_v7 = vld [vmem:[#allocation11 + $0x1088] sm:$0xf]  ;;  %v15153_v14 = vor.u32 %v18007_v4, %v15152_v5  ;;  %v8487_v22 = vpop.f32.mrf.mxu3  ;;  %v13362_v4 = vld [vmem:[#allocation11 + $0x748] sm:$0xf0] }
 0x22e   :  { %v17863_v8 = vld [vmem:[#allocation11 + $0x10c4] sm:$0xf0]  ;;  %v18943_v31 = vadd.f32 %v8487_v22, %v8475_v21 }
 0x22f   :  { %8701 = vmatpush.bf16.msra.mxu0 %v14833_v15  ;;  %v14577_v15 = vor.u32 %v17863_v8, %v14576_v7  ;;  %v13552_v41 = vld [vmem:[#allocation11 + $0x888] sm:$0xf]  ;;  %v17407_v7 = vld [vmem:[#allocation11 + $0x28c] sm:$0xf] }
 0x230   :  { %v17607_v16 = vld [vmem:[#allocation11 + $0x8c4] sm:$0xf0]  ;;  %v12786_v8 = vld [vmem:[#allocation11 + $0x2c8] sm:$0xf0] }
 0x231   :  { %8714 = vmatpush.bf16.msra.mxu1 %v15345_v26  ;;  %8676 = vmatpush.bf16.msrb.mxu2 %v13745_v40  ;;  %v15088_v48 = vld [vmem:[#allocation11 + $0x1488] sm:$0xf]  ;;  %v16109_v26 = vor.u32 %v18238_v56, %v16106_v13  ;;  %v13365_v13 = vor.u32 %v17551_v6, %v13362_v4 }
 0x232   :  { %v17991_v18 = vld [vmem:[#allocation11 + $0x14c4] sm:$0xf0] }
 0x233   :  { %8702 = vmatpush.bf16.msra.mxu0 %v14769_v57  ;;  %v14512_v19 = vld [vmem:[#allocation11 + $0x1008] sm:$0xf]  ;;  %v13553_v57 = vor.u32 %v17607_v16, %v13552_v41  ;;  %v15089_v33 = vor.u32 %v17991_v18, %v15088_v48  ;;  %8640 = vmatpush.bf16.msra.mxu3 %v16109_v26  ;;  %v17535_v16 = vld [vmem:[#allocation11 + $0x68c] sm:$0xf] }
 0x234   :  { %v17847_v20 = vld [vmem:[#allocation11 + $0x1044] sm:$0xf0]  ;;  %v13298_v48 = vld [vmem:[#allocation11 + $0x6c8] sm:$0xf0] }
 0x235   :  { %8715 = vmatpush.bf16.msra.mxu1 %v15281_v42  ;;  %8677 = vmatpush.bf16.msrb.mxu2 %v13681_v62  ;;  %v14513_v53 = vor.u32 %v17847_v20, %v14512_v19  ;;  %v13488_v34 = vld [vmem:[#allocation11 + $0x808] sm:$0xf]  ;;  %v17567_v42 = vld [vmem:[#allocation11 + $0x78c] sm:$0xf]  ;;  %v13301_v23 = vor.u32 %v17535_v16, %v13298_v48 }
 0x236   :  { %v17591_v35 = vld [vmem:[#allocation11 + $0x844] sm:$0xf0]  ;;  %v12722_v18 = vld [vmem:[#allocation11 + $0x248] sm:$0xf0] }
 0x237   :  { %8703 = vmatpush.bf16.msra.mxu0 %v14705_v59  ;;  %v15024_v36 = vld [vmem:[#allocation11 + $0x1408] sm:$0xf]  ;;  %v16045_v59 = vor.u32 %v18222_v29, %v16042_v30  ;;  %v13489_v45 = vor.u32 %v17591_v35, %v13488_v34  ;;  %v12725_v24 = vor.u32 %v17391_v17, %v12722_v18  ;;  %v17519_v29 = vld [vmem:[#allocation11 + $0x60c] sm:$0xf] }
 0x238   :  { %v17975_v39 = vld [vmem:[#allocation11 + $0x1444] sm:$0xf0]  ;;  %v12658_v34 = vld [vmem:[#allocation11 + $0x1c8] sm:$0xf0] }
 0x239   :  { %8716 = vmatpush.bf16.msra.mxu1 %v15217_v37  ;;  %8678 = vmatpush.bf16.msrb.mxu2 %v13617_v10  ;;  %v14448_v40 = vld [vmem:[#allocation11 + $0xf88] sm:$0xf]  ;;  %v15025_v52 = vor.u32 %v17975_v39, %v15024_v36  ;;  %v8489_v37 = vpop.f32.mrf.mxu3  ;;  %v17951_v16 = vld [vmem:[#allocation11 + $0x138c] sm:$0xf] }
 0x23a   :  { %v17831_v43 = vld [vmem:[#allocation11 + $0xfc4] sm:$0xf0]  ;;  %8641 = vmatpush.bf16.msra.mxu3 %v16045_v59  ;;  %v17503_v59 = vld [vmem:[#allocation11 + $0x58c] sm:$0xf] }
 0x23b   :  { %8704 = vmatpush.bf16.msra.mxu0 %v14641_v2  ;;  %v15984_v60 = vld [vmem:[#allocation11 + $0x1b88] sm:$0xf]  ;;  %v14449_v61 = vor.u32 %v17831_v43, %v14448_v40  ;;  %v13429_v2 = vor.u32 %v17567_v42, %v13426_v46  ;;  %v17359_v46 = vld [vmem:[#allocation11 + $0x10c] sm:$0xf] }
 0x23c   :  { %v18215_v32 = vld [vmem:[#allocation11 + $0x1bc4] sm:$0xf0]  ;;  %v17487_v37 = vld [vmem:[#allocation11 + $0x50c] sm:$0xf] }
 0x23d   :  { %8717 = vmatpush.bf16.msra.mxu1 %v15153_v14  ;;  %8679 = vmatpush.bf16.msrb.mxu2 %v13553_v57  ;;  %v15985_v62 = vor.u32 %v18215_v32, %v15984_v60  ;;  %v14384_v63 = vld [vmem:[#allocation11 + $0xf08] sm:$0xf]  ;;  %v12789_v14 = vor.u32 %v17407_v7, %v12786_v8  ;;  %v14962_v48 = vld [vmem:[#allocation11 + $0x13c8] sm:$0xf0] }
 0x23e   :  { %v17815_v1 = vld [vmem:[#allocation11 + $0xf44] sm:$0xf0]  ;;  %8686 = vmatpush.bf16.msrb.mxu3 %v14449_v61 }
 0x23f   :  { %8705 = vmatpush.bf16.msra.mxu0 %v14577_v15  ;;  %v15920_v0 = vld [vmem:[#allocation11 + $0x1b08] sm:$0xf]  ;;  %v14385_v9 = vor.u32 %v17815_v1, %v14384_v63  ;;  %8642 = vmatmul.bf16.vlgmr.msra.gmra.mxu3 %v18933_v58 }
 0x240   :  { %v18199_v5 = vld [vmem:[#allocation11 + $0x1b44] sm:$0xf0] }
 0x241   :  { %8718 = vmatpush.bf16.msra.mxu1 %v15089_v33  ;;  %8680 = vmatpush.bf16.msrb.mxu2 %v13489_v45  ;;  %v15921_v11 = vor.u32 %v18199_v5, %v15920_v0  ;;  %v14320_v10 = vld [vmem:[#allocation11 + $0xe88] sm:$0xf]  ;;  %v13234_v33 = vld [vmem:[#allocation11 + $0x648] sm:$0xf0] }
 0x242   :  { %v17799_v56 = vld [vmem:[#allocation11 + $0xec4] sm:$0xf0]  ;;  %8687 = vmatpush.bf16.msrb.mxu3 %v14385_v9  ;;  %v13237_v43 = vor.u32 %v17519_v29, %v13234_v33  ;;  %v13170_v45 = vld [vmem:[#allocation11 + $0x5c8] sm:$0xf0] }
 0x243   :  { %8706 = vmatpush.bf16.msra.mxu0 %v14513_v53  ;;  %v15856_v15 = vld [vmem:[#allocation11 + $0x1a88] sm:$0xf]  ;;  %v14321_v19 = vor.u32 %v17799_v56, %v14320_v10  ;;  %v8500_v30 = vpop.f32.mrf.mxu0  ;;  %v17375_v53 = vld [vmem:[#allocation11 + $0x18c] sm:$0xf]  ;;  %v13173_v61 = vor.u32 %v17503_v59, %v13170_v45 }
 0x244   :  { %v18183_v41 = vld [vmem:[#allocation11 + $0x1ac4] sm:$0xf0]  ;;  %8681 = vmatmul.bf16.vlgmr.msrb.gmra.mxu2 %v18907_v44  ;;  %v18950_v35 = vadd.f32 %v8500_v30, %v18943_v31  ;;  %v12661_v60 = vor.u32 %v17375_v53, %v12658_v34  ;;  %v17343_v0 = vld [vmem:[#allocation11 + $0x8c] sm:$0xf] }
 0x245   :  { %8719 = vmatpush.bf16.msra.mxu1 %v15025_v52  ;;  %8725 = vmatpush.bf16.msra.mxu2 %v15985_v62  ;;  %v15857_v20 = vor.u32 %v18183_v41, %v15856_v15  ;;  %v14256_v21 = vld [vmem:[#allocation11 + $0xe08] sm:$0xf]  ;;  %v12597_v62 = vor.u32 %v17359_v46, %v12594_v49  ;;  %v12530_v5 = vld [vmem:[#allocation11 + $0xc8] sm:$0xf0] }
 0x246   :  { %8707 = vmatmul.bf16.vlgmr.msra.gmra.mxu0 %v18914_v3  ;;  %v17783_v22 = vld [vmem:[#allocation11 + $0xe44] sm:$0xf0]  ;;  %8688 = vmatpush.bf16.msrb.mxu3 %v14321_v19  ;;  %v17327_v15 = vld [vmem:[#allocation11 + $0xc] sm:$0xf] }
 0x247   :  { %8751 = vmatpush.bf16.msrb.mxu0 %v12917_v38  ;;  %v15792_v26 = vld [vmem:[#allocation11 + $0x1a08] sm:$0xf]  ;;  %v14257_v36 = vor.u32 %v17783_v22, %v14256_v21  ;;  %v12466_v41 = vld [vmem:[#allocation11 + $0x48] sm:$0xf0] }
 0x248   :  { %8720 = vmatmul.bf16.vlgmr.msra.gmra.mxu1 %v18920_v54  ;;  %v18167_v57 = vld [vmem:[#allocation11 + $0x1a44] sm:$0xf0]  ;;  %v12469_v22 = vor.u32 %v17327_v15, %v12466_v41  ;;  %v12978_v29 = vld [vmem:[#allocation11 + $0x448] sm:$0xf0] }
 0x249   :  { %8764 = vmatpush.bf16.msrb.mxu1 %v13429_v2  ;;  %8726 = vmatpush.bf16.msra.mxu2 %v15921_v11  ;;  %v15793_v38 = vor.u32 %v18167_v57, %v15792_v26  ;;  %v14192_v39 = vld [vmem:[#allocation11 + $0xd88] sm:$0xf]  ;;  %v12533_v11 = vor.u32 %v17343_v0, %v12530_v5  ;;  %v17455_v26 = vld [vmem:[#allocation11 + $0x40c] sm:$0xf]  ;;  %v14965_v57 = vor.u32 %v17951_v16, %v14962_v48 }
 0x24a   :  { %v17767_v40 = vld [vmem:[#allocation11 + $0xdc4] sm:$0xf0]  ;;  %8689 = vmatpush.bf16.msrb.mxu3 %v14257_v36  ;;  %v17695_v53 = vld [vmem:[#allocation11 + $0xb8c] sm:$0xf] }
 0x24b   :  { %8752 = vmatpush.bf16.msrb.mxu0 %v12853_v47  ;;  %v15728_v32 = vld [vmem:[#allocation11 + $0x1988] sm:$0xf]  ;;  %v14193_v31 = vor.u32 %v17767_v40, %v14192_v39  ;;  %v8502_v2 = vpop.f32.mrf.mxu0  ;;  %v13106_v47 = vld [vmem:[#allocation11 + $0x548] sm:$0xf0] }
 0x24c   :  { %v18151_v42 = vld [vmem:[#allocation11 + $0x19c4] sm:$0xf0]  ;;  %v13109_v9 = vor.u32 %v17487_v37, %v13106_v47  ;;  %v13938_v34 = vld [vmem:[#allocation11 + $0xbc8] sm:$0xf0] }
 0x24d   :  { %8765 = vmatpush.bf16.msrb.mxu1 %v13365_v13  ;;  %8727 = vmatpush.bf16.msra.mxu2 %v15857_v20  ;;  %v15729_v51 = vor.u32 %v18151_v42, %v15728_v32  ;;  %v14128_v52 = vld [vmem:[#allocation11 + $0xd08] sm:$0xf]  ;;  %v17471_v13 = vld [vmem:[#allocation11 + $0x48c] sm:$0xf]  ;;  %v12981_v32 = vor.u32 %v17455_v26, %v12978_v29  ;;  %v13941_v59 = vor.u32 %v17695_v53, %v13938_v34 }
 0x24e   :  { %v17751_v55 = vld [vmem:[#allocation11 + $0xd44] sm:$0xf0]  ;;  %8690 = vmatpush.bf16.msrb.mxu3 %v14193_v31  ;;  %v18079_v36 = vld [vmem:[#allocation11 + $0x178c] sm:$0xf] }
 0x24f   :  { %8753 = vmatpush.bf16.msrb.mxu0 %v12789_v14  ;;  %v15664_v63 = vld [vmem:[#allocation11 + $0x1908] sm:$0xf]  ;;  %v14129_v6 = vor.u32 %v17751_v55, %v14128_v52  ;;  %v13042_v14 = vld [vmem:[#allocation11 + $0x4c8] sm:$0xf0] }
 0x250   :  { %v18135_v1 = vld [vmem:[#allocation11 + $0x1944] sm:$0xf0]  ;;  %v13045_v21 = vor.u32 %v17471_v13, %v13042_v14  ;;  %v15474_v40 = vld [vmem:[#allocation11 + $0x17c8] sm:$0xf0] }
 0x251   :  { %8766 = vmatpush.bf16.msrb.mxu1 %v13301_v23  ;;  %8728 = vmatpush.bf16.msra.mxu2 %v15793_v38  ;;  %v15665_v4 = vor.u32 %v18135_v1, %v15664_v63  ;;  %v14064_v7 = vld [vmem:[#allocation11 + $0xc88] sm:$0xf]  ;;  %v15477_v49 = vor.u32 %v18079_v36, %v15474_v40  ;;  %v13874_v52 = vld [vmem:[#allocation11 + $0xb48] sm:$0xf0] }
 0x252   :  { %v17735_v8 = vld [vmem:[#allocation11 + $0xcc4] sm:$0xf0]  ;;  %8691 = vmatpush.bf16.msrb.mxu3 %v14129_v6  ;;  %v18063_v55 = vld [vmem:[#allocation11 + $0x170c] sm:$0xf] }
 0x253   :  { %8754 = vmatpush.bf16.msrb.mxu0 %v12725_v24  ;;  %v15600_v10 = vld [vmem:[#allocation11 + $0x1888] sm:$0xf]  ;;  %v14065_v17 = vor.u32 %v17735_v8, %v14064_v7  ;;  %v14834_v63 = vld [vmem:[#allocation11 + $0x12c8] sm:$0xf0] }
 0x254   :  { %v18119_v56 = vld [vmem:[#allocation11 + $0x18c4] sm:$0xf0]  ;;  %v17663_v6 = vld [vmem:[#allocation11 + $0xa8c] sm:$0xf] }
 0x255   :  { %8767 = vmatpush.bf16.msrb.mxu1 %v13237_v43  ;;  %8729 = vmatpush.bf16.msra.mxu2 %v15729_v51  ;;  %v15601_v18 = vor.u32 %v18119_v56, %v15600_v10  ;;  %v14000_v19 = vld [vmem:[#allocation11 + $0xc08] sm:$0xf]  ;;  %v17935_v43 = vld [vmem:[#allocation11 + $0x130c] sm:$0xf] }
 0x256   :  { %v17719_v20 = vld [vmem:[#allocation11 + $0xc44] sm:$0xf0]  ;;  %8692 = vmatpush.bf16.msrb.mxu3 %v14065_v17  ;;  %v17679_v51 = vld [vmem:[#allocation11 + $0xb0c] sm:$0xf] }
 0x257   :  { %8755 = vmatpush.bf16.msrb.mxu0 %v12661_v60  ;;  %v15536_v23 = vld [vmem:[#allocation11 + $0x1808] sm:$0xf]  ;;  %v14001_v38 = vor.u32 %v17719_v20, %v14000_v19  ;;  %v14898_v60 = vld [vmem:[#allocation11 + $0x1348] sm:$0xf0]  ;;  %v13877_v37 = vor.u32 %v17679_v51, %v13874_v52 }
 0x258   :  { %v18103_v24 = vld [vmem:[#allocation11 + $0x1844] sm:$0xf0]  ;;  %v14901_v31 = vor.u32 %v17935_v43, %v14898_v60  ;;  %v18047_v7 = vld [vmem:[#allocation11 + $0x168c] sm:$0xf] }
 0x259   :  { %8768 = vmatpush.bf16.msrb.mxu1 %v13173_v61  ;;  %8730 = vmatpush.bf16.msra.mxu2 %v15665_v4  ;;  %v16496_v30 = vld [vmem:[#allocation11 + $0x1f88] sm:$0xf]  ;;  %v15537_v39 = vor.u32 %v18103_v24, %v15536_v23  ;;  %v15410_v61 = vld [vmem:[#allocation11 + $0x1748] sm:$0xf0] }
 0x25a   :  { %v18343_v33 = vld [vmem:[#allocation11 + $0x1fc4] sm:$0xf0]  ;;  %8693 = vmatpush.bf16.msrb.mxu3 %v14001_v38  ;;  %v15413_v0 = vor.u32 %v18063_v55, %v15410_v61  ;;  %v13810_v4 = vld [vmem:[#allocation11 + $0xac8] sm:$0xf0] }
 0x25b   :  { %8756 = vmatpush.bf16.msrb.mxu0 %v12597_v62  ;;  %v16497_v42 = vor.u32 %v18343_v33, %v16496_v30  ;;  %v16432_v45 = vld [vmem:[#allocation11 + $0x1f08] sm:$0xf]  ;;  %v17919_v62 = vld [vmem:[#allocation11 + $0x128c] sm:$0xf]  ;;  %v13813_v13 = vor.u32 %v17663_v6, %v13810_v4  ;;  %v8513_v16 = vpop.f32.mrf.mxu1 }
 0x25c   :  { %v18327_v46 = vld [vmem:[#allocation11 + $0x1f44] sm:$0xf0]  ;;  %v14837_v5 = vor.u32 %v17919_v62, %v14834_v63  ;;  %v15346_v8 = vld [vmem:[#allocation11 + $0x16c8] sm:$0xf0]  ;;  %v18959_v20 = vadd.f32 %v8513_v16, %v18950_v35  ;;  %v3288_v62 = vperm.slane %v18937_v12, 1 }
 0x25d   :  { %8769 = vmatpush.bf16.msrb.mxu1 %v13109_v9  ;;  %8731 = vmatpush.bf16.msra.mxu2 %v15601_v18  ;;  %v16433_v1 = vor.u32 %v18327_v46, %v16432_v45  ;;  %v16368_v2 = vld [vmem:[#allocation11 + $0x1e88] sm:$0xf]  ;;  %v17903_v9 = vld [vmem:[#allocation11 + $0x120c] sm:$0xf]  ;;  %v15349_v41 = vor.u32 %v18047_v7, %v15346_v8 }
 0x25e   :  { %8738 = vmatpush.bf16.msra.mxu3 %v16497_v42  ;;  %v18311_v47 = vld [vmem:[#allocation11 + $0x1ec4] sm:$0xf0]  ;;  %v17647_v17 = vld [vmem:[#allocation11 + $0xa0c] sm:$0xf] }
 0x25f   :  { %8757 = vmatpush.bf16.msrb.mxu0 %v12533_v11  ;;  %8694 = vmatmul.bf16.vlgmr.msrb.gmra.mxu3 %v18909_v50  ;;  %v14770_v11 = vld [vmem:[#allocation11 + $0x1248] sm:$0xf0]  ;;  %v16369_v56 = vor.u32 %v18311_v47, %v16368_v2  ;;  %v16304_v14 = vld [vmem:[#allocation11 + $0x1e08] sm:$0xf] }
 0x260   :  { %v18295_v15 = vld [vmem:[#allocation11 + $0x1e44] sm:$0xf0]  ;;  %v14773_v48 = vor.u32 %v17903_v9, %v14770_v11  ;;  %v13746_v18 = vld [vmem:[#allocation11 + $0xa48] sm:$0xf0]  ;;  %v12920_v11 = vld [vmem:[#allocation11 + $0x390] sm:$0xf] }
 0x261   :  { %8770 = vmatpush.bf16.msrb.mxu1 %v13045_v21  ;;  %8732 = vmatpush.bf16.msra.mxu2 %v15537_v39  ;;  %v18031_v19 = vld [vmem:[#allocation11 + $0x160c] sm:$0xf]  ;;  %v16305_v24 = vor.u32 %v18295_v15, %v16304_v14  ;;  %v13749_v26 = vor.u32 %v17647_v17, %v13746_v18  ;;  %v18279_v29 = vld [vmem:[#allocation11 + $0x1dc4] sm:$0xf0] }
 0x262   :  { %8739 = vmatpush.bf16.msra.mxu3 %v16433_v1  ;;  %v15282_v21 = vld [vmem:[#allocation11 + $0x1648] sm:$0xf0]  ;;  %v18263_v42 = vld [vmem:[#allocation11 + $0x1d44] sm:$0xf0] }
 0x263   :  { %8758 = vmatpush.bf16.msrb.mxu0 %v12469_v22  ;;  %v18956_v10 = vpop.f32.mrf.mxu0  ;;  %v17887_v22 = vld [vmem:[#allocation11 + $0x118c] sm:$0xf]  ;;  %v15285_v30 = vor.u32 %v18031_v19, %v15282_v21  ;;  %v8515_v45 = vpop.f32.mrf.mxu1  ;;  %v18247_v2 = vld [vmem:[#allocation11 + $0x1cc4] sm:$0xf0] }
 0x264   :  { %8733 = vmatmul.bf16.vlgmr.msra.gmra.mxu2 %v18926_v28  ;;  %v14706_v23 = vld [vmem:[#allocation11 + $0x11c8] sm:$0xf0]  ;;  %v8553_v12 = vadd.f32 %v18956_v10, %v3288_v62  ;;  %v16048_v15 = vld [vmem:[#allocation11 + $0x1c08] sm:$0xf] }
 0x265   :  { %8771 = vmatpush.bf16.msrb.mxu1 %v12981_v32  ;;  %8777 = vmatpush.bf16.msrb.mxu2 %v13941_v59  ;;  %v14709_v33 = vor.u32 %v17887_v22, %v14706_v23  ;;  %v17631_v53 = vld [vmem:[#allocation11 + $0x98c] sm:$0xf]  ;;  %v16176_v32 = vld [vmem:[#allocation11 + $0x1d08] sm:$0xf] }
 0x266   :  { %8759 = vmatmul.bf16.vlgmr.msrb.gmra.mxu0 %v18901_v25  ;;  %8740 = vmatpush.bf16.msra.mxu3 %v16369_v56  ;;  %v13682_v34 = vld [vmem:[#allocation11 + $0x9c8] sm:$0xf0]  ;;  %v16177_v63 = vor.u32 %v18263_v42, %v16176_v32  ;;  %v17448_v56 = vld [vmem:[#allocation11 + $0x3cc] sm:$0xf0] }
 0x267   :  { %8803 = vmatpush.bf16.msra.mxu0 %v14965_v57  ;;  %v16240_v57 = vld [vmem:[#allocation11 + $0x1d88] sm:$0xf]  ;;  %v18015_v36 = vld [vmem:[#allocation11 + $0x158c] sm:$0xf]  ;;  %v13685_v60 = vor.u32 %v17631_v53, %v13682_v34  ;;  %v12921_v23 = vor.u32 %v17448_v56, %v12920_v11  ;;  %v17576_v34 = vld [vmem:[#allocation11 + $0x7cc] sm:$0xf0] }
 0x268   :  { %8772 = vmatmul.bf16.vlgmr.msrb.gmra.mxu1 %v18903_v27  ;;  %v15218_v38 = vld [vmem:[#allocation11 + $0x15c8] sm:$0xf0]  ;;  %v16241_v43 = vor.u32 %v18279_v29, %v16240_v57 }
 0x269   :  { %8816 = vmatpush.bf16.msra.mxu1 %v15477_v49  ;;  %8778 = vmatpush.bf16.msrb.mxu2 %v13877_v37  ;;  %v17871_v39 = vld [vmem:[#allocation11 + $0x110c] sm:$0xf]  ;;  %v15221_v59 = vor.u32 %v18015_v36, %v15218_v38  ;;  %v16112_v37 = vld [vmem:[#allocation11 + $0x1c88] sm:$0xf]  ;;  %v12856_v36 = vld [vmem:[#allocation11 + $0x310] sm:$0xf] }
 0x26a   :  { %v14642_v35 = vld [vmem:[#allocation11 + $0x1148] sm:$0xf0]  ;;  %8741 = vmatpush.bf16.msra.mxu3 %v16305_v24  ;;  %v17432_v38 = vld [vmem:[#allocation11 + $0x34c] sm:$0xf0] }
 0x26b   :  { %8804 = vmatpush.bf16.msra.mxu0 %v14901_v31  ;;  %v8554_v40 = vpop.f32.mrf.mxu0  ;;  %v14645_v46 = vor.u32 %v17871_v39, %v14642_v35  ;;  %v17615_v49 = vld [vmem:[#allocation11 + $0x90c] sm:$0xf]  ;;  %v12857_v42 = vor.u32 %v17432_v38, %v12856_v36  ;;  %v17368_v36 = vld [vmem:[#allocation11 + $0x14c] sm:$0xf0] }
 0x26c   :  { %v13618_v31 = vld [vmem:[#allocation11 + $0x948] sm:$0xf0] }
 0x26d   :  { %8817 = vmatpush.bf16.msra.mxu1 %v15413_v0  ;;  %8779 = vmatpush.bf16.msrb.mxu2 %v13813_v13  ;;  %v17999_v51 = vld [vmem:[#allocation11 + $0x150c] sm:$0xf]  ;;  %v13621_v1 = vor.u32 %v17615_v49, %v13618_v31  ;;  %v16113_v13 = vor.u32 %v18247_v2, %v16112_v37  ;;  %v17560_v49 = vld [vmem:[#allocation11 + $0x74c] sm:$0xf0] }
 0x26e   :  { %v15154_v52 = vld [vmem:[#allocation11 + $0x1548] sm:$0xf0]  ;;  %8742 = vmatpush.bf16.msra.mxu3 %v16241_v43  ;;  %v12792_v31 = vld [vmem:[#allocation11 + $0x290] sm:$0xf] }
 0x26f   :  { %8805 = vmatpush.bf16.msra.mxu0 %v14837_v5  ;;  %v17855_v55 = vld [vmem:[#allocation11 + $0x108c] sm:$0xf]  ;;  %v15157_v47 = vor.u32 %v17999_v51, %v15154_v52  ;;  %v17416_v51 = vld [vmem:[#allocation11 + $0x2cc] sm:$0xf0] }
 0x270   :  { %v14578_v61 = vld [vmem:[#allocation11 + $0x10c8] sm:$0xf0]  ;;  %v12793_v37 = vor.u32 %v17416_v51, %v12792_v31  ;;  %v12536_v31 = vld [vmem:[#allocation11 + $0x90] sm:$0xf] }
 0x271   :  { %8818 = vmatpush.bf16.msra.mxu1 %v15349_v41  ;;  %8780 = vmatpush.bf16.msrb.mxu2 %v13749_v26  ;;  %v14581_v0 = vor.u32 %v17855_v55, %v14578_v61  ;;  %v17599_v5 = vld [vmem:[#allocation11 + $0x88c] sm:$0xf]  ;;  %v18231_v41 = vld [vmem:[#allocation11 + $0x1c44] sm:$0xf0]  ;;  %v17352_v51 = vld [vmem:[#allocation11 + $0xcc] sm:$0xf0] }
 0x272   :  { %v13554_v6 = vld [vmem:[#allocation11 + $0x8c8] sm:$0xf0]  ;;  %8743 = vmatpush.bf16.msra.mxu3 %v16177_v63 }
 0x273   :  { %8806 = vmatpush.bf16.msra.mxu0 %v14773_v48  ;;  %v17983_v4 = vld [vmem:[#allocation11 + $0x148c] sm:$0xf]  ;;  %v13557_v14 = vor.u32 %v17599_v5, %v13554_v6  ;;  %v8565_v48 = vpop.f32.mrf.mxu1  ;;  %v17544_v5 = vld [vmem:[#allocation11 + $0x6cc] sm:$0xf0] }
 0x274   :  { %v15090_v7 = vld [vmem:[#allocation11 + $0x14c8] sm:$0xf0]  ;;  %v18963_v22 = vadd.f32 %v8565_v48, %v8553_v12  ;;  %v12728_v6 = vld [vmem:[#allocation11 + $0x210] sm:$0xf] }
 0x275   :  { %8819 = vmatpush.bf16.msra.mxu1 %v15285_v30  ;;  %8781 = vmatpush.bf16.msrb.mxu2 %v13685_v60  ;;  %v17839_v8 = vld [vmem:[#allocation11 + $0x100c] sm:$0xf]  ;;  %v15093_v16 = vor.u32 %v17983_v4, %v15090_v7  ;;  %v13432_v30 = vld [vmem:[#allocation11 + $0x790] sm:$0xf] }
 0x276   :  { %v14514_v9 = vld [vmem:[#allocation11 + $0x1048] sm:$0xf0]  ;;  %8744 = vmatpush.bf16.msra.mxu3 %v16113_v13  ;;  %v13433_v32 = vor.u32 %v17576_v34, %v13432_v30  ;;  %v17400_v4 = vld [vmem:[#allocation11 + $0x24c] sm:$0xf0] }
 0x277   :  { %8807 = vmatpush.bf16.msra.mxu0 %v14709_v33  ;;  %v14517_v17 = vor.u32 %v17839_v8, %v14514_v9  ;;  %v17583_v18 = vld [vmem:[#allocation11 + $0x80c] sm:$0xf]  ;;  %v16049_v33 = vor.u32 %v18231_v41, %v16048_v15  ;;  %v12729_v13 = vor.u32 %v17400_v4, %v12728_v6  ;;  %v13240_v41 = vld [vmem:[#allocation11 + $0x610] sm:$0xf] }
 0x278   :  { %v13490_v19 = vld [vmem:[#allocation11 + $0x848] sm:$0xf0]  ;;  %v12664_v48 = vld [vmem:[#allocation11 + $0x190] sm:$0xf] }
 0x279   :  { %8820 = vmatpush.bf16.msra.mxu1 %v15221_v59  ;;  %8782 = vmatpush.bf16.msrb.mxu2 %v13621_v1  ;;  %v17967_v21 = vld [vmem:[#allocation11 + $0x140c] sm:$0xf]  ;;  %v13493_v53 = vor.u32 %v17583_v18, %v13490_v19  ;;  %v13176_v30 = vld [vmem:[#allocation11 + $0x590] sm:$0xf] }
 0x27a   :  { %v15026_v24 = vld [vmem:[#allocation11 + $0x1448] sm:$0xf0]  ;;  %8745 = vmatpush.bf16.msra.mxu3 %v16049_v33  ;;  %v12600_v34 = vld [vmem:[#allocation11 + $0x110] sm:$0xf] }
 0x27b   :  { %8808 = vmatpush.bf16.msra.mxu0 %v14645_v46  ;;  %v17823_v26 = vld [vmem:[#allocation11 + $0xf8c] sm:$0xf]  ;;  %v15029_v39 = vor.u32 %v17967_v21, %v15026_v24  ;;  %v13368_v46 = vld [vmem:[#allocation11 + $0x710] sm:$0xf]  ;;  %v8567_v52 = vpop.f32.mrf.mxu1 }
 0x27c   :  { %v14450_v10 = vld [vmem:[#allocation11 + $0xfc8] sm:$0xf0]  ;;  %v13369_v1 = vor.u32 %v17560_v49, %v13368_v46  ;;  %v8526_v33 = vpop.f32.mrf.mxu2  ;;  %v13112_v46 = vld [vmem:[#allocation11 + $0x510] sm:$0xf] }
 0x27d   :  { %8821 = vmatpush.bf16.msra.mxu1 %v15157_v47  ;;  %v18207_v57 = vld [vmem:[#allocation11 + $0x1b8c] sm:$0xf]  ;;  %8783 = vmatpush.bf16.msrb.mxu2 %v13557_v14  ;;  %v14453_v35 = vor.u32 %v17823_v26, %v14450_v10  ;;  %v18974_v38 = vadd.f32 %v8526_v33, %v18959_v20  ;;  %v17496_v49 = vld [vmem:[#allocation11 + $0x54c] sm:$0xf0] }
 0x27e   :  { %v15986_v29 = vld [vmem:[#allocation11 + $0x1bc8] sm:$0xf0]  ;;  %8746 = vmatmul.bf16.vlgmr.msra.gmra.mxu3 %v18933_v58  ;;  %v12472_v6 = vld [vmem:[#allocation11 + $0x10] sm:$0xf] }
 0x27f   :  { %8809 = vmatpush.bf16.msra.mxu0 %v14581_v0  ;;  %v15989_v40 = vor.u32 %v18207_v57, %v15986_v29  ;;  %v17807_v43 = vld [vmem:[#allocation11 + $0xf0c] sm:$0xf]  ;;  %8790 = vmatpush.bf16.msrb.mxu3 %v14453_v35  ;;  %v13304_v0 = vld [vmem:[#allocation11 + $0x690] sm:$0xf] }
 0x280   :  { %v14386_v60 = vld [vmem:[#allocation11 + $0xf48] sm:$0xf0]  ;;  %v13305_v12 = vor.u32 %v17544_v5, %v13304_v0  ;;  %v17480_v5 = vld [vmem:[#allocation11 + $0x4cc] sm:$0xf0] }
 0x281   :  { %8822 = vmatpush.bf16.msra.mxu1 %v15093_v16  ;;  %v18191_v59 = vld [vmem:[#allocation11 + $0x1b0c] sm:$0xf]  ;;  %8784 = vmatpush.bf16.msrb.mxu2 %v13493_v53  ;;  %v14389_v55 = vor.u32 %v17807_v43, %v14386_v60  ;;  %v17528_v16 = vld [vmem:[#allocation11 + $0x64c] sm:$0xf0] }
 0x282   :  { %v15922_v45 = vld [vmem:[#allocation11 + $0x1b48] sm:$0xf0]  ;;  %v13241_v26 = vor.u32 %v17528_v16, %v13240_v41  ;;  %v17512_v53 = vld [vmem:[#allocation11 + $0x5cc] sm:$0xf0] }
 0x283   :  { %8810 = vmatpush.bf16.msra.mxu0 %v14517_v17  ;;  %v15925_v61 = vor.u32 %v18191_v59, %v15922_v45  ;;  %v17791_v62 = vld [vmem:[#allocation11 + $0xe8c] sm:$0xf]  ;;  %v18969_v7 = vpop.f32.mrf.mxu0  ;;  %8791 = vmatpush.bf16.msrb.mxu3 %v14389_v55  ;;  %v17384_v17 = vld [vmem:[#allocation11 + $0x1cc] sm:$0xf0] }
 0x284   :  { %v14322_v63 = vld [vmem:[#allocation11 + $0xec8] sm:$0xf0]  ;;  %8785 = vmatmul.bf16.vlgmr.msrb.gmra.mxu2 %v18907_v44  ;;  %v12665_v10 = vor.u32 %v17384_v17, %v12664_v48  ;;  %v8528_v0 = vpop.f32.mrf.mxu2  ;;  %v17336_v4 = vld [vmem:[#allocation11 + $0x4c] sm:$0xf0] }
 0x285   :  { %8823 = vmatpush.bf16.msra.mxu1 %v15029_v39  ;;  %8829 = vmatpush.bf16.msra.mxu2 %v15989_v40  ;;  %v18175_v2 = vld [vmem:[#allocation11 + $0x1a8c] sm:$0xf]  ;;  %v14325_v8 = vor.u32 %v17791_v62, %v14322_v63  ;;  %v18971_v18 = vpop.f32.mrf.mxu1  ;;  %v13113_v63 = vor.u32 %v17496_v49, %v13112_v46  ;;  %v12984_v48 = vld [vmem:[#allocation11 + $0x410] sm:$0xf] }
 0x286   :  { %8811 = vmatmul.bf16.vlgmr.msra.gmra.mxu0 %v18914_v3  ;;  %v15858_v47 = vld [vmem:[#allocation11 + $0x1ac8] sm:$0xf0]  ;;  %v14904_v33 = vld [vmem:[#allocation11 + $0x1310] sm:$0xf] }
 0x287   :  { %8855 = vmatpush.bf16.msrb.mxu0 %v12921_v23  ;;  %v15861_v9 = vor.u32 %v18175_v2, %v15858_v47  ;;  %v17775_v11 = vld [vmem:[#allocation11 + $0xe0c] sm:$0xf]  ;;  %8792 = vmatpush.bf16.msrb.mxu3 %v14325_v8  ;;  %v13048_v47 = vld [vmem:[#allocation11 + $0x490] sm:$0xf] }
 0x288   :  { %8824 = vmatmul.bf16.vlgmr.msra.gmra.mxu1 %v18920_v54  ;;  %v14258_v56 = vld [vmem:[#allocation11 + $0xe48] sm:$0xf0]  ;;  %v14968_v8 = vld [vmem:[#allocation11 + $0x1390] sm:$0xf] }
 0x289   :  { %8868 = vmatpush.bf16.msrb.mxu1 %v13433_v32  ;;  %8830 = vmatpush.bf16.msra.mxu2 %v15925_v61  ;;  %v18159_v14 = vld [vmem:[#allocation11 + $0x1a0c] sm:$0xf]  ;;  %v14261_v19 = vor.u32 %v17775_v11, %v14258_v56  ;;  %v13177_v32 = vor.u32 %v17512_v53, %v13176_v30  ;;  %v18088_v30 = vld [vmem:[#allocation11 + $0x17cc] sm:$0xf0] }
 0x28a   :  { %v15794_v15 = vld [vmem:[#allocation11 + $0x1a48] sm:$0xf0]  ;;  %v17944_v53 = vld [vmem:[#allocation11 + $0x134c] sm:$0xf0] }
 0x28b   :  { %8856 = vmatpush.bf16.msrb.mxu0 %v12857_v42  ;;  %v15797_v21 = vor.u32 %v18159_v14, %v15794_v15  ;;  %v17759_v23 = vld [vmem:[#allocation11 + $0xd8c] sm:$0xf]  ;;  %v8606_v39 = vpop.f32.mrf.mxu0  ;;  %8793 = vmatpush.bf16.msrb.mxu3 %v14261_v19  ;;  %v12601_v42 = vor.u32 %v17368_v36, %v12600_v34  ;;  %v13049_v14 = vor.u32 %v17480_v5, %v13048_v47  ;;  %v17464_v19 = vld [vmem:[#allocation11 + $0x44c] sm:$0xf0] }
 0x28c   :  { %v14194_v24 = vld [vmem:[#allocation11 + $0xdc8] sm:$0xf0]  ;;  %v12473_v15 = vor.u32 %v17336_v4, %v12472_v6  ;;  %v12985_v34 = vor.u32 %v17464_v19, %v12984_v48  ;;  %v15416_v46 = vld [vmem:[#allocation11 + $0x1710] sm:$0xf] }
 0x28d   :  { %8869 = vmatpush.bf16.msrb.mxu1 %v13369_v1  ;;  %8831 = vmatpush.bf16.msra.mxu2 %v15861_v9  ;;  %v18143_v57 = vld [vmem:[#allocation11 + $0x198c] sm:$0xf]  ;;  %v14197_v35 = vor.u32 %v17759_v23, %v14194_v24  ;;  %v8619_v52 = vpop.f32.mrf.mxu1  ;;  %v12537_v1 = vor.u32 %v17352_v51, %v12536_v31  ;;  %v17960_v9 = vld [vmem:[#allocation11 + $0x13cc] sm:$0xf0] }
 0x28e   :  { %v15730_v29 = vld [vmem:[#allocation11 + $0x19c8] sm:$0xf0]  ;;  %v14969_v17 = vor.u32 %v17960_v9, %v14968_v8  ;;  %v13944_v24 = vld [vmem:[#allocation11 + $0xb90] sm:$0xf] }
 0x28f   :  { %8857 = vmatpush.bf16.msrb.mxu0 %v12793_v37  ;;  %v15733_v40 = vor.u32 %v18143_v57, %v15730_v29  ;;  %v17743_v43 = vld [vmem:[#allocation11 + $0xd0c] sm:$0xf]  ;;  %8794 = vmatpush.bf16.msrb.mxu3 %v14197_v35  ;;  %v8578_v35 = vpop.f32.mrf.mxu2  ;;  %v18072_v49 = vld [vmem:[#allocation11 + $0x174c] sm:$0xf0] }
 0x290   :  { %v14130_v60 = vld [vmem:[#allocation11 + $0xd48] sm:$0xf0]  ;;  %v14840_v31 = vld [vmem:[#allocation11 + $0x1290] sm:$0xf] }
 0x291   :  { %8870 = vmatpush.bf16.msrb.mxu1 %v13305_v12  ;;  %8832 = vmatpush.bf16.msra.mxu2 %v15797_v21  ;;  %v18127_v59 = vld [vmem:[#allocation11 + $0x190c] sm:$0xf]  ;;  %v14133_v20 = vor.u32 %v17743_v43, %v14130_v60  ;;  %v17928_v51 = vld [vmem:[#allocation11 + $0x12cc] sm:$0xf0] }
 0x292   :  { %v15666_v45 = vld [vmem:[#allocation11 + $0x1948] sm:$0xf0]  ;;  %v15352_v47 = vld [vmem:[#allocation11 + $0x1690] sm:$0xf] }
 0x293   :  { %8858 = vmatpush.bf16.msrb.mxu0 %v12729_v13  ;;  %v15669_v55 = vor.u32 %v18127_v59, %v15666_v45  ;;  %v17727_v61 = vld [vmem:[#allocation11 + $0xc8c] sm:$0xf]  ;;  %8795 = vmatpush.bf16.msrb.mxu3 %v14133_v20  ;;  %v13880_v59 = vld [vmem:[#allocation11 + $0xb10] sm:$0xf] }
 0x294   :  { %v14066_v62 = vld [vmem:[#allocation11 + $0xcc8] sm:$0xf0]  ;;  %v17688_v45 = vld [vmem:[#allocation11 + $0xb4c] sm:$0xf0] }
 0x295   :  { %8871 = vmatpush.bf16.msrb.mxu1 %v13241_v26  ;;  %8833 = vmatpush.bf16.msra.mxu2 %v15733_v40  ;;  %v18111_v37 = vld [vmem:[#allocation11 + $0x188c] sm:$0xf]  ;;  %v14069_v11 = vor.u32 %v17727_v61, %v14066_v62  ;;  %v17704_v26 = vld [vmem:[#allocation11 + $0xbcc] sm:$0xf0]  ;;  %v13881_v20 = vor.u32 %v17688_v45, %v13880_v59 }
 0x296   :  { %v15602_v2 = vld [vmem:[#allocation11 + $0x18c8] sm:$0xf0]  ;;  %v13945_v39 = vor.u32 %v17704_v26, %v13944_v24  ;;  %v18056_v0 = vld [vmem:[#allocation11 + $0x16cc] sm:$0xf0] }
 0x297   :  { %8859 = vmatpush.bf16.msrb.mxu0 %v12665_v10  ;;  %v15605_v56 = vor.u32 %v18111_v37, %v15602_v2  ;;  %v17711_v12 = vld [vmem:[#allocation11 + $0xc0c] sm:$0xf]  ;;  %v15480_v10 = vld [vmem:[#allocation11 + $0x1790] sm:$0xf]  ;;  %8796 = vmatpush.bf16.msrb.mxu3 %v14069_v11 }
 0x298   :  { %v14002_v13 = vld [vmem:[#allocation11 + $0xc48] sm:$0xf0]  ;;  %v15481_v60 = vor.u32 %v18088_v30, %v15480_v10  ;;  %v13816_v37 = vld [vmem:[#allocation11 + $0xa90] sm:$0xf] }
 0x299   :  { %8872 = vmatpush.bf16.msrb.mxu1 %v13177_v32  ;;  %8834 = vmatpush.bf16.msra.mxu2 %v15669_v55  ;;  %v18095_v41 = vld [vmem:[#allocation11 + $0x180c] sm:$0xf]  ;;  %v14005_v57 = vor.u32 %v17711_v12, %v14002_v13  ;;  %v14905_v32 = vor.u32 %v17944_v53, %v14904_v33  ;;  %v18980_v55 = vld [vmem:[#allocation13] sm:$0xff]  ;;  %v17672_v2 = vld [vmem:[#allocation11 + $0xacc] sm:$0xf0] }
 0x29a   :  { %v15538_v16 = vld [vmem:[#allocation11 + $0x1848] sm:$0xf0]  ;;  %v14776_v5 = vld [vmem:[#allocation11 + $0x1210] sm:$0xf]  ;;  %v13817_v11 = vor.u32 %v17672_v2, %v13816_v37 }
 0x29b   :  { %8860 = vmatpush.bf16.msrb.mxu0 %v12601_v42  ;;  %v18335_v21 = vld [vmem:[#allocation11 + $0x1f8c] sm:$0xf]  ;;  %v15541_v29 = vor.u32 %v18095_v41, %v15538_v16  ;;  %v18977_v42 = vadd.f32 %v8578_v35, %v18963_v22  ;;  %8797 = vmatpush.bf16.msrb.mxu3 %v14005_v57  ;;  %v3289_v22 = vperm.slane %v18980_v55, 2  ;;  %v17912_v6 = vld [vmem:[#allocation11 + $0x124c] sm:$0xf0] }
 0x29c   :  { %v16498_v23 = vld [vmem:[#allocation11 + $0x1fc8] sm:$0xf0]  ;;  %v13752_v41 = vld [vmem:[#allocation11 + $0xa10] sm:$0xf] }
 0x29d   :  { %8873 = vmatpush.bf16.msrb.mxu1 %v13113_v63  ;;  %8835 = vmatpush.bf16.msra.mxu2 %v15605_v56  ;;  %v16501_v36 = vor.u32 %v18335_v21, %v16498_v23  ;;  %v18319_v40 = vld [vmem:[#allocation11 + $0x1f0c] sm:$0xf]  ;;  %v15417_v63 = vor.u32 %v18072_v49, %v15416_v46  ;;  %v8580_v56 = vpop.f32.mrf.mxu2  ;;  %v17656_v16 = vld [vmem:[#allocation11 + $0xa4c] sm:$0xf0] }
 0x29e   :  { %v16434_v43 = vld [vmem:[#allocation11 + $0x1f48] sm:$0xf0]  ;;  %8798 = vmatmul.bf16.vlgmr.msrb.gmra.mxu3 %v18909_v50  ;;  %v15288_v48 = vld [vmem:[#allocation11 + $0x1610] sm:$0xf]  ;;  %v13753_v10 = vor.u32 %v17656_v16, %v13752_v41 }
 0x29f   :  { %8861 = vmatpush.bf16.msrb.mxu0 %v12537_v1  ;;  %8842 = vmatpush.bf16.msra.mxu3 %v16501_v36  ;;  %v16437_v52 = vor.u32 %v18319_v40, %v16434_v43  ;;  %v18303_v61 = vld [vmem:[#allocation11 + $0x1e8c] sm:$0xf]  ;;  %v14841_v1 = vor.u32 %v17928_v51, %v14840_v31  ;;  %v14712_v19 = vld [vmem:[#allocation11 + $0x1190] sm:$0xf] }
 0x2a0   :  { %v16370_v62 = vld [vmem:[#allocation11 + $0x1ec8] sm:$0xf0]  ;;  %v17896_v21 = vld [vmem:[#allocation11 + $0x11cc] sm:$0xf0] }
 0x2a1   :  { %8874 = vmatpush.bf16.msrb.mxu1 %v13049_v14  ;;  %8836 = vmatpush.bf16.msra.mxu2 %v15541_v29  ;;  %v16373_v9 = vor.u32 %v18303_v61, %v16370_v62  ;;  %v18287_v12 = vld [vmem:[#allocation11 + $0x1e0c] sm:$0xf]  ;;  %v15353_v14 = vor.u32 %v18056_v0, %v15352_v47  ;;  %v14713_v33 = vor.u32 %v17896_v21, %v14712_v19  ;;  %v13688_v53 = vld [vmem:[#allocation11 + $0x990] sm:$0xf] }
 0x2a2   :  { %v16306_v13 = vld [vmem:[#allocation11 + $0x1e48] sm:$0xf0]  ;;  %v15224_v36 = vld [vmem:[#allocation11 + $0x1590] sm:$0xf] }
 0x2a3   :  { %8862 = vmatpush.bf16.msrb.mxu0 %v12473_v15  ;;  %v8656_v4 = vpop.f32.mrf.mxu0  ;;  %8843 = vmatpush.bf16.msra.mxu3 %v16437_v52  ;;  %v14777_v15 = vor.u32 %v17912_v6, %v14776_v5  ;;  %v16309_v26 = vor.u32 %v18287_v12, %v16306_v13  ;;  %v18271_v57 = vld [vmem:[#allocation11 + $0x1d8c] sm:$0xf]  ;;  %v18024_v35 = vld [vmem:[#allocation11 + $0x15cc] sm:$0xf0] }
 0x2a4   :  { %8837 = vmatmul.bf16.vlgmr.msra.gmra.mxu2 %v18926_v28  ;;  %v8657_v8 = vadd.f32 %v8656_v4, %v3289_v22  ;;  %v16242_v29 = vld [vmem:[#allocation11 + $0x1dc8] sm:$0xf0]  ;;  %v14648_v40 = vld [vmem:[#allocation11 + $0x1110] sm:$0xf]  ;;  %v15225_v31 = vor.u32 %v18024_v35, %v15224_v36 }
 0x2a5   :  { %8875 = vmatpush.bf16.msrb.mxu1 %v12985_v34  ;;  %8881 = vmatpush.bf16.msrb.mxu2 %v13945_v39  ;;  %v8669_v23 = vpop.f32.mrf.mxu1  ;;  %v17640_v34 = vld [vmem:[#allocation11 + $0x9cc] sm:$0xf0]  ;;  %v8539_v39 = vpop.f32.mrf.mxu3  ;;  %v16245_v59 = vor.u32 %v18271_v57, %v16242_v29  ;;  %v18255_v46 = vld [vmem:[#allocation11 + $0x1d0c] sm:$0xf] }
 0x2a6   :  { %8863 = vmatmul.bf16.vlgmr.msrb.gmra.mxu0 %v18901_v25  ;;  %v18986_v24 = vadd.f32 %v8669_v23, %v8657_v8  ;;  %v17880_v43 = vld [vmem:[#allocation11 + $0x114c] sm:$0xf0]  ;;  %v13689_v45 = vor.u32 %v17640_v34, %v13688_v53  ;;  %v16178_v49 = vld [vmem:[#allocation11 + $0x1d48] sm:$0xf0] }
 0x2a7   :  { %8907 = vmatpush.bf16.msra.mxu0 %v14969_v17  ;;  %v18040_v17 = vld [vmem:[#allocation11 + $0x164c] sm:$0xf0]  ;;  %8844 = vmatpush.bf16.msra.mxu3 %v16373_v9  ;;  %v14649_v51 = vor.u32 %v17880_v43, %v14648_v40  ;;  %v18991_v52 = vpop.f32.mrf.mxu2  ;;  %v16181_v37 = vor.u32 %v18255_v46, %v16178_v49  ;;  %v18239_v47 = vld [vmem:[#allocation11 + $0x1c8c] sm:$0xf]  ;;  %v13434_v43 = vld [vmem:[#allocation11 + $0x7d0] sm:$0xf0] }
 0x2a8   :  { %8876 = vmatmul.bf16.vlgmr.msrb.gmra.mxu1 %v18903_v27  ;;  %v15289_v30 = vor.u32 %v18040_v17, %v15288_v48  ;;  %v17624_v22 = vld [vmem:[#allocation11 + $0x94c] sm:$0xf0]  ;;  %v16114_v0 = vld [vmem:[#allocation11 + $0x1cc8] sm:$0xf0] }
 0x2a9   :  { %8920 = vmatpush.bf16.msra.mxu1 %v15481_v60  ;;  %8882 = vmatpush.bf16.msrb.mxu2 %v13881_v20  ;;  %v18989_v60 = vadd.f32 %v8539_v39, %v18974_v38  ;;  %v13624_v20 = vld [vmem:[#allocation11 + $0x910] sm:$0xf]  ;;  %v16117_v41 = vor.u32 %v18239_v47, %v16114_v0  ;;  %v18223_v48 = vld [vmem:[#allocation11 + $0x1c0c] sm:$0xf]  ;;  %v17568_v39 = vld [vmem:[#allocation11 + $0x794] sm:$0xf] }
 0x2aa   :  { %v15160_v61 = vld [vmem:[#allocation11 + $0x1510] sm:$0xf]  ;;  %v13625_v2 = vor.u32 %v17624_v22, %v13624_v20  ;;  %v16050_v17 = vld [vmem:[#allocation11 + $0x1c48] sm:$0xf0]  ;;  %v13437_v22 = vor.u32 %v17568_v39, %v13434_v43  ;;  %v12794_v47 = vld [vmem:[#allocation11 + $0x2d0] sm:$0xf0] }
 0x2ab   :  { %8908 = vmatpush.bf16.msra.mxu0 %v14905_v32  ;;  %v8658_v32 = vpop.f32.mrf.mxu0  ;;  %8845 = vmatpush.bf16.msra.mxu3 %v16309_v26  ;;  %v18008_v62 = vld [vmem:[#allocation11 + $0x154c] sm:$0xf0]  ;;  %v16053_v35 = vor.u32 %v18223_v48, %v16050_v17 }
 0x2ac   :  { %v17864_v38 = vld [vmem:[#allocation11 + $0x10cc] sm:$0xf0]  ;;  %v15161_v5 = vor.u32 %v18008_v62, %v15160_v61  ;;  %v17424_v32 = vld [vmem:[#allocation11 + $0x314] sm:$0xf] }
 0x2ad   :  { %8921 = vmatpush.bf16.msra.mxu1 %v15417_v63  ;;  %8883 = vmatpush.bf16.msrb.mxu2 %v13817_v11  ;;  %v14584_v63 = vld [vmem:[#allocation11 + $0x1090] sm:$0xf]  ;;  %v8541_v11 = vpop.f32.mrf.mxu3 }
 0x2ae   :  { %v14585_v6 = vor.u32 %v17864_v38, %v14584_v63  ;;  %v13560_v4 = vld [vmem:[#allocation11 + $0x890] sm:$0xf] }
 0x2af   :  { %8909 = vmatpush.bf16.msra.mxu0 %v14841_v1  ;;  %v8671_v1 = vpop.f32.mrf.mxu1  ;;  %8846 = vmatpush.bf16.msra.mxu3 %v16245_v59  ;;  %v17608_v8 = vld [vmem:[#allocation11 + $0x8cc] sm:$0xf0]  ;;  %v8632_v23 = vpop.f32.mrf.mxu2  ;;  %v12858_v59 = vld [vmem:[#allocation11 + $0x350] sm:$0xf0] }
 0x2b0   :  { %v15096_v9 = vld [vmem:[#allocation11 + $0x1490] sm:$0xf]  ;;  %v13561_v16 = vor.u32 %v17608_v8, %v13560_v4  ;;  %v12861_v61 = vor.u32 %v17424_v32, %v12858_v59  ;;  %v17552_v1 = vld [vmem:[#allocation11 + $0x714] sm:$0xf] }
 0x2b1   :  { %8922 = vmatpush.bf16.msra.mxu1 %v15353_v14  ;;  %8884 = vmatpush.bf16.msrb.mxu2 %v13753_v10  ;;  %v17992_v56 = vld [vmem:[#allocation11 + $0x14cc] sm:$0xf0]  ;;  %v17440_v14 = vld [vmem:[#allocation11 + $0x394] sm:$0xf] }
 0x2b2   :  { %v14520_v12 = vld [vmem:[#allocation11 + $0x1010] sm:$0xf]  ;;  %v15097_v19 = vor.u32 %v17992_v56, %v15096_v9 }
 0x2b3   :  { %8910 = vmatpush.bf16.msra.mxu0 %v14777_v15  ;;  %v17848_v13 = vld [vmem:[#allocation11 + $0x104c] sm:$0xf0]  ;;  %v12922_v15 = vld [vmem:[#allocation11 + $0x3d0] sm:$0xf0]  ;;  %8847 = vmatpush.bf16.msra.mxu3 %v16181_v37 }
 0x2b4   :  { %v14521_v21 = vor.u32 %v17848_v13, %v14520_v12  ;;  %v13496_v26 = vld [vmem:[#allocation11 + $0x810] sm:$0xf]  ;;  %v12925_v29 = vor.u32 %v17440_v14, %v12922_v15  ;;  %v13370_v37 = vld [vmem:[#allocation11 + $0x750] sm:$0xf0] }
 0x2b5   :  { %8923 = vmatpush.bf16.msra.mxu1 %v15289_v30  ;;  %8885 = vmatpush.bf16.msrb.mxu2 %v13689_v45  ;;  %v17592_v10 = vld [vmem:[#allocation11 + $0x84c] sm:$0xf0]  ;;  %v17536_v12 = vld [vmem:[#allocation11 + $0x694] sm:$0xf] }
 0x2b6   :  { %v15032_v57 = vld [vmem:[#allocation11 + $0x1410] sm:$0xf]  ;;  %v13497_v40 = vor.u32 %v17592_v10, %v13496_v26  ;;  %v17392_v14 = vld [vmem:[#allocation11 + $0x214] sm:$0xf] }
 0x2b7   :  { %8911 = vmatpush.bf16.msra.mxu0 %v14713_v33  ;;  %v17976_v30 = vld [vmem:[#allocation11 + $0x144c] sm:$0xf0]  ;;  %8848 = vmatpush.bf16.msra.mxu3 %v16117_v41  ;;  %v12730_v15 = vld [vmem:[#allocation11 + $0x250] sm:$0xf0] }
 0x2b8   :  { %v14456_v33 = vld [vmem:[#allocation11 + $0xf90] sm:$0xf]  ;;  %v15033_v45 = vor.u32 %v17976_v30, %v15032_v57  ;;  %v12733_v26 = vor.u32 %v17392_v14, %v12730_v15  ;;  %v13242_v30 = vld [vmem:[#allocation11 + $0x650] sm:$0xf0] }
 0x2b9   :  { %8924 = vmatpush.bf16.msra.mxu1 %v15225_v31  ;;  %8886 = vmatpush.bf16.msrb.mxu2 %v13625_v2  ;;  %v17832_v53 = vld [vmem:[#allocation11 + $0xfcc] sm:$0xf0]  ;;  %v8591_v31 = vpop.f32.mrf.mxu3  ;;  %v17408_v2 = vld [vmem:[#allocation11 + $0x294] sm:$0xf] }
 0x2ba   :  { %v15992_v34 = vld [vmem:[#allocation11 + $0x1b90] sm:$0xf]  ;;  %v14457_v46 = vor.u32 %v17832_v53, %v14456_v33  ;;  %v8592_v62 = vadd.f32 %v8591_v31, %v18977_v42  ;;  %v13373_v42 = vor.u32 %v17552_v1, %v13370_v37  ;;  %v12797_v9 = vor.u32 %v17408_v2, %v12794_v47  ;;  %v17376_v33 = vld [vmem:[#allocation11 + $0x194] sm:$0xf] }
 0x2bb   :  { %8912 = vmatpush.bf16.msra.mxu0 %v14649_v51  ;;  %v18216_v36 = vld [vmem:[#allocation11 + $0x1bcc] sm:$0xf0]  ;;  %8849 = vmatpush.bf16.msra.mxu3 %v16053_v35  ;;  %v12666_v53 = vld [vmem:[#allocation11 + $0x1d0] sm:$0xf0] }
 0x2bc   :  { %v15993_v49 = vor.u32 %v18216_v36, %v15992_v34  ;;  %v14392_v51 = vld [vmem:[#allocation11 + $0xf10] sm:$0xf]  ;;  %v8605_v0 = vadd.f32 %v18969_v7, %v8592_v62  ;;  %v13306_v7 = vld [vmem:[#allocation11 + $0x6d0] sm:$0xf0]  ;;  %v12669_v43 = vor.u32 %v17376_v33, %v12666_v53 }
 0x2bd   :  { %8925 = vmatpush.bf16.msra.mxu1 %v15161_v5  ;;  %8887 = vmatpush.bf16.msrb.mxu2 %v13561_v16  ;;  %v17816_v20 = vld [vmem:[#allocation11 + $0xf4c] sm:$0xf0]  ;;  %v13309_v23 = vor.u32 %v17536_v12, %v13306_v7  ;;  %v12602_v31 = vld [vmem:[#allocation11 + $0x150] sm:$0xf0] }
 0x2be   :  { %v15928_v63 = vld [vmem:[#allocation11 + $0x1b10] sm:$0xf]  ;;  %v14393_v5 = vor.u32 %v17816_v20, %v14392_v51  ;;  %v8618_v13 = vadd.f32 %v18971_v18, %v8605_v0  ;;  %8850 = vmatmul.bf16.vlgmr.msra.gmra.mxu3 %v18933_v58  ;;  %v17488_v47 = vld [vmem:[#allocation11 + $0x514] sm:$0xf] }
 0x2bf   :  { %8913 = vmatpush.bf16.msra.mxu0 %v14585_v6  ;;  %v18200_v38 = vld [vmem:[#allocation11 + $0x1b4c] sm:$0xf0]  ;;  %8894 = vmatpush.bf16.msrb.mxu3 %v14457_v46  ;;  %v13178_v46 = vld [vmem:[#allocation11 + $0x5d0] sm:$0xf0] }
 0x2c0   :  { %v15929_v6 = vor.u32 %v18200_v38, %v15928_v63  ;;  %v14328_v4 = vld [vmem:[#allocation11 + $0xe90] sm:$0xf]  ;;  %v8631_v41 = vadd.f32 %v18991_v52, %v8618_v13 }
 0x2c1   :  { %8926 = vmatpush.bf16.msra.mxu1 %v15097_v19  ;;  %8888 = vmatpush.bf16.msrb.mxu2 %v13497_v40  ;;  %v17800_v8 = vld [vmem:[#allocation11 + $0xecc] sm:$0xf0]  ;;  %v8593_v19 = vpop.f32.mrf.mxu3 }
 0x2c2   :  { %v15864_v11 = vld [vmem:[#allocation11 + $0x1a90] sm:$0xf]  ;;  %v14329_v48 = vor.u32 %v17800_v8, %v14328_v4  ;;  %v17344_v4 = vld [vmem:[#allocation11 + $0x94] sm:$0xf] }
 0x2c3   :  { %8914 = vmatpush.bf16.msra.mxu0 %v14521_v21  ;;  %v18184_v56 = vld [vmem:[#allocation11 + $0x1acc] sm:$0xf0]  ;;  %8895 = vmatpush.bf16.msrb.mxu3 %v14393_v5  ;;  %v19001_v16 = vpop.f32.mrf.mxu0  ;;  %v12538_v8 = vld [vmem:[#allocation11 + $0xd0] sm:$0xf0] }
 0x2c4   :  { %8889 = vmatmul.bf16.vlgmr.msrb.gmra.mxu2 %v18907_v44  ;;  %v15865_v17 = vor.u32 %v18184_v56, %v15864_v11  ;;  %v14264_v21 = vld [vmem:[#allocation11 + $0xe10] sm:$0xf]  ;;  %v12541_v14 = vor.u32 %v17344_v4, %v12538_v8  ;;  %v17328_v19 = vld [vmem:[#allocation11 + $0x14] sm:$0xf] }
 0x2c5   :  { %8927 = vmatpush.bf16.msra.mxu1 %v15033_v45  ;;  %8933 = vmatpush.bf16.msra.mxu2 %v15993_v49  ;;  %v17784_v18 = vld [vmem:[#allocation11 + $0xe4c] sm:$0xf0]  ;;  %v19003_v52 = vpop.f32.mrf.mxu1  ;;  %v17504_v45 = vld [vmem:[#allocation11 + $0x594] sm:$0xf] }
 0x2c6   :  { %8915 = vmatmul.bf16.vlgmr.msra.gmra.mxu0 %v18914_v3  ;;  %v15800_v10 = vld [vmem:[#allocation11 + $0x1a10] sm:$0xf]  ;;  %v14265_v34 = vor.u32 %v17784_v18, %v14264_v21  ;;  %v17360_v49 = vld [vmem:[#allocation11 + $0x114] sm:$0xf]  ;;  %v13181_v63 = vor.u32 %v17504_v45, %v13178_v46 }
 0x2c7   :  { %8959 = vmatpush.bf16.msrb.mxu0 %v12925_v29  ;;  %v18168_v57 = vld [vmem:[#allocation11 + $0x1a4c] sm:$0xf0]  ;;  %v17520_v29 = vld [vmem:[#allocation11 + $0x614] sm:$0xf]  ;;  %8896 = vmatpush.bf16.msrb.mxu3 %v14329_v48  ;;  %v8682_v38 = vpop.f32.mrf.mxu2  ;;  %v12605_v1 = vor.u32 %v17360_v49, %v12602_v31 }
 0x2c8   :  { %8928 = vmatmul.bf16.vlgmr.msra.gmra.mxu1 %v18920_v54  ;;  %v15801_v36 = vor.u32 %v18168_v57, %v15800_v10  ;;  %v14200_v39 = vld [vmem:[#allocation11 + $0xd90] sm:$0xf]  ;;  %v13245_v40 = vor.u32 %v17520_v29, %v13242_v30  ;;  %v19006_v0 = vadd.f32 %v8682_v38, %v18986_v24  ;;  %v17472_v48 = vld [vmem:[#allocation11 + $0x494] sm:$0xf] }
 0x2c9   :  { %8972 = vmatpush.bf16.msrb.mxu1 %v13437_v22  ;;  %8934 = vmatpush.bf16.msra.mxu2 %v15929_v6  ;;  %v17768_v35 = vld [vmem:[#allocation11 + $0xdcc] sm:$0xf0]  ;;  %v8643_v5 = vpop.f32.mrf.mxu3  ;;  %v13114_v6 = vld [vmem:[#allocation11 + $0x550] sm:$0xf0] }
 0x2ca   :  { %v15736_v32 = vld [vmem:[#allocation11 + $0x1990] sm:$0xf]  ;;  %v14201_v20 = vor.u32 %v17768_v35, %v14200_v39  ;;  %v13117_v7 = vor.u32 %v17488_v47, %v13114_v6  ;;  %v12474_v21 = vld [vmem:[#allocation11 + $0x50] sm:$0xf0] }
 0x2cb   :  { %8960 = vmatpush.bf16.msrb.mxu0 %v12861_v61  ;;  %v18152_v59 = vld [vmem:[#allocation11 + $0x19cc] sm:$0xf0]  ;;  %8897 = vmatpush.bf16.msrb.mxu3 %v14265_v34  ;;  %v8710_v51 = vpop.f32.mrf.mxu0  ;;  %v17952_v18 = vld [vmem:[#allocation11 + $0x1394] sm:$0xf]  ;;  %v12477_v33 = vor.u32 %v17328_v19, %v12474_v21 }
 0x2cc   :  { %v15737_v22 = vor.u32 %v18152_v59, %v15736_v32  ;;  %v14136_v61 = vld [vmem:[#allocation11 + $0xd10] sm:$0xf]  ;;  %v17696_v59 = vld [vmem:[#allocation11 + $0xb94] sm:$0xf] }
 0x2cd   :  { %8973 = vmatpush.bf16.msrb.mxu1 %v13373_v42  ;;  %8935 = vmatpush.bf16.msra.mxu2 %v15865_v17  ;;  %v17752_v62 = vld [vmem:[#allocation11 + $0xd4c] sm:$0xf0]  ;;  %v19008_v42 = vadd.f32 %v8643_v5, %v8631_v41  ;;  %v13050_v17 = vld [vmem:[#allocation11 + $0x4d0] sm:$0xf0] }
 0x2ce   :  { %v15672_v37 = vld [vmem:[#allocation11 + $0x1910] sm:$0xf]  ;;  %v14137_v11 = vor.u32 %v17752_v62, %v14136_v61  ;;  %v14970_v41 = vld [vmem:[#allocation11 + $0x13d0] sm:$0xf0]  ;;  %v13053_v29 = vor.u32 %v17472_v48, %v13050_v17 }
 0x2cf   :  { %8961 = vmatpush.bf16.msrb.mxu0 %v12797_v9  ;;  %v18136_v2 = vld [vmem:[#allocation11 + $0x194c] sm:$0xf0]  ;;  %v8723_v9 = vpop.f32.mrf.mxu1  ;;  %8898 = vmatpush.bf16.msrb.mxu3 %v14201_v20  ;;  %v8684_v30 = vpop.f32.mrf.mxu2  ;;  %v14973_v35 = vor.u32 %v17952_v18, %v14970_v41  ;;  %v13946_v45 = vld [vmem:[#allocation11 + $0xbd0] sm:$0xf0] }
 0x2d0   :  { %v15673_v56 = vor.u32 %v18136_v2, %v15672_v37  ;;  %v14072_v12 = vld [vmem:[#allocation11 + $0xc90] sm:$0xf]  ;;  %v18080_v46 = vld [vmem:[#allocation11 + $0x1794] sm:$0xf] }
 0x2d1   :  { %8974 = vmatpush.bf16.msrb.mxu1 %v13309_v23  ;;  %8936 = vmatpush.bf16.msra.mxu2 %v15801_v36  ;;  %v17736_v13 = vld [vmem:[#allocation11 + $0xccc] sm:$0xf0]  ;;  %v17456_v36 = vld [vmem:[#allocation11 + $0x414] sm:$0xf]  ;;  %v8645_v39 = vpop.f32.mrf.mxu3 }
 0x2d2   :  { %v15608_v15 = vld [vmem:[#allocation11 + $0x1890] sm:$0xf]  ;;  %v14073_v23 = vor.u32 %v17736_v13, %v14072_v12  ;;  %v15482_v51 = vld [vmem:[#allocation11 + $0x17d0] sm:$0xf0]  ;;  %v3290_v12 = vperm.slane %v18980_v55, 3 }
 0x2d3   :  { %8962 = vmatpush.bf16.msrb.mxu0 %v12733_v26  ;;  %v18120_v24 = vld [vmem:[#allocation11 + $0x18cc] sm:$0xf0]  ;;  %8899 = vmatpush.bf16.msrb.mxu3 %v14137_v11  ;;  %v17936_v20 = vld [vmem:[#allocation11 + $0x1314] sm:$0xf]  ;;  %v15485_v37 = vor.u32 %v18080_v46, %v15482_v51 }
 0x2d4   :  { %v15609_v26 = vor.u32 %v18120_v24, %v15608_v15  ;;  %v14008_v10 = vld [vmem:[#allocation11 + $0xc10] sm:$0xf]  ;;  %v17680_v47 = vld [vmem:[#allocation11 + $0xb14] sm:$0xf] }
 0x2d5   :  { %8975 = vmatpush.bf16.msrb.mxu1 %v13245_v40  ;;  %8937 = vmatpush.bf16.msra.mxu2 %v15737_v22  ;;  %v17720_v57 = vld [vmem:[#allocation11 + $0xc4c] sm:$0xf0]  ;;  %v12986_v40 = vld [vmem:[#allocation11 + $0x450] sm:$0xf0] }
 0x2d6   :  { %v15544_v53 = vld [vmem:[#allocation11 + $0x1810] sm:$0xf]  ;;  %v14009_v49 = vor.u32 %v17720_v57, %v14008_v10  ;;  %v14906_v22 = vld [vmem:[#allocation11 + $0x1350] sm:$0xf0]  ;;  %v12989_v61 = vor.u32 %v17456_v36, %v12986_v40 }
 0x2d7   :  { %8963 = vmatpush.bf16.msrb.mxu0 %v12669_v43  ;;  %v18104_v34 = vld [vmem:[#allocation11 + $0x184c] sm:$0xf0]  ;;  %8900 = vmatpush.bf16.msrb.mxu3 %v14073_v23  ;;  %v14909_v2 = vor.u32 %v17936_v20, %v14906_v22  ;;  %v13882_v5 = vld [vmem:[#allocation11 + $0xb50] sm:$0xf0] }
 0x2d8   :  { %v16504_v43 = vld [vmem:[#allocation11 + $0x1f90] sm:$0xf]  ;;  %v15545_v31 = vor.u32 %v18104_v34, %v15544_v53  ;;  %v18064_v6 = vld [vmem:[#allocation11 + $0x1714] sm:$0xf] }
 0x2d9   :  { %8976 = vmatpush.bf16.msrb.mxu1 %v13181_v63  ;;  %8938 = vmatpush.bf16.msra.mxu2 %v15673_v56  ;;  %v18344_v32 = vld [vmem:[#allocation11 + $0x1fcc] sm:$0xf0]  ;;  %v13949_v63 = vor.u32 %v17696_v59, %v13946_v45  ;;  %v15418_v4 = vld [vmem:[#allocation11 + $0x1750] sm:$0xf0]  ;;  %v13885_v56 = vor.u32 %v17680_v47, %v13882_v5 }
 0x2da   :  { %v16505_v62 = vor.u32 %v18344_v32, %v16504_v43  ;;  %v16440_v38 = vld [vmem:[#allocation11 + $0x1f10] sm:$0xf]  ;;  %v17920_v8 = vld [vmem:[#allocation11 + $0x1294] sm:$0xf] }
 0x2db   :  { %8964 = vmatpush.bf16.msrb.mxu0 %v12605_v1  ;;  %v18328_v1 = vld [vmem:[#allocation11 + $0x1f4c] sm:$0xf0]  ;;  %8901 = vmatpush.bf16.msrb.mxu3 %v14009_v49  ;;  %v14842_v9 = vld [vmem:[#allocation11 + $0x12d0] sm:$0xf0] }
 0x2dc   :  { %v16441_v11 = vor.u32 %v18328_v1, %v16440_v38  ;;  %v16376_v13 = vld [vmem:[#allocation11 + $0x1e90] sm:$0xf]  ;;  %v14845_v15 = vor.u32 %v17920_v8, %v14842_v9  ;;  %v17664_v24 = vld [vmem:[#allocation11 + $0xa94] sm:$0xf] }
 0x2dd   :  { %8977 = vmatpush.bf16.msrb.mxu1 %v13117_v7  ;;  %8939 = vmatpush.bf16.msra.mxu2 %v15609_v26  ;;  %v18312_v7 = vld [vmem:[#allocation11 + $0x1ecc] sm:$0xf0]  ;;  %v13818_v48 = vld [vmem:[#allocation11 + $0xad0] sm:$0xf0] }
 0x2de   :  { %v18048_v17 = vld [vmem:[#allocation11 + $0x1694] sm:$0xf]  ;;  %8902 = vmatmul.bf16.vlgmr.msrb.gmra.mxu3 %v18909_v50  ;;  %v16377_v41 = vor.u32 %v18312_v7, %v16376_v13  ;;  %v13821_v23 = vor.u32 %v17664_v24, %v13818_v48  ;;  %v16312_v26 = vld [vmem:[#allocation11 + $0x1e10] sm:$0xf] }
 0x2df   :  { %8965 = vmatpush.bf16.msrb.mxu0 %v12541_v14  ;;  %8946 = vmatpush.bf16.msra.mxu3 %v16505_v62  ;;  %v15421_v14 = vor.u32 %v18064_v6, %v15418_v4  ;;  %v15354_v19 = vld [vmem:[#allocation11 + $0x16d0] sm:$0xf0]  ;;  %v18296_v10 = vld [vmem:[#allocation11 + $0x1e4c] sm:$0xf0] }
 0x2e0   :  { %v17904_v21 = vld [vmem:[#allocation11 + $0x1214] sm:$0xf]  ;;  %v16313_v43 = vor.u32 %v18296_v10, %v16312_v26  ;;  %v16248_v59 = vld [vmem:[#allocation11 + $0x1d90] sm:$0xf] }
 0x2e1   :  { %8978 = vmatpush.bf16.msrb.mxu1 %v13053_v29  ;;  %8940 = vmatpush.bf16.msra.mxu2 %v15545_v31  ;;  %v14778_v18 = vld [vmem:[#allocation11 + $0x1250] sm:$0xf0]  ;;  %v15357_v29 = vor.u32 %v18048_v17, %v15354_v19  ;;  %v18280_v45 = vld [vmem:[#allocation11 + $0x1dcc] sm:$0xf0] }
 0x2e2   :  { %v14781_v30 = vor.u32 %v17904_v21, %v14778_v18  ;;  %v13754_v53 = vld [vmem:[#allocation11 + $0xa50] sm:$0xf0]  ;;  %v16249_v1 = vor.u32 %v18280_v45, %v16248_v59  ;;  %v18264_v47 = vld [vmem:[#allocation11 + $0x1d4c] sm:$0xf0]  ;;  %v8695_v6 = vpop.f32.mrf.mxu3 }
 0x2e3   :  { %8966 = vmatpush.bf16.msrb.mxu0 %v12477_v33  ;;  %8947 = vmatpush.bf16.msra.mxu3 %v16441_v11  ;;  %v8760_v55 = vpop.f32.mrf.mxu0  ;;  %v17648_v33 = vld [vmem:[#allocation11 + $0xa14] sm:$0xf]  ;;  %v16120_v19 = vld [vmem:[#allocation11 + $0x1c90] sm:$0xf] }
 0x2e4   :  { %8941 = vmatmul.bf16.vlgmr.msra.gmra.mxu2 %v18926_v28  ;;  %v8761_v57 = vadd.f32 %v8760_v55, %v3290_v12  ;;  %v18032_v34 = vld [vmem:[#allocation11 + $0x1614] sm:$0xf]  ;;  %v13757_v32 = vor.u32 %v17648_v33, %v13754_v53  ;;  %v8696_v12 = vadd.f32 %v8695_v6, %v19006_v0  ;;  %v18248_v21 = vld [vmem:[#allocation11 + $0x1ccc] sm:$0xf0]  ;;  %v17449_v33 = vld [vmem:[#allocation11 + $0x3d4] sm:$0xf0] }
 0x2e5   :  { %8979 = vmatpush.bf16.msrb.mxu1 %v12989_v61  ;;  %8985 = vmatpush.bf16.msrb.mxu2 %v13949_v63  ;;  %v15290_v36 = vld [vmem:[#allocation11 + $0x1650] sm:$0xf0]  ;;  %v8773_v40 = vpop.f32.mrf.mxu1  ;;  %v16121_v53 = vor.u32 %v18248_v21, %v16120_v19 }
 0x2e6   :  { %8967 = vmatmul.bf16.vlgmr.msrb.gmra.mxu0 %v18901_v25  ;;  %v17888_v39 = vld [vmem:[#allocation11 + $0x1194] sm:$0xf]  ;;  %v19015_v46 = vadd.f32 %v8773_v40, %v8761_v57  ;;  %v15293_v49 = vor.u32 %v18032_v34, %v15290_v36  ;;  %v16056_v36 = vld [vmem:[#allocation11 + $0x1c10] sm:$0xf] }
 0x2e7   :  { %9011 = vmatpush.bf16.msra.mxu0 %v14973_v35  ;;  %v14714_v35 = vld [vmem:[#allocation11 + $0x11d0] sm:$0xf0]  ;;  %8948 = vmatpush.bf16.msra.mxu3 %v16377_v41  ;;  %v8734_v4 = vpop.f32.mrf.mxu2 }
 0x2e8   :  { %8980 = vmatmul.bf16.vlgmr.msrb.gmra.mxu1 %v18903_v27  ;;  %v14717_v31 = vor.u32 %v17888_v39, %v14714_v35  ;;  %v17632_v51 = vld [vmem:[#allocation11 + $0x994] sm:$0xf]  ;;  %v18232_v39 = vld [vmem:[#allocation11 + $0x1c4c] sm:$0xf0] }
 0x2e9   :  { %9024 = vmatpush.bf16.msra.mxu1 %v15485_v37  ;;  %8986 = vmatpush.bf16.msrb.mxu2 %v13885_v56  ;;  %v13690_v20 = vld [vmem:[#allocation11 + $0x9d0] sm:$0xf0] }
 0x2ea   :  { %v18016_v22 = vld [vmem:[#allocation11 + $0x1594] sm:$0xf]  ;;  %v13693_v37 = vor.u32 %v17632_v51, %v13690_v20  ;;  %v8697_v40 = vpop.f32.mrf.mxu3 }
 0x2eb   :  { %9012 = vmatpush.bf16.msra.mxu0 %v14909_v2  ;;  %v15226_v61 = vld [vmem:[#allocation11 + $0x15d0] sm:$0xf0]  ;;  %8949 = vmatpush.bf16.msra.mxu3 %v16313_v43  ;;  %v8762_v38 = vpop.f32.mrf.mxu0  ;;  %v16184_v2 = vld [vmem:[#allocation11 + $0x1d10] sm:$0xf]  ;;  %v13248_v40 = vld [vmem:[#allocation11 + $0x618] sm:$0xf] }
 0x2ec   :  { %v17872_v62 = vld [vmem:[#allocation11 + $0x1114] sm:$0xf]  ;;  %v15229_v5 = vor.u32 %v18016_v22, %v15226_v61  ;;  %v16185_v48 = vor.u32 %v18264_v47, %v16184_v2  ;;  %v17433_v2 = vld [vmem:[#allocation11 + $0x354] sm:$0xf0] }
 0x2ed   :  { %9025 = vmatpush.bf16.msra.mxu1 %v15421_v14  ;;  %8987 = vmatpush.bf16.msrb.mxu2 %v13821_v23  ;;  %v14650_v63 = vld [vmem:[#allocation11 + $0x1150] sm:$0xf0]  ;;  %v8775_v24 = vpop.f32.mrf.mxu1 }
 0x2ee   :  { %v14653_v8 = vor.u32 %v17872_v62, %v14650_v63  ;;  %v17616_v9 = vld [vmem:[#allocation11 + $0x914] sm:$0xf]  ;;  %v13440_v62 = vld [vmem:[#allocation11 + $0x798] sm:$0xf]  ;;  %v16057_v63 = vor.u32 %v18232_v39, %v16056_v36 }
 0x2ef   :  { %9013 = vmatpush.bf16.msra.mxu0 %v14845_v15  ;;  %v13626_v11 = vld [vmem:[#allocation11 + $0x950] sm:$0xf0]  ;;  %8950 = vmatpush.bf16.msra.mxu3 %v16249_v1  ;;  %v8709_v15 = vadd.f32 %v19001_v16, %v8696_v12  ;;  %v8736_v43 = vpop.f32.mrf.mxu2  ;;  %v17577_v1 = vld [vmem:[#allocation11 + $0x7d4] sm:$0xf0] }
 0x2f0   :  { %v18000_v56 = vld [vmem:[#allocation11 + $0x1514] sm:$0xf]  ;;  %v13629_v17 = vor.u32 %v17616_v9, %v13626_v11  ;;  %v13441_v9 = vor.u32 %v17577_v1, %v13440_v62  ;;  %v17529_v43 = vld [vmem:[#allocation11 + $0x654] sm:$0xf0] }
 0x2f1   :  { %9026 = vmatpush.bf16.msra.mxu1 %v15357_v29  ;;  %8988 = vmatpush.bf16.msrb.mxu2 %v13757_v32  ;;  %v15162_v13 = vld [vmem:[#allocation11 + $0x1550] sm:$0xf0]  ;;  %v8722_v0 = vadd.f32 %v19003_v52, %v8709_v15  ;;  %v17417_v15 = vld [vmem:[#allocation11 + $0x2d4] sm:$0xf0] }
 0x2f2   :  { %v17856_v7 = vld [vmem:[#allocation11 + $0x1094] sm:$0xf]  ;;  %v15165_v18 = vor.u32 %v18000_v56, %v15162_v13  ;;  %v13376_v13 = vld [vmem:[#allocation11 + $0x718] sm:$0xf] }
 0x2f3   :  { %9014 = vmatpush.bf16.msra.mxu0 %v14781_v30  ;;  %v14586_v14 = vld [vmem:[#allocation11 + $0x10d0] sm:$0xf0]  ;;  %v12928_v30 = vld [vmem:[#allocation11 + $0x398] sm:$0xf]  ;;  %v19020_v16 = vadd.f32 %v8734_v4, %v8722_v0  ;;  %8951 = vmatpush.bf16.msra.mxu3 %v16185_v48 }
 0x2f4   :  { %v14589_v55 = vor.u32 %v17856_v7, %v14586_v14  ;;  %v17600_v41 = vld [vmem:[#allocation11 + $0x894] sm:$0xf]  ;;  %v17561_v7 = vld [vmem:[#allocation11 + $0x754] sm:$0xf0] }
 0x2f5   :  { %9027 = vmatpush.bf16.msra.mxu1 %v15293_v49  ;;  %8989 = vmatpush.bf16.msrb.mxu2 %v13693_v37  ;;  %v13562_v23 = vld [vmem:[#allocation11 + $0x8d0] sm:$0xf0]  ;;  %v12929_v49 = vor.u32 %v17449_v33, %v12928_v30  ;;  %v12864_v37 = vld [vmem:[#allocation11 + $0x318] sm:$0xf]  ;;  %v13377_v21 = vor.u32 %v17561_v7, %v13376_v13 }
 0x2f6   :  { %v17984_v26 = vld [vmem:[#allocation11 + $0x1494] sm:$0xf]  ;;  %v13565_v34 = vor.u32 %v17600_v41, %v13562_v23  ;;  %v12865_v11 = vor.u32 %v17433_v2, %v12864_v37  ;;  %v12800_v14 = vld [vmem:[#allocation11 + $0x298] sm:$0xf] }
 0x2f7   :  { %9015 = vmatpush.bf16.msra.mxu0 %v14717_v31  ;;  %v15098_v10 = vld [vmem:[#allocation11 + $0x14d0] sm:$0xf0]  ;;  %8952 = vmatpush.bf16.msra.mxu3 %v16121_v53  ;;  %v13312_v23 = vld [vmem:[#allocation11 + $0x698] sm:$0xf] }
 0x2f8   :  { %v17840_v57 = vld [vmem:[#allocation11 + $0x1014] sm:$0xf]  ;;  %v15101_v35 = vor.u32 %v17984_v26, %v15098_v10  ;;  %v17545_v26 = vld [vmem:[#allocation11 + $0x6d4] sm:$0xf0] }
 0x2f9   :  { %9028 = vmatpush.bf16.msra.mxu1 %v15229_v5  ;;  %v14522_v29 = vld [vmem:[#allocation11 + $0x1050] sm:$0xf0]  ;;  %8990 = vmatpush.bf16.msrb.mxu2 %v13629_v17  ;;  %v12736_v0 = vld [vmem:[#allocation11 + $0x218] sm:$0xf] }
 0x2fa   :  { %v14525_v32 = vor.u32 %v17840_v57, %v14522_v29  ;;  %v17584_v52 = vld [vmem:[#allocation11 + $0x814] sm:$0xf]  ;;  %v17401_v10 = vld [vmem:[#allocation11 + $0x254] sm:$0xf0] }
 0x2fb   :  { %9016 = vmatpush.bf16.msra.mxu0 %v14653_v8  ;;  %v13498_v59 = vld [vmem:[#allocation11 + $0x850] sm:$0xf0]  ;;  %8953 = vmatpush.bf16.msra.mxu3 %v16057_v63  ;;  %v12737_v36 = vor.u32 %v17401_v10, %v12736_v0  ;;  %v13184_v63 = vld [vmem:[#allocation11 + $0x598] sm:$0xf] }
 0x2fc   :  { %v17968_v45 = vld [vmem:[#allocation11 + $0x1414] sm:$0xf]  ;;  %v13501_v38 = vor.u32 %v17584_v52, %v13498_v59  ;;  %v17385_v52 = vld [vmem:[#allocation11 + $0x1d4] sm:$0xf0] }
 0x2fd   :  { %9029 = vmatpush.bf16.msra.mxu1 %v15165_v18  ;;  %v15034_v31 = vld [vmem:[#allocation11 + $0x1450] sm:$0xf0]  ;;  %8991 = vmatpush.bf16.msrb.mxu2 %v13565_v34  ;;  %v12801_v18 = vor.u32 %v17417_v15, %v12800_v14  ;;  %v13313_v34 = vor.u32 %v17545_v26, %v13312_v23  ;;  %v12608_v1 = vld [vmem:[#allocation11 + $0x118] sm:$0xf] }
 0x2fe   :  { %v17824_v51 = vld [vmem:[#allocation11 + $0xf94] sm:$0xf]  ;;  %v15037_v47 = vor.u32 %v17968_v45, %v15034_v31  ;;  %8954 = vmatmul.bf16.vlgmr.msra.gmra.mxu3 %v18933_v58  ;;  %v17369_v37 = vld [vmem:[#allocation11 + $0x154] sm:$0xf0] }
 0x2ff   :  { %9017 = vmatpush.bf16.msra.mxu0 %v14589_v55  ;;  %v14458_v20 = vld [vmem:[#allocation11 + $0xfd0] sm:$0xf0]  ;;  %v13120_v7 = vld [vmem:[#allocation11 + $0x518] sm:$0xf] }
 0x300   :  { %v18208_v22 = vld [vmem:[#allocation11 + $0x1b94] sm:$0xf]  ;;  %v14461_v5 = vor.u32 %v17824_v51, %v14458_v20  ;;  %v13249_v20 = vor.u32 %v17529_v43, %v13248_v40  ;;  %v13056_v10 = vld [vmem:[#allocation11 + $0x498] sm:$0xf] }
 0x301   :  { %v15994_v61 = vld [vmem:[#allocation11 + $0x1bd0] sm:$0xf0]  ;;  %9030 = vmatpush.bf16.msra.mxu1 %v15101_v35  ;;  %8992 = vmatpush.bf16.msrb.mxu2 %v13501_v38  ;;  %v17513_v38 = vld [vmem:[#allocation11 + $0x5d4] sm:$0xf0] }
 0x302   :  { %v15997_v6 = vor.u32 %v18208_v22, %v15994_v61  ;;  %v17808_v4 = vld [vmem:[#allocation11 + $0xf14] sm:$0xf]  ;;  %8998 = vmatpush.bf16.msrb.mxu3 %v14461_v5 }
 0x303   :  { %9018 = vmatpush.bf16.msra.mxu0 %v14525_v32  ;;  %v14394_v8 = vld [vmem:[#allocation11 + $0xf50] sm:$0xf0]  ;;  %v19026_v57 = vpop.f32.mrf.mxu0  ;;  %v12672_v32 = vld [vmem:[#allocation11 + $0x198] sm:$0xf] }
 0x304   :  { %v18192_v56 = vld [vmem:[#allocation11 + $0x1b14] sm:$0xf]  ;;  %v14397_v24 = vor.u32 %v17808_v4, %v14394_v8  ;;  %8993 = vmatmul.bf16.vlgmr.msrb.gmra.mxu2 %v18907_v44  ;;  %v12673_v22 = vor.u32 %v17385_v52, %v12672_v32  ;;  %v13185_v8 = vor.u32 %v17513_v38, %v13184_v63  ;;  %v17705_v63 = vld [vmem:[#allocation11 + $0xbd4] sm:$0xf0] }
 0x305   :  { %v15930_v12 = vld [vmem:[#allocation11 + $0x1b50] sm:$0xf0]  ;;  %9031 = vmatpush.bf16.msra.mxu1 %v15037_v47  ;;  %9037 = vmatpush.bf16.msra.mxu2 %v15997_v6  ;;  %v19028_v59 = vpop.f32.mrf.mxu1  ;;  %v15488_v38 = vld [vmem:[#allocation11 + $0x1798] sm:$0xf] }
 0x306   :  { %9019 = vmatmul.bf16.vlgmr.msra.gmra.mxu0 %v18914_v3  ;;  %v15933_v48 = vor.u32 %v18192_v56, %v15930_v12  ;;  %v17792_v17 = vld [vmem:[#allocation11 + $0xe94] sm:$0xf]  ;;  %8999 = vmatpush.bf16.msrb.mxu3 %v14397_v24  ;;  %v12609_v56 = vor.u32 %v17369_v37, %v12608_v1  ;;  %v17497_v24 = vld [vmem:[#allocation11 + $0x554] sm:$0xf0] }
 0x307   :  { %9063 = vmatpush.bf16.msrb.mxu0 %v12929_v49  ;;  %v14330_v19 = vld [vmem:[#allocation11 + $0xed0] sm:$0xf0]  ;;  %v13121_v23 = vor.u32 %v17497_v24, %v13120_v7  ;;  %v17689_v7 = vld [vmem:[#allocation11 + $0xb54] sm:$0xf0] }
 0x308   :  { %v18176_v55 = vld [vmem:[#allocation11 + $0x1a94] sm:$0xf]  ;;  %9032 = vmatmul.bf16.vlgmr.msra.gmra.mxu1 %v18920_v54  ;;  %v14333_v29 = vor.u32 %v17792_v17, %v14330_v19  ;;  %v17353_v17 = vld [vmem:[#allocation11 + $0xd4] sm:$0xf0] }
 0x309   :  { %9076 = vmatpush.bf16.msrb.mxu1 %v13441_v9  ;;  %v15866_v41 = vld [vmem:[#allocation11 + $0x1ad0] sm:$0xf0]  ;;  %9038 = vmatpush.bf16.msra.mxu2 %v15933_v48  ;;  %v8747_v9 = vpop.f32.mrf.mxu3  ;;  %v12544_v48 = vld [vmem:[#allocation11 + $0x98] sm:$0xf] }
 0x30a   :  { %v15869_v30 = vor.u32 %v18176_v55, %v15866_v41  ;;  %v17776_v33 = vld [vmem:[#allocation11 + $0xe14] sm:$0xf]  ;;  %9000 = vmatpush.bf16.msrb.mxu3 %v14333_v29  ;;  %v19031_v14 = vadd.f32 %v8747_v9, %v19020_v16  ;;  %v12545_v26 = vor.u32 %v17353_v17, %v12544_v48  ;;  %v17481_v29 = vld [vmem:[#allocation11 + $0x4d4] sm:$0xf0] }
 0x30b   :  { %9064 = vmatpush.bf16.msrb.mxu0 %v12865_v11  ;;  %v14266_v53 = vld [vmem:[#allocation11 + $0xe50] sm:$0xf0]  ;;  %v8814_v2 = vpop.f32.mrf.mxu0  ;;  %v8786_v11 = vpop.f32.mrf.mxu2  ;;  %v13057_v40 = vor.u32 %v17481_v29, %v13056_v10  ;;  %v15424_v24 = vld [vmem:[#allocation11 + $0x1718] sm:$0xf] }
 0x30c   :  { %v18160_v39 = vld [vmem:[#allocation11 + $0x1a14] sm:$0xf]  ;;  %v14269_v45 = vor.u32 %v17776_v33, %v14266_v53  ;;  %v19034_v15 = vadd.f32 %v8786_v11, %v19015_v46  ;;  %v12480_v46 = vld [vmem:[#allocation11 + $0x18] sm:$0xf] }
 0x30d   :  { %9077 = vmatpush.bf16.msrb.mxu1 %v13377_v21  ;;  %v15802_v35 = vld [vmem:[#allocation11 + $0x1a50] sm:$0xf0]  ;;  %9039 = vmatpush.bf16.msra.mxu2 %v15869_v30  ;;  %v8827_v19 = vpop.f32.mrf.mxu1  ;;  %v17337_v30 = vld [vmem:[#allocation11 + $0x54] sm:$0xf0] }
 0x30e   :  { %v15805_v49 = vor.u32 %v18160_v39, %v15802_v35  ;;  %v17760_v31 = vld [vmem:[#allocation11 + $0xd94] sm:$0xf]  ;;  %9001 = vmatpush.bf16.msrb.mxu3 %v14269_v45  ;;  %v14976_v33 = vld [vmem:[#allocation11 + $0x1398] sm:$0xf]  ;;  %v12481_v52 = vor.u32 %v17337_v30, %v12480_v46 }
 0x30f   :  { %9065 = vmatpush.bf16.msrb.mxu0 %v12801_v18  ;;  %v14202_v51 = vld [vmem:[#allocation11 + $0xdd0] sm:$0xf0]  ;;  %v17961_v53 = vld [vmem:[#allocation11 + $0x13d4] sm:$0xf0] }
 0x310   :  { %v18144_v61 = vld [vmem:[#allocation11 + $0x1994] sm:$0xf]  ;;  %v14205_v47 = vor.u32 %v17760_v31, %v14202_v51  ;;  %v12992_v31 = vld [vmem:[#allocation11 + $0x418] sm:$0xf]  ;;  %v14977_v51 = vor.u32 %v17961_v53, %v14976_v33 }
 0x311   :  { %9078 = vmatpush.bf16.msrb.mxu1 %v13313_v34  ;;  %v15738_v62 = vld [vmem:[#allocation11 + $0x19d0] sm:$0xf0]  ;;  %9040 = vmatpush.bf16.msra.mxu2 %v15805_v49  ;;  %v8749_v43 = vpop.f32.mrf.mxu3  ;;  %v18089_v2 = vld [vmem:[#allocation11 + $0x17d4] sm:$0xf0] }
 0x312   :  { %v15741_v5 = vor.u32 %v18144_v61, %v15738_v62  ;;  %v17744_v6 = vld [vmem:[#allocation11 + $0xd14] sm:$0xf]  ;;  %9002 = vmatpush.bf16.msrb.mxu3 %v14205_v47  ;;  %v13952_v62 = vld [vmem:[#allocation11 + $0xb98] sm:$0xf] }
 0x313   :  { %9066 = vmatpush.bf16.msrb.mxu0 %v12737_v36  ;;  %v14138_v4 = vld [vmem:[#allocation11 + $0xd50] sm:$0xf0]  ;;  %v8788_v32 = vpop.f32.mrf.mxu2  ;;  %v14912_v47 = vld [vmem:[#allocation11 + $0x1318] sm:$0xf] }
 0x314   :  { %v18128_v12 = vld [vmem:[#allocation11 + $0x1914] sm:$0xf]  ;;  %v14141_v21 = vor.u32 %v17744_v6, %v14138_v4  ;;  %v18073_v48 = vld [vmem:[#allocation11 + $0x1754] sm:$0xf0] }
 0x315   :  { %9079 = vmatpush.bf16.msrb.mxu1 %v13249_v20  ;;  %v15674_v13 = vld [vmem:[#allocation11 + $0x1950] sm:$0xf0]  ;;  %9041 = vmatpush.bf16.msra.mxu2 %v15741_v5  ;;  %v17465_v20 = vld [vmem:[#allocation11 + $0x454] sm:$0xf0] }
 0x316   :  { %v15677_v18 = vor.u32 %v18128_v12, %v15674_v13  ;;  %v17728_v55 = vld [vmem:[#allocation11 + $0xc94] sm:$0xf]  ;;  %9003 = vmatpush.bf16.msrb.mxu3 %v14141_v21  ;;  %v17945_v5 = vld [vmem:[#allocation11 + $0x1354] sm:$0xf0]  ;;  %v12993_v6 = vor.u32 %v17465_v20, %v12992_v31 }
 0x317   :  { %9067 = vmatpush.bf16.msrb.mxu0 %v12673_v22  ;;  %v14074_v41 = vld [vmem:[#allocation11 + $0xcd0] sm:$0xf0]  ;;  %v14913_v12 = vor.u32 %v17945_v5, %v14912_v47  ;;  %v13888_v13 = vld [vmem:[#allocation11 + $0xb18] sm:$0xf] }
 0x318   :  { %v18112_v0 = vld [vmem:[#allocation11 + $0x1894] sm:$0xf]  ;;  %v14077_v34 = vor.u32 %v17728_v55, %v14074_v41  ;;  %v14848_v17 = vld [vmem:[#allocation11 + $0x1298] sm:$0xf]  ;;  %v19037_v55 = vld [vmem:[#allocation13] sm:$0xff] }
 0x319   :  { %9080 = vmatpush.bf16.msrb.mxu1 %v13185_v8  ;;  %v15610_v16 = vld [vmem:[#allocation11 + $0x18d0] sm:$0xf0]  ;;  %9042 = vmatpush.bf16.msra.mxu2 %v15677_v18  ;;  %v13953_v8 = vor.u32 %v17705_v63, %v13952_v62  ;;  %v17929_v19 = vld [vmem:[#allocation11 + $0x12d4] sm:$0xf0]  ;;  %v13889_v18 = vor.u32 %v17689_v7, %v13888_v13  ;;  %v3291_v41 = vperm.slane %v19037_v55, 4 }
 0x31a   :  { %v15613_v36 = vor.u32 %v18112_v0, %v15610_v16  ;;  %v17712_v39 = vld [vmem:[#allocation11 + $0xc14] sm:$0xf]  ;;  %9004 = vmatpush.bf16.msrb.mxu3 %v14077_v34  ;;  %v15425_v0 = vor.u32 %v18073_v48, %v15424_v24  ;;  %v14849_v16 = vor.u32 %v17929_v19, %v14848_v17  ;;  %v13824_v10 = vld [vmem:[#allocation11 + $0xa98] sm:$0xf] }
 0x31b   :  { %9068 = vmatpush.bf16.msrb.mxu0 %v12609_v56  ;;  %v14010_v35 = vld [vmem:[#allocation11 + $0xc50] sm:$0xf0]  ;;  %v15489_v56 = vor.u32 %v18089_v2, %v15488_v38  ;;  %v17673_v29 = vld [vmem:[#allocation11 + $0xad4] sm:$0xf0] }
 0x31c   :  { %v18096_v45 = vld [vmem:[#allocation11 + $0x1814] sm:$0xf]  ;;  %v14013_v1 = vor.u32 %v17712_v39, %v14010_v35  ;;  %v15360_v46 = vld [vmem:[#allocation11 + $0x1698] sm:$0xf]  ;;  %v13825_v39 = vor.u32 %v17673_v29, %v13824_v10 }
 0x31d   :  { %9081 = vmatpush.bf16.msrb.mxu1 %v13121_v23  ;;  %v15546_v49 = vld [vmem:[#allocation11 + $0x1850] sm:$0xf0]  ;;  %9043 = vmatpush.bf16.msra.mxu2 %v15613_v36  ;;  %v18057_v30 = vld [vmem:[#allocation11 + $0x16d4] sm:$0xf0] }
 0x31e   :  { %v18336_v22 = vld [vmem:[#allocation11 + $0x1f94] sm:$0xf]  ;;  %v15549_v37 = vor.u32 %v18096_v45, %v15546_v49  ;;  %9005 = vmatpush.bf16.msrb.mxu3 %v14013_v1  ;;  %v14784_v33 = vld [vmem:[#allocation11 + $0x1218] sm:$0xf]  ;;  %v15361_v32 = vor.u32 %v18057_v30, %v15360_v46 }
 0x31f   :  { %9069 = vmatpush.bf16.msrb.mxu0 %v12545_v26  ;;  %v16506_v61 = vld [vmem:[#allocation11 + $0x1fd0] sm:$0xf0]  ;;  %v17913_v53 = vld [vmem:[#allocation11 + $0x1254] sm:$0xf0] }
 0x320   :  { %v16509_v4 = vor.u32 %v18336_v22, %v16506_v61  ;;  %v18320_v9 = vld [vmem:[#allocation11 + $0x1f14] sm:$0xf]  ;;  %v13760_v45 = vld [vmem:[#allocation11 + $0xa18] sm:$0xf] }
 0x321   :  { %9082 = vmatpush.bf16.msrb.mxu1 %v13057_v40  ;;  %v16442_v11 = vld [vmem:[#allocation11 + $0x1f50] sm:$0xf0]  ;;  %9044 = vmatpush.bf16.msra.mxu2 %v15549_v37  ;;  %v17657_v49 = vld [vmem:[#allocation11 + $0xa54] sm:$0xf0]  ;;  %v8799_v17 = vpop.f32.mrf.mxu3 }
 0x322   :  { %9050 = vmatpush.bf16.msra.mxu3 %v16509_v4  ;;  %v16445_v21 = vor.u32 %v18320_v9, %v16442_v11  ;;  %v18304_v23 = vld [vmem:[#allocation11 + $0x1e94] sm:$0xf]  ;;  %v15296_v31 = vld [vmem:[#allocation11 + $0x1618] sm:$0xf]  ;;  %v13761_v63 = vor.u32 %v17657_v49, %v13760_v45  ;;  %v17441_v49 = vld [vmem:[#allocation11 + $0x39c] sm:$0xf] }
 0x323   :  { %9070 = vmatpush.bf16.msrb.mxu0 %v12481_v52  ;;  %v16378_v26 = vld [vmem:[#allocation11 + $0x1ed0] sm:$0xf0]  ;;  %9006 = vmatmul.bf16.vlgmr.msrb.gmra.mxu3 %v18909_v50  ;;  %v8864_v34 = vpop.f32.mrf.mxu0  ;;  %v14785_v52 = vor.u32 %v17913_v53, %v14784_v33  ;;  %v14720_v20 = vld [vmem:[#allocation11 + $0x1198] sm:$0xf] }
 0x324   :  { %9045 = vmatmul.bf16.vlgmr.msra.gmra.mxu2 %v18926_v28  ;;  %v16381_v36 = vor.u32 %v18304_v23, %v16378_v26  ;;  %v18288_v35 = vld [vmem:[#allocation11 + $0x1e14] sm:$0xf]  ;;  %v8865_v43 = vadd.f32 %v8864_v34, %v3291_v41  ;;  %v17897_v22 = vld [vmem:[#allocation11 + $0x11d4] sm:$0xf0]  ;;  %v8800_v26 = vadd.f32 %v8799_v17, %v19034_v15 }
 0x325   :  { %9083 = vmatpush.bf16.msrb.mxu1 %v12993_v6  ;;  %9089 = vmatpush.bf16.msrb.mxu2 %v13953_v8  ;;  %v16314_v40 = vld [vmem:[#allocation11 + $0x1e50] sm:$0xf0]  ;;  %v8877_v61 = vpop.f32.mrf.mxu1  ;;  %v14721_v47 = vor.u32 %v17897_v22, %v14720_v20  ;;  %v13696_v5 = vld [vmem:[#allocation11 + $0x998] sm:$0xf] }
 0x326   :  { %9071 = vmatmul.bf16.vlgmr.msrb.gmra.mxu0 %v18901_v25  ;;  %9051 = vmatpush.bf16.msra.mxu3 %v16445_v21  ;;  %v16317_v62 = vor.u32 %v18288_v35, %v16314_v40  ;;  %v18272_v38 = vld [vmem:[#allocation11 + $0x1d94] sm:$0xf]  ;;  %v19043_v37 = vadd.f32 %v8877_v61, %v8865_v43  ;;  %v17641_v6 = vld [vmem:[#allocation11 + $0x9d4] sm:$0xf0]  ;;  %v8813_v29 = vadd.f32 %v19026_v57, %v8800_v26 }
 0x327   :  { %9115 = vmatpush.bf16.msra.mxu0 %v14977_v51  ;;  %v18041_v51 = vld [vmem:[#allocation11 + $0x1654] sm:$0xf0]  ;;  %v16250_v1 = vld [vmem:[#allocation11 + $0x1dd0] sm:$0xf0]  ;;  %v13697_v13 = vor.u32 %v17641_v6, %v13696_v5  ;;  %v8838_v19 = vpop.f32.mrf.mxu2 }
 0x328   :  { %9084 = vmatmul.bf16.vlgmr.msrb.gmra.mxu1 %v18903_v27  ;;  %v15297_v2 = vor.u32 %v18041_v51, %v15296_v31  ;;  %v15232_v4 = vld [vmem:[#allocation11 + $0x1598] sm:$0xf]  ;;  %v18256_v7 = vld [vmem:[#allocation11 + $0x1d14] sm:$0xf]  ;;  %v8826_v15 = vadd.f32 %v19028_v59, %v8813_v29  ;;  %v12930_v31 = vld [vmem:[#allocation11 + $0x3d8] sm:$0xf0] }
 0x329   :  { %9128 = vmatpush.bf16.msra.mxu1 %v15489_v56  ;;  %9090 = vmatpush.bf16.msrb.mxu2 %v13889_v18  ;;  %v18025_v8 = vld [vmem:[#allocation11 + $0x15d4] sm:$0xf0]  ;;  %v16186_v24 = vld [vmem:[#allocation11 + $0x1d50] sm:$0xf0]  ;;  %v12933_v5 = vor.u32 %v17441_v49, %v12930_v31  ;;  %v13378_v29 = vld [vmem:[#allocation11 + $0x758] sm:$0xf0] }
 0x32a   :  { %9052 = vmatpush.bf16.msra.mxu3 %v16381_v36  ;;  %v14656_v9 = vld [vmem:[#allocation11 + $0x1118] sm:$0xf]  ;;  %v15233_v48 = vor.u32 %v18025_v8, %v15232_v4  ;;  %v16189_v30 = vor.u32 %v18256_v7, %v16186_v24  ;;  %v18240_v53 = vld [vmem:[#allocation11 + $0x1c94] sm:$0xf]  ;;  %v19048_v57 = vadd.f32 %v8838_v19, %v8826_v15  ;;  %v13442_v7 = vld [vmem:[#allocation11 + $0x7d8] sm:$0xf0] }
 0x32b   :  { %9116 = vmatpush.bf16.msra.mxu0 %v14913_v12  ;;  %v17881_v11 = vld [vmem:[#allocation11 + $0x1154] sm:$0xf0]  ;;  %v8866_v56 = vpop.f32.mrf.mxu0  ;;  %v16253_v12 = vor.u32 %v18272_v38, %v16250_v1  ;;  %v16122_v34 = vld [vmem:[#allocation11 + $0x1cd0] sm:$0xf0]  ;;  %v17425_v24 = vld [vmem:[#allocation11 + $0x31c] sm:$0xf] }
 0x32c   :  { %v14657_v21 = vor.u32 %v17881_v11, %v14656_v9  ;;  %v13632_v18 = vld [vmem:[#allocation11 + $0x918] sm:$0xf]  ;;  %v16125_v51 = vor.u32 %v18240_v53, %v16122_v34  ;;  %v18224_v22 = vld [vmem:[#allocation11 + $0x1c14] sm:$0xf]  ;;  %v17569_v56 = vld [vmem:[#allocation11 + $0x79c] sm:$0xf] }
 0x32d   :  { %9129 = vmatpush.bf16.msra.mxu1 %v15425_v0  ;;  %9091 = vmatpush.bf16.msrb.mxu2 %v13825_v39  ;;  %v17625_v41 = vld [vmem:[#allocation11 + $0x954] sm:$0xf0]  ;;  %v8879_v46 = vpop.f32.mrf.mxu1  ;;  %v16058_v61 = vld [vmem:[#allocation11 + $0x1c50] sm:$0xf0]  ;;  %v17537_v15 = vld [vmem:[#allocation11 + $0x69c] sm:$0xf] }
 0x32e   :  { %9053 = vmatpush.bf16.msra.mxu3 %v16317_v62  ;;  %v15168_v23 = vld [vmem:[#allocation11 + $0x1518] sm:$0xf]  ;;  %v13633_v33 = vor.u32 %v17625_v41, %v13632_v18  ;;  %v17409_v46 = vld [vmem:[#allocation11 + $0x29c] sm:$0xf] }
 0x32f   :  { %9117 = vmatpush.bf16.msra.mxu0 %v14849_v16  ;;  %v18009_v0 = vld [vmem:[#allocation11 + $0x1554] sm:$0xf0]  ;;  %v8840_v38 = vpop.f32.mrf.mxu2 }
 0x330   :  { %v14592_v16 = vld [vmem:[#allocation11 + $0x1098] sm:$0xf]  ;;  %v15169_v36 = vor.u32 %v18009_v0, %v15168_v23  ;;  %v13445_v23 = vor.u32 %v17569_v56, %v13442_v7  ;;  %v17505_v7 = vld [vmem:[#allocation11 + $0x59c] sm:$0xf] }
 0x331   :  { %9130 = vmatpush.bf16.msra.mxu1 %v15361_v32  ;;  %9092 = vmatpush.bf16.msrb.mxu2 %v13761_v63  ;;  %v17865_v10 = vld [vmem:[#allocation11 + $0x10d4] sm:$0xf0]  ;;  %v8801_v63 = vpop.f32.mrf.mxu3 }
 0x332   :  { %9054 = vmatpush.bf16.msra.mxu3 %v16253_v12  ;;  %v14593_v39 = vor.u32 %v17865_v10, %v14592_v16  ;;  %v13568_v35 = vld [vmem:[#allocation11 + $0x898] sm:$0xf]  ;;  %v16061_v12 = vor.u32 %v18224_v22, %v16058_v61  ;;  %v17553_v10 = vld [vmem:[#allocation11 + $0x71c] sm:$0xf] }
 0x333   :  { %9118 = vmatpush.bf16.msra.mxu0 %v14785_v52  ;;  %v17609_v40 = vld [vmem:[#allocation11 + $0x8d4] sm:$0xf0] }
 0x334   :  { %v15104_v43 = vld [vmem:[#allocation11 + $0x1498] sm:$0xf]  ;;  %v13569_v20 = vor.u32 %v17609_v40, %v13568_v35 }
 0x335   :  { %9131 = vmatpush.bf16.msra.mxu1 %v15297_v2  ;;  %9093 = vmatpush.bf16.msrb.mxu2 %v13697_v13  ;;  %v17993_v32 = vld [vmem:[#allocation11 + $0x14d4] sm:$0xf0] }
 0x336   :  { %v14528_v52 = vld [vmem:[#allocation11 + $0x1018] sm:$0xf]  ;;  %9055 = vmatpush.bf16.msra.mxu3 %v16189_v30  ;;  %v15105_v62 = vor.u32 %v17993_v32, %v15104_v43  ;;  %v12802_v30 = vld [vmem:[#allocation11 + $0x2d8] sm:$0xf0] }
 0x337   :  { %9119 = vmatpush.bf16.msra.mxu0 %v14721_v47  ;;  %v17849_v45 = vld [vmem:[#allocation11 + $0x1054] sm:$0xf0]  ;;  %v12805_v35 = vor.u32 %v17409_v46, %v12802_v30  ;;  %v13314_v32 = vld [vmem:[#allocation11 + $0x6d8] sm:$0xf0] }
 0x338   :  { %v14529_v1 = vor.u32 %v17849_v45, %v14528_v52  ;;  %v13504_v59 = vld [vmem:[#allocation11 + $0x818] sm:$0xf]  ;;  %v17393_v52 = vld [vmem:[#allocation11 + $0x21c] sm:$0xf]  ;;  %v13317_v61 = vor.u32 %v17537_v15, %v13314_v32 }
 0x339   :  { %9132 = vmatpush.bf16.msra.mxu1 %v15233_v48  ;;  %9094 = vmatpush.bf16.msrb.mxu2 %v13633_v33  ;;  %v17593_v2 = vld [vmem:[#allocation11 + $0x854] sm:$0xf0]  ;;  %v12866_v48 = vld [vmem:[#allocation11 + $0x358] sm:$0xf0] }
 0x33a   :  { %v15040_v47 = vld [vmem:[#allocation11 + $0x1418] sm:$0xf]  ;;  %9056 = vmatpush.bf16.msra.mxu3 %v16125_v51  ;;  %v13505_v13 = vor.u32 %v17593_v2, %v13504_v59  ;;  %v12869_v26 = vor.u32 %v17425_v24, %v12866_v48  ;;  %v12738_v45 = vld [vmem:[#allocation11 + $0x258] sm:$0xf0] }
 0x33b   :  { %9120 = vmatpush.bf16.msra.mxu0 %v14657_v21  ;;  %v17977_v6 = vld [vmem:[#allocation11 + $0x1454] sm:$0xf0]  ;;  %v13250_v59 = vld [vmem:[#allocation11 + $0x658] sm:$0xf0] }
 0x33c   :  { %v14464_v4 = vld [vmem:[#allocation11 + $0xf98] sm:$0xf]  ;;  %v15041_v17 = vor.u32 %v17977_v6, %v15040_v47  ;;  %v17377_v2 = vld [vmem:[#allocation11 + $0x19c] sm:$0xf] }
 0x33d   :  { %9133 = vmatpush.bf16.msra.mxu1 %v15169_v36  ;;  %v17833_v8 = vld [vmem:[#allocation11 + $0xfd4] sm:$0xf0]  ;;  %9095 = vmatpush.bf16.msrb.mxu2 %v13569_v20  ;;  %v12674_v47 = vld [vmem:[#allocation11 + $0x1d8] sm:$0xf0] }
 0x33e   :  { %v16000_v9 = vld [vmem:[#allocation11 + $0x1b98] sm:$0xf]  ;;  %v14465_v19 = vor.u32 %v17833_v8, %v14464_v4  ;;  %9057 = vmatpush.bf16.msra.mxu3 %v16061_v12  ;;  %v12677_v56 = vor.u32 %v17377_v2, %v12674_v47  ;;  %v13186_v24 = vld [vmem:[#allocation11 + $0x5d8] sm:$0xf0] }
 0x33f   :  { %9121 = vmatpush.bf16.msra.mxu0 %v14593_v39  ;;  %v18217_v11 = vld [vmem:[#allocation11 + $0x1bd4] sm:$0xf0]  ;;  %v13381_v39 = vor.u32 %v17553_v10, %v13378_v29  ;;  %v17361_v48 = vld [vmem:[#allocation11 + $0x11c] sm:$0xf] }
 0x340   :  { %v16001_v21 = vor.u32 %v18217_v11, %v16000_v9  ;;  %v14400_v18 = vld [vmem:[#allocation11 + $0xf18] sm:$0xf]  ;;  %v17489_v30 = vld [vmem:[#allocation11 + $0x51c] sm:$0xf] }
 0x341   :  { %9134 = vmatpush.bf16.msra.mxu1 %v15105_v62  ;;  %v17817_v41 = vld [vmem:[#allocation11 + $0xf54] sm:$0xf0]  ;;  %9096 = vmatpush.bf16.msrb.mxu2 %v13505_v13  ;;  %v12741_v62 = vor.u32 %v17393_v52, %v12738_v45 }
 0x342   :  { %v15936_v0 = vld [vmem:[#allocation11 + $0x1b18] sm:$0xf]  ;;  %9102 = vmatpush.bf16.msrb.mxu3 %v14465_v19  ;;  %v14401_v33 = vor.u32 %v17817_v41, %v14400_v18 }
 0x343   :  { %9122 = vmatpush.bf16.msra.mxu0 %v14529_v1  ;;  %v18201_v16 = vld [vmem:[#allocation11 + $0x1b54] sm:$0xf0]  ;;  %9058 = vmatmul.bf16.vlgmr.msra.gmra.mxu3 %v18933_v58  ;;  %v19054_v49 = vpop.f32.mrf.mxu0  ;;  %v17521_v1 = vld [vmem:[#allocation11 + $0x61c] sm:$0xf] }
 0x344   :  { %v15937_v53 = vor.u32 %v18201_v16, %v15936_v0  ;;  %v14336_v34 = vld [vmem:[#allocation11 + $0xe98] sm:$0xf]  ;;  %9097 = vmatmul.bf16.vlgmr.msrb.gmra.mxu2 %v18907_v44  ;;  %v13253_v11 = vor.u32 %v17521_v1, %v13250_v59  ;;  %v8851_v0 = vpop.f32.mrf.mxu3 }
 0x345   :  { %9135 = vmatpush.bf16.msra.mxu1 %v15041_v17  ;;  %9141 = vmatpush.bf16.msra.mxu2 %v16001_v21  ;;  %v17801_v36 = vld [vmem:[#allocation11 + $0xed4] sm:$0xf0]  ;;  %v12610_v17 = vld [vmem:[#allocation11 + $0x158] sm:$0xf0] }
 0x346   :  { %9123 = vmatmul.bf16.vlgmr.msra.gmra.mxu0 %v18914_v3  ;;  %v15872_v40 = vld [vmem:[#allocation11 + $0x1a98] sm:$0xf]  ;;  %9103 = vmatpush.bf16.msrb.mxu3 %v14401_v33  ;;  %v14337_v31 = vor.u32 %v17801_v36, %v14336_v34  ;;  %v12613_v10 = vor.u32 %v17361_v48, %v12610_v17  ;;  %v19059_v33 = vadd.f32 %v8851_v0, %v19048_v57  ;;  %v13122_v34 = vld [vmem:[#allocation11 + $0x558] sm:$0xf0] }
 0x347   :  { %9167 = vmatpush.bf16.msrb.mxu0 %v12933_v5  ;;  %v18185_v43 = vld [vmem:[#allocation11 + $0x1ad4] sm:$0xf0]  ;;  %v19056_v5 = vpop.f32.mrf.mxu1  ;;  %v8890_v16 = vpop.f32.mrf.mxu2  ;;  %v17345_v36 = vld [vmem:[#allocation11 + $0x9c] sm:$0xf]  ;;  %v13125_v52 = vor.u32 %v17489_v30, %v13122_v34 }
 0x348   :  { %9136 = vmatmul.bf16.vlgmr.msra.gmra.mxu1 %v18920_v54  ;;  %v15873_v51 = vor.u32 %v18185_v43, %v15872_v40  ;;  %v14272_v20 = vld [vmem:[#allocation11 + $0xe18] sm:$0xf]  ;;  %v13954_v48 = vld [vmem:[#allocation11 + $0xbd8] sm:$0xf0] }
 0x349   :  { %9180 = vmatpush.bf16.msrb.mxu1 %v13445_v23  ;;  %9142 = vmatpush.bf16.msra.mxu2 %v15937_v53  ;;  %v17785_v22 = vld [vmem:[#allocation11 + $0xe54] sm:$0xf0]  ;;  %v19062_v53 = vadd.f32 %v8890_v16, %v19043_v37  ;;  %v17329_v37 = vld [vmem:[#allocation11 + $0x1c] sm:$0xf] }
 0x34a   :  { %v15808_v63 = vld [vmem:[#allocation11 + $0x1a18] sm:$0xf]  ;;  %9104 = vmatpush.bf16.msrb.mxu3 %v14337_v31  ;;  %v14273_v6 = vor.u32 %v17785_v22, %v14272_v20  ;;  %v13058_v20 = vld [vmem:[#allocation11 + $0x4d8] sm:$0xf0] }
 0x34b   :  { %9168 = vmatpush.bf16.msrb.mxu0 %v12869_v26  ;;  %v18169_v38 = vld [vmem:[#allocation11 + $0x1a54] sm:$0xf0]  ;;  %v8918_v19 = vpop.f32.mrf.mxu0  ;;  %v13189_v26 = vor.u32 %v17505_v7, %v13186_v24  ;;  %v12482_v22 = vld [vmem:[#allocation11 + $0x58] sm:$0xf0] }
 0x34c   :  { %v15809_v4 = vor.u32 %v18169_v38, %v15808_v63  ;;  %v14208_v8 = vld [vmem:[#allocation11 + $0xd98] sm:$0xf]  ;;  %v8853_v47 = vpop.f32.mrf.mxu3  ;;  %v17697_v24 = vld [vmem:[#allocation11 + $0xb9c] sm:$0xf] }
 0x34d   :  { %9181 = vmatpush.bf16.msrb.mxu1 %v13381_v39  ;;  %9143 = vmatpush.bf16.msra.mxu2 %v15873_v51  ;;  %v17769_v9 = vld [vmem:[#allocation11 + $0xdd4] sm:$0xf0]  ;;  %v12546_v39 = vld [vmem:[#allocation11 + $0xd8] sm:$0xf0]  ;;  %v13957_v16 = vor.u32 %v17697_v24, %v13954_v48 }
 0x34e   :  { %v15744_v12 = vld [vmem:[#allocation11 + $0x1998] sm:$0xf]  ;;  %9105 = vmatpush.bf16.msrb.mxu3 %v14273_v6  ;;  %v14209_v21 = vor.u32 %v17769_v9, %v14208_v8  ;;  %v12549_v45 = vor.u32 %v17345_v36, %v12546_v39  ;;  %v17473_v51 = vld [vmem:[#allocation11 + $0x49c] sm:$0xf] }
 0x34f   :  { %9169 = vmatpush.bf16.msrb.mxu0 %v12805_v35  ;;  %v18153_v13 = vld [vmem:[#allocation11 + $0x19d4] sm:$0xf0]  ;;  %v8931_v35 = vpop.f32.mrf.mxu1  ;;  %v13061_v2 = vor.u32 %v17473_v51, %v13058_v20  ;;  %v8892_v6 = vpop.f32.mrf.mxu2  ;;  %v18081_v17 = vld [vmem:[#allocation11 + $0x179c] sm:$0xf] }
 0x350   :  { %v15745_v18 = vor.u32 %v18153_v13, %v15744_v12  ;;  %v14144_v41 = vld [vmem:[#allocation11 + $0xd18] sm:$0xf]  ;;  %v12994_v12 = vld [vmem:[#allocation11 + $0x458] sm:$0xf0] }
 0x351   :  { %9182 = vmatpush.bf16.msrb.mxu1 %v13317_v61  ;;  %9144 = vmatpush.bf16.msra.mxu2 %v15809_v4  ;;  %v17753_v23 = vld [vmem:[#allocation11 + $0xd54] sm:$0xf0]  ;;  %v17953_v61 = vld [vmem:[#allocation11 + $0x139c] sm:$0xf]  ;;  %v12485_v4 = vor.u32 %v17329_v37, %v12482_v22 }
 0x352   :  { %v15680_v29 = vld [vmem:[#allocation11 + $0x1918] sm:$0xf]  ;;  %9106 = vmatpush.bf16.msrb.mxu3 %v14209_v21  ;;  %v14145_v40 = vor.u32 %v17753_v23, %v14144_v41  ;;  %v17937_v41 = vld [vmem:[#allocation11 + $0x131c] sm:$0xf] }
 0x353   :  { %9170 = vmatpush.bf16.msrb.mxu0 %v12741_v62  ;;  %v18137_v46 = vld [vmem:[#allocation11 + $0x1954] sm:$0xf0]  ;;  %v14978_v62 = vld [vmem:[#allocation11 + $0x13d8] sm:$0xf0] }
 0x354   :  { %v15681_v43 = vor.u32 %v18137_v46, %v15680_v29  ;;  %v14080_v15 = vld [vmem:[#allocation11 + $0xc98] sm:$0xf]  ;;  %v14914_v23 = vld [vmem:[#allocation11 + $0x1358] sm:$0xf0] }
 0x355   :  { %9183 = vmatpush.bf16.msrb.mxu1 %v13253_v11  ;;  %9145 = vmatpush.bf16.msra.mxu2 %v15745_v18  ;;  %v17737_v32 = vld [vmem:[#allocation11 + $0xcd4] sm:$0xf0]  ;;  %v17457_v11 = vld [vmem:[#allocation11 + $0x41c] sm:$0xf]  ;;  %v14917_v30 = vor.u32 %v17937_v41, %v14914_v23 }
 0x356   :  { %v15616_v31 = vld [vmem:[#allocation11 + $0x1898] sm:$0xf]  ;;  %9107 = vmatpush.bf16.msrb.mxu3 %v14145_v40  ;;  %v14081_v63 = vor.u32 %v17737_v32, %v14080_v15  ;;  %v15490_v18 = vld [vmem:[#allocation11 + $0x17d8] sm:$0xf0] }
 0x357   :  { %9171 = vmatpush.bf16.msrb.mxu0 %v12677_v56  ;;  %v18121_v57 = vld [vmem:[#allocation11 + $0x18d4] sm:$0xf0]  ;;  %v14981_v56 = vor.u32 %v17953_v61, %v14978_v62  ;;  %v15493_v46 = vor.u32 %v18081_v17, %v15490_v18  ;;  %v17681_v34 = vld [vmem:[#allocation11 + $0xb1c] sm:$0xf] }
 0x358   :  { %v15617_v38 = vor.u32 %v18121_v57, %v15616_v31  ;;  %v14016_v1 = vld [vmem:[#allocation11 + $0xc18] sm:$0xf]  ;;  %v13890_v36 = vld [vmem:[#allocation11 + $0xb58] sm:$0xf0] }
 0x359   :  { %9184 = vmatpush.bf16.msrb.mxu1 %v13189_v26  ;;  %9146 = vmatpush.bf16.msra.mxu2 %v15681_v43  ;;  %v17721_v59 = vld [vmem:[#allocation11 + $0xc54] sm:$0xf0]  ;;  %v12997_v26 = vor.u32 %v17457_v11, %v12994_v12  ;;  %v18065_v39 = vld [vmem:[#allocation11 + $0x171c] sm:$0xf]  ;;  %v13893_v32 = vor.u32 %v17681_v34, %v13890_v36 }
 0x35a   :  { %v15552_v8 = vld [vmem:[#allocation11 + $0x1818] sm:$0xf]  ;;  %9108 = vmatpush.bf16.msrb.mxu3 %v14081_v63  ;;  %v14017_v19 = vor.u32 %v17721_v59, %v14016_v1  ;;  %v15426_v35 = vld [vmem:[#allocation11 + $0x1758] sm:$0xf0] }
 0x35b   :  { %9172 = vmatpush.bf16.msrb.mxu0 %v12613_v10  ;;  %v18105_v9 = vld [vmem:[#allocation11 + $0x1854] sm:$0xf0]  ;;  %v17921_v40 = vld [vmem:[#allocation11 + $0x129c] sm:$0xf]  ;;  %v15429_v57 = vor.u32 %v18065_v39, %v15426_v35 }
 0x35c   :  { %v16512_v13 = vld [vmem:[#allocation11 + $0x1f98] sm:$0xf]  ;;  %v15553_v21 = vor.u32 %v18105_v9, %v15552_v8  ;;  %v14850_v43 = vld [vmem:[#allocation11 + $0x12d8] sm:$0xf0] }
 0x35d   :  { %9185 = vmatpush.bf16.msrb.mxu1 %v13125_v52  ;;  %v18345_v7 = vld [vmem:[#allocation11 + $0x1fd4] sm:$0xf0]  ;;  %9147 = vmatpush.bf16.msra.mxu2 %v15617_v38  ;;  %v3292_v52 = vperm.slane %v19037_v55, 5  ;;  %v14853_v51 = vor.u32 %v17921_v40, %v14850_v43  ;;  %v17665_v20 = vld [vmem:[#allocation11 + $0xa9c] sm:$0xf] }
 0x35e   :  { %v16513_v0 = vor.u32 %v18345_v7, %v16512_v13  ;;  %v16448_v10 = vld [vmem:[#allocation11 + $0x1f18] sm:$0xf]  ;;  %9109 = vmatpush.bf16.msrb.mxu3 %v14017_v19  ;;  %v13826_v37 = vld [vmem:[#allocation11 + $0xad8] sm:$0xf0] }
 0x35f   :  { %9173 = vmatpush.bf16.msrb.mxu0 %v12549_v45  ;;  %v18329_v29 = vld [vmem:[#allocation11 + $0x1f54] sm:$0xf0]  ;;  %v18049_v22 = vld [vmem:[#allocation11 + $0x169c] sm:$0xf]  ;;  %v13829_v1 = vor.u32 %v17665_v20, %v13826_v37 }
 0x360   :  { %v16449_v15 = vor.u32 %v18329_v29, %v16448_v10  ;;  %v16384_v45 = vld [vmem:[#allocation11 + $0x1e98] sm:$0xf]  ;;  %v15362_v61 = vld [vmem:[#allocation11 + $0x16d8] sm:$0xf0] }
 0x361   :  { %9186 = vmatpush.bf16.msrb.mxu1 %v13061_v2  ;;  %9148 = vmatpush.bf16.msra.mxu2 %v15553_v21  ;;  %v18313_v31 = vld [vmem:[#allocation11 + $0x1ed4] sm:$0xf0]  ;;  %v17905_v62 = vld [vmem:[#allocation11 + $0x121c] sm:$0xf]  ;;  %v15365_v6 = vor.u32 %v18049_v22, %v15362_v61  ;;  %v8903_v40 = vpop.f32.mrf.mxu3 }
 0x362   :  { %9154 = vmatpush.bf16.msra.mxu3 %v16513_v0  ;;  %v14786_v63 = vld [vmem:[#allocation11 + $0x1258] sm:$0xf0]  ;;  %v16385_v38 = vor.u32 %v18313_v31, %v16384_v45  ;;  %v16320_v59 = vld [vmem:[#allocation11 + $0x1e18] sm:$0xf]  ;;  %v8904_v31 = vadd.f32 %v8903_v40, %v19062_v53 }
 0x363   :  { %9174 = vmatpush.bf16.msrb.mxu0 %v12485_v4  ;;  %9110 = vmatmul.bf16.vlgmr.msrb.gmra.mxu3 %v18909_v50  ;;  %v8968_v55 = vpop.f32.mrf.mxu0  ;;  %v18297_v2 = vld [vmem:[#allocation11 + $0x1e54] sm:$0xf0]  ;;  %v14789_v4 = vor.u32 %v17905_v62, %v14786_v63  ;;  %v17649_v8 = vld [vmem:[#allocation11 + $0xa1c] sm:$0xf] }
 0x364   :  { %9149 = vmatmul.bf16.vlgmr.msra.gmra.mxu2 %v18926_v28  ;;  %v8969_v47 = vadd.f32 %v8968_v55, %v3292_v52  ;;  %v13762_v9 = vld [vmem:[#allocation11 + $0xa58] sm:$0xf0]  ;;  %v16321_v24 = vor.u32 %v18297_v2, %v16320_v59  ;;  %v16256_v17 = vld [vmem:[#allocation11 + $0x1d98] sm:$0xf]  ;;  %v8917_v37 = vadd.f32 %v19054_v49, %v8904_v31 }
 0x365   :  { %9187 = vmatpush.bf16.msrb.mxu1 %v12997_v26  ;;  %9193 = vmatpush.bf16.msrb.mxu2 %v13957_v16  ;;  %v18033_v11 = vld [vmem:[#allocation11 + $0x161c] sm:$0xf]  ;;  %v8981_v7 = vpop.f32.mrf.mxu1  ;;  %v13765_v48 = vor.u32 %v17649_v8, %v13762_v9  ;;  %v18281_v19 = vld [vmem:[#allocation11 + $0x1dd4] sm:$0xf0]  ;;  %v12936_v9 = vld [vmem:[#allocation11 + $0x3a0] sm:$0xf] }
 0x366   :  { %9175 = vmatmul.bf16.vlgmr.msrb.gmra.mxu0 %v18901_v25  ;;  %9155 = vmatpush.bf16.msra.mxu3 %v16449_v15  ;;  %v17889_v12 = vld [vmem:[#allocation11 + $0x119c] sm:$0xf]  ;;  %v19069_v21 = vadd.f32 %v8981_v7, %v8969_v47  ;;  %v16192_v36 = vld [vmem:[#allocation11 + $0x1d18] sm:$0xf]  ;;  %v8930_v53 = vadd.f32 %v19056_v5, %v8917_v37  ;;  %v17562_v37 = vld [vmem:[#allocation11 + $0x75c] sm:$0xf0] }
 0x367   :  { %9219 = vmatpush.bf16.msra.mxu0 %v14981_v56  ;;  %v15298_v56 = vld [vmem:[#allocation11 + $0x1658] sm:$0xf0]  ;;  %v18265_v39 = vld [vmem:[#allocation11 + $0x1d54] sm:$0xf0]  ;;  %v8942_v43 = vpop.f32.mrf.mxu2 }
 0x368   :  { %9188 = vmatmul.bf16.vlgmr.msrb.gmra.mxu1 %v18903_v27  ;;  %v14722_v13 = vld [vmem:[#allocation11 + $0x11d8] sm:$0xf0]  ;;  %v15301_v18 = vor.u32 %v18033_v11, %v15298_v56  ;;  %v16193_v61 = vor.u32 %v18265_v39, %v16192_v36  ;;  %v16128_v63 = vld [vmem:[#allocation11 + $0x1c98] sm:$0xf]  ;;  %v17450_v11 = vld [vmem:[#allocation11 + $0x3dc] sm:$0xf0]  ;;  %v19074_v49 = vadd.f32 %v8942_v43, %v8930_v53 }
 0x369   :  { %9232 = vmatpush.bf16.msra.mxu1 %v15493_v46  ;;  %9194 = vmatpush.bf16.msrb.mxu2 %v13893_v32  ;;  %v14725_v41 = vor.u32 %v17889_v12, %v14722_v13  ;;  %v17633_v23 = vld [vmem:[#allocation11 + $0x99c] sm:$0xf]  ;;  %v18249_v55 = vld [vmem:[#allocation11 + $0x1cd4] sm:$0xf0]  ;;  %v17578_v36 = vld [vmem:[#allocation11 + $0x7dc] sm:$0xf0] }
 0x36a   :  { %9156 = vmatpush.bf16.msra.mxu3 %v16385_v38  ;;  %v13698_v26 = vld [vmem:[#allocation11 + $0x9d8] sm:$0xf0]  ;;  %v16129_v56 = vor.u32 %v18249_v55, %v16128_v63  ;;  %v16064_v13 = vld [vmem:[#allocation11 + $0x1c18] sm:$0xf]  ;;  %v12872_v39 = vld [vmem:[#allocation11 + $0x320] sm:$0xf] }
 0x36b   :  { %9220 = vmatpush.bf16.msra.mxu0 %v14917_v30  ;;  %v18017_v0 = vld [vmem:[#allocation11 + $0x159c] sm:$0xf]  ;;  %v8970_v46 = vpop.f32.mrf.mxu0  ;;  %v16257_v30 = vor.u32 %v18281_v19, %v16256_v17  ;;  %v13701_v34 = vor.u32 %v17633_v23, %v13698_v26  ;;  %v18233_v7 = vld [vmem:[#allocation11 + $0x1c54] sm:$0xf0]  ;;  %v12937_v23 = vor.u32 %v17450_v11, %v12936_v9  ;;  %v13320_v53 = vld [vmem:[#allocation11 + $0x6a0] sm:$0xf] }
 0x36c   :  { %v15234_v16 = vld [vmem:[#allocation11 + $0x15d8] sm:$0xf0]  ;;  %v13448_v46 = vld [vmem:[#allocation11 + $0x7a0] sm:$0xf] }
 0x36d   :  { %9233 = vmatpush.bf16.msra.mxu1 %v15429_v57  ;;  %9195 = vmatpush.bf16.msrb.mxu2 %v13829_v1  ;;  %v17873_v10 = vld [vmem:[#allocation11 + $0x111c] sm:$0xf]  ;;  %v15237_v35 = vor.u32 %v18017_v0, %v15234_v16  ;;  %v8983_v22 = vpop.f32.mrf.mxu1 }
 0x36e   :  { %v14658_v29 = vld [vmem:[#allocation11 + $0x1158] sm:$0xf0]  ;;  %9157 = vmatpush.bf16.msra.mxu3 %v16321_v24  ;;  %v12808_v22 = vld [vmem:[#allocation11 + $0x2a0] sm:$0xf] }
 0x36f   :  { %9221 = vmatpush.bf16.msra.mxu0 %v14853_v51  ;;  %v14661_v15 = vor.u32 %v17873_v10, %v14658_v29  ;;  %v17617_v32 = vld [vmem:[#allocation11 + $0x91c] sm:$0xf]  ;;  %v8944_v17 = vpop.f32.mrf.mxu2 }
 0x370   :  { %v13634_v52 = vld [vmem:[#allocation11 + $0x958] sm:$0xf0] }
 0x371   :  { %9234 = vmatpush.bf16.msra.mxu1 %v15365_v6  ;;  %9196 = vmatpush.bf16.msrb.mxu2 %v13765_v48  ;;  %v18001_v45 = vld [vmem:[#allocation11 + $0x151c] sm:$0xf]  ;;  %v13637_v62 = vor.u32 %v17617_v32, %v13634_v52  ;;  %v8905_v48 = vpop.f32.mrf.mxu3 }
 0x372   :  { %v15170_v57 = vld [vmem:[#allocation11 + $0x1558] sm:$0xf0]  ;;  %9158 = vmatpush.bf16.msra.mxu3 %v16257_v30  ;;  %v16065_v30 = vor.u32 %v18233_v7, %v16064_v13 }
 0x373   :  { %9222 = vmatpush.bf16.msra.mxu0 %v14789_v4  ;;  %v17857_v51 = vld [vmem:[#allocation11 + $0x109c] sm:$0xf]  ;;  %v15173_v38 = vor.u32 %v18001_v45, %v15170_v57  ;;  %v13449_v45 = vor.u32 %v17578_v36, %v13448_v46  ;;  %v13192_v36 = vld [vmem:[#allocation11 + $0x5a0] sm:$0xf] }
 0x374   :  { %v14594_v20 = vld [vmem:[#allocation11 + $0x10d8] sm:$0xf0] }
 0x375   :  { %9235 = vmatpush.bf16.msra.mxu1 %v15301_v18  ;;  %9197 = vmatpush.bf16.msrb.mxu2 %v13701_v34  ;;  %v14597_v1 = vor.u32 %v17857_v51, %v14594_v20  ;;  %v17601_v59 = vld [vmem:[#allocation11 + $0x89c] sm:$0xf]  ;;  %v13384_v20 = vld [vmem:[#allocation11 + $0x720] sm:$0xf] }
 0x376   :  { %v13570_v2 = vld [vmem:[#allocation11 + $0x8d8] sm:$0xf0]  ;;  %9159 = vmatpush.bf16.msra.mxu3 %v16193_v61  ;;  %v17418_v61 = vld [vmem:[#allocation11 + $0x2dc] sm:$0xf0] }
 0x377   :  { %9223 = vmatpush.bf16.msra.mxu0 %v14725_v41  ;;  %v17985_v47 = vld [vmem:[#allocation11 + $0x149c] sm:$0xf]  ;;  %v13573_v12 = vor.u32 %v17601_v59, %v13570_v2  ;;  %v12809_v59 = vor.u32 %v17418_v61, %v12808_v22  ;;  %v13128_v61 = vld [vmem:[#allocation11 + $0x520] sm:$0xf] }
 0x378   :  { %v15106_v6 = vld [vmem:[#allocation11 + $0x14d8] sm:$0xf0] }
 0x379   :  { %9236 = vmatpush.bf16.msra.mxu1 %v15237_v35  ;;  %v17841_v4 = vld [vmem:[#allocation11 + $0x101c] sm:$0xf]  ;;  %9198 = vmatpush.bf16.msrb.mxu2 %v13637_v62  ;;  %v15109_v24 = vor.u32 %v17985_v47, %v15106_v6  ;;  %v17434_v35 = vld [vmem:[#allocation11 + $0x35c] sm:$0xf0] }
 0x37a   :  { %v14530_v8 = vld [vmem:[#allocation11 + $0x1058] sm:$0xf0]  ;;  %9160 = vmatpush.bf16.msra.mxu3 %v16129_v56  ;;  %v12873_v31 = vor.u32 %v17434_v35, %v12872_v39  ;;  %v17546_v6 = vld [vmem:[#allocation11 + $0x6dc] sm:$0xf0] }
 0x37b   :  { %9224 = vmatpush.bf16.msra.mxu0 %v14661_v15  ;;  %v14533_v19 = vor.u32 %v17841_v4, %v14530_v8  ;;  %v17585_v5 = vld [vmem:[#allocation11 + $0x81c] sm:$0xf]  ;;  %v12744_v4 = vld [vmem:[#allocation11 + $0x220] sm:$0xf]  ;;  %v13321_v7 = vor.u32 %v17546_v6, %v13320_v53 }
 0x37c   :  { %v13506_v18 = vld [vmem:[#allocation11 + $0x858] sm:$0xf0]  ;;  %v17402_v8 = vld [vmem:[#allocation11 + $0x25c] sm:$0xf0] }
 0x37d   :  { %9237 = vmatpush.bf16.msra.mxu1 %v15173_v38  ;;  %v17969_v41 = vld [vmem:[#allocation11 + $0x141c] sm:$0xf]  ;;  %9199 = vmatpush.bf16.msrb.mxu2 %v13573_v12  ;;  %v13509_v34 = vor.u32 %v17585_v5, %v13506_v18  ;;  %v17530_v5 = vld [vmem:[#allocation11 + $0x65c] sm:$0xf0] }
 0x37e   :  { %v15042_v26 = vld [vmem:[#allocation11 + $0x1458] sm:$0xf0]  ;;  %9161 = vmatpush.bf16.msra.mxu3 %v16065_v30  ;;  %v12680_v18 = vld [vmem:[#allocation11 + $0x1a0] sm:$0xf] }
 0x37f   :  { %9225 = vmatpush.bf16.msra.mxu0 %v14597_v1  ;;  %v17825_v0 = vld [vmem:[#allocation11 + $0xf9c] sm:$0xf]  ;;  %v15045_v40 = vor.u32 %v17969_v41, %v15042_v26  ;;  %v13385_v1 = vor.u32 %v17562_v37, %v13384_v20  ;;  %v17386_v41 = vld [vmem:[#allocation11 + $0x1dc] sm:$0xf0] }
 0x380   :  { %v14466_v16 = vld [vmem:[#allocation11 + $0xfd8] sm:$0xf0]  ;;  %v12681_v46 = vor.u32 %v17386_v41, %v12680_v18  ;;  %v17514_v39 = vld [vmem:[#allocation11 + $0x5dc] sm:$0xf0] }
 0x381   :  { %v18209_v10 = vld [vmem:[#allocation11 + $0x1b9c] sm:$0xf]  ;;  %9238 = vmatpush.bf16.msra.mxu1 %v15109_v24  ;;  %v14469_v43 = vor.u32 %v17825_v0, %v14466_v16  ;;  %9200 = vmatpush.bf16.msrb.mxu2 %v13509_v34  ;;  %v12745_v24 = vor.u32 %v17402_v8, %v12744_v4  ;;  %v12616_v35 = vld [vmem:[#allocation11 + $0x120] sm:$0xf] }
 0x382   :  { %v16002_v29 = vld [vmem:[#allocation11 + $0x1bd8] sm:$0xf0]  ;;  %9162 = vmatmul.bf16.vlgmr.msra.gmra.mxu3 %v18933_v58 }
 0x383   :  { %9226 = vmatpush.bf16.msra.mxu0 %v14533_v19  ;;  %v16005_v15 = vor.u32 %v18209_v10, %v16002_v29  ;;  %v17809_v32 = vld [vmem:[#allocation11 + $0xf1c] sm:$0xf]  ;;  %9206 = vmatpush.bf16.msrb.mxu3 %v14469_v43  ;;  %v19080_v9 = vpop.f32.mrf.mxu0  ;;  %v13256_v19 = vld [vmem:[#allocation11 + $0x620] sm:$0xf] }
 0x384   :  { %v14402_v52 = vld [vmem:[#allocation11 + $0xf58] sm:$0xf0]  ;;  %9201 = vmatmul.bf16.vlgmr.msrb.gmra.mxu2 %v18907_v44  ;;  %v13257_v29 = vor.u32 %v17530_v5, %v13256_v19 }
 0x385   :  { %v18193_v57 = vld [vmem:[#allocation11 + $0x1b1c] sm:$0xf]  ;;  %9239 = vmatpush.bf16.msra.mxu1 %v15045_v40  ;;  %9245 = vmatpush.bf16.msra.mxu2 %v16005_v15  ;;  %v14405_v62 = vor.u32 %v17809_v32, %v14402_v52  ;;  %v17370_v40 = vld [vmem:[#allocation11 + $0x15c] sm:$0xf0] }
 0x386   :  { %v15938_v51 = vld [vmem:[#allocation11 + $0x1b58] sm:$0xf0]  ;;  %9227 = vmatmul.bf16.vlgmr.msra.gmra.mxu0 %v18914_v3  ;;  %v12617_v20 = vor.u32 %v17370_v40, %v12616_v35  ;;  %v17706_v35 = vld [vmem:[#allocation11 + $0xbdc] sm:$0xf0] }
 0x387   :  { %9271 = vmatpush.bf16.msrb.mxu0 %v12937_v23  ;;  %v15941_v63 = vor.u32 %v18193_v57, %v15938_v51  ;;  %v17793_v55 = vld [vmem:[#allocation11 + $0xe9c] sm:$0xf]  ;;  %9207 = vmatpush.bf16.msrb.mxu3 %v14405_v62  ;;  %v19082_v23 = vpop.f32.mrf.mxu1  ;;  %v8955_v57 = vpop.f32.mrf.mxu3  ;;  %v15496_v40 = vld [vmem:[#allocation11 + $0x17a0] sm:$0xf] }
 0x388   :  { %v14338_v38 = vld [vmem:[#allocation11 + $0xed8] sm:$0xf0]  ;;  %9240 = vmatmul.bf16.vlgmr.msra.gmra.mxu1 %v18920_v54  ;;  %v8994_v51 = vpop.f32.mrf.mxu2  ;;  %v19085_v62 = vadd.f32 %v8955_v57, %v19074_v49 }
 0x389   :  { %9284 = vmatpush.bf16.msrb.mxu1 %v13449_v45  ;;  %v18177_v2 = vld [vmem:[#allocation11 + $0x1a9c] sm:$0xf]  ;;  %9246 = vmatpush.bf16.msra.mxu2 %v15941_v63  ;;  %v14341_v11 = vor.u32 %v17793_v55, %v14338_v38  ;;  %v19088_v63 = vadd.f32 %v8994_v51, %v19069_v21  ;;  %v17498_v55 = vld [vmem:[#allocation11 + $0x55c] sm:$0xf0] }
 0x38a   :  { %v15874_v47 = vld [vmem:[#allocation11 + $0x1ad8] sm:$0xf0]  ;;  %v12552_v38 = vld [vmem:[#allocation11 + $0xa0] sm:$0xf]  ;;  %v13129_v4 = vor.u32 %v17498_v55, %v13128_v61 }
 0x38b   :  { %9272 = vmatpush.bf16.msrb.mxu0 %v12873_v31  ;;  %v15877_v56 = vor.u32 %v18177_v2, %v15874_v47  ;;  %v17777_v12 = vld [vmem:[#allocation11 + $0xe1c] sm:$0xf]  ;;  %9208 = vmatpush.bf16.msrb.mxu3 %v14341_v11  ;;  %v9022_v43 = vpop.f32.mrf.mxu0  ;;  %v13193_v31 = vor.u32 %v17514_v39, %v13192_v36  ;;  %v12488_v21 = vld [vmem:[#allocation11 + $0x20] sm:$0xf] }
 0x38c   :  { %v14274_v13 = vld [vmem:[#allocation11 + $0xe58] sm:$0xf0]  ;;  %v13960_v39 = vld [vmem:[#allocation11 + $0xba0] sm:$0xf] }
 0x38d   :  { %9285 = vmatpush.bf16.msrb.mxu1 %v13385_v1  ;;  %v18161_v48 = vld [vmem:[#allocation11 + $0x1a1c] sm:$0xf]  ;;  %9247 = vmatpush.bf16.msra.mxu2 %v15877_v56  ;;  %v14277_v26 = vor.u32 %v17777_v12, %v14274_v13  ;;  %v17354_v1 = vld [vmem:[#allocation11 + $0xdc] sm:$0xf0]  ;;  %v13961_v51 = vor.u32 %v17706_v35, %v13960_v39 }
 0x38e   :  { %v15810_v17 = vld [vmem:[#allocation11 + $0x1a58] sm:$0xf0]  ;;  %v12553_v8 = vor.u32 %v17354_v1, %v12552_v38  ;;  %v13064_v56 = vld [vmem:[#allocation11 + $0x4a0] sm:$0xf] }
 0x38f   :  { %9273 = vmatpush.bf16.msrb.mxu0 %v12809_v59  ;;  %v15813_v0 = vor.u32 %v18161_v48, %v15810_v17  ;;  %v17761_v16 = vld [vmem:[#allocation11 + $0xd9c] sm:$0xf]  ;;  %9209 = vmatpush.bf16.msrb.mxu3 %v14277_v26  ;;  %v9035_v59 = vpop.f32.mrf.mxu1  ;;  %v17482_v12 = vld [vmem:[#allocation11 + $0x4dc] sm:$0xf0]  ;;  %v8957_v41 = vpop.f32.mrf.mxu3 }
 0x390   :  { %v14210_v10 = vld [vmem:[#allocation11 + $0xdd8] sm:$0xf0]  ;;  %v17338_v13 = vld [vmem:[#allocation11 + $0x5c] sm:$0xf0]  ;;  %v13065_v18 = vor.u32 %v17482_v12, %v13064_v56  ;;  %v8996_v26 = vpop.f32.mrf.mxu2 }
 0x391   :  { %9286 = vmatpush.bf16.msrb.mxu1 %v13321_v7  ;;  %v18145_v30 = vld [vmem:[#allocation11 + $0x199c] sm:$0xf]  ;;  %9248 = vmatpush.bf16.msra.mxu2 %v15813_v0  ;;  %v14213_v15 = vor.u32 %v17761_v16, %v14210_v10  ;;  %v14984_v7 = vld [vmem:[#allocation11 + $0x13a0] sm:$0xf]  ;;  %v12489_v0 = vor.u32 %v17338_v13, %v12488_v21 }
 0x392   :  { %v15746_v34 = vld [vmem:[#allocation11 + $0x19d8] sm:$0xf0]  ;;  %v13896_v55 = vld [vmem:[#allocation11 + $0xb20] sm:$0xf] }
 0x393   :  { %9274 = vmatpush.bf16.msrb.mxu0 %v12745_v24  ;;  %v15749_v32 = vor.u32 %v18145_v30, %v15746_v34  ;;  %v17745_v52 = vld [vmem:[#allocation11 + $0xd1c] sm:$0xf]  ;;  %9210 = vmatpush.bf16.msrb.mxu3 %v14213_v15  ;;  %v17962_v24 = vld [vmem:[#allocation11 + $0x13dc] sm:$0xf0] }
 0x394   :  { %v14146_v45 = vld [vmem:[#allocation11 + $0xd58] sm:$0xf0]  ;;  %v17466_v30 = vld [vmem:[#allocation11 + $0x45c] sm:$0xf0] }
 0x395   :  { %9287 = vmatpush.bf16.msrb.mxu1 %v13257_v29  ;;  %v18129_v37 = vld [vmem:[#allocation11 + $0x191c] sm:$0xf]  ;;  %9249 = vmatpush.bf16.msra.mxu2 %v15749_v32  ;;  %v14149_v2 = vor.u32 %v17745_v52, %v14146_v45  ;;  %v13000_v29 = vld [vmem:[#allocation11 + $0x420] sm:$0xf] }
 0x396   :  { %v15682_v22 = vld [vmem:[#allocation11 + $0x1958] sm:$0xf0]  ;;  %v18090_v32 = vld [vmem:[#allocation11 + $0x17dc] sm:$0xf0] }
 0x397   :  { %9275 = vmatpush.bf16.msrb.mxu0 %v12681_v46  ;;  %v15685_v47 = vor.u32 %v18129_v37, %v15682_v22  ;;  %v17729_v53 = vld [vmem:[#allocation11 + $0xc9c] sm:$0xf]  ;;  %9211 = vmatpush.bf16.msrb.mxu3 %v14149_v2  ;;  %v14985_v46 = vor.u32 %v17962_v24, %v14984_v7  ;;  %v14920_v52 = vld [vmem:[#allocation11 + $0x1320] sm:$0xf]  ;;  %v15497_v22 = vor.u32 %v18090_v32, %v15496_v40 }
 0x398   :  { %v14082_v6 = vld [vmem:[#allocation11 + $0xcd8] sm:$0xf0]  ;;  %v17946_v45 = vld [vmem:[#allocation11 + $0x135c] sm:$0xf0] }
 0x399   :  { %9288 = vmatpush.bf16.msrb.mxu1 %v13193_v31  ;;  %v18113_v11 = vld [vmem:[#allocation11 + $0x189c] sm:$0xf]  ;;  %9250 = vmatpush.bf16.msra.mxu2 %v15685_v47  ;;  %v14085_v48 = vor.u32 %v17729_v53, %v14082_v6  ;;  %v13001_v31 = vor.u32 %v17466_v30, %v13000_v29  ;;  %v14921_v61 = vor.u32 %v17946_v45, %v14920_v52  ;;  %v17690_v38 = vld [vmem:[#allocation11 + $0xb5c] sm:$0xf0] }
 0x39a   :  { %v15618_v49 = vld [vmem:[#allocation11 + $0x18d8] sm:$0xf0]  ;;  %v15432_v1 = vld [vmem:[#allocation11 + $0x1720] sm:$0xf]  ;;  %v13897_v6 = vor.u32 %v17690_v38, %v13896_v55 }
 0x39b   :  { %9276 = vmatpush.bf16.msrb.mxu0 %v12617_v20  ;;  %v15621_v17 = vor.u32 %v18113_v11, %v15618_v49  ;;  %v17713_v19 = vld [vmem:[#allocation11 + $0xc1c] sm:$0xf]  ;;  %9212 = vmatpush.bf16.msrb.mxu3 %v14085_v48  ;;  %v18074_v59 = vld [vmem:[#allocation11 + $0x175c] sm:$0xf0] }
 0x39c   :  { %v14018_v5 = vld [vmem:[#allocation11 + $0xc58] sm:$0xf0]  ;;  %v14856_v2 = vld [vmem:[#allocation11 + $0x12a0] sm:$0xf]  ;;  %v15433_v56 = vor.u32 %v18074_v59, %v15432_v1 }
 0x39d   :  { %9289 = vmatpush.bf16.msrb.mxu1 %v13129_v4  ;;  %v18097_v16 = vld [vmem:[#allocation11 + $0x181c] sm:$0xf]  ;;  %9251 = vmatpush.bf16.msra.mxu2 %v15621_v17  ;;  %v14021_v43 = vor.u32 %v17713_v19, %v14018_v5  ;;  %v17930_v47 = vld [vmem:[#allocation11 + $0x12dc] sm:$0xf0] }
 0x39e   :  { %v15554_v10 = vld [vmem:[#allocation11 + $0x1858] sm:$0xf0]  ;;  %v19091_v4 = vld [vmem:[#allocation13] sm:$0xff]  ;;  %v14857_v12 = vor.u32 %v17930_v47, %v14856_v2 }
 0x39f   :  { %9277 = vmatpush.bf16.msrb.mxu0 %v12553_v8  ;;  %v18337_v34 = vld [vmem:[#allocation11 + $0x1f9c] sm:$0xf]  ;;  %v15557_v15 = vor.u32 %v18097_v16, %v15554_v10  ;;  %9213 = vmatpush.bf16.msrb.mxu3 %v14021_v43  ;;  %v3293_v8 = vperm.slane %v19091_v4, 6  ;;  %v13832_v21 = vld [vmem:[#allocation11 + $0xaa0] sm:$0xf] }
 0x3a0   :  { %v16514_v36 = vld [vmem:[#allocation11 + $0x1fd8] sm:$0xf0]  ;;  %v17674_v13 = vld [vmem:[#allocation11 + $0xadc] sm:$0xf0] }
 0x3a1   :  { %9290 = vmatpush.bf16.msrb.mxu1 %v13065_v18  ;;  %v16517_v57 = vor.u32 %v18337_v34, %v16514_v36  ;;  %v18321_v20 = vld [vmem:[#allocation11 + $0x1f1c] sm:$0xf]  ;;  %9252 = vmatpush.bf16.msra.mxu2 %v15557_v15  ;;  %v15368_v7 = vld [vmem:[#allocation11 + $0x16a0] sm:$0xf]  ;;  %v13833_v18 = vor.u32 %v17674_v13, %v13832_v21 }
 0x3a2   :  { %v16450_v37 = vld [vmem:[#allocation11 + $0x1f58] sm:$0xf0]  ;;  %9214 = vmatmul.bf16.vlgmr.msrb.gmra.mxu3 %v18909_v50  ;;  %v18058_v24 = vld [vmem:[#allocation11 + $0x16dc] sm:$0xf0] }
 0x3a3   :  { %9278 = vmatpush.bf16.msrb.mxu0 %v12489_v0  ;;  %9258 = vmatpush.bf16.msra.mxu3 %v16517_v57  ;;  %v16453_v53 = vor.u32 %v18321_v20, %v16450_v37  ;;  %v18305_v11 = vld [vmem:[#allocation11 + $0x1e9c] sm:$0xf]  ;;  %v14792_v48 = vld [vmem:[#allocation11 + $0x1220] sm:$0xf]  ;;  %v9072_v19 = vpop.f32.mrf.mxu0  ;;  %v15369_v16 = vor.u32 %v18058_v24, %v15368_v7 }
 0x3a4   :  { %v16386_v49 = vld [vmem:[#allocation11 + $0x1ed8] sm:$0xf0]  ;;  %9253 = vmatmul.bf16.vlgmr.msra.gmra.mxu2 %v18926_v28  ;;  %v17914_v17 = vld [vmem:[#allocation11 + $0x125c] sm:$0xf0]  ;;  %v9073_v0 = vadd.f32 %v9072_v19, %v3293_v8 }
 0x3a5   :  { %9291 = vmatpush.bf16.msrb.mxu1 %v13001_v31  ;;  %9297 = vmatpush.bf16.msrb.mxu2 %v13961_v51  ;;  %v16389_v5 = vor.u32 %v18305_v11, %v16386_v49  ;;  %v18289_v41 = vld [vmem:[#allocation11 + $0x1e1c] sm:$0xf]  ;;  %v14793_v10 = vor.u32 %v17914_v17, %v14792_v48  ;;  %v13768_v29 = vld [vmem:[#allocation11 + $0xa20] sm:$0xf]  ;;  %v9085_v35 = vpop.f32.mrf.mxu1 }
 0x3a6   :  { %9279 = vmatmul.bf16.vlgmr.msrb.gmra.mxu0 %v18901_v25  ;;  %v16322_v26 = vld [vmem:[#allocation11 + $0x1e58] sm:$0xf0]  ;;  %v15304_v30 = vld [vmem:[#allocation11 + $0x1620] sm:$0xf]  ;;  %v19097_v52 = vadd.f32 %v9085_v35, %v9073_v0 }
 0x3a7   :  { %9323 = vmatpush.bf16.msra.mxu0 %v14985_v46  ;;  %9259 = vmatpush.bf16.msra.mxu3 %v16453_v53  ;;  %v17658_v46 = vld [vmem:[#allocation11 + $0xa5c] sm:$0xf0]  ;;  %v16325_v40 = vor.u32 %v18289_v41, %v16322_v26  ;;  %v18273_v15 = vld [vmem:[#allocation11 + $0x1d9c] sm:$0xf]  ;;  %v9007_v53 = vpop.f32.mrf.mxu3 }
 0x3a8   :  { %9292 = vmatmul.bf16.vlgmr.msrb.gmra.mxu1 %v18903_v27  ;;  %v18042_v34 = vld [vmem:[#allocation11 + $0x165c] sm:$0xf0]  ;;  %v13769_v43 = vor.u32 %v17658_v46, %v13768_v29  ;;  %v16258_v32 = vld [vmem:[#allocation11 + $0x1dd8] sm:$0xf0] }
 0x3a9   :  { %9336 = vmatpush.bf16.msra.mxu1 %v15497_v22  ;;  %9298 = vmatpush.bf16.msrb.mxu2 %v13897_v6  ;;  %v14728_v36 = vld [vmem:[#allocation11 + $0x11a0] sm:$0xf]  ;;  %v15305_v45 = vor.u32 %v18042_v34, %v15304_v30  ;;  %v16261_v38 = vor.u32 %v18273_v15, %v16258_v32  ;;  %v18257_v59 = vld [vmem:[#allocation11 + $0x1d1c] sm:$0xf]  ;;  %v9046_v6 = vpop.f32.mrf.mxu2  ;;  %v17442_v34 = vld [vmem:[#allocation11 + $0x3a4] sm:$0xf] }
 0x3aa   :  { %v17898_v39 = vld [vmem:[#allocation11 + $0x11dc] sm:$0xf0]  ;;  %v16194_v2 = vld [vmem:[#allocation11 + $0x1d58] sm:$0xf0] }
 0x3ab   :  { %9324 = vmatpush.bf16.msra.mxu0 %v14921_v61  ;;  %9260 = vmatpush.bf16.msra.mxu3 %v16389_v5  ;;  %v14729_v31 = vor.u32 %v17898_v39, %v14728_v36  ;;  %v13704_v57 = vld [vmem:[#allocation11 + $0x9a0] sm:$0xf]  ;;  %v9074_v55 = vpop.f32.mrf.mxu0  ;;  %v16197_v17 = vor.u32 %v18257_v59, %v16194_v2  ;;  %v18241_v5 = vld [vmem:[#allocation11 + $0x1c9c] sm:$0xf]  ;;  %v12938_v36 = vld [vmem:[#allocation11 + $0x3e0] sm:$0xf0] }
 0x3ac   :  { %v17642_v51 = vld [vmem:[#allocation11 + $0x9dc] sm:$0xf0] }
 0x3ad   :  { %9337 = vmatpush.bf16.msra.mxu1 %v15433_v56  ;;  %9299 = vmatpush.bf16.msrb.mxu2 %v13833_v18  ;;  %v15240_v20 = vld [vmem:[#allocation11 + $0x15a0] sm:$0xf]  ;;  %v13705_v1 = vor.u32 %v17642_v51, %v13704_v57  ;;  %v9087_v48 = vpop.f32.mrf.mxu1  ;;  %v16130_v18 = vld [vmem:[#allocation11 + $0x1cd8] sm:$0xf0] }
 0x3ae   :  { %v18026_v37 = vld [vmem:[#allocation11 + $0x15dc] sm:$0xf0]  ;;  %v16133_v39 = vor.u32 %v18241_v5, %v16130_v18  ;;  %v17554_v48 = vld [vmem:[#allocation11 + $0x724] sm:$0xf] }
 0x3af   :  { %9325 = vmatpush.bf16.msra.mxu0 %v14857_v12  ;;  %v14664_v22 = vld [vmem:[#allocation11 + $0x1120] sm:$0xf]  ;;  %9261 = vmatpush.bf16.msra.mxu3 %v16325_v40  ;;  %v15241_v47 = vor.u32 %v18026_v37, %v15240_v20  ;;  %v9008_v12 = vadd.f32 %v9007_v53, %v19088_v63  ;;  %v18225_v40 = vld [vmem:[#allocation11 + $0x1c1c] sm:$0xf]  ;;  %v9009_v32 = vpop.f32.mrf.mxu3  ;;  %v12941_v20 = vor.u32 %v17442_v34, %v12938_v36  ;;  %v17426_v53 = vld [vmem:[#allocation11 + $0x324] sm:$0xf] }
 0x3b0   :  { %v17882_v61 = vld [vmem:[#allocation11 + $0x115c] sm:$0xf0]  ;;  %v12810_v5 = vld [vmem:[#allocation11 + $0x2e0] sm:$0xf0] }
 0x3b1   :  { %9338 = vmatpush.bf16.msra.mxu1 %v15369_v16  ;;  %9300 = vmatpush.bf16.msrb.mxu2 %v13769_v43  ;;  %v14665_v8 = vor.u32 %v17882_v61, %v14664_v22  ;;  %v13640_v11 = vld [vmem:[#allocation11 + $0x920] sm:$0xf]  ;;  %v9021_v24 = vadd.f32 %v19080_v9, %v9008_v12  ;;  %v16066_v43 = vld [vmem:[#allocation11 + $0x1c58] sm:$0xf0]  ;;  %v17394_v34 = vld [vmem:[#allocation11 + $0x224] sm:$0xf] }
 0x3b2   :  { %v17626_v49 = vld [vmem:[#allocation11 + $0x95c] sm:$0xf0]  ;;  %v16069_v59 = vor.u32 %v18225_v40, %v16066_v43  ;;  %v12746_v36 = vld [vmem:[#allocation11 + $0x260] sm:$0xf0] }
 0x3b3   :  { %9326 = vmatpush.bf16.msra.mxu0 %v14793_v10  ;;  %v15176_v56 = vld [vmem:[#allocation11 + $0x1520] sm:$0xf]  ;;  %9262 = vmatpush.bf16.msra.mxu3 %v16261_v38  ;;  %v13641_v19 = vor.u32 %v17626_v49, %v13640_v11  ;;  %v9034_v63 = vadd.f32 %v19082_v23, %v9021_v24 }
 0x3b4   :  { %v18010_v21 = vld [vmem:[#allocation11 + $0x155c] sm:$0xf0] }
 0x3b5   :  { %9339 = vmatpush.bf16.msra.mxu1 %v15305_v45  ;;  %v14600_v13 = vld [vmem:[#allocation11 + $0x10a0] sm:$0xf]  ;;  %9301 = vmatpush.bf16.msrb.mxu2 %v13705_v1  ;;  %v15177_v41 = vor.u32 %v18010_v21, %v15176_v56  ;;  %v19102_v9 = vadd.f32 %v9046_v6, %v9034_v63  ;;  %v9048_v45 = vpop.f32.mrf.mxu2  ;;  %v17570_v1 = vld [vmem:[#allocation11 + $0x7a4] sm:$0xf] }
 0x3b6   :  { %v17866_v7 = vld [vmem:[#allocation11 + $0x10dc] sm:$0xf0]  ;;  %v12874_v6 = vld [vmem:[#allocation11 + $0x360] sm:$0xf0]  ;;  %v12749_v45 = vor.u32 %v17394_v34, %v12746_v36 }
 0x3b7   :  { %9327 = vmatpush.bf16.msra.mxu0 %v14729_v31  ;;  %v14601_v26 = vor.u32 %v17866_v7, %v14600_v13  ;;  %v13576_v0 = vld [vmem:[#allocation11 + $0x8a0] sm:$0xf]  ;;  %9263 = vmatpush.bf16.msra.mxu3 %v16197_v17  ;;  %v12877_v13 = vor.u32 %v17426_v53, %v12874_v6  ;;  %v13386_v17 = vld [vmem:[#allocation11 + $0x760] sm:$0xf0] }
 0x3b8   :  { %v17610_v16 = vld [vmem:[#allocation11 + $0x8dc] sm:$0xf0]  ;;  %v17506_v6 = vld [vmem:[#allocation11 + $0x5a4] sm:$0xf] }
 0x3b9   :  { %9340 = vmatpush.bf16.msra.mxu1 %v15241_v47  ;;  %v15112_v10 = vld [vmem:[#allocation11 + $0x14a0] sm:$0xf]  ;;  %9302 = vmatpush.bf16.msrb.mxu2 %v13641_v19  ;;  %v13577_v35 = vor.u32 %v17610_v16, %v13576_v0  ;;  %v13450_v47 = vld [vmem:[#allocation11 + $0x7e0] sm:$0xf0]  ;;  %v13389_v16 = vor.u32 %v17554_v48, %v13386_v17 }
 0x3ba   :  { %v17994_v29 = vld [vmem:[#allocation11 + $0x14dc] sm:$0xf0]  ;;  %v13453_v21 = vor.u32 %v17570_v1, %v13450_v47  ;;  %v17410_v19 = vld [vmem:[#allocation11 + $0x2a4] sm:$0xf] }
 0x3bb   :  { %9328 = vmatpush.bf16.msra.mxu0 %v14665_v8  ;;  %v14536_v46 = vld [vmem:[#allocation11 + $0x1020] sm:$0xf]  ;;  %v15113_v15 = vor.u32 %v17994_v29, %v15112_v10  ;;  %9264 = vmatpush.bf16.msra.mxu3 %v16133_v39  ;;  %v12813_v10 = vor.u32 %v17410_v19, %v12810_v5 }
 0x3bc   :  { %v17850_v30 = vld [vmem:[#allocation11 + $0x105c] sm:$0xf0] }
 0x3bd   :  { %9341 = vmatpush.bf16.msra.mxu1 %v15177_v41  ;;  %v14537_v31 = vor.u32 %v17850_v30, %v14536_v46  ;;  %v13512_v23 = vld [vmem:[#allocation11 + $0x820] sm:$0xf]  ;;  %9303 = vmatpush.bf16.msrb.mxu2 %v13577_v35  ;;  %v17538_v46 = vld [vmem:[#allocation11 + $0x6a4] sm:$0xf] }
 0x3be   :  { %v17594_v57 = vld [vmem:[#allocation11 + $0x85c] sm:$0xf0]  ;;  %v13322_v30 = vld [vmem:[#allocation11 + $0x6e0] sm:$0xf0] }
 0x3bf   :  { %9329 = vmatpush.bf16.msra.mxu0 %v14601_v26  ;;  %v15048_v51 = vld [vmem:[#allocation11 + $0x1420] sm:$0xf]  ;;  %v13513_v2 = vor.u32 %v17594_v57, %v13512_v23  ;;  %9265 = vmatpush.bf16.msra.mxu3 %v16069_v59  ;;  %v13325_v32 = vor.u32 %v17538_v46, %v13322_v30  ;;  %v17522_v57 = vld [vmem:[#allocation11 + $0x624] sm:$0xf] }
 0x3c0   :  { %v17978_v37 = vld [vmem:[#allocation11 + $0x145c] sm:$0xf0] }
 0x3c1   :  { %v14472_v22 = vld [vmem:[#allocation11 + $0xfa0] sm:$0xf]  ;;  %9342 = vmatpush.bf16.msra.mxu1 %v15113_v15  ;;  %v15049_v8 = vor.u32 %v17978_v37, %v15048_v51  ;;  %9304 = vmatpush.bf16.msrb.mxu2 %v13513_v2  ;;  %v13258_v51 = vld [vmem:[#allocation11 + $0x660] sm:$0xf0] }
 0x3c2   :  { %v17834_v61 = vld [vmem:[#allocation11 + $0xfdc] sm:$0xf0]  ;;  %9266 = vmatmul.bf16.vlgmr.msra.gmra.mxu3 %v18933_v58  ;;  %v12682_v37 = vld [vmem:[#allocation11 + $0x1e0] sm:$0xf0]  ;;  %v13261_v59 = vor.u32 %v17522_v57, %v13258_v51 }
 0x3c3   :  { %v16008_v55 = vld [vmem:[#allocation11 + $0x1ba0] sm:$0xf]  ;;  %9330 = vmatpush.bf16.msra.mxu0 %v14537_v31  ;;  %v14473_v11 = vor.u32 %v17834_v61, %v14472_v22  ;;  %v19108_v39 = vpop.f32.mrf.mxu0 }
 0x3c4   :  { %v18218_v38 = vld [vmem:[#allocation11 + $0x1bdc] sm:$0xf0]  ;;  %9305 = vmatmul.bf16.vlgmr.msrb.gmra.mxu2 %v18907_v44 }
 0x3c5   :  { %v16009_v49 = vor.u32 %v18218_v38, %v16008_v55  ;;  %v14408_v56 = vld [vmem:[#allocation11 + $0xf20] sm:$0xf]  ;;  %9343 = vmatpush.bf16.msra.mxu1 %v15049_v8  ;;  %9310 = vmatpush.bf16.msrb.mxu3 %v14473_v11  ;;  %v19110_v22 = vpop.f32.mrf.mxu1  ;;  %v13194_v8 = vld [vmem:[#allocation11 + $0x5e0] sm:$0xf0] }
 0x3c6   :  { %v17818_v12 = vld [vmem:[#allocation11 + $0xf5c] sm:$0xf0]  ;;  %9331 = vmatmul.bf16.vlgmr.msra.gmra.mxu0 %v18914_v3  ;;  %v17362_v11 = vld [vmem:[#allocation11 + $0x124] sm:$0xf]  ;;  %v9059_v48 = vpop.f32.mrf.mxu3 }
 0x3c7   :  { %9375 = vmatpush.bf16.msrb.mxu0 %v12941_v20  ;;  %v15944_v7 = vld [vmem:[#allocation11 + $0x1b20] sm:$0xf]  ;;  %9349 = vmatpush.bf16.msra.mxu2 %v16009_v49  ;;  %v14409_v18 = vor.u32 %v17818_v12, %v14408_v56  ;;  %v17378_v20 = vld [vmem:[#allocation11 + $0x1a4] sm:$0xf]  ;;  %v9098_v17 = vpop.f32.mrf.mxu2 }
 0x3c8   :  { %v18202_v24 = vld [vmem:[#allocation11 + $0x1b5c] sm:$0xf0]  ;;  %9344 = vmatmul.bf16.vlgmr.msra.gmra.mxu1 %v18920_v54  ;;  %v12685_v2 = vor.u32 %v17378_v20, %v12682_v37  ;;  %v12618_v49 = vld [vmem:[#allocation11 + $0x160] sm:$0xf0] }
 0x3c9   :  { %v15945_v41 = vor.u32 %v18202_v24, %v15944_v7  ;;  %v14344_v26 = vld [vmem:[#allocation11 + $0xea0] sm:$0xf]  ;;  %9388 = vmatpush.bf16.msrb.mxu1 %v13453_v21  ;;  %9311 = vmatpush.bf16.msrb.mxu3 %v14409_v18  ;;  %v13197_v24 = vor.u32 %v17506_v6, %v13194_v8  ;;  %v12621_v19 = vor.u32 %v17362_v11, %v12618_v49  ;;  %v13002_v6 = vld [vmem:[#allocation11 + $0x460] sm:$0xf0] }
 0x3ca   :  { %v17802_v0 = vld [vmem:[#allocation11 + $0xedc] sm:$0xf0]  ;;  %v17698_v49 = vld [vmem:[#allocation11 + $0xba4] sm:$0xf] }
 0x3cb   :  { %9376 = vmatpush.bf16.msrb.mxu0 %v12877_v13  ;;  %v15880_v63 = vld [vmem:[#allocation11 + $0x1aa0] sm:$0xf]  ;;  %9350 = vmatpush.bf16.msra.mxu2 %v15945_v41  ;;  %v14345_v35 = vor.u32 %v17802_v0, %v14344_v26  ;;  %v9126_v56 = vpop.f32.mrf.mxu0  ;;  %v17490_v41 = vld [vmem:[#allocation11 + $0x524] sm:$0xf]  ;;  %v19113_v26 = vadd.f32 %v9059_v48, %v19102_v9  ;;  %v19116_v0 = vadd.f32 %v9098_v17, %v19097_v52 }
 0x3cc   :  { %v18186_v29 = vld [vmem:[#allocation11 + $0x1adc] sm:$0xf0]  ;;  %v17330_v52 = vld [vmem:[#allocation11 + $0x24] sm:$0xf] }
 0x3cd   :  { %v15881_v40 = vor.u32 %v18186_v29, %v15880_v63  ;;  %v14280_v43 = vld [vmem:[#allocation11 + $0xe20] sm:$0xf]  ;;  %9389 = vmatpush.bf16.msrb.mxu1 %v13389_v16  ;;  %9312 = vmatpush.bf16.msrb.mxu3 %v14345_v35  ;;  %v13130_v16 = vld [vmem:[#allocation11 + $0x560] sm:$0xf0]  ;;  %v9139_v29 = vpop.f32.mrf.mxu1 }
 0x3ce   :  { %v17786_v15 = vld [vmem:[#allocation11 + $0xe5c] sm:$0xf0]  ;;  %v12554_v63 = vld [vmem:[#allocation11 + $0xe0] sm:$0xf0]  ;;  %v13133_v35 = vor.u32 %v17490_v41, %v13130_v16 }
 0x3cf   :  { %9377 = vmatpush.bf16.msrb.mxu0 %v12813_v10  ;;  %v15816_v31 = vld [vmem:[#allocation11 + $0x1a20] sm:$0xf]  ;;  %9351 = vmatpush.bf16.msra.mxu2 %v15881_v40  ;;  %v14281_v61 = vor.u32 %v17786_v15, %v14280_v43  ;;  %v17346_v10 = vld [vmem:[#allocation11 + $0xa4] sm:$0xf] }
 0x3d0   :  { %v18170_v23 = vld [vmem:[#allocation11 + $0x1a5c] sm:$0xf0]  ;;  %v12557_v40 = vor.u32 %v17346_v10, %v12554_v63  ;;  %v17474_v15 = vld [vmem:[#allocation11 + $0x4a4] sm:$0xf] }
 0x3d1   :  { %v15817_v55 = vor.u32 %v18170_v23, %v15816_v31  ;;  %v14216_v38 = vld [vmem:[#allocation11 + $0xda0] sm:$0xf]  ;;  %9390 = vmatpush.bf16.msrb.mxu1 %v13325_v32  ;;  %9313 = vmatpush.bf16.msrb.mxu3 %v14281_v61  ;;  %v13066_v32 = vld [vmem:[#allocation11 + $0x4e0] sm:$0xf0] }
 0x3d2   :  { %v17770_v1 = vld [vmem:[#allocation11 + $0xddc] sm:$0xf0]  ;;  %v17954_v31 = vld [vmem:[#allocation11 + $0x13a4] sm:$0xf]  ;;  %v13069_v61 = vor.u32 %v17474_v15, %v13066_v32 }
 0x3d3   :  { %9378 = vmatpush.bf16.msrb.mxu0 %v12749_v45  ;;  %v15752_v47 = vld [vmem:[#allocation11 + $0x19a0] sm:$0xf]  ;;  %9352 = vmatpush.bf16.msra.mxu2 %v15817_v55  ;;  %v14217_v12 = vor.u32 %v17770_v1, %v14216_v38  ;;  %v12490_v45 = vld [vmem:[#allocation11 + $0x60] sm:$0xf0]  ;;  %v9061_v55 = vpop.f32.mrf.mxu3  ;;  %v9100_v38 = vpop.f32.mrf.mxu2 }
 0x3d4   :  { %v18154_v53 = vld [vmem:[#allocation11 + $0x19dc] sm:$0xf0]  ;;  %v14986_v23 = vld [vmem:[#allocation11 + $0x13e0] sm:$0xf0]  ;;  %v12493_v1 = vor.u32 %v17330_v52, %v12490_v45 }
 0x3d5   :  { %v15753_v21 = vor.u32 %v18154_v53, %v15752_v47  ;;  %v14152_v13 = vld [vmem:[#allocation11 + $0xd20] sm:$0xf]  ;;  %9391 = vmatpush.bf16.msrb.mxu1 %v13261_v59  ;;  %9314 = vmatpush.bf16.msrb.mxu3 %v14217_v12  ;;  %v17458_v47 = vld [vmem:[#allocation11 + $0x424] sm:$0xf]  ;;  %v14989_v53 = vor.u32 %v17954_v31, %v14986_v23 }
 0x3d6   :  { %v17754_v7 = vld [vmem:[#allocation11 + $0xd5c] sm:$0xf0]  ;;  %v13962_v56 = vld [vmem:[#allocation11 + $0xbe0] sm:$0xf0]  ;;  %v13005_v17 = vor.u32 %v17458_v47, %v13002_v6 }
 0x3d7   :  { %9379 = vmatpush.bf16.msrb.mxu0 %v12685_v2  ;;  %v15688_v5 = vld [vmem:[#allocation11 + $0x1920] sm:$0xf]  ;;  %9353 = vmatpush.bf16.msra.mxu2 %v15753_v21  ;;  %v14153_v46 = vor.u32 %v17754_v7, %v14152_v13  ;;  %v18082_v12 = vld [vmem:[#allocation11 + $0x17a4] sm:$0xf] }
 0x3d8   :  { %v18138_v18 = vld [vmem:[#allocation11 + $0x195c] sm:$0xf0]  ;;  %v15498_v7 = vld [vmem:[#allocation11 + $0x17e0] sm:$0xf0] }
 0x3d9   :  { %v15689_v30 = vor.u32 %v18138_v18, %v15688_v5  ;;  %v14088_v34 = vld [vmem:[#allocation11 + $0xca0] sm:$0xf]  ;;  %9392 = vmatpush.bf16.msrb.mxu1 %v13197_v24  ;;  %9315 = vmatpush.bf16.msrb.mxu3 %v14153_v46  ;;  %v17938_v24 = vld [vmem:[#allocation11 + $0x1324] sm:$0xf]  ;;  %v13965_v5 = vor.u32 %v17698_v49, %v13962_v56  ;;  %v15501_v16 = vor.u32 %v18082_v12, %v15498_v7 }
 0x3da   :  { %v17738_v36 = vld [vmem:[#allocation11 + $0xcdc] sm:$0xf0]  ;;  %v14922_v48 = vld [vmem:[#allocation11 + $0x1360] sm:$0xf0] }
 0x3db   :  { %9380 = vmatpush.bf16.msrb.mxu0 %v12621_v19  ;;  %v15624_v43 = vld [vmem:[#allocation11 + $0x18a0] sm:$0xf]  ;;  %9354 = vmatpush.bf16.msra.mxu2 %v15689_v30  ;;  %v14089_v57 = vor.u32 %v17738_v36, %v14088_v34  ;;  %v14925_v10 = vor.u32 %v17938_v24, %v14922_v48  ;;  %v17682_v63 = vld [vmem:[#allocation11 + $0xb24] sm:$0xf] }
 0x3dc   :  { %v18122_v9 = vld [vmem:[#allocation11 + $0x18dc] sm:$0xf0]  ;;  %v13898_v29 = vld [vmem:[#allocation11 + $0xb60] sm:$0xf0] }
 0x3dd   :  { %v15625_v51 = vor.u32 %v18122_v9, %v15624_v43  ;;  %v14024_v20 = vld [vmem:[#allocation11 + $0xc20] sm:$0xf]  ;;  %9393 = vmatpush.bf16.msrb.mxu1 %v13133_v35  ;;  %9316 = vmatpush.bf16.msrb.mxu3 %v14089_v57  ;;  %v18066_v46 = vld [vmem:[#allocation11 + $0x1724] sm:$0xf]  ;;  %v3294_v43 = vperm.slane %v19091_v4, 7 }
 0x3de   :  { %v17722_v37 = vld [vmem:[#allocation11 + $0xc5c] sm:$0xf0]  ;;  %v15434_v30 = vld [vmem:[#allocation11 + $0x1760] sm:$0xf0] }
 0x3df   :  { %9381 = vmatpush.bf16.msrb.mxu0 %v12557_v40  ;;  %v15560_v59 = vld [vmem:[#allocation11 + $0x1820] sm:$0xf]  ;;  %9355 = vmatpush.bf16.msra.mxu2 %v15625_v51  ;;  %v14025_v21 = vor.u32 %v17722_v37, %v14024_v20  ;;  %v17922_v34 = vld [vmem:[#allocation11 + $0x12a4] sm:$0xf]  ;;  %v13901_v40 = vor.u32 %v17682_v63, %v13898_v29  ;;  %v15437_v32 = vor.u32 %v18066_v46, %v15434_v30 }
 0x3e0   :  { %v18106_v2 = vld [vmem:[#allocation11 + $0x185c] sm:$0xf0]  ;;  %v14858_v36 = vld [vmem:[#allocation11 + $0x12e0] sm:$0xf0] }
 0x3e1   :  { %v16520_v8 = vld [vmem:[#allocation11 + $0x1fa0] sm:$0xf]  ;;  %v15561_v13 = vor.u32 %v18106_v2, %v15560_v59  ;;  %9394 = vmatpush.bf16.msrb.mxu1 %v13069_v61  ;;  %9317 = vmatpush.bf16.msrb.mxu3 %v14025_v21  ;;  %v14861_v52 = vor.u32 %v17922_v34, %v14858_v36  ;;  %v17666_v45 = vld [vmem:[#allocation11 + $0xaa4] sm:$0xf] }
 0x3e2   :  { %v18346_v11 = vld [vmem:[#allocation11 + $0x1fdc] sm:$0xf0]  ;;  %v13834_v31 = vld [vmem:[#allocation11 + $0xae0] sm:$0xf0] }
 0x3e3   :  { %9382 = vmatpush.bf16.msrb.mxu0 %v12493_v1  ;;  %v16521_v19 = vor.u32 %v18346_v11, %v16520_v8  ;;  %v16456_v18 = vld [vmem:[#allocation11 + $0x1f20] sm:$0xf]  ;;  %9356 = vmatpush.bf16.msra.mxu2 %v15561_v13  ;;  %v18050_v23 = vld [vmem:[#allocation11 + $0x16a4] sm:$0xf]  ;;  %v9176_v4 = vpop.f32.mrf.mxu0  ;;  %v13837_v61 = vor.u32 %v17666_v45, %v13834_v31 }
 0x3e4   :  { %v18330_v41 = vld [vmem:[#allocation11 + $0x1f5c] sm:$0xf0]  ;;  %9318 = vmatmul.bf16.vlgmr.msrb.gmra.mxu3 %v18909_v50  ;;  %v15370_v57 = vld [vmem:[#allocation11 + $0x16e0] sm:$0xf0]  ;;  %v9177_v1 = vadd.f32 %v9176_v4, %v3294_v43 }
 0x3e5   :  { %9395 = vmatpush.bf16.msrb.mxu1 %v13005_v17  ;;  %9362 = vmatpush.bf16.msra.mxu3 %v16521_v19  ;;  %v16457_v35 = vor.u32 %v18330_v41, %v16456_v18  ;;  %v16392_v9 = vld [vmem:[#allocation11 + $0x1ea0] sm:$0xf]  ;;  %v17906_v51 = vld [vmem:[#allocation11 + $0x1224] sm:$0xf]  ;;  %v15373_v59 = vor.u32 %v18050_v23, %v15370_v57  ;;  %v9189_v56 = vpop.f32.mrf.mxu1 }
 0x3e6   :  { %9383 = vmatmul.bf16.vlgmr.msrb.gmra.mxu0 %v18901_v25  ;;  %v18314_v15 = vld [vmem:[#allocation11 + $0x1edc] sm:$0xf0]  ;;  %9357 = vmatmul.bf16.vlgmr.msra.gmra.mxu2 %v18926_v28  ;;  %v14794_v20 = vld [vmem:[#allocation11 + $0x1260] sm:$0xf0]  ;;  %v19123_v24 = vadd.f32 %v9189_v56, %v9177_v1 }
 0x3e7   :  { %9427 = vmatpush.bf16.msra.mxu0 %v14989_v53  ;;  %9401 = vmatpush.bf16.msrb.mxu2 %v13965_v5  ;;  %v16393_v37 = vor.u32 %v18314_v15, %v16392_v9  ;;  %v16328_v55 = vld [vmem:[#allocation11 + $0x1e20] sm:$0xf]  ;;  %v14797_v2 = vor.u32 %v17906_v51, %v14794_v20  ;;  %v17650_v47 = vld [vmem:[#allocation11 + $0xa24] sm:$0xf] }
 0x3e8   :  { %9396 = vmatmul.bf16.vlgmr.msrb.gmra.mxu1 %v18903_v27  ;;  %v18298_v38 = vld [vmem:[#allocation11 + $0x1e5c] sm:$0xf0]  ;;  %v13770_v53 = vld [vmem:[#allocation11 + $0xa60] sm:$0xf0] }
 0x3e9   :  { %9440 = vmatpush.bf16.msra.mxu1 %v15501_v16  ;;  %9363 = vmatpush.bf16.msra.mxu3 %v16457_v35  ;;  %v18034_v6 = vld [vmem:[#allocation11 + $0x1624] sm:$0xf]  ;;  %v16329_v12 = vor.u32 %v18298_v38, %v16328_v55  ;;  %v13773_v21 = vor.u32 %v17650_v47, %v13770_v53  ;;  %v16264_v13 = vld [vmem:[#allocation11 + $0x1da0] sm:$0xf]  ;;  %v9111_v35 = vpop.f32.mrf.mxu3 }
 0x3ea   :  { %v15306_v8 = vld [vmem:[#allocation11 + $0x1660] sm:$0xf0]  ;;  %v18282_v7 = vld [vmem:[#allocation11 + $0x1ddc] sm:$0xf0] }
 0x3eb   :  { %9428 = vmatpush.bf16.msra.mxu0 %v14925_v10  ;;  %9402 = vmatpush.bf16.msrb.mxu2 %v13901_v40  ;;  %v17890_v11 = vld [vmem:[#allocation11 + $0x11a4] sm:$0xf]  ;;  %v15309_v48 = vor.u32 %v18034_v6, %v15306_v8  ;;  %v9178_v63 = vpop.f32.mrf.mxu0  ;;  %v16265_v29 = vor.u32 %v18282_v7, %v16264_v13  ;;  %v16200_v30 = vld [vmem:[#allocation11 + $0x1d20] sm:$0xf]  ;;  %v9150_v40 = vpop.f32.mrf.mxu2  ;;  %v12944_v8 = vld [vmem:[#allocation11 + $0x3a8] sm:$0xf] }
 0x3ec   :  { %v14730_v49 = vld [vmem:[#allocation11 + $0x11e0] sm:$0xf0]  ;;  %v18266_v34 = vld [vmem:[#allocation11 + $0x1d5c] sm:$0xf0] }
 0x3ed   :  { %9441 = vmatpush.bf16.msra.mxu1 %v15437_v32  ;;  %9364 = vmatpush.bf16.msra.mxu3 %v16393_v37  ;;  %v14733_v17 = vor.u32 %v17890_v11, %v14730_v49  ;;  %v17634_v19 = vld [vmem:[#allocation11 + $0x9a4] sm:$0xf]  ;;  %v9191_v51 = vpop.f32.mrf.mxu1  ;;  %v16201_v20 = vor.u32 %v18266_v34, %v16200_v30  ;;  %v16136_v37 = vld [vmem:[#allocation11 + $0x1ca0] sm:$0xf]  ;;  %v17451_v11 = vld [vmem:[#allocation11 + $0x3e4] sm:$0xf0] }
 0x3ee   :  { %v13706_v5 = vld [vmem:[#allocation11 + $0x9e0] sm:$0xf0]  ;;  %v13392_v51 = vld [vmem:[#allocation11 + $0x728] sm:$0xf] }
 0x3ef   :  { %9429 = vmatpush.bf16.msra.mxu0 %v14861_v52  ;;  %9403 = vmatpush.bf16.msrb.mxu2 %v13837_v61  ;;  %v18018_v18 = vld [vmem:[#allocation11 + $0x15a4] sm:$0xf]  ;;  %v13709_v46 = vor.u32 %v17634_v19, %v13706_v5  ;;  %v9112_v52 = vadd.f32 %v9111_v35, %v19116_v0  ;;  %v18250_v61 = vld [vmem:[#allocation11 + $0x1cdc] sm:$0xf0]  ;;  %v12880_v35 = vld [vmem:[#allocation11 + $0x328] sm:$0xf] }
 0x3f0   :  { %v15242_v41 = vld [vmem:[#allocation11 + $0x15e0] sm:$0xf0]  ;;  %v16137_v49 = vor.u32 %v18250_v61, %v16136_v37  ;;  %v17419_v37 = vld [vmem:[#allocation11 + $0x2e4] sm:$0xf0] }
 0x3f1   :  { %9442 = vmatpush.bf16.msra.mxu1 %v15373_v59  ;;  %v17874_v16 = vld [vmem:[#allocation11 + $0x1124] sm:$0xf]  ;;  %9365 = vmatpush.bf16.msra.mxu3 %v16329_v12  ;;  %v15245_v36 = vor.u32 %v18018_v18, %v15242_v41  ;;  %v9125_v57 = vadd.f32 %v19108_v39, %v9112_v52  ;;  %v16072_v12 = vld [vmem:[#allocation11 + $0x1c20] sm:$0xf]  ;;  %v9113_v7 = vpop.f32.mrf.mxu3  ;;  %v12945_v18 = vor.u32 %v17451_v11, %v12944_v8  ;;  %v12752_v8 = vld [vmem:[#allocation11 + $0x228] sm:$0xf] }
 0x3f2   :  { %v14666_v10 = vld [vmem:[#allocation11 + $0x1160] sm:$0xf0]  ;;  %v17403_v11 = vld [vmem:[#allocation11 + $0x264] sm:$0xf0] }
 0x3f3   :  { %9430 = vmatpush.bf16.msra.mxu0 %v14797_v2  ;;  %9404 = vmatpush.bf16.msrb.mxu2 %v13773_v21  ;;  %v14669_v43 = vor.u32 %v17874_v16, %v14666_v10  ;;  %v17618_v9 = vld [vmem:[#allocation11 + $0x924] sm:$0xf]  ;;  %v9138_v0 = vadd.f32 %v19110_v22, %v9125_v57  ;;  %v18234_v21 = vld [vmem:[#allocation11 + $0x1c5c] sm:$0xf0] }
 0x3f4   :  { %v13642_v15 = vld [vmem:[#allocation11 + $0x960] sm:$0xf0]  ;;  %v16073_v30 = vor.u32 %v18234_v21, %v16072_v12 }
 0x3f5   :  { %9443 = vmatpush.bf16.msra.mxu1 %v15309_v48  ;;  %v18002_v32 = vld [vmem:[#allocation11 + $0x1524] sm:$0xf]  ;;  %9366 = vmatpush.bf16.msra.mxu3 %v16265_v29  ;;  %v13645_v4 = vor.u32 %v17618_v9, %v13642_v15  ;;  %v19128_v39 = vadd.f32 %v9150_v40, %v9138_v0  ;;  %v9152_v48 = vpop.f32.mrf.mxu2  ;;  %v17435_v40 = vld [vmem:[#allocation11 + $0x364] sm:$0xf0] }
 0x3f6   :  { %v15178_v45 = vld [vmem:[#allocation11 + $0x1560] sm:$0xf0]  ;;  %v12753_v48 = vor.u32 %v17403_v11, %v12752_v8 }
 0x3f7   :  { %9431 = vmatpush.bf16.msra.mxu0 %v14733_v17  ;;  %v17858_v31 = vld [vmem:[#allocation11 + $0x10a4] sm:$0xf]  ;;  %9405 = vmatpush.bf16.msrb.mxu2 %v13709_v46  ;;  %v15181_v55 = vor.u32 %v18002_v32, %v15178_v45  ;;  %v13456_v46 = vld [vmem:[#allocation11 + $0x7a8] sm:$0xf] }
 0x3f8   :  { %v14602_v23 = vld [vmem:[#allocation11 + $0x10e0] sm:$0xf0] }
 0x3f9   :  { %9444 = vmatpush.bf16.msra.mxu1 %v15245_v36  ;;  %v14605_v38 = vor.u32 %v17858_v31, %v14602_v23  ;;  %v17602_v1 = vld [vmem:[#allocation11 + $0x8a4] sm:$0xf]  ;;  %9367 = vmatpush.bf16.msra.mxu3 %v16201_v20  ;;  %v17579_v36 = vld [vmem:[#allocation11 + $0x7e4] sm:$0xf0]  ;;  %v12881_v31 = vor.u32 %v17435_v40, %v12880_v35 }
 0x3fa   :  { %v13578_v59 = vld [vmem:[#allocation11 + $0x8e0] sm:$0xf0]  ;;  %v13457_v45 = vor.u32 %v17579_v36, %v13456_v46  ;;  %v17563_v20 = vld [vmem:[#allocation11 + $0x764] sm:$0xf0] }
 0x3fb   :  { %9432 = vmatpush.bf16.msra.mxu0 %v14669_v43  ;;  %v17986_v2 = vld [vmem:[#allocation11 + $0x14a4] sm:$0xf]  ;;  %9406 = vmatpush.bf16.msrb.mxu2 %v13645_v4  ;;  %v13581_v56 = vor.u32 %v17602_v1, %v13578_v59  ;;  %v12816_v4 = vld [vmem:[#allocation11 + $0x2a8] sm:$0xf]  ;;  %v13393_v59 = vor.u32 %v17563_v20, %v13392_v51 }
 0x3fc   :  { %v15114_v47 = vld [vmem:[#allocation11 + $0x14e0] sm:$0xf0]  ;;  %v13200_v40 = vld [vmem:[#allocation11 + $0x5a8] sm:$0xf] }
 0x3fd   :  { %v17842_v53 = vld [vmem:[#allocation11 + $0x1024] sm:$0xf]  ;;  %9445 = vmatpush.bf16.msra.mxu1 %v15181_v55  ;;  %v15117_v13 = vor.u32 %v17986_v2, %v15114_v47  ;;  %9368 = vmatpush.bf16.msra.mxu3 %v16137_v49  ;;  %v12817_v2 = vor.u32 %v17419_v37, %v12816_v4 }
 0x3fe   :  { %v14538_v6 = vld [vmem:[#allocation11 + $0x1060] sm:$0xf0] }
 0x3ff   :  { %9433 = vmatpush.bf16.msra.mxu0 %v14605_v38  ;;  %v14541_v17 = vor.u32 %v17842_v53, %v14538_v6  ;;  %v17586_v22 = vld [vmem:[#allocation11 + $0x824] sm:$0xf]  ;;  %9407 = vmatpush.bf16.msrb.mxu2 %v13581_v56  ;;  %v13328_v53 = vld [vmem:[#allocation11 + $0x6a8] sm:$0xf] }
 0x400   :  { %v13514_v19 = vld [vmem:[#allocation11 + $0x860] sm:$0xf0]  ;;  %v17547_v6 = vld [vmem:[#allocation11 + $0x6e4] sm:$0xf0] }
 0x401   :  { %v17970_v5 = vld [vmem:[#allocation11 + $0x1424] sm:$0xf]  ;;  %v13517_v34 = vor.u32 %v17586_v22, %v13514_v19  ;;  %9446 = vmatpush.bf16.msra.mxu1 %v15117_v13  ;;  %9369 = vmatpush.bf16.msra.mxu3 %v16073_v30  ;;  %v13329_v7 = vor.u32 %v17547_v6, %v13328_v53  ;;  %v13264_v19 = vld [vmem:[#allocation11 + $0x628] sm:$0xf] }
 0x402   :  { %v15050_v41 = vld [vmem:[#allocation11 + $0x1460] sm:$0xf0] }
 0x403   :  { %v17826_v16 = vld [vmem:[#allocation11 + $0xfa4] sm:$0xf]  ;;  %9434 = vmatpush.bf16.msra.mxu0 %v14541_v17  ;;  %v15053_v43 = vor.u32 %v17970_v5, %v15050_v41  ;;  %9408 = vmatpush.bf16.msrb.mxu2 %v13517_v34  ;;  %v19134_v49 = vpop.f32.mrf.mxu0  ;;  %v17531_v5 = vld [vmem:[#allocation11 + $0x664] sm:$0xf0] }
 0x404   :  { %v14474_v10 = vld [vmem:[#allocation11 + $0xfe0] sm:$0xf0]  ;;  %9370 = vmatmul.bf16.vlgmr.msra.gmra.mxu3 %v18933_v58  ;;  %v17387_v41 = vld [vmem:[#allocation11 + $0x1e4] sm:$0xf0]  ;;  %v13265_v30 = vor.u32 %v17531_v5, %v13264_v19 }
 0x405   :  { %v18210_v63 = vld [vmem:[#allocation11 + $0x1ba4] sm:$0xf]  ;;  %v14477_v9 = vor.u32 %v17826_v16, %v14474_v10  ;;  %9447 = vmatpush.bf16.msra.mxu1 %v15053_v43  ;;  %v19136_v16 = vpop.f32.mrf.mxu1  ;;  %v17515_v43 = vld [vmem:[#allocation11 + $0x5e4] sm:$0xf0]  ;;  %v9163_v51 = vpop.f32.mrf.mxu3 }
 0x406   :  { %v16010_v29 = vld [vmem:[#allocation11 + $0x1be0] sm:$0xf0]  ;;  %9435 = vmatmul.bf16.vlgmr.msra.gmra.mxu0 %v18914_v3  ;;  %9409 = vmatmul.bf16.vlgmr.msrb.gmra.mxu2 %v18907_v44 }
 0x407   :  { %9479 = vmatpush.bf16.msrb.mxu0 %v12945_v18  ;;  %v16013_v15 = vor.u32 %v18210_v63, %v16010_v29  ;;  %v17810_v32 = vld [vmem:[#allocation11 + $0xf24] sm:$0xf]  ;;  %9414 = vmatpush.bf16.msrb.mxu3 %v14477_v9  ;;  %v12688_v18 = vld [vmem:[#allocation11 + $0x1a8] sm:$0xf]  ;;  %v9202_v20 = vpop.f32.mrf.mxu2 }
 0x408   :  { %v14410_v52 = vld [vmem:[#allocation11 + $0xf60] sm:$0xf0]  ;;  %9448 = vmatmul.bf16.vlgmr.msra.gmra.mxu1 %v18920_v54  ;;  %v12689_v34 = vor.u32 %v17387_v41, %v12688_v18  ;;  %v12624_v9 = vld [vmem:[#allocation11 + $0x128] sm:$0xf] }
 0x409   :  { %v18194_v23 = vld [vmem:[#allocation11 + $0x1b24] sm:$0xf]  ;;  %9453 = vmatpush.bf16.msra.mxu2 %v16013_v15  ;;  %v14413_v61 = vor.u32 %v17810_v32, %v14410_v52  ;;  %9492 = vmatpush.bf16.msrb.mxu1 %v13457_v45  ;;  %v17371_v15 = vld [vmem:[#allocation11 + $0x164] sm:$0xf0] }
 0x40a   :  { %v15946_v57 = vld [vmem:[#allocation11 + $0x1b60] sm:$0xf0]  ;;  %v12625_v4 = vor.u32 %v17371_v15, %v12624_v9  ;;  %v13968_v15 = vld [vmem:[#allocation11 + $0xba8] sm:$0xf] }
 0x40b   :  { %v15949_v55 = vor.u32 %v18194_v23, %v15946_v57  ;;  %v17794_v38 = vld [vmem:[#allocation11 + $0xea4] sm:$0xf]  ;;  %9480 = vmatpush.bf16.msrb.mxu0 %v12881_v31  ;;  %9415 = vmatpush.bf16.msrb.mxu3 %v14413_v61  ;;  %v9230_v32 = vpop.f32.mrf.mxu0  ;;  %v13201_v57 = vor.u32 %v17515_v43, %v13200_v40  ;;  %v17467_v40 = vld [vmem:[#allocation11 + $0x464] sm:$0xf0] }
 0x40c   :  { %v14346_v1 = vld [vmem:[#allocation11 + $0xee0] sm:$0xf0]  ;;  %v17707_v32 = vld [vmem:[#allocation11 + $0xbe4] sm:$0xf0] }
 0x40d   :  { %v18178_v0 = vld [vmem:[#allocation11 + $0x1aa4] sm:$0xf]  ;;  %9454 = vmatpush.bf16.msra.mxu2 %v15949_v55  ;;  %v14349_v56 = vor.u32 %v17794_v38, %v14346_v1  ;;  %9493 = vmatpush.bf16.msrb.mxu1 %v13393_v59  ;;  %v13136_v55 = vld [vmem:[#allocation11 + $0x528] sm:$0xf]  ;;  %v19139_v38 = vadd.f32 %v9163_v51, %v19128_v39  ;;  %v19142_v1 = vadd.f32 %v9202_v20, %v19123_v24 }
 0x40e   :  { %v15882_v47 = vld [vmem:[#allocation11 + $0x1ae0] sm:$0xf0]  ;;  %v17499_v59 = vld [vmem:[#allocation11 + $0x564] sm:$0xf0] }
 0x40f   :  { %v15885_v12 = vor.u32 %v18178_v0, %v15882_v47  ;;  %v17778_v21 = vld [vmem:[#allocation11 + $0xe24] sm:$0xf]  ;;  %9481 = vmatpush.bf16.msrb.mxu0 %v12817_v2  ;;  %9416 = vmatpush.bf16.msrb.mxu3 %v14349_v56  ;;  %v12560_v2 = vld [vmem:[#allocation11 + $0xa8] sm:$0xf]  ;;  %v9243_v47 = vpop.f32.mrf.mxu1  ;;  %v13137_v56 = vor.u32 %v17499_v59, %v13136_v55 }
 0x410   :  { %v14282_v13 = vld [vmem:[#allocation11 + $0xe60] sm:$0xf0]  ;;  %v17355_v0 = vld [vmem:[#allocation11 + $0xe4] sm:$0xf0] }
 0x411   :  { %v18162_v17 = vld [vmem:[#allocation11 + $0x1a24] sm:$0xf]  ;;  %9455 = vmatpush.bf16.msra.mxu2 %v15885_v12  ;;  %v14285_v10 = vor.u32 %v17778_v21, %v14282_v13  ;;  %9494 = vmatpush.bf16.msrb.mxu1 %v13329_v7  ;;  %v12561_v12 = vor.u32 %v17355_v0, %v12560_v2  ;;  %v13072_v13 = vld [vmem:[#allocation11 + $0x4a8] sm:$0xf] }
 0x412   :  { %v15818_v22 = vld [vmem:[#allocation11 + $0x1a60] sm:$0xf0]  ;;  %v17483_v7 = vld [vmem:[#allocation11 + $0x4e4] sm:$0xf0] }
 0x413   :  { %v15821_v63 = vor.u32 %v18162_v17, %v15818_v22  ;;  %v17762_v29 = vld [vmem:[#allocation11 + $0xda4] sm:$0xf]  ;;  %9482 = vmatpush.bf16.msrb.mxu0 %v12753_v48  ;;  %9417 = vmatpush.bf16.msrb.mxu3 %v14285_v10  ;;  %v12496_v24 = vld [vmem:[#allocation11 + $0x28] sm:$0xf]  ;;  %v13073_v10 = vor.u32 %v17483_v7, %v13072_v13 }
 0x414   :  { %v14218_v46 = vld [vmem:[#allocation11 + $0xde0] sm:$0xf0]  ;;  %v17339_v48 = vld [vmem:[#allocation11 + $0x64] sm:$0xf0] }
 0x415   :  { %v18146_v36 = vld [vmem:[#allocation11 + $0x19a4] sm:$0xf]  ;;  %9456 = vmatpush.bf16.msra.mxu2 %v15821_v63  ;;  %v14221_v52 = vor.u32 %v17762_v29, %v14218_v46  ;;  %9495 = vmatpush.bf16.msrb.mxu1 %v13265_v30  ;;  %v14992_v17 = vld [vmem:[#allocation11 + $0x13a8] sm:$0xf]  ;;  %v9165_v63 = vpop.f32.mrf.mxu3  ;;  %v9204_v29 = vpop.f32.mrf.mxu2  ;;  %v12497_v46 = vor.u32 %v17339_v48, %v12496_v24 }
 0x416   :  { %v15754_v35 = vld [vmem:[#allocation11 + $0x19e0] sm:$0xf0]  ;;  %v17963_v22 = vld [vmem:[#allocation11 + $0x13e4] sm:$0xf0] }
 0x417   :  { %v15757_v45 = vor.u32 %v18146_v36, %v15754_v35  ;;  %v17746_v31 = vld [vmem:[#allocation11 + $0xd24] sm:$0xf]  ;;  %9483 = vmatpush.bf16.msrb.mxu0 %v12689_v34  ;;  %9418 = vmatpush.bf16.msrb.mxu3 %v14221_v52  ;;  %v13008_v36 = vld [vmem:[#allocation11 + $0x428] sm:$0xf]  ;;  %v14993_v35 = vor.u32 %v17963_v22, %v14992_v17 }
 0x418   :  { %v14154_v23 = vld [vmem:[#allocation11 + $0xd60] sm:$0xf0]  ;;  %v15504_v52 = vld [vmem:[#allocation11 + $0x17a8] sm:$0xf]  ;;  %v13009_v20 = vor.u32 %v17467_v40, %v13008_v36 }
 0x419   :  { %v18130_v37 = vld [vmem:[#allocation11 + $0x1924] sm:$0xf]  ;;  %9457 = vmatpush.bf16.msra.mxu2 %v15757_v45  ;;  %v14157_v53 = vor.u32 %v17746_v31, %v14154_v23  ;;  %9496 = vmatpush.bf16.msrb.mxu1 %v13201_v57  ;;  %v18091_v23 = vld [vmem:[#allocation11 + $0x17e4] sm:$0xf0] }
 0x41a   :  { %v15690_v61 = vld [vmem:[#allocation11 + $0x1960] sm:$0xf0]  ;;  %v14928_v57 = vld [vmem:[#allocation11 + $0x1328] sm:$0xf]  ;;  %v15505_v2 = vor.u32 %v18091_v23, %v15504_v52 }
 0x41b   :  { %v15693_v6 = vor.u32 %v18130_v37, %v15690_v61  ;;  %v17730_v8 = vld [vmem:[#allocation11 + $0xca4] sm:$0xf]  ;;  %9484 = vmatpush.bf16.msrb.mxu0 %v12625_v4  ;;  %9419 = vmatpush.bf16.msrb.mxu3 %v14157_v53  ;;  %v17947_v51 = vld [vmem:[#allocation11 + $0x1364] sm:$0xf0]  ;;  %v13969_v37 = vor.u32 %v17707_v32, %v13968_v15 }
 0x41c   :  { %v14090_v11 = vld [vmem:[#allocation11 + $0xce0] sm:$0xf0]  ;;  %v13904_v59 = vld [vmem:[#allocation11 + $0xb28] sm:$0xf]  ;;  %v14929_v0 = vor.u32 %v17947_v51, %v14928_v57 }
 0x41d   :  { %v18114_v21 = vld [vmem:[#allocation11 + $0x18a4] sm:$0xf]  ;;  %9458 = vmatpush.bf16.msra.mxu2 %v15693_v6  ;;  %v14093_v19 = vor.u32 %v17730_v8, %v14090_v11  ;;  %9497 = vmatpush.bf16.msrb.mxu1 %v13137_v56  ;;  %v17691_v47 = vld [vmem:[#allocation11 + $0xb64] sm:$0xf0] }
 0x41e   :  { %v15626_v39 = vld [vmem:[#allocation11 + $0x18e0] sm:$0xf0]  ;;  %v15440_v53 = vld [vmem:[#allocation11 + $0x1728] sm:$0xf] }
 0x41f   :  { %v15629_v5 = vor.u32 %v18114_v21, %v15626_v39  ;;  %v17714_v18 = vld [vmem:[#allocation11 + $0xc24] sm:$0xf]  ;;  %9485 = vmatpush.bf16.msrb.mxu0 %v12561_v12  ;;  %9420 = vmatpush.bf16.msrb.mxu3 %v14093_v19  ;;  %v19144_v6 = vld [vmem:[#allocation13 + $0x8] sm:$0xff]  ;;  %v13905_v21 = vor.u32 %v17691_v47, %v13904_v59 }
 0x420   :  { %v14026_v41 = vld [vmem:[#allocation11 + $0xc60] sm:$0xf0]  ;;  %v18075_v8 = vld [vmem:[#allocation11 + $0x1764] sm:$0xf0]  ;;  %v3295_v39 = vperm.slane %v19144_v6, 0 }
 0x421   :  { %v18098_v30 = vld [vmem:[#allocation11 + $0x1824] sm:$0xf]  ;;  %9459 = vmatpush.bf16.msra.mxu2 %v15629_v5  ;;  %v14029_v45 = vor.u32 %v17714_v18, %v14026_v41  ;;  %9498 = vmatpush.bf16.msrb.mxu1 %v13073_v10  ;;  %v14864_v11 = vld [vmem:[#allocation11 + $0x12a8] sm:$0xf]  ;;  %v15441_v24 = vor.u32 %v18075_v8, %v15440_v53 }
 0x422   :  { %v15562_v34 = vld [vmem:[#allocation11 + $0x1860] sm:$0xf0]  ;;  %v17931_v56 = vld [vmem:[#allocation11 + $0x12e4] sm:$0xf0] }
 0x423   :  { %v18338_v43 = vld [vmem:[#allocation11 + $0x1fa4] sm:$0xf]  ;;  %v15565_v31 = vor.u32 %v18098_v30, %v15562_v34  ;;  %9486 = vmatpush.bf16.msrb.mxu0 %v12497_v46  ;;  %9421 = vmatpush.bf16.msrb.mxu3 %v14029_v45  ;;  %v14865_v48 = vor.u32 %v17931_v56, %v14864_v11  ;;  %v13840_v17 = vld [vmem:[#allocation11 + $0xaa8] sm:$0xf]  ;;  %v9280_v10 = vpop.f32.mrf.mxu0 }
 0x424   :  { %v16522_v9 = vld [vmem:[#allocation11 + $0x1fe0] sm:$0xf0]  ;;  %v17675_v22 = vld [vmem:[#allocation11 + $0xae4] sm:$0xf0]  ;;  %v9281_v34 = vadd.f32 %v9280_v10, %v3295_v39 }
 0x425   :  { %v16525_v4 = vor.u32 %v18338_v43, %v16522_v9  ;;  %v18322_v61 = vld [vmem:[#allocation11 + $0x1f24] sm:$0xf]  ;;  %9460 = vmatpush.bf16.msra.mxu2 %v15565_v31  ;;  %9499 = vmatpush.bf16.msrb.mxu1 %v13009_v20  ;;  %v15376_v19 = vld [vmem:[#allocation11 + $0x16a8] sm:$0xf]  ;;  %v13841_v29 = vor.u32 %v17675_v22, %v13840_v17  ;;  %v9293_v45 = vpop.f32.mrf.mxu1  ;;  %v9215_v39 = vpop.f32.mrf.mxu3 }
 0x426   :  { %v16458_v55 = vld [vmem:[#allocation11 + $0x1f60] sm:$0xf0]  ;;  %9487 = vmatmul.bf16.vlgmr.msrb.gmra.mxu0 %v18901_v25  ;;  %9422 = vmatmul.bf16.vlgmr.msrb.gmra.mxu3 %v18909_v50  ;;  %v18059_v5 = vld [vmem:[#allocation11 + $0x16e4] sm:$0xf0]  ;;  %v19151_v20 = vadd.f32 %v9293_v45, %v9281_v34  ;;  %v9216_v22 = vadd.f32 %v9215_v39, %v19142_v1  ;;  %v12946_v45 = vld [vmem:[#allocation11 + $0x3e8] sm:$0xf0] }
 0x427   :  { %9531 = vmatpush.bf16.msra.mxu0 %v14993_v35  ;;  %9466 = vmatpush.bf16.msra.mxu3 %v16525_v4  ;;  %v16461_v12 = vor.u32 %v18322_v61, %v16458_v55  ;;  %v18306_v13 = vld [vmem:[#allocation11 + $0x1ea4] sm:$0xf]  ;;  %v14800_v18 = vld [vmem:[#allocation11 + $0x1228] sm:$0xf]  ;;  %v15377_v36 = vor.u32 %v18059_v5, %v15376_v19 }
 0x428   :  { %v16394_v7 = vld [vmem:[#allocation11 + $0x1ee0] sm:$0xf0]  ;;  %9461 = vmatmul.bf16.vlgmr.msra.gmra.mxu2 %v18926_v28  ;;  %v17915_v41 = vld [vmem:[#allocation11 + $0x1264] sm:$0xf0]  ;;  %9500 = vmatmul.bf16.vlgmr.msrb.gmra.mxu1 %v18903_v27 }
 0x429   :  { %9505 = vmatpush.bf16.msrb.mxu2 %v13969_v37  ;;  %9544 = vmatpush.bf16.msra.mxu1 %v15505_v2  ;;  %v16397_v63 = vor.u32 %v18306_v13, %v16394_v7  ;;  %v18290_v46 = vld [vmem:[#allocation11 + $0x1e24] sm:$0xf]  ;;  %v14801_v35 = vor.u32 %v17915_v41, %v14800_v18  ;;  %v13776_v40 = vld [vmem:[#allocation11 + $0xa28] sm:$0xf]  ;;  %v9254_v13 = vpop.f32.mrf.mxu2  ;;  %v9229_v41 = vadd.f32 %v19134_v49, %v9216_v22 }
 0x42a   :  { %v16330_v30 = vld [vmem:[#allocation11 + $0x1e60] sm:$0xf0]  ;;  %v17659_v43 = vld [vmem:[#allocation11 + $0xa64] sm:$0xf0] }
 0x42b   :  { %9532 = vmatpush.bf16.msra.mxu0 %v14929_v0  ;;  %9467 = vmatpush.bf16.msra.mxu3 %v16461_v12  ;;  %v15312_v9 = vld [vmem:[#allocation11 + $0x1628] sm:$0xf]  ;;  %v16333_v31 = vor.u32 %v18290_v46, %v16330_v30  ;;  %v13777_v23 = vor.u32 %v17659_v43, %v13776_v40  ;;  %v18274_v57 = vld [vmem:[#allocation11 + $0x1da4] sm:$0xf]  ;;  %v9282_v53 = vpop.f32.mrf.mxu0  ;;  %v9242_v1 = vadd.f32 %v19136_v16, %v9229_v41 }
 0x42c   :  { %v18043_v15 = vld [vmem:[#allocation11 + $0x1664] sm:$0xf0]  ;;  %v16266_v51 = vld [vmem:[#allocation11 + $0x1de0] sm:$0xf0] }
 0x42d   :  { %9506 = vmatpush.bf16.msrb.mxu2 %v13905_v21  ;;  %9545 = vmatpush.bf16.msra.mxu1 %v15441_v24  ;;  %v14736_v32 = vld [vmem:[#allocation11 + $0x11a8] sm:$0xf]  ;;  %v15313_v4 = vor.u32 %v18043_v15, %v15312_v9  ;;  %v16269_v8 = vor.u32 %v18274_v57, %v16266_v51  ;;  %v18258_v56 = vld [vmem:[#allocation11 + $0x1d24] sm:$0xf]  ;;  %v9295_v10 = vpop.f32.mrf.mxu1  ;;  %v19156_v49 = vadd.f32 %v9254_v13, %v9242_v1  ;;  %v13458_v13 = vld [vmem:[#allocation11 + $0x7e8] sm:$0xf0] }
 0x42e   :  { %v17899_v52 = vld [vmem:[#allocation11 + $0x11e4] sm:$0xf0]  ;;  %v16202_v12 = vld [vmem:[#allocation11 + $0x1d60] sm:$0xf0] }
 0x42f   :  { %9533 = vmatpush.bf16.msra.mxu0 %v14865_v48  ;;  %9468 = vmatpush.bf16.msra.mxu3 %v16397_v63  ;;  %v14737_v37 = vor.u32 %v17899_v52, %v14736_v32  ;;  %v13712_v61 = vld [vmem:[#allocation11 + $0x9a8] sm:$0xf]  ;;  %v16205_v63 = vor.u32 %v18258_v56, %v16202_v12  ;;  %v18242_v46 = vld [vmem:[#allocation11 + $0x1ca4] sm:$0xf]  ;;  %v17443_v52 = vld [vmem:[#allocation11 + $0x3ac] sm:$0xf] }
 0x430   :  { %v17643_v55 = vld [vmem:[#allocation11 + $0x9e4] sm:$0xf0]  ;;  %v16138_v30 = vld [vmem:[#allocation11 + $0x1ce0] sm:$0xf0]  ;;  %v17571_v12 = vld [vmem:[#allocation11 + $0x7ac] sm:$0xf] }
 0x431   :  { %9507 = vmatpush.bf16.msrb.mxu2 %v13841_v29  ;;  %9546 = vmatpush.bf16.msra.mxu1 %v15377_v36  ;;  %v15248_v59 = vld [vmem:[#allocation11 + $0x15a8] sm:$0xf]  ;;  %v13713_v11 = vor.u32 %v17643_v55, %v13712_v61  ;;  %v18226_v57 = vld [vmem:[#allocation11 + $0x1c24] sm:$0xf]  ;;  %v9256_v61 = vpop.f32.mrf.mxu2 }
 0x432   :  { %v18027_v2 = vld [vmem:[#allocation11 + $0x15e4] sm:$0xf0]  ;;  %v16074_v51 = vld [vmem:[#allocation11 + $0x1c60] sm:$0xf0] }
 0x433   :  { %9534 = vmatpush.bf16.msra.mxu0 %v14801_v35  ;;  %v14672_v0 = vld [vmem:[#allocation11 + $0x1128] sm:$0xf]  ;;  %9469 = vmatpush.bf16.msra.mxu3 %v16333_v31  ;;  %v15249_v21 = vor.u32 %v18027_v2, %v15248_v59  ;;  %v16141_v31 = vor.u32 %v18242_v46, %v16138_v30  ;;  %v13394_v46 = vld [vmem:[#allocation11 + $0x768] sm:$0xf0] }
 0x434   :  { %v17883_v47 = vld [vmem:[#allocation11 + $0x1164] sm:$0xf0]  ;;  %v17411_v30 = vld [vmem:[#allocation11 + $0x2ac] sm:$0xf] }
 0x435   :  { %9508 = vmatpush.bf16.msrb.mxu2 %v13777_v23  ;;  %9547 = vmatpush.bf16.msra.mxu1 %v15313_v4  ;;  %v14673_v7 = vor.u32 %v17883_v47, %v14672_v0  ;;  %v13648_v24 = vld [vmem:[#allocation11 + $0x928] sm:$0xf]  ;;  %v12949_v0 = vor.u32 %v17443_v52, %v12946_v45  ;;  %v17539_v52 = vld [vmem:[#allocation11 + $0x6ac] sm:$0xf] }
 0x436   :  { %v17627_v48 = vld [vmem:[#allocation11 + $0x964] sm:$0xf0]  ;;  %v13330_v45 = vld [vmem:[#allocation11 + $0x6e8] sm:$0xf0] }
 0x437   :  { %9535 = vmatpush.bf16.msra.mxu0 %v14737_v37  ;;  %v15184_v17 = vld [vmem:[#allocation11 + $0x1528] sm:$0xf]  ;;  %9470 = vmatpush.bf16.msra.mxu3 %v16269_v8  ;;  %v13649_v29 = vor.u32 %v17627_v48, %v13648_v24  ;;  %v9217_v37 = vpop.f32.mrf.mxu3  ;;  %v12882_v24 = vld [vmem:[#allocation11 + $0x368] sm:$0xf0] }
 0x438   :  { %v18011_v19 = vld [vmem:[#allocation11 + $0x1564] sm:$0xf0] }
 0x439   :  { %v14608_v5 = vld [vmem:[#allocation11 + $0x10a8] sm:$0xf]  ;;  %9509 = vmatpush.bf16.msrb.mxu2 %v13713_v11  ;;  %9548 = vmatpush.bf16.msra.mxu1 %v15249_v21  ;;  %v15185_v34 = vor.u32 %v18011_v19, %v15184_v17  ;;  %v16077_v21 = vor.u32 %v18226_v57, %v16074_v51 }
 0x43a   :  { %v17867_v18 = vld [vmem:[#allocation11 + $0x10e4] sm:$0xf0] }
 0x43b   :  { %9536 = vmatpush.bf16.msra.mxu0 %v14673_v7  ;;  %v14609_v36 = vor.u32 %v17867_v18, %v14608_v5  ;;  %v13584_v35 = vld [vmem:[#allocation11 + $0x8a8] sm:$0xf]  ;;  %9471 = vmatpush.bf16.msra.mxu3 %v16205_v63  ;;  %v17427_v7 = vld [vmem:[#allocation11 + $0x32c] sm:$0xf]  ;;  %v13461_v18 = vor.u32 %v17571_v12, %v13458_v13 }
 0x43c   :  { %v17611_v40 = vld [vmem:[#allocation11 + $0x8e4] sm:$0xf0]  ;;  %v12885_v41 = vor.u32 %v17427_v7, %v12882_v24 }
 0x43d   :  { %v15120_v43 = vld [vmem:[#allocation11 + $0x14a8] sm:$0xf]  ;;  %9510 = vmatpush.bf16.msrb.mxu2 %v13649_v29  ;;  %v13585_v23 = vor.u32 %v17611_v40, %v13584_v35  ;;  %9549 = vmatpush.bf16.msra.mxu1 %v15185_v34  ;;  %v17555_v29 = vld [vmem:[#allocation11 + $0x72c] sm:$0xf] }
 0x43e   :  { %v17995_v9 = vld [vmem:[#allocation11 + $0x14e4] sm:$0xf0]  ;;  %v12818_v34 = vld [vmem:[#allocation11 + $0x2e8] sm:$0xf0]  ;;  %v13397_v1 = vor.u32 %v17555_v29, %v13394_v46 }
 0x43f   :  { %v14544_v15 = vld [vmem:[#allocation11 + $0x1028] sm:$0xf]  ;;  %9537 = vmatpush.bf16.msra.mxu0 %v14609_v36  ;;  %v15121_v4 = vor.u32 %v17995_v9, %v15120_v43  ;;  %9472 = vmatpush.bf16.msra.mxu3 %v16141_v31  ;;  %v12821_v9 = vor.u32 %v17411_v30, %v12818_v34  ;;  %v17395_v31 = vld [vmem:[#allocation11 + $0x22c] sm:$0xf] }
 0x440   :  { %v17851_v32 = vld [vmem:[#allocation11 + $0x1064] sm:$0xf0] }
 0x441   :  { %v14545_v55 = vor.u32 %v17851_v32, %v14544_v15  ;;  %v13520_v16 = vld [vmem:[#allocation11 + $0x828] sm:$0xf]  ;;  %9511 = vmatpush.bf16.msrb.mxu2 %v13585_v23  ;;  %9550 = vmatpush.bf16.msra.mxu1 %v15121_v4  ;;  %v12754_v23 = vld [vmem:[#allocation11 + $0x268] sm:$0xf0] }
 0x442   :  { %v17595_v59 = vld [vmem:[#allocation11 + $0x864] sm:$0xf0] }
 0x443   :  { %v15056_v2 = vld [vmem:[#allocation11 + $0x1428] sm:$0xf]  ;;  %v13521_v39 = vor.u32 %v17595_v59, %v13520_v16  ;;  %9538 = vmatpush.bf16.msra.mxu0 %v14545_v55  ;;  %9473 = vmatpush.bf16.msra.mxu3 %v16077_v21  ;;  %v19162_v57 = vpop.f32.mrf.mxu0  ;;  %v13333_v55 = vor.u32 %v17539_v52, %v13330_v45  ;;  %v12757_v16 = vor.u32 %v17395_v31, %v12754_v23  ;;  %v12562_v52 = vld [vmem:[#allocation11 + $0xe8] sm:$0xf0] }
 0x444   :  { %v17979_v47 = vld [vmem:[#allocation11 + $0x1464] sm:$0xf0] }
 0x445   :  { %v14480_v53 = vld [vmem:[#allocation11 + $0xfa8] sm:$0xf]  ;;  %v15057_v48 = vor.u32 %v17979_v47, %v15056_v2  ;;  %9512 = vmatpush.bf16.msrb.mxu2 %v13521_v39  ;;  %v13266_v47 = vld [vmem:[#allocation11 + $0x668] sm:$0xf0]  ;;  %v9267_v30 = vpop.f32.mrf.mxu3 }
 0x446   :  { %v17835_v8 = vld [vmem:[#allocation11 + $0xfe4] sm:$0xf0]  ;;  %9539 = vmatmul.bf16.vlgmr.msra.gmra.mxu0 %v18914_v3  ;;  %9474 = vmatmul.bf16.vlgmr.msra.gmra.mxu3 %v18933_v58 }
 0x447   :  { %v16016_v11 = vld [vmem:[#allocation11 + $0x1ba8] sm:$0xf]  ;;  %9583 = vmatpush.bf16.msrb.mxu0 %v12949_v0  ;;  %v14481_v17 = vor.u32 %v17835_v8, %v14480_v53  ;;  %9551 = vmatpush.bf16.msra.mxu1 %v15057_v48  ;;  %v17523_v0 = vld [vmem:[#allocation11 + $0x62c] sm:$0xf]  ;;  %v9306_v34 = vpop.f32.mrf.mxu2 }
 0x448   :  { %v18219_v56 = vld [vmem:[#allocation11 + $0x1be4] sm:$0xf0]  ;;  %9513 = vmatmul.bf16.vlgmr.msrb.gmra.mxu2 %v18907_v44  ;;  %v17379_v53 = vld [vmem:[#allocation11 + $0x1ac] sm:$0xf]  ;;  %v13269_v13 = vor.u32 %v17523_v0, %v13266_v47 }
 0x449   :  { %v16017_v22 = vor.u32 %v18219_v56, %v16016_v11  ;;  %v14416_v19 = vld [vmem:[#allocation11 + $0xf28] sm:$0xf]  ;;  %9518 = vmatpush.bf16.msrb.mxu3 %v14481_v17  ;;  %v12690_v8 = vld [vmem:[#allocation11 + $0x1e8] sm:$0xf0]  ;;  %v19164_v11 = vpop.f32.mrf.mxu1 }
 0x44a   :  { %v17819_v5 = vld [vmem:[#allocation11 + $0xf64] sm:$0xf0]  ;;  %9552 = vmatmul.bf16.vlgmr.msra.gmra.mxu1 %v18920_v54  ;;  %v12693_v7 = vor.u32 %v17379_v53, %v12690_v8  ;;  %v17507_v17 = vld [vmem:[#allocation11 + $0x5ac] sm:$0xf] }
 0x44b   :  { %v15952_v10 = vld [vmem:[#allocation11 + $0x1b28] sm:$0xf]  ;;  %9557 = vmatpush.bf16.msra.mxu2 %v16017_v22  ;;  %v14417_v36 = vor.u32 %v17819_v5, %v14416_v19  ;;  %9596 = vmatpush.bf16.msrb.mxu1 %v13461_v18  ;;  %v13202_v22 = vld [vmem:[#allocation11 + $0x5e8] sm:$0xf0]  ;;  %v9334_v18 = vpop.f32.mrf.mxu0 }
 0x44c   :  { %v18203_v63 = vld [vmem:[#allocation11 + $0x1b64] sm:$0xf0]  ;;  %9584 = vmatpush.bf16.msrb.mxu0 %v12885_v41  ;;  %v17363_v19 = vld [vmem:[#allocation11 + $0x12c] sm:$0xf]  ;;  %v13205_v46 = vor.u32 %v17507_v17, %v13202_v22 }
 0x44d   :  { %v15953_v35 = vor.u32 %v18203_v63, %v15952_v10  ;;  %v14352_v40 = vld [vmem:[#allocation11 + $0xea8] sm:$0xf]  ;;  %9519 = vmatpush.bf16.msrb.mxu3 %v14417_v36  ;;  %v12626_v5 = vld [vmem:[#allocation11 + $0x168] sm:$0xf0] }
 0x44e   :  { %v17803_v43 = vld [vmem:[#allocation11 + $0xee4] sm:$0xf0]  ;;  %v12629_v36 = vor.u32 %v17363_v19, %v12626_v5  ;;  %v17955_v0 = vld [vmem:[#allocation11 + $0x13ac] sm:$0xf] }
 0x44f   :  { %v15888_v15 = vld [vmem:[#allocation11 + $0x1aa8] sm:$0xf]  ;;  %9558 = vmatpush.bf16.msra.mxu2 %v15953_v35  ;;  %v14353_v51 = vor.u32 %v17803_v43, %v14352_v40  ;;  %9597 = vmatpush.bf16.msrb.mxu1 %v13397_v1  ;;  %v17491_v43 = vld [vmem:[#allocation11 + $0x52c] sm:$0xf]  ;;  %v19167_v1 = vadd.f32 %v9267_v30, %v19156_v49 }
 0x450   :  { %v18187_v32 = vld [vmem:[#allocation11 + $0x1ae4] sm:$0xf0]  ;;  %9585 = vmatpush.bf16.msrb.mxu0 %v12821_v9  ;;  %v19170_v9 = vadd.f32 %v9306_v34, %v19151_v20  ;;  %v17331_v20 = vld [vmem:[#allocation11 + $0x2c] sm:$0xf] }
 0x451   :  { %v15889_v4 = vor.u32 %v18187_v32, %v15888_v15  ;;  %v14288_v37 = vld [vmem:[#allocation11 + $0xe28] sm:$0xf]  ;;  %9520 = vmatpush.bf16.msrb.mxu3 %v14353_v51  ;;  %v13138_v15 = vld [vmem:[#allocation11 + $0x568] sm:$0xf0]  ;;  %v9347_v45 = vpop.f32.mrf.mxu1 }
 0x452   :  { %v17787_v61 = vld [vmem:[#allocation11 + $0xe64] sm:$0xf0]  ;;  %v17347_v32 = vld [vmem:[#allocation11 + $0xac] sm:$0xf] }
 0x453   :  { %v15824_v59 = vld [vmem:[#allocation11 + $0x1a28] sm:$0xf]  ;;  %9559 = vmatpush.bf16.msra.mxu2 %v15889_v4  ;;  %v14289_v56 = vor.u32 %v17787_v61, %v14288_v37  ;;  %9598 = vmatpush.bf16.msrb.mxu1 %v13333_v55  ;;  %v13141_v37 = vor.u32 %v17491_v43, %v13138_v15  ;;  %v12565_v61 = vor.u32 %v17347_v32, %v12562_v52  ;;  %v14994_v47 = vld [vmem:[#allocation11 + $0x13e8] sm:$0xf0] }
 0x454   :  { %v18171_v2 = vld [vmem:[#allocation11 + $0x1a64] sm:$0xf0]  ;;  %9586 = vmatpush.bf16.msrb.mxu0 %v12757_v16  ;;  %v17475_v16 = vld [vmem:[#allocation11 + $0x4ac] sm:$0xf]  ;;  %v14997_v22 = vor.u32 %v17955_v0, %v14994_v47 }
 0x455   :  { %v15825_v12 = vor.u32 %v18171_v2, %v15824_v59  ;;  %v14224_v21 = vld [vmem:[#allocation11 + $0xda8] sm:$0xf]  ;;  %9521 = vmatpush.bf16.msrb.mxu3 %v14289_v56  ;;  %v13074_v59 = vld [vmem:[#allocation11 + $0x4e8] sm:$0xf0] }
 0x456   :  { %v17771_v39 = vld [vmem:[#allocation11 + $0xde4] sm:$0xf0]  ;;  %v12498_v2 = vld [vmem:[#allocation11 + $0x68] sm:$0xf0] }
 0x457   :  { %v15760_v24 = vld [vmem:[#allocation11 + $0x19a8] sm:$0xf]  ;;  %9560 = vmatpush.bf16.msra.mxu2 %v15825_v12  ;;  %v14225_v41 = vor.u32 %v17771_v39, %v14224_v21  ;;  %9599 = vmatpush.bf16.msrb.mxu1 %v13269_v13  ;;  %v13077_v21 = vor.u32 %v17475_v16, %v13074_v59  ;;  %v9269_v39 = vpop.f32.mrf.mxu3  ;;  %v9308_v13 = vpop.f32.mrf.mxu2  ;;  %v17459_v17 = vld [vmem:[#allocation11 + $0x42c] sm:$0xf]  ;;  %v3296_v16 = vperm.slane %v19144_v6, 1 }
 0x458   :  { %v18155_v48 = vld [vmem:[#allocation11 + $0x19e4] sm:$0xf0]  ;;  %9587 = vmatpush.bf16.msrb.mxu0 %v12693_v7  ;;  %v12501_v7 = vor.u32 %v17331_v20, %v12498_v2  ;;  %v13010_v19 = vld [vmem:[#allocation11 + $0x468] sm:$0xf0] }
 0x459   :  { %v15761_v10 = vor.u32 %v18155_v48, %v15760_v24  ;;  %v14160_v63 = vld [vmem:[#allocation11 + $0xd28] sm:$0xf]  ;;  %9522 = vmatpush.bf16.msrb.mxu3 %v14225_v41  ;;  %v17699_v41 = vld [vmem:[#allocation11 + $0xbac] sm:$0xf] }
 0x45a   :  { %v17755_v29 = vld [vmem:[#allocation11 + $0xd64] sm:$0xf0]  ;;  %v15506_v30 = vld [vmem:[#allocation11 + $0x17e8] sm:$0xf0] }
 0x45b   :  { %v15696_v35 = vld [vmem:[#allocation11 + $0x1928] sm:$0xf]  ;;  %9561 = vmatpush.bf16.msra.mxu2 %v15761_v10  ;;  %v14161_v31 = vor.u32 %v17755_v29, %v14160_v63  ;;  %9600 = vmatpush.bf16.msrb.mxu1 %v13205_v46  ;;  %v13970_v10 = vld [vmem:[#allocation11 + $0xbe8] sm:$0xf0] }
 0x45c   :  { %v18139_v40 = vld [vmem:[#allocation11 + $0x1964] sm:$0xf0]  ;;  %9588 = vmatpush.bf16.msrb.mxu0 %v12629_v36  ;;  %v18083_v63 = vld [vmem:[#allocation11 + $0x17ac] sm:$0xf]  ;;  %v13973_v43 = vor.u32 %v17699_v41, %v13970_v10 }
 0x45d   :  { %v15697_v23 = vor.u32 %v18139_v40, %v15696_v35  ;;  %v14096_v51 = vld [vmem:[#allocation11 + $0xca8] sm:$0xf]  ;;  %9523 = vmatpush.bf16.msrb.mxu3 %v14161_v31  ;;  %v17939_v34 = vld [vmem:[#allocation11 + $0x132c] sm:$0xf]  ;;  %v13013_v35 = vor.u32 %v17459_v17, %v13010_v19  ;;  %v15509_v52 = vor.u32 %v18083_v63, %v15506_v30 }
 0x45e   :  { %v17739_v4 = vld [vmem:[#allocation11 + $0xce4] sm:$0xf0]  ;;  %v14930_v36 = vld [vmem:[#allocation11 + $0x1368] sm:$0xf0] }
 0x45f   :  { %v15632_v55 = vld [vmem:[#allocation11 + $0x18a8] sm:$0xf]  ;;  %9562 = vmatpush.bf16.msra.mxu2 %v15697_v23  ;;  %v14097_v53 = vor.u32 %v17739_v4, %v14096_v51  ;;  %9601 = vmatpush.bf16.msrb.mxu1 %v13141_v37  ;;  %v14933_v45 = vor.u32 %v17939_v34, %v14930_v36  ;;  %v17683_v31 = vld [vmem:[#allocation11 + $0xb2c] sm:$0xf] }
 0x460   :  { %v18123_v49 = vld [vmem:[#allocation11 + $0x18e4] sm:$0xf0]  ;;  %9589 = vmatpush.bf16.msrb.mxu0 %v12565_v61  ;;  %v13906_v23 = vld [vmem:[#allocation11 + $0xb68] sm:$0xf0] }
 0x461   :  { %v15633_v8 = vor.u32 %v18123_v49, %v15632_v55  ;;  %v14032_v56 = vld [vmem:[#allocation11 + $0xc28] sm:$0xf]  ;;  %9524 = vmatpush.bf16.msrb.mxu3 %v14097_v53  ;;  %v18067_v51 = vld [vmem:[#allocation11 + $0x172c] sm:$0xf]  ;;  %v13909_v49 = vor.u32 %v17683_v31, %v13906_v23 }
 0x462   :  { %v17723_v12 = vld [vmem:[#allocation11 + $0xc64] sm:$0xf0]  ;;  %v15442_v4 = vld [vmem:[#allocation11 + $0x1768] sm:$0xf0] }
 0x463   :  { %v15568_v24 = vld [vmem:[#allocation11 + $0x1828] sm:$0xf]  ;;  %9563 = vmatpush.bf16.msra.mxu2 %v15633_v8  ;;  %v14033_v29 = vor.u32 %v17723_v12, %v14032_v56  ;;  %9602 = vmatpush.bf16.msrb.mxu1 %v13077_v21  ;;  %v17923_v37 = vld [vmem:[#allocation11 + $0x12ac] sm:$0xf]  ;;  %v15445_v2 = vor.u32 %v18067_v51, %v15442_v4  ;;  %v9384_v6 = vpop.f32.mrf.mxu0 }
 0x464   :  { %v18107_v48 = vld [vmem:[#allocation11 + $0x1864] sm:$0xf0]  ;;  %9590 = vmatpush.bf16.msrb.mxu0 %v12501_v7  ;;  %v14866_v61 = vld [vmem:[#allocation11 + $0x12e8] sm:$0xf0] }
 0x465   :  { %v16528_v5 = vld [vmem:[#allocation11 + $0x1fa8] sm:$0xf]  ;;  %v15569_v46 = vor.u32 %v18107_v48, %v15568_v24  ;;  %9525 = vmatpush.bf16.msrb.mxu3 %v14033_v29  ;;  %v14869_v0 = vor.u32 %v17923_v37, %v14866_v61  ;;  %v17667_v47 = vld [vmem:[#allocation11 + $0xaac] sm:$0xf]  ;;  %v9385_v48 = vadd.f32 %v9384_v6, %v3296_v16  ;;  %v9397_v29 = vpop.f32.mrf.mxu1 }
 0x466   :  { %v18347_v18 = vld [vmem:[#allocation11 + $0x1fe4] sm:$0xf0]  ;;  %v13842_v53 = vld [vmem:[#allocation11 + $0xae8] sm:$0xf0] }
 0x467   :  { %v16529_v40 = vor.u32 %v18347_v18, %v16528_v5  ;;  %v16464_v15 = vld [vmem:[#allocation11 + $0x1f28] sm:$0xf]  ;;  %9564 = vmatpush.bf16.msra.mxu2 %v15569_v46  ;;  %9591 = vmatmul.bf16.vlgmr.msrb.gmra.mxu0 %v18901_v25  ;;  %v18051_v8 = vld [vmem:[#allocation11 + $0x16ac] sm:$0xf]  ;;  %v13845_v13 = vor.u32 %v17667_v47, %v13842_v53  ;;  %v9319_v16 = vpop.f32.mrf.mxu3 }
 0x468   :  { %9635 = vmatpush.bf16.msra.mxu0 %v14997_v22  ;;  %v18331_v32 = vld [vmem:[#allocation11 + $0x1f64] sm:$0xf0]  ;;  %9603 = vmatpush.bf16.msrb.mxu1 %v13013_v35  ;;  %v15378_v56 = vld [vmem:[#allocation11 + $0x16e8] sm:$0xf0]  ;;  %v19177_v35 = vadd.f32 %v9397_v29, %v9385_v48  ;;  %v9320_v53 = vadd.f32 %v9319_v16, %v19170_v9  ;;  %v17452_v29 = vld [vmem:[#allocation11 + $0x3ec] sm:$0xf0] }
 0x469   :  { %9570 = vmatpush.bf16.msra.mxu3 %v16529_v40  ;;  %v16465_v55 = vor.u32 %v18331_v32, %v16464_v15  ;;  %v16400_v59 = vld [vmem:[#allocation11 + $0x1ea8] sm:$0xf]  ;;  %v17907_v12 = vld [vmem:[#allocation11 + $0x122c] sm:$0xf]  ;;  %v15381_v17 = vor.u32 %v18051_v8, %v15378_v56 }
 0x46a   :  { %v18315_v20 = vld [vmem:[#allocation11 + $0x1ee4] sm:$0xf0]  ;;  %9526 = vmatmul.bf16.vlgmr.msrb.gmra.mxu3 %v18909_v50  ;;  %9565 = vmatmul.bf16.vlgmr.msra.gmra.mxu2 %v18926_v28  ;;  %v14802_v21 = vld [vmem:[#allocation11 + $0x1268] sm:$0xf0] }
 0x46b   :  { %9609 = vmatpush.bf16.msrb.mxu2 %v13973_v43  ;;  %9604 = vmatmul.bf16.vlgmr.msrb.gmra.mxu1 %v18903_v27  ;;  %v16401_v39 = vor.u32 %v18315_v20, %v16400_v59  ;;  %v16336_v7 = vld [vmem:[#allocation11 + $0x1e28] sm:$0xf]  ;;  %v14805_v22 = vor.u32 %v17907_v12, %v14802_v21  ;;  %v17651_v19 = vld [vmem:[#allocation11 + $0xa2c] sm:$0xf]  ;;  %v9386_v51 = vpop.f32.mrf.mxu0  ;;  %v9358_v59 = vpop.f32.mrf.mxu2  ;;  %v9333_v21 = vadd.f32 %v19162_v57, %v9320_v53 }
 0x46c   :  { %9648 = vmatpush.bf16.msra.mxu1 %v15509_v52  ;;  %9636 = vmatpush.bf16.msra.mxu0 %v14933_v45  ;;  %v18299_v24 = vld [vmem:[#allocation11 + $0x1e64] sm:$0xf0]  ;;  %v13778_v5 = vld [vmem:[#allocation11 + $0xa68] sm:$0xf0] }
 0x46d   :  { %9571 = vmatpush.bf16.msra.mxu3 %v16465_v55  ;;  %v18035_v18 = vld [vmem:[#allocation11 + $0x162c] sm:$0xf]  ;;  %v16337_v46 = vor.u32 %v18299_v24, %v16336_v7  ;;  %v13781_v30 = vor.u32 %v17651_v19, %v13778_v5  ;;  %v16272_v34 = vld [vmem:[#allocation11 + $0x1da8] sm:$0xf]  ;;  %v9399_v6 = vpop.f32.mrf.mxu1  ;;  %v9346_v9 = vadd.f32 %v19164_v11, %v9333_v21 }
 0x46e   :  { %v15314_v41 = vld [vmem:[#allocation11 + $0x1668] sm:$0xf0]  ;;  %v18283_v36 = vld [vmem:[#allocation11 + $0x1de4] sm:$0xf0] }
 0x46f   :  { %9610 = vmatpush.bf16.msrb.mxu2 %v13909_v49  ;;  %v17891_v10 = vld [vmem:[#allocation11 + $0x11ac] sm:$0xf]  ;;  %v15317_v40 = vor.u32 %v18035_v18, %v15314_v41  ;;  %v16273_v4 = vor.u32 %v18283_v36, %v16272_v34  ;;  %v16208_v61 = vld [vmem:[#allocation11 + $0x1d28] sm:$0xf]  ;;  %v19182_v57 = vadd.f32 %v9358_v59, %v9346_v9  ;;  %v17580_v59 = vld [vmem:[#allocation11 + $0x7ec] sm:$0xf0] }
 0x470   :  { %9649 = vmatpush.bf16.msra.mxu1 %v15445_v2  ;;  %9637 = vmatpush.bf16.msra.mxu0 %v14869_v0  ;;  %v14738_v63 = vld [vmem:[#allocation11 + $0x11e8] sm:$0xf0]  ;;  %v18267_v55 = vld [vmem:[#allocation11 + $0x1d64] sm:$0xf0] }
 0x471   :  { %9572 = vmatpush.bf16.msra.mxu3 %v16401_v39  ;;  %v14741_v43 = vor.u32 %v17891_v10, %v14738_v63  ;;  %v17635_v15 = vld [vmem:[#allocation11 + $0x9ac] sm:$0xf]  ;;  %v16209_v39 = vor.u32 %v18267_v55, %v16208_v61  ;;  %v16144_v7 = vld [vmem:[#allocation11 + $0x1ca8] sm:$0xf]  ;;  %v12952_v63 = vld [vmem:[#allocation11 + $0x3b0] sm:$0xf] }
 0x472   :  { %v13714_v32 = vld [vmem:[#allocation11 + $0x9e8] sm:$0xf0]  ;;  %v18251_v24 = vld [vmem:[#allocation11 + $0x1ce4] sm:$0xf0]  ;;  %v13464_v55 = vld [vmem:[#allocation11 + $0x7b0] sm:$0xf] }
 0x473   :  { %9611 = vmatpush.bf16.msrb.mxu2 %v13845_v13  ;;  %v18019_v52 = vld [vmem:[#allocation11 + $0x15ac] sm:$0xf]  ;;  %v13717_v37 = vor.u32 %v17635_v15, %v13714_v32  ;;  %v16080_v34 = vld [vmem:[#allocation11 + $0x1c28] sm:$0xf]  ;;  %v9360_v15 = vpop.f32.mrf.mxu2 }
 0x474   :  { %9650 = vmatpush.bf16.msra.mxu1 %v15381_v17  ;;  %9638 = vmatpush.bf16.msra.mxu0 %v14805_v22  ;;  %v15250_v45 = vld [vmem:[#allocation11 + $0x15e8] sm:$0xf0]  ;;  %v18235_v36 = vld [vmem:[#allocation11 + $0x1c64] sm:$0xf0] }
 0x475   :  { %v17875_v31 = vld [vmem:[#allocation11 + $0x112c] sm:$0xf]  ;;  %9573 = vmatpush.bf16.msra.mxu3 %v16337_v46  ;;  %v15253_v49 = vor.u32 %v18019_v52, %v15250_v45  ;;  %v16145_v46 = vor.u32 %v18251_v24, %v16144_v7  ;;  %v17564_v7 = vld [vmem:[#allocation11 + $0x76c] sm:$0xf0] }
 0x476   :  { %v14674_v23 = vld [vmem:[#allocation11 + $0x1168] sm:$0xf0]  ;;  %v12824_v24 = vld [vmem:[#allocation11 + $0x2b0] sm:$0xf] }
 0x477   :  { %9612 = vmatpush.bf16.msrb.mxu2 %v13781_v30  ;;  %v14677_v20 = vor.u32 %v17875_v31, %v14674_v23  ;;  %v17619_v2 = vld [vmem:[#allocation11 + $0x92c] sm:$0xf]  ;;  %v12953_v31 = vor.u32 %v17452_v29, %v12952_v63  ;;  %v13336_v63 = vld [vmem:[#allocation11 + $0x6b0] sm:$0xf] }
 0x478   :  { %9651 = vmatpush.bf16.msra.mxu1 %v15317_v40  ;;  %9639 = vmatpush.bf16.msra.mxu0 %v14741_v43  ;;  %v13650_v0 = vld [vmem:[#allocation11 + $0x968] sm:$0xf0]  ;;  %v9321_v43 = vpop.f32.mrf.mxu3  ;;  %v17548_v29 = vld [vmem:[#allocation11 + $0x6ec] sm:$0xf0] }
 0x479   :  { %v18003_v47 = vld [vmem:[#allocation11 + $0x152c] sm:$0xf]  ;;  %9574 = vmatpush.bf16.msra.mxu3 %v16273_v4  ;;  %v13653_v13 = vor.u32 %v17619_v2, %v13650_v0  ;;  %v17436_v2 = vld [vmem:[#allocation11 + $0x36c] sm:$0xf0] }
 0x47a   :  { %v15186_v8 = vld [vmem:[#allocation11 + $0x1568] sm:$0xf0] }
 0x47b   :  { %v17859_v56 = vld [vmem:[#allocation11 + $0x10ac] sm:$0xf]  ;;  %9613 = vmatpush.bf16.msrb.mxu2 %v13717_v37  ;;  %v15189_v48 = vor.u32 %v18003_v47, %v15186_v8 }
 0x47c   :  { %v14610_v12 = vld [vmem:[#allocation11 + $0x10e8] sm:$0xf0]  ;;  %9652 = vmatpush.bf16.msra.mxu1 %v15253_v49  ;;  %9640 = vmatpush.bf16.msra.mxu0 %v14677_v20  ;;  %v16081_v49 = vor.u32 %v18235_v36, %v16080_v34  ;;  %v12888_v20 = vld [vmem:[#allocation11 + $0x330] sm:$0xf] }
 0x47d   :  { %v14613_v17 = vor.u32 %v17859_v56, %v14610_v12  ;;  %v17603_v22 = vld [vmem:[#allocation11 + $0x8ac] sm:$0xf]  ;;  %9575 = vmatpush.bf16.msra.mxu3 %v16209_v39  ;;  %v13465_v12 = vor.u32 %v17580_v59, %v13464_v55  ;;  %v12889_v21 = vor.u32 %v17436_v2, %v12888_v20 }
 0x47e   :  { %v13586_v19 = vld [vmem:[#allocation11 + $0x8e8] sm:$0xf0] }
 0x47f   :  { %v17987_v5 = vld [vmem:[#allocation11 + $0x14ac] sm:$0xf]  ;;  %9614 = vmatpush.bf16.msrb.mxu2 %v13653_v13  ;;  %v13589_v30 = vor.u32 %v17603_v22, %v13586_v19  ;;  %v13400_v13 = vld [vmem:[#allocation11 + $0x730] sm:$0xf] }
 0x480   :  { %v15122_v18 = vld [vmem:[#allocation11 + $0x14e8] sm:$0xf0]  ;;  %9653 = vmatpush.bf16.msra.mxu1 %v15189_v48  ;;  %9641 = vmatpush.bf16.msra.mxu0 %v14613_v17  ;;  %v17420_v48 = vld [vmem:[#allocation11 + $0x2ec] sm:$0xf0]  ;;  %v13401_v9 = vor.u32 %v17564_v7, %v13400_v13 }
 0x481   :  { %v17843_v41 = vld [vmem:[#allocation11 + $0x102c] sm:$0xf]  ;;  %v15125_v40 = vor.u32 %v17987_v5, %v15122_v18  ;;  %9576 = vmatpush.bf16.msra.mxu3 %v16145_v46  ;;  %v12825_v18 = vor.u32 %v17420_v48, %v12824_v24  ;;  %v12760_v46 = vld [vmem:[#allocation11 + $0x230] sm:$0xf] }
 0x482   :  { %v14546_v10 = vld [vmem:[#allocation11 + $0x1068] sm:$0xf0] }
 0x483   :  { %v14549_v32 = vor.u32 %v17843_v41, %v14546_v10  ;;  %v17587_v11 = vld [vmem:[#allocation11 + $0x82c] sm:$0xf]  ;;  %9615 = vmatpush.bf16.msrb.mxu2 %v13589_v30  ;;  %v17404_v30 = vld [vmem:[#allocation11 + $0x26c] sm:$0xf0]  ;;  %v19188_v34 = vpop.f32.mrf.mxu0 }
 0x484   :  { %v13522_v52 = vld [vmem:[#allocation11 + $0x868] sm:$0xf0]  ;;  %9654 = vmatpush.bf16.msra.mxu1 %v15125_v40 }
 0x485   :  { %v17971_v45 = vld [vmem:[#allocation11 + $0x142c] sm:$0xf]  ;;  %v13525_v16 = vor.u32 %v17587_v11, %v13522_v52  ;;  %9642 = vmatpush.bf16.msra.mxu0 %v14549_v32  ;;  %9577 = vmatpush.bf16.msra.mxu3 %v16081_v49  ;;  %v13337_v32 = vor.u32 %v17548_v29, %v13336_v63  ;;  %v12761_v11 = vor.u32 %v17404_v30, %v12760_v46  ;;  %v17356_v63 = vld [vmem:[#allocation11 + $0xec] sm:$0xf0] }
 0x486   :  { %v15058_v23 = vld [vmem:[#allocation11 + $0x1468] sm:$0xf0] }
 0x487   :  { %v17827_v51 = vld [vmem:[#allocation11 + $0xfac] sm:$0xf]  ;;  %v15061_v0 = vor.u32 %v17971_v45, %v15058_v23  ;;  %9616 = vmatpush.bf16.msrb.mxu2 %v13525_v16  ;;  %v17532_v23 = vld [vmem:[#allocation11 + $0x66c] sm:$0xf0]  ;;  %v9371_v24 = vpop.f32.mrf.mxu3 }
 0x488   :  { %v14482_v4 = vld [vmem:[#allocation11 + $0xfe8] sm:$0xf0]  ;;  %9643 = vmatmul.bf16.vlgmr.msra.gmra.mxu0 %v18914_v3  ;;  %9578 = vmatmul.bf16.vlgmr.msra.gmra.mxu3 %v18933_v58 }
 0x489   :  { %v18211_v37 = vld [vmem:[#allocation11 + $0x1bac] sm:$0xf]  ;;  %9687 = vmatpush.bf16.msrb.mxu0 %v12953_v31  ;;  %v14485_v47 = vor.u32 %v17827_v51, %v14482_v4  ;;  %9655 = vmatpush.bf16.msra.mxu1 %v15061_v0  ;;  %v13272_v31 = vld [vmem:[#allocation11 + $0x630] sm:$0xf]  ;;  %v9410_v48 = vpop.f32.mrf.mxu2 }
 0x48a   :  { %v16018_v61 = vld [vmem:[#allocation11 + $0x1be8] sm:$0xf0]  ;;  %9617 = vmatmul.bf16.vlgmr.msrb.gmra.mxu2 %v18907_v44  ;;  %v12696_v51 = vld [vmem:[#allocation11 + $0x1b0] sm:$0xf]  ;;  %v13273_v59 = vor.u32 %v17532_v23, %v13272_v31 }
 0x48b   :  { %v16021_v53 = vor.u32 %v18211_v37, %v16018_v61  ;;  %v17811_v8 = vld [vmem:[#allocation11 + $0xf2c] sm:$0xf]  ;;  %9622 = vmatpush.bf16.msrb.mxu3 %v14485_v47  ;;  %v17388_v4 = vld [vmem:[#allocation11 + $0x1ec] sm:$0xf0]  ;;  %v19190_v37 = vpop.f32.mrf.mxu1 }
 0x48c   :  { %v14418_v56 = vld [vmem:[#allocation11 + $0xf68] sm:$0xf0]  ;;  %9656 = vmatmul.bf16.vlgmr.msra.gmra.mxu1 %v18920_v54  ;;  %v12697_v20 = vor.u32 %v17388_v4, %v12696_v51  ;;  %v13208_v47 = vld [vmem:[#allocation11 + $0x5b0] sm:$0xf] }
 0x48d   :  { %v18195_v6 = vld [vmem:[#allocation11 + $0x1b2c] sm:$0xf]  ;;  %9661 = vmatpush.bf16.msra.mxu2 %v16021_v53  ;;  %v14421_v17 = vor.u32 %v17811_v8, %v14418_v56  ;;  %9700 = vmatpush.bf16.msrb.mxu1 %v13465_v12  ;;  %v17516_v53 = vld [vmem:[#allocation11 + $0x5ec] sm:$0xf0]  ;;  %v9438_v12 = vpop.f32.mrf.mxu0 }
 0x48e   :  { %v15954_v39 = vld [vmem:[#allocation11 + $0x1b68] sm:$0xf0]  ;;  %9688 = vmatpush.bf16.msrb.mxu0 %v12889_v21  ;;  %v12632_v8 = vld [vmem:[#allocation11 + $0x130] sm:$0xf]  ;;  %v13209_v7 = vor.u32 %v17516_v53, %v13208_v47 }
 0x48f   :  { %v15957_v22 = vor.u32 %v18195_v6, %v15954_v39  ;;  %v17795_v19 = vld [vmem:[#allocation11 + $0xeac] sm:$0xf]  ;;  %9623 = vmatpush.bf16.msrb.mxu3 %v14421_v17  ;;  %v17372_v56 = vld [vmem:[#allocation11 + $0x16c] sm:$0xf0] }
 0x490   :  { %v14354_v5 = vld [vmem:[#allocation11 + $0xee8] sm:$0xf0]  ;;  %v12633_v17 = vor.u32 %v17372_v56, %v12632_v8  ;;  %v15000_v31 = vld [vmem:[#allocation11 + $0x13b0] sm:$0xf] }
 0x491   :  { %v18179_v41 = vld [vmem:[#allocation11 + $0x1aac] sm:$0xf]  ;;  %9662 = vmatpush.bf16.msra.mxu2 %v15957_v22  ;;  %v14357_v36 = vor.u32 %v17795_v19, %v14354_v5  ;;  %9701 = vmatpush.bf16.msrb.mxu1 %v13401_v9  ;;  %v13144_v5 = vld [vmem:[#allocation11 + $0x530] sm:$0xf]  ;;  %v19193_v9 = vadd.f32 %v9371_v24, %v19182_v57 }
 0x492   :  { %v15890_v10 = vld [vmem:[#allocation11 + $0x1ae8] sm:$0xf0]  ;;  %9689 = vmatpush.bf16.msrb.mxu0 %v12825_v18  ;;  %v19196_v18 = vadd.f32 %v9410_v48, %v19177_v35  ;;  %v12504_v35 = vld [vmem:[#allocation11 + $0x30] sm:$0xf] }
 0x493   :  { %v15893_v40 = vor.u32 %v18179_v41, %v15890_v10  ;;  %v17779_v43 = vld [vmem:[#allocation11 + $0xe2c] sm:$0xf]  ;;  %9624 = vmatpush.bf16.msrb.mxu3 %v14357_v36  ;;  %v17500_v41 = vld [vmem:[#allocation11 + $0x56c] sm:$0xf0]  ;;  %v9451_v29 = vpop.f32.mrf.mxu1 }
 0x494   :  { %v14290_v15 = vld [vmem:[#allocation11 + $0xe68] sm:$0xf0]  ;;  %v12568_v10 = vld [vmem:[#allocation11 + $0xb0] sm:$0xf] }
 0x495   :  { %v18163_v52 = vld [vmem:[#allocation11 + $0x1a2c] sm:$0xf]  ;;  %9663 = vmatpush.bf16.msra.mxu2 %v15893_v40  ;;  %v14293_v61 = vor.u32 %v17779_v43, %v14290_v15  ;;  %9702 = vmatpush.bf16.msrb.mxu1 %v13337_v32  ;;  %v13145_v43 = vor.u32 %v17500_v41, %v13144_v5  ;;  %v12569_v15 = vor.u32 %v17356_v63, %v12568_v10  ;;  %v17964_v23 = vld [vmem:[#allocation11 + $0x13ec] sm:$0xf0] }
 0x496   :  { %v15826_v45 = vld [vmem:[#allocation11 + $0x1a68] sm:$0xf0]  ;;  %9690 = vmatpush.bf16.msrb.mxu0 %v12761_v11  ;;  %v13080_v11 = vld [vmem:[#allocation11 + $0x4b0] sm:$0xf]  ;;  %v15001_v53 = vor.u32 %v17964_v23, %v15000_v31 }
 0x497   :  { %v15829_v55 = vor.u32 %v18163_v52, %v15826_v45  ;;  %v17763_v49 = vld [vmem:[#allocation11 + $0xdac] sm:$0xf]  ;;  %9625 = vmatpush.bf16.msrb.mxu3 %v14293_v61  ;;  %v17484_v52 = vld [vmem:[#allocation11 + $0x4ec] sm:$0xf0] }
 0x498   :  { %v14226_v16 = vld [vmem:[#allocation11 + $0xde8] sm:$0xf0]  ;;  %v17340_v45 = vld [vmem:[#allocation11 + $0x6c] sm:$0xf0] }
 0x499   :  { %v18147_v2 = vld [vmem:[#allocation11 + $0x19ac] sm:$0xf]  ;;  %9664 = vmatpush.bf16.msra.mxu2 %v15829_v55  ;;  %v14229_v21 = vor.u32 %v17763_v49, %v14226_v16  ;;  %9703 = vmatpush.bf16.msrb.mxu1 %v13273_v59  ;;  %v13081_v49 = vor.u32 %v17484_v52, %v13080_v11  ;;  %v9373_v16 = vpop.f32.mrf.mxu3  ;;  %v9412_v59 = vpop.f32.mrf.mxu2  ;;  %v13016_v47 = vld [vmem:[#allocation11 + $0x430] sm:$0xf] }
 0x49a   :  { %v15762_v0 = vld [vmem:[#allocation11 + $0x19e8] sm:$0xf0]  ;;  %9691 = vmatpush.bf16.msrb.mxu0 %v12697_v20  ;;  %v12505_v20 = vor.u32 %v17340_v45, %v12504_v35  ;;  %v17468_v8 = vld [vmem:[#allocation11 + $0x46c] sm:$0xf0] }
 0x49b   :  { %v15765_v6 = vor.u32 %v18147_v2, %v15762_v0  ;;  %v17747_v39 = vld [vmem:[#allocation11 + $0xd2c] sm:$0xf]  ;;  %9626 = vmatpush.bf16.msrb.mxu3 %v14229_v21  ;;  %v13976_v21 = vld [vmem:[#allocation11 + $0xbb0] sm:$0xf] }
 0x49c   :  { %v14162_v13 = vld [vmem:[#allocation11 + $0xd68] sm:$0xf0]  ;;  %v18092_v24 = vld [vmem:[#allocation11 + $0x17ec] sm:$0xf0] }
 0x49d   :  { %v18131_v22 = vld [vmem:[#allocation11 + $0x192c] sm:$0xf]  ;;  %9665 = vmatpush.bf16.msra.mxu2 %v15765_v6  ;;  %v14165_v46 = vor.u32 %v17747_v39, %v14162_v13  ;;  %9704 = vmatpush.bf16.msrb.mxu1 %v13209_v7  ;;  %v17708_v6 = vld [vmem:[#allocation11 + $0xbec] sm:$0xf0] }
 0x49e   :  { %v15698_v19 = vld [vmem:[#allocation11 + $0x1968] sm:$0xf0]  ;;  %9692 = vmatpush.bf16.msrb.mxu0 %v12633_v17  ;;  %v15512_v39 = vld [vmem:[#allocation11 + $0x17b0] sm:$0xf]  ;;  %v13977_v5 = vor.u32 %v17708_v6, %v13976_v21 }
 0x49f   :  { %v15701_v30 = vor.u32 %v18131_v22, %v15698_v19  ;;  %v17731_v36 = vld [vmem:[#allocation11 + $0xcac] sm:$0xf]  ;;  %9627 = vmatpush.bf16.msrb.mxu3 %v14165_v46  ;;  %v14936_v48 = vld [vmem:[#allocation11 + $0x1330] sm:$0xf]  ;;  %v13017_v22 = vor.u32 %v17468_v8, %v13016_v47  ;;  %v15513_v63 = vor.u32 %v18092_v24, %v15512_v39 }
 0x4a0   :  { %v14098_v40 = vld [vmem:[#allocation11 + $0xce8] sm:$0xf0]  ;;  %v17948_v17 = vld [vmem:[#allocation11 + $0x136c] sm:$0xf0] }
 0x4a1   :  { %v18115_v32 = vld [vmem:[#allocation11 + $0x18ac] sm:$0xf]  ;;  %9666 = vmatpush.bf16.msra.mxu2 %v15701_v30  ;;  %v14101_v51 = vor.u32 %v17731_v36, %v14098_v40  ;;  %9705 = vmatpush.bf16.msrb.mxu1 %v13145_v43  ;;  %v14937_v29 = vor.u32 %v17948_v17, %v14936_v48  ;;  %v13912_v46 = vld [vmem:[#allocation11 + $0xb30] sm:$0xf] }
 0x4a2   :  { %v15634_v57 = vld [vmem:[#allocation11 + $0x18e8] sm:$0xf0]  ;;  %9693 = vmatpush.bf16.msrb.mxu0 %v12569_v15  ;;  %v17692_v30 = vld [vmem:[#allocation11 + $0xb6c] sm:$0xf0] }
 0x4a3   :  { %v15637_v4 = vor.u32 %v18115_v32, %v15634_v57  ;;  %v17715_v61 = vld [vmem:[#allocation11 + $0xc2c] sm:$0xf]  ;;  %9628 = vmatpush.bf16.msrb.mxu3 %v14101_v51  ;;  %v15448_v36 = vld [vmem:[#allocation11 + $0x1730] sm:$0xf]  ;;  %v13913_v57 = vor.u32 %v17692_v30, %v13912_v46  ;;  %v9488_v59 = vpop.f32.mrf.mxu0 }
 0x4a4   :  { %v14034_v55 = vld [vmem:[#allocation11 + $0xc68] sm:$0xf0]  ;;  %v18076_v40 = vld [vmem:[#allocation11 + $0x176c] sm:$0xf0] }
 0x4a5   :  { %v18099_v2 = vld [vmem:[#allocation11 + $0x182c] sm:$0xf]  ;;  %9667 = vmatpush.bf16.msra.mxu2 %v15637_v4  ;;  %v14037_v13 = vor.u32 %v17715_v61, %v14034_v55  ;;  %9706 = vmatpush.bf16.msrb.mxu1 %v13081_v49  ;;  %v14872_v43 = vld [vmem:[#allocation11 + $0x12b0] sm:$0xf]  ;;  %v15449_v31 = vor.u32 %v18076_v40, %v15448_v36  ;;  %v9501_v24 = vpop.f32.mrf.mxu1 }
 0x4a6   :  { %v15570_v0 = vld [vmem:[#allocation11 + $0x1868] sm:$0xf0]  ;;  %9694 = vmatpush.bf16.msrb.mxu0 %v12505_v20  ;;  %v17932_v15 = vld [vmem:[#allocation11 + $0x12ec] sm:$0xf0] }
 0x4a7   :  { %v18339_v56 = vld [vmem:[#allocation11 + $0x1fac] sm:$0xf]  ;;  %v15573_v7 = vor.u32 %v18099_v2, %v15570_v0  ;;  %9629 = vmatpush.bf16.msrb.mxu3 %v14037_v13  ;;  %v14873_v23 = vor.u32 %v17932_v15, %v14872_v43  ;;  %v13848_v51 = vld [vmem:[#allocation11 + $0xab0] sm:$0xf] }
 0x4a8   :  { %v16530_v12 = vld [vmem:[#allocation11 + $0x1fe8] sm:$0xf0]  ;;  %v17676_v4 = vld [vmem:[#allocation11 + $0xaec] sm:$0xf0] }
 0x4a9   :  { %v16533_v19 = vor.u32 %v18339_v56, %v16530_v12  ;;  %v18323_v41 = vld [vmem:[#allocation11 + $0x1f2c] sm:$0xf]  ;;  %9668 = vmatpush.bf16.msra.mxu2 %v15573_v7  ;;  %9695 = vmatmul.bf16.vlgmr.msrb.gmra.mxu0 %v18901_v25  ;;  %v15384_v61 = vld [vmem:[#allocation11 + $0x16b0] sm:$0xf]  ;;  %v13849_v2 = vor.u32 %v17676_v4, %v13848_v51 }
 0x4aa   :  { %9739 = vmatpush.bf16.msra.mxu0 %v15001_v53  ;;  %v16466_v10 = vld [vmem:[#allocation11 + $0x1f68] sm:$0xf0]  ;;  %9707 = vmatpush.bf16.msrb.mxu1 %v13017_v22  ;;  %v18060_v55 = vld [vmem:[#allocation11 + $0x16ec] sm:$0xf0] }
 0x4ab   :  { %9674 = vmatpush.bf16.msra.mxu3 %v16533_v19  ;;  %v16469_v32 = vor.u32 %v18323_v41, %v16466_v10  ;;  %v19199_v11 = vld [vmem:[#allocation13 + $0x8] sm:$0xff]  ;;  %v14808_v49 = vld [vmem:[#allocation11 + $0x1230] sm:$0xf]  ;;  %v15385_v8 = vor.u32 %v18060_v55, %v15384_v61  ;;  %v9490_v43 = vpop.f32.mrf.mxu0 }
 0x4ac   :  { %v3297_v52 = vperm.slane %v19199_v11, 2  ;;  %v18307_v35 = vld [vmem:[#allocation11 + $0x1eac] sm:$0xf]  ;;  %9630 = vmatmul.bf16.vlgmr.msrb.gmra.mxu3 %v18909_v50  ;;  %9669 = vmatmul.bf16.vlgmr.msra.gmra.mxu2 %v18926_v28  ;;  %v17916_v16 = vld [vmem:[#allocation11 + $0x126c] sm:$0xf0] }
 0x4ad   :  { %9713 = vmatpush.bf16.msrb.mxu2 %v13977_v5  ;;  %v16402_v45 = vld [vmem:[#allocation11 + $0x1ee8] sm:$0xf0]  ;;  %9708 = vmatmul.bf16.vlgmr.msrb.gmra.mxu1 %v18903_v27  ;;  %v14809_v56 = vor.u32 %v17916_v16, %v14808_v49  ;;  %v13784_v12 = vld [vmem:[#allocation11 + $0xa30] sm:$0xf] }
 0x4ae   :  { %9752 = vmatpush.bf16.msra.mxu1 %v15513_v63  ;;  %9740 = vmatpush.bf16.msra.mxu0 %v14937_v29  ;;  %v16405_v20 = vor.u32 %v18307_v35, %v16402_v45  ;;  %v18291_v0 = vld [vmem:[#allocation11 + $0x1e2c] sm:$0xf]  ;;  %v9489_v53 = vadd.f32 %v9488_v59, %v3297_v52  ;;  %v17660_v21 = vld [vmem:[#allocation11 + $0xa6c] sm:$0xf0]  ;;  %v9423_v45 = vpop.f32.mrf.mxu3 }
 0x4af   :  { %9675 = vmatpush.bf16.msra.mxu3 %v16469_v32  ;;  %v16338_v47 = vld [vmem:[#allocation11 + $0x1e68] sm:$0xf0]  ;;  %v15320_v6 = vld [vmem:[#allocation11 + $0x1630] sm:$0xf]  ;;  %v13785_v17 = vor.u32 %v17660_v21, %v13784_v12  ;;  %v9424_v55 = vadd.f32 %v9423_v45, %v19196_v18  ;;  %v17572_v45 = vld [vmem:[#allocation11 + $0x7b4] sm:$0xf] }
 0x4b0   :  { %v18044_v39 = vld [vmem:[#allocation11 + $0x166c] sm:$0xf0]  ;;  %v16341_v48 = vor.u32 %v18291_v0, %v16338_v47  ;;  %v18275_v22 = vld [vmem:[#allocation11 + $0x1dac] sm:$0xf]  ;;  %v19205_v5 = vadd.f32 %v9501_v24, %v9489_v53 }
 0x4b1   :  { %9714 = vmatpush.bf16.msrb.mxu2 %v13913_v57  ;;  %v14744_v13 = vld [vmem:[#allocation11 + $0x11b0] sm:$0xf]  ;;  %v16274_v19 = vld [vmem:[#allocation11 + $0x1de8] sm:$0xf0]  ;;  %v15321_v41 = vor.u32 %v18044_v39, %v15320_v6 }
 0x4b2   :  { %9753 = vmatpush.bf16.msra.mxu1 %v15449_v31  ;;  %9741 = vmatpush.bf16.msra.mxu0 %v14873_v23  ;;  %v17900_v7 = vld [vmem:[#allocation11 + $0x11ec] sm:$0xf0]  ;;  %v16277_v15 = vor.u32 %v18275_v22, %v16274_v19  ;;  %v18259_v57 = vld [vmem:[#allocation11 + $0x1d2c] sm:$0xf]  ;;  %v9462_v31 = vpop.f32.mrf.mxu2 }
 0x4b3   :  { %9676 = vmatpush.bf16.msra.mxu3 %v16405_v20  ;;  %v14745_v10 = vor.u32 %v17900_v7, %v14744_v13  ;;  %v13720_v63 = vld [vmem:[#allocation11 + $0x9b0] sm:$0xf]  ;;  %v16210_v52 = vld [vmem:[#allocation11 + $0x1d68] sm:$0xf0]  ;;  %v9437_v20 = vadd.f32 %v19188_v34, %v9424_v55 }
 0x4b4   :  { %v17644_v29 = vld [vmem:[#allocation11 + $0x9ec] sm:$0xf0]  ;;  %v16213_v0 = vor.u32 %v18259_v57, %v16210_v52  ;;  %v18243_v53 = vld [vmem:[#allocation11 + $0x1cac] sm:$0xf] }
 0x4b5   :  { %9715 = vmatpush.bf16.msrb.mxu2 %v13849_v2  ;;  %v15256_v46 = vld [vmem:[#allocation11 + $0x15b0] sm:$0xf]  ;;  %v13721_v32 = vor.u32 %v17644_v29, %v13720_v63  ;;  %v9503_v2 = vpop.f32.mrf.mxu1  ;;  %v9450_v18 = vadd.f32 %v19190_v37, %v9437_v20 }
 0x4b6   :  { %9754 = vmatpush.bf16.msra.mxu1 %v15385_v8  ;;  %9742 = vmatpush.bf16.msra.mxu0 %v14809_v56  ;;  %v18028_v30 = vld [vmem:[#allocation11 + $0x15ec] sm:$0xf0]  ;;  %v16146_v8 = vld [vmem:[#allocation11 + $0x1ce8] sm:$0xf0]  ;;  %v9425_v29 = vpop.f32.mrf.mxu3 }
 0x4b7   :  { %v14680_v36 = vld [vmem:[#allocation11 + $0x1130] sm:$0xf]  ;;  %9677 = vmatpush.bf16.msra.mxu3 %v16341_v48  ;;  %v15257_v35 = vor.u32 %v18028_v30, %v15256_v46  ;;  %v17444_v48 = vld [vmem:[#allocation11 + $0x3b4] sm:$0xf]  ;;  %v19210_v34 = vadd.f32 %v9462_v31, %v9450_v18  ;;  %v16149_v22 = vor.u32 %v18243_v53, %v16146_v8 }
 0x4b8   :  { %v17884_v40 = vld [vmem:[#allocation11 + $0x116c] sm:$0xf0]  ;;  %v17556_v8 = vld [vmem:[#allocation11 + $0x734] sm:$0xf] }
 0x4b9   :  { %9716 = vmatpush.bf16.msrb.mxu2 %v13785_v17  ;;  %v14681_v23 = vor.u32 %v17884_v40, %v14680_v36  ;;  %v13656_v51 = vld [vmem:[#allocation11 + $0x930] sm:$0xf]  ;;  %v12954_v17 = vld [vmem:[#allocation11 + $0x3f0] sm:$0xf0] }
 0x4ba   :  { %9755 = vmatpush.bf16.msra.mxu1 %v15321_v41  ;;  %9743 = vmatpush.bf16.msra.mxu0 %v14745_v10  ;;  %v17628_v4 = vld [vmem:[#allocation11 + $0x96c] sm:$0xf0]  ;;  %v18227_v41 = vld [vmem:[#allocation11 + $0x1c2c] sm:$0xf]  ;;  %v9464_v46 = vpop.f32.mrf.mxu2  ;;  %v12957_v43 = vor.u32 %v17444_v48, %v12954_v17 }
 0x4bb   :  { %v15192_v61 = vld [vmem:[#allocation11 + $0x1530] sm:$0xf]  ;;  %9678 = vmatpush.bf16.msra.mxu3 %v16277_v15  ;;  %v13657_v47 = vor.u32 %v17628_v4, %v13656_v51  ;;  %v16082_v10 = vld [vmem:[#allocation11 + $0x1c68] sm:$0xf0]  ;;  %v13466_v51 = vld [vmem:[#allocation11 + $0x7f0] sm:$0xf0] }
 0x4bc   :  { %v18012_v49 = vld [vmem:[#allocation11 + $0x156c] sm:$0xf0]  ;;  %v16085_v31 = vor.u32 %v18227_v41, %v16082_v10  ;;  %v17428_v4 = vld [vmem:[#allocation11 + $0x334] sm:$0xf]  ;;  %v13469_v2 = vor.u32 %v17572_v45, %v13466_v51 }
 0x4bd   :  { %v14616_v16 = vld [vmem:[#allocation11 + $0x10b0] sm:$0xf]  ;;  %9717 = vmatpush.bf16.msrb.mxu2 %v13721_v32  ;;  %v15193_v56 = vor.u32 %v18012_v49, %v15192_v61  ;;  %v12890_v61 = vld [vmem:[#allocation11 + $0x370] sm:$0xf0] }
 0x4be   :  { %v17868_v59 = vld [vmem:[#allocation11 + $0x10ec] sm:$0xf0]  ;;  %9756 = vmatpush.bf16.msra.mxu1 %v15257_v35  ;;  %9744 = vmatpush.bf16.msra.mxu0 %v14681_v23  ;;  %v17396_v41 = vld [vmem:[#allocation11 + $0x234] sm:$0xf] }
 0x4bf   :  { %v14617_v12 = vor.u32 %v17868_v59, %v14616_v16  ;;  %v13592_v21 = vld [vmem:[#allocation11 + $0x8b0] sm:$0xf]  ;;  %9679 = vmatpush.bf16.msra.mxu3 %v16213_v0  ;;  %v12893_v0 = vor.u32 %v17428_v4, %v12890_v61  ;;  %v12762_v10 = vld [vmem:[#allocation11 + $0x270] sm:$0xf0] }
 0x4c0   :  { %v17612_v6 = vld [vmem:[#allocation11 + $0x8ec] sm:$0xf0] }
 0x4c1   :  { %v15128_v39 = vld [vmem:[#allocation11 + $0x14b0] sm:$0xf]  ;;  %9718 = vmatpush.bf16.msrb.mxu2 %v13657_v47  ;;  %v13593_v19 = vor.u32 %v17612_v6, %v13592_v21  ;;  %v12826_v21 = vld [vmem:[#allocation11 + $0x2f0] sm:$0xf0] }
 0x4c2   :  { %v17996_v13 = vld [vmem:[#allocation11 + $0x14ec] sm:$0xf0]  ;;  %9757 = vmatpush.bf16.msra.mxu1 %v15193_v56  ;;  %9745 = vmatpush.bf16.msra.mxu0 %v14617_v12  ;;  %v13402_v56 = vld [vmem:[#allocation11 + $0x770] sm:$0xf0] }
 0x4c3   :  { %v14552_v7 = vld [vmem:[#allocation11 + $0x1030] sm:$0xf]  ;;  %v15129_v63 = vor.u32 %v17996_v13, %v15128_v39  ;;  %9680 = vmatpush.bf16.msra.mxu3 %v16149_v22  ;;  %v17412_v12 = vld [vmem:[#allocation11 + $0x2b4] sm:$0xf] }
 0x4c4   :  { %v17852_v24 = vld [vmem:[#allocation11 + $0x106c] sm:$0xf0]  ;;  %v17540_v22 = vld [vmem:[#allocation11 + $0x6b4] sm:$0xf] }
 0x4c5   :  { %v14553_v30 = vor.u32 %v17852_v24, %v14552_v7  ;;  %v13528_v37 = vld [vmem:[#allocation11 + $0x830] sm:$0xf]  ;;  %9719 = vmatpush.bf16.msrb.mxu2 %v13593_v19  ;;  %v13405_v7 = vor.u32 %v17556_v8, %v13402_v56  ;;  %v12829_v24 = vor.u32 %v17412_v12, %v12826_v21  ;;  %v13338_v19 = vld [vmem:[#allocation11 + $0x6f0] sm:$0xf0] }
 0x4c6   :  { %v17596_v36 = vld [vmem:[#allocation11 + $0x86c] sm:$0xf0]  ;;  %9758 = vmatpush.bf16.msra.mxu1 %v15129_v63  ;;  %v19216_v63 = vpop.f32.mrf.mxu0 }
 0x4c7   :  { %v15064_v40 = vld [vmem:[#allocation11 + $0x1430] sm:$0xf]  ;;  %v13529_v23 = vor.u32 %v17596_v36, %v13528_v37  ;;  %9746 = vmatpush.bf16.msra.mxu0 %v14553_v30  ;;  %9681 = vmatpush.bf16.msra.mxu3 %v16085_v31  ;;  %v13341_v36 = vor.u32 %v17540_v22, %v13338_v19  ;;  %v19218_v45 = vpop.f32.mrf.mxu1  ;;  %v13146_v22 = vld [vmem:[#allocation11 + $0x570] sm:$0xf0] }
 0x4c8   :  { %v17980_v15 = vld [vmem:[#allocation11 + $0x146c] sm:$0xf0]  ;;  %v17348_v19 = vld [vmem:[#allocation11 + $0xb4] sm:$0xf] }
 0x4c9   :  { %v14488_v32 = vld [vmem:[#allocation11 + $0xfb0] sm:$0xf]  ;;  %v15065_v55 = vor.u32 %v17980_v15, %v15064_v40  ;;  %9720 = vmatpush.bf16.msrb.mxu2 %v13529_v23  ;;  %v12765_v40 = vor.u32 %v17396_v41, %v12762_v10  ;;  %v12570_v41 = vld [vmem:[#allocation11 + $0xf0] sm:$0xf0] }
 0x4ca   :  { %v17836_v57 = vld [vmem:[#allocation11 + $0xfec] sm:$0xf0]  ;;  %9747 = vmatmul.bf16.vlgmr.msra.gmra.mxu0 %v18914_v3  ;;  %9682 = vmatmul.bf16.vlgmr.msra.gmra.mxu3 %v18933_v58 }
 0x4cb   :  { %v16024_v52 = vld [vmem:[#allocation11 + $0x1bb0] sm:$0xf]  ;;  %9791 = vmatpush.bf16.msrb.mxu0 %v12957_v43  ;;  %v14489_v49 = vor.u32 %v17836_v57, %v14488_v32  ;;  %9759 = vmatpush.bf16.msra.mxu1 %v15065_v55  ;;  %v17524_v32 = vld [vmem:[#allocation11 + $0x634] sm:$0xf] }
 0x4cc   :  { %v18220_v35 = vld [vmem:[#allocation11 + $0x1bec] sm:$0xf0]  ;;  %9721 = vmatmul.bf16.vlgmr.msrb.gmra.mxu2 %v18907_v44  ;;  %v13274_v57 = vld [vmem:[#allocation11 + $0x670] sm:$0xf0] }
 0x4cd   :  { %v16025_v16 = vor.u32 %v18220_v35, %v16024_v52  ;;  %v14424_v59 = vld [vmem:[#allocation11 + $0xf30] sm:$0xf]  ;;  %9726 = vmatpush.bf16.msrb.mxu3 %v14489_v49  ;;  %v17380_v52 = vld [vmem:[#allocation11 + $0x1b4] sm:$0xf]  ;;  %v13277_v61 = vor.u32 %v17524_v32, %v13274_v57 }
 0x4ce   :  { %v17820_v20 = vld [vmem:[#allocation11 + $0xf6c] sm:$0xf0]  ;;  %9760 = vmatmul.bf16.vlgmr.msra.gmra.mxu1 %v18920_v54  ;;  %v12698_v35 = vld [vmem:[#allocation11 + $0x1f0] sm:$0xf0] }
 0x4cf   :  { %v15960_v47 = vld [vmem:[#allocation11 + $0x1b30] sm:$0xf]  ;;  %9765 = vmatpush.bf16.msra.mxu2 %v16025_v16  ;;  %v14425_v6 = vor.u32 %v17820_v20, %v14424_v59  ;;  %9804 = vmatpush.bf16.msrb.mxu1 %v13469_v2  ;;  %v12701_v55 = vor.u32 %v17380_v52, %v12698_v35  ;;  %v17508_v59 = vld [vmem:[#allocation11 + $0x5b4] sm:$0xf]  ;;  %v9555_v10 = vpop.f32.mrf.mxu1 }
 0x4d0   :  { %v18204_v53 = vld [vmem:[#allocation11 + $0x1b6c] sm:$0xf0]  ;;  %9792 = vmatpush.bf16.msrb.mxu0 %v12893_v0  ;;  %v13210_v20 = vld [vmem:[#allocation11 + $0x5f0] sm:$0xf0] }
 0x4d1   :  { %v15961_v39 = vor.u32 %v18204_v53, %v15960_v47  ;;  %v14360_v18 = vld [vmem:[#allocation11 + $0xeb0] sm:$0xf]  ;;  %9727 = vmatpush.bf16.msrb.mxu3 %v14425_v6  ;;  %v17364_v2 = vld [vmem:[#allocation11 + $0x134] sm:$0xf]  ;;  %v9542_v47 = vpop.f32.mrf.mxu0  ;;  %v13213_v21 = vor.u32 %v17508_v59, %v13210_v20  ;;  %v9475_v6 = vpop.f32.mrf.mxu3 }
 0x4d2   :  { %v17804_v13 = vld [vmem:[#allocation11 + $0xeec] sm:$0xf0]  ;;  %v12634_v0 = vld [vmem:[#allocation11 + $0x170] sm:$0xf0] }
 0x4d3   :  { %v15896_v48 = vld [vmem:[#allocation11 + $0x1ab0] sm:$0xf]  ;;  %9766 = vmatpush.bf16.msra.mxu2 %v15961_v39  ;;  %v14361_v29 = vor.u32 %v17804_v13, %v14360_v18  ;;  %9805 = vmatpush.bf16.msrb.mxu1 %v13405_v7  ;;  %v9514_v39 = vpop.f32.mrf.mxu2  ;;  %v12637_v18 = vor.u32 %v17364_v2, %v12634_v0  ;;  %v13082_v32 = vld [vmem:[#allocation11 + $0x4f0] sm:$0xf0] }
 0x4d4   :  { %v18188_v17 = vld [vmem:[#allocation11 + $0x1aec] sm:$0xf0]  ;;  %9793 = vmatpush.bf16.msrb.mxu0 %v12829_v24  ;;  %v17492_v24 = vld [vmem:[#allocation11 + $0x534] sm:$0xf] }
 0x4d5   :  { %v15897_v46 = vor.u32 %v18188_v17, %v15896_v48  ;;  %v14296_v30 = vld [vmem:[#allocation11 + $0xe30] sm:$0xf]  ;;  %9728 = vmatpush.bf16.msrb.mxu3 %v14361_v29  ;;  %v19221_v48 = vadd.f32 %v9475_v6, %v19210_v34  ;;  %v19224_v17 = vadd.f32 %v9514_v39, %v19205_v5  ;;  %v17332_v5 = vld [vmem:[#allocation11 + $0x34] sm:$0xf] }
 0x4d6   :  { %v17788_v37 = vld [vmem:[#allocation11 + $0xe6c] sm:$0xf0]  ;;  %v12506_v57 = vld [vmem:[#allocation11 + $0x70] sm:$0xf0] }
 0x4d7   :  { %v15832_v43 = vld [vmem:[#allocation11 + $0x1a30] sm:$0xf]  ;;  %9767 = vmatpush.bf16.msra.mxu2 %v15897_v46  ;;  %v14297_v31 = vor.u32 %v17788_v37, %v14296_v30  ;;  %9806 = vmatpush.bf16.msrb.mxu1 %v13341_v36  ;;  %v13149_v36 = vor.u32 %v17492_v24, %v13146_v22  ;;  %v17956_v52 = vld [vmem:[#allocation11 + $0x13b4] sm:$0xf] }
 0x4d8   :  { %v18172_v15 = vld [vmem:[#allocation11 + $0x1a6c] sm:$0xf0]  ;;  %9794 = vmatpush.bf16.msrb.mxu0 %v12765_v40  ;;  %v12573_v40 = vor.u32 %v17348_v19, %v12570_v41  ;;  %v15002_v35 = vld [vmem:[#allocation11 + $0x13f0] sm:$0xf0] }
 0x4d9   :  { %v15833_v23 = vor.u32 %v18172_v15, %v15832_v43  ;;  %v14232_v51 = vld [vmem:[#allocation11 + $0xdb0] sm:$0xf]  ;;  %9729 = vmatpush.bf16.msrb.mxu3 %v14297_v31  ;;  %v17476_v15 = vld [vmem:[#allocation11 + $0x4b4] sm:$0xf]  ;;  %v15005_v0 = vor.u32 %v17956_v52, %v15002_v35 }
 0x4da   :  { %v17772_v4 = vld [vmem:[#allocation11 + $0xdec] sm:$0xf0]  ;;  %v17460_v2 = vld [vmem:[#allocation11 + $0x434] sm:$0xf] }
 0x4db   :  { %v15768_v49 = vld [vmem:[#allocation11 + $0x19b0] sm:$0xf]  ;;  %9768 = vmatpush.bf16.msra.mxu2 %v15833_v23  ;;  %v14233_v53 = vor.u32 %v17772_v4, %v14232_v51  ;;  %9807 = vmatpush.bf16.msrb.mxu1 %v13277_v61  ;;  %v13085_v61 = vor.u32 %v17476_v15, %v13082_v32  ;;  %v13018_v47 = vld [vmem:[#allocation11 + $0x470] sm:$0xf0] }
 0x4dc   :  { %v18156_v16 = vld [vmem:[#allocation11 + $0x19ec] sm:$0xf0]  ;;  %9795 = vmatpush.bf16.msrb.mxu0 %v12701_v55  ;;  %v9477_v55 = vpop.f32.mrf.mxu3  ;;  %v13021_v24 = vor.u32 %v17460_v2, %v13018_v47 }
 0x4dd   :  { %v15769_v8 = vor.u32 %v18156_v16, %v15768_v49  ;;  %v14168_v56 = vld [vmem:[#allocation11 + $0xd30] sm:$0xf]  ;;  %9730 = vmatpush.bf16.msrb.mxu3 %v14233_v53  ;;  %v9516_v49 = vpop.f32.mrf.mxu2  ;;  %v12509_v16 = vor.u32 %v17332_v5, %v12506_v57  ;;  %v3298_v5 = vperm.slane %v19199_v11, 3  ;;  %v17908_v55 = vld [vmem:[#allocation11 + $0x1234] sm:$0xf] }
 0x4de   :  { %v17756_v12 = vld [vmem:[#allocation11 + $0xd6c] sm:$0xf0]  ;;  %v14810_v49 = vld [vmem:[#allocation11 + $0x1270] sm:$0xf0] }
 0x4df   :  { %v15704_v13 = vld [vmem:[#allocation11 + $0x1930] sm:$0xf]  ;;  %9769 = vmatpush.bf16.msra.mxu2 %v15769_v8  ;;  %v14169_v29 = vor.u32 %v17756_v12, %v14168_v56  ;;  %9808 = vmatpush.bf16.msrb.mxu1 %v13213_v21  ;;  %v17700_v56 = vld [vmem:[#allocation11 + $0xbb4] sm:$0xf] }
 0x4e0   :  { %v18140_v7 = vld [vmem:[#allocation11 + $0x196c] sm:$0xf0]  ;;  %9796 = vmatpush.bf16.msrb.mxu0 %v12637_v18  ;;  %v13978_v12 = vld [vmem:[#allocation11 + $0xbf0] sm:$0xf0] }
 0x4e1   :  { %v15705_v46 = vor.u32 %v18140_v7, %v15704_v13  ;;  %v14104_v30 = vld [vmem:[#allocation11 + $0xcb0] sm:$0xf]  ;;  %9731 = vmatpush.bf16.msrb.mxu3 %v14169_v29  ;;  %v18084_v21 = vld [vmem:[#allocation11 + $0x17b4] sm:$0xf]  ;;  %v13981_v19 = vor.u32 %v17700_v56, %v13978_v12 }
 0x4e2   :  { %v17740_v37 = vld [vmem:[#allocation11 + $0xcec] sm:$0xf0]  ;;  %v15514_v18 = vld [vmem:[#allocation11 + $0x17f0] sm:$0xf0] }
 0x4e3   :  { %v15640_v43 = vld [vmem:[#allocation11 + $0x18b0] sm:$0xf]  ;;  %9770 = vmatpush.bf16.msra.mxu2 %v15705_v46  ;;  %v14105_v31 = vor.u32 %v17740_v37, %v14104_v30  ;;  %9809 = vmatpush.bf16.msrb.mxu1 %v13149_v36  ;;  %v17940_v13 = vld [vmem:[#allocation11 + $0x1334] sm:$0xf]  ;;  %v15517_v29 = vor.u32 %v18084_v21, %v15514_v18 }
 0x4e4   :  { %v18124_v34 = vld [vmem:[#allocation11 + $0x18ec] sm:$0xf0]  ;;  %9797 = vmatpush.bf16.msrb.mxu0 %v12573_v40  ;;  %v14938_v7 = vld [vmem:[#allocation11 + $0x1370] sm:$0xf0]  ;;  %v9592_v11 = vpop.f32.mrf.mxu0 }
 0x4e5   :  { %v15641_v23 = vor.u32 %v18124_v34, %v15640_v43  ;;  %v14040_v51 = vld [vmem:[#allocation11 + $0xc30] sm:$0xf]  ;;  %9732 = vmatpush.bf16.msrb.mxu3 %v14105_v31  ;;  %v14941_v46 = vor.u32 %v17940_v13, %v14938_v7  ;;  %v17684_v30 = vld [vmem:[#allocation11 + $0xb34] sm:$0xf] }
 0x4e6   :  { %v17724_v4 = vld [vmem:[#allocation11 + $0xc6c] sm:$0xf0]  ;;  %v13914_v37 = vld [vmem:[#allocation11 + $0xb70] sm:$0xf0] }
 0x4e7   :  { %v15576_v59 = vld [vmem:[#allocation11 + $0x1830] sm:$0xf]  ;;  %9771 = vmatpush.bf16.msra.mxu2 %v15641_v23  ;;  %v14041_v6 = vor.u32 %v17724_v4, %v14040_v51  ;;  %9810 = vmatpush.bf16.msrb.mxu1 %v13085_v61  ;;  %v18068_v36 = vld [vmem:[#allocation11 + $0x1734] sm:$0xf]  ;;  %v13917_v32 = vor.u32 %v17684_v30, %v13914_v37 }
 0x4e8   :  { %v18108_v20 = vld [vmem:[#allocation11 + $0x186c] sm:$0xf0]  ;;  %9798 = vmatpush.bf16.msrb.mxu0 %v12509_v16  ;;  %v15450_v40 = vld [vmem:[#allocation11 + $0x1770] sm:$0xf0]  ;;  %v9605_v18 = vpop.f32.mrf.mxu1 }
 0x4e9   :  { %v16536_v53 = vld [vmem:[#allocation11 + $0x1fb0] sm:$0xf]  ;;  %v15577_v39 = vor.u32 %v18108_v20, %v15576_v59  ;;  %9733 = vmatpush.bf16.msrb.mxu3 %v14041_v6  ;;  %v17924_v43 = vld [vmem:[#allocation11 + $0x12b4] sm:$0xf]  ;;  %v15453_v35 = vor.u32 %v18068_v36, %v15450_v40 }
 0x4ea   :  { %v18348_v8 = vld [vmem:[#allocation11 + $0x1fec] sm:$0xf0]  ;;  %v14874_v34 = vld [vmem:[#allocation11 + $0x12f0] sm:$0xf0] }
 0x4eb   :  { %v16537_v22 = vor.u32 %v18348_v8, %v16536_v53  ;;  %v16472_v41 = vld [vmem:[#allocation11 + $0x1f30] sm:$0xf]  ;;  %9772 = vmatpush.bf16.msra.mxu2 %v15577_v39  ;;  %9799 = vmatmul.bf16.vlgmr.msrb.gmra.mxu0 %v18901_v25  ;;  %v14877_v31 = vor.u32 %v17924_v43, %v14874_v34  ;;  %v17668_v23 = vld [vmem:[#allocation11 + $0xab4] sm:$0xf]  ;;  %v14813_v53 = vor.u32 %v17908_v55, %v14810_v49 }
 0x4ec   :  { %9843 = vmatpush.bf16.msra.mxu0 %v15005_v0  ;;  %v18332_v10 = vld [vmem:[#allocation11 + $0x1f6c] sm:$0xf0]  ;;  %9811 = vmatpush.bf16.msrb.mxu1 %v13021_v24  ;;  %v13850_v51 = vld [vmem:[#allocation11 + $0xaf0] sm:$0xf0]  ;;  %v9593_v0 = vadd.f32 %v9592_v11, %v3298_v5  ;;  %v9594_v43 = vpop.f32.mrf.mxu0 }
 0x4ed   :  { %9778 = vmatpush.bf16.msra.mxu3 %v16537_v22  ;;  %v16473_v15 = vor.u32 %v18332_v10, %v16472_v41  ;;  %v16408_v57 = vld [vmem:[#allocation11 + $0x1eb0] sm:$0xf]  ;;  %v18052_v4 = vld [vmem:[#allocation11 + $0x16b4] sm:$0xf]  ;;  %v13853_v59 = vor.u32 %v17668_v23, %v13850_v51 }
 0x4ee   :  { %v18316_v52 = vld [vmem:[#allocation11 + $0x1eec] sm:$0xf0]  ;;  %9734 = vmatmul.bf16.vlgmr.msrb.gmra.mxu3 %v18909_v50  ;;  %9773 = vmatmul.bf16.vlgmr.msra.gmra.mxu2 %v18926_v28  ;;  %v15386_v61 = vld [vmem:[#allocation11 + $0x16f0] sm:$0xf0] }
 0x4ef   :  { %9817 = vmatpush.bf16.msrb.mxu2 %v13981_v19  ;;  %9812 = vmatmul.bf16.vlgmr.msrb.gmra.mxu1 %v18903_v27  ;;  %v16409_v16 = vor.u32 %v18316_v52, %v16408_v57  ;;  %v16344_v20 = vld [vmem:[#allocation11 + $0x1e30] sm:$0xf]  ;;  %v15389_v47 = vor.u32 %v18052_v4, %v15386_v61  ;;  %v17652_v8 = vld [vmem:[#allocation11 + $0xa34] sm:$0xf]  ;;  %v19231_v19 = vadd.f32 %v9605_v18, %v9593_v0  ;;  %v9527_v52 = vpop.f32.mrf.mxu3 }
 0x4f0   :  { %9856 = vmatpush.bf16.msra.mxu1 %v15517_v29  ;;  %9844 = vmatpush.bf16.msra.mxu0 %v14941_v46  ;;  %v18300_v2 = vld [vmem:[#allocation11 + $0x1e6c] sm:$0xf0]  ;;  %v13786_v56 = vld [vmem:[#allocation11 + $0xa70] sm:$0xf0]  ;;  %v9528_v61 = vadd.f32 %v9527_v52, %v19224_v17  ;;  %v13472_v52 = vld [vmem:[#allocation11 + $0x7b8] sm:$0xf] }
 0x4f1   :  { %9779 = vmatpush.bf16.msra.mxu3 %v16473_v15  ;;  %v18036_v12 = vld [vmem:[#allocation11 + $0x1634] sm:$0xf]  ;;  %v16345_v13 = vor.u32 %v18300_v2, %v16344_v20  ;;  %v13789_v7 = vor.u32 %v17652_v8, %v13786_v56  ;;  %v16280_v24 = vld [vmem:[#allocation11 + $0x1db0] sm:$0xf] }
 0x4f2   :  { %v15322_v21 = vld [vmem:[#allocation11 + $0x1670] sm:$0xf0]  ;;  %v18284_v22 = vld [vmem:[#allocation11 + $0x1dec] sm:$0xf0] }
 0x4f3   :  { %9818 = vmatpush.bf16.msrb.mxu2 %v13917_v32  ;;  %v17892_v6 = vld [vmem:[#allocation11 + $0x11b4] sm:$0xf]  ;;  %v15325_v41 = vor.u32 %v18036_v12, %v15322_v21  ;;  %v16281_v34 = vor.u32 %v18284_v22, %v16280_v24  ;;  %v16216_v32 = vld [vmem:[#allocation11 + $0x1d30] sm:$0xf] }
 0x4f4   :  { %9857 = vmatpush.bf16.msra.mxu1 %v15453_v35  ;;  %9845 = vmatpush.bf16.msra.mxu0 %v14877_v31  ;;  %v14746_v39 = vld [vmem:[#allocation11 + $0x11f0] sm:$0xf0]  ;;  %v18268_v5 = vld [vmem:[#allocation11 + $0x1d6c] sm:$0xf0]  ;;  %v9566_v35 = vpop.f32.mrf.mxu2 }
 0x4f5   :  { %9780 = vmatpush.bf16.msra.mxu3 %v16409_v16  ;;  %v14749_v10 = vor.u32 %v17892_v6, %v14746_v39  ;;  %v17636_v29 = vld [vmem:[#allocation11 + $0x9b4] sm:$0xf]  ;;  %v9541_v16 = vadd.f32 %v19216_v63, %v9528_v61  ;;  %v16217_v20 = vor.u32 %v18268_v5, %v16216_v32  ;;  %v16152_v0 = vld [vmem:[#allocation11 + $0x1cb0] sm:$0xf] }
 0x4f6   :  { %v13722_v46 = vld [vmem:[#allocation11 + $0x9f0] sm:$0xf0] }
 0x4f7   :  { %9819 = vmatpush.bf16.msrb.mxu2 %v13853_v59  ;;  %v18020_v30 = vld [vmem:[#allocation11 + $0x15b4] sm:$0xf]  ;;  %v13725_v15 = vor.u32 %v17636_v29, %v13722_v46  ;;  %v9607_v59 = vpop.f32.mrf.mxu1  ;;  %v9554_v17 = vadd.f32 %v19218_v45, %v9541_v16  ;;  %v9529_v46 = vpop.f32.mrf.mxu3 }
 0x4f8   :  { %9858 = vmatpush.bf16.msra.mxu1 %v15389_v47  ;;  %9846 = vmatpush.bf16.msra.mxu0 %v14813_v53  ;;  %v15258_v37 = vld [vmem:[#allocation11 + $0x15f0] sm:$0xf0]  ;;  %v18252_v47 = vld [vmem:[#allocation11 + $0x1cec] sm:$0xf0] }
 0x4f9   :  { %v17876_v36 = vld [vmem:[#allocation11 + $0x1134] sm:$0xf]  ;;  %9781 = vmatpush.bf16.msra.mxu3 %v16345_v13  ;;  %v15261_v57 = vor.u32 %v18020_v30, %v15258_v37  ;;  %v12960_v13 = vld [vmem:[#allocation11 + $0x3b8] sm:$0xf]  ;;  %v19236_v63 = vadd.f32 %v9566_v35, %v9554_v17  ;;  %v16153_v24 = vor.u32 %v18252_v47, %v16152_v0 }
 0x4fa   :  { %v14682_v40 = vld [vmem:[#allocation11 + $0x1170] sm:$0xf0]  ;;  %v13408_v47 = vld [vmem:[#allocation11 + $0x738] sm:$0xf] }
 0x4fb   :  { %9820 = vmatpush.bf16.msrb.mxu2 %v13789_v7  ;;  %v14685_v31 = vor.u32 %v17876_v36, %v14682_v40  ;;  %v17620_v23 = vld [vmem:[#allocation11 + $0x934] sm:$0xf]  ;;  %v17453_v7 = vld [vmem:[#allocation11 + $0x3f4] sm:$0xf0] }
 0x4fc   :  { %9859 = vmatpush.bf16.msra.mxu1 %v15325_v41  ;;  %9847 = vmatpush.bf16.msra.mxu0 %v14749_v10  ;;  %v13658_v51 = vld [vmem:[#allocation11 + $0x970] sm:$0xf0]  ;;  %v16088_v41 = vld [vmem:[#allocation11 + $0x1c30] sm:$0xf]  ;;  %v9568_v30 = vpop.f32.mrf.mxu2  ;;  %v12961_v43 = vor.u32 %v17453_v7, %v12960_v13 }
 0x4fd   :  { %v18004_v4 = vld [vmem:[#allocation11 + $0x1534] sm:$0xf]  ;;  %9782 = vmatpush.bf16.msra.mxu3 %v16281_v34  ;;  %v13661_v2 = vor.u32 %v17620_v23, %v13658_v51  ;;  %v18236_v10 = vld [vmem:[#allocation11 + $0x1c6c] sm:$0xf0]  ;;  %v17581_v23 = vld [vmem:[#allocation11 + $0x7f4] sm:$0xf0] }
 0x4fe   :  { %v15194_v55 = vld [vmem:[#allocation11 + $0x1570] sm:$0xf0]  ;;  %v16089_v35 = vor.u32 %v18236_v10, %v16088_v41  ;;  %v12896_v51 = vld [vmem:[#allocation11 + $0x338] sm:$0xf]  ;;  %v13473_v59 = vor.u32 %v17581_v23, %v13472_v52 }
 0x4ff   :  { %v17860_v49 = vld [vmem:[#allocation11 + $0x10b4] sm:$0xf]  ;;  %9821 = vmatpush.bf16.msrb.mxu2 %v13725_v15  ;;  %v15197_v53 = vor.u32 %v18004_v4, %v15194_v55  ;;  %v17437_v4 = vld [vmem:[#allocation11 + $0x374] sm:$0xf0] }
 0x500   :  { %v14618_v11 = vld [vmem:[#allocation11 + $0x10f0] sm:$0xf0]  ;;  %9860 = vmatpush.bf16.msra.mxu1 %v15261_v57  ;;  %9848 = vmatpush.bf16.msra.mxu0 %v14685_v31  ;;  %v12768_v41 = vld [vmem:[#allocation11 + $0x238] sm:$0xf] }
 0x501   :  { %v14621_v8 = vor.u32 %v17860_v49, %v14618_v11  ;;  %v17604_v56 = vld [vmem:[#allocation11 + $0x8b4] sm:$0xf]  ;;  %9783 = vmatpush.bf16.msra.mxu3 %v16217_v20  ;;  %v12897_v20 = vor.u32 %v17437_v4, %v12896_v51  ;;  %v17405_v10 = vld [vmem:[#allocation11 + $0x274] sm:$0xf0] }
 0x502   :  { %v13594_v12 = vld [vmem:[#allocation11 + $0x8f0] sm:$0xf0] }
 0x503   :  { %v17988_v21 = vld [vmem:[#allocation11 + $0x14b4] sm:$0xf]  ;;  %9822 = vmatpush.bf16.msrb.mxu2 %v13661_v2  ;;  %v13597_v22 = vor.u32 %v17604_v56, %v13594_v12  ;;  %v17421_v56 = vld [vmem:[#allocation11 + $0x2f4] sm:$0xf0] }
 0x504   :  { %v15130_v6 = vld [vmem:[#allocation11 + $0x14f0] sm:$0xf0]  ;;  %9861 = vmatpush.bf16.msra.mxu1 %v15197_v53  ;;  %9849 = vmatpush.bf16.msra.mxu0 %v14621_v8  ;;  %v17565_v53 = vld [vmem:[#allocation11 + $0x774] sm:$0xf0] }
 0x505   :  { %v17844_v39 = vld [vmem:[#allocation11 + $0x1034] sm:$0xf]  ;;  %v15133_v29 = vor.u32 %v17988_v21, %v15130_v6  ;;  %9784 = vmatpush.bf16.msra.mxu3 %v16153_v24  ;;  %v12832_v8 = vld [vmem:[#allocation11 + $0x2b8] sm:$0xf] }
 0x506   :  { %v14554_v18 = vld [vmem:[#allocation11 + $0x1070] sm:$0xf0]  ;;  %v13344_v24 = vld [vmem:[#allocation11 + $0x6b8] sm:$0xf] }
 0x507   :  { %v14557_v37 = vor.u32 %v17844_v39, %v14554_v18  ;;  %v17588_v45 = vld [vmem:[#allocation11 + $0x834] sm:$0xf]  ;;  %9823 = vmatpush.bf16.msrb.mxu2 %v13597_v22  ;;  %v13409_v39 = vor.u32 %v17565_v53, %v13408_v47  ;;  %v12833_v18 = vor.u32 %v17421_v56, %v12832_v8  ;;  %v17549_v22 = vld [vmem:[#allocation11 + $0x6f4] sm:$0xf0] }
 0x508   :  { %v13530_v36 = vld [vmem:[#allocation11 + $0x870] sm:$0xf0]  ;;  %9862 = vmatpush.bf16.msra.mxu1 %v15133_v29  ;;  %v19242_v29 = vpop.f32.mrf.mxu0 }
 0x509   :  { %v17972_v40 = vld [vmem:[#allocation11 + $0x1434] sm:$0xf]  ;;  %v13533_v31 = vor.u32 %v17588_v45, %v13530_v36  ;;  %9850 = vmatpush.bf16.msra.mxu0 %v14557_v37  ;;  %9785 = vmatpush.bf16.msra.mxu3 %v16089_v35  ;;  %v13345_v36 = vor.u32 %v17549_v22, %v13344_v24  ;;  %v19244_v52 = vpop.f32.mrf.mxu1  ;;  %v17501_v24 = vld [vmem:[#allocation11 + $0x574] sm:$0xf0] }
 0x50a   :  { %v15066_v34 = vld [vmem:[#allocation11 + $0x1470] sm:$0xf0]  ;;  %v12576_v22 = vld [vmem:[#allocation11 + $0xb8] sm:$0xf] }
 0x50b   :  { %v17828_v15 = vld [vmem:[#allocation11 + $0xfb4] sm:$0xf]  ;;  %v15069_v61 = vor.u32 %v17972_v40, %v15066_v34  ;;  %9824 = vmatpush.bf16.msrb.mxu2 %v13533_v31  ;;  %v12769_v40 = vor.u32 %v17405_v10, %v12768_v41  ;;  %v17357_v41 = vld [vmem:[#allocation11 + $0xf4] sm:$0xf0] }
 0x50c   :  { %v14490_v32 = vld [vmem:[#allocation11 + $0xff0] sm:$0xf0]  ;;  %9851 = vmatmul.bf16.vlgmr.msra.gmra.mxu0 %v18914_v3  ;;  %9786 = vmatmul.bf16.vlgmr.msra.gmra.mxu3 %v18933_v58 }
 0x50d   :  { %v18212_v5 = vld [vmem:[#allocation11 + $0x1bb4] sm:$0xf]  ;;  %9895 = vmatpush.bf16.msrb.mxu0 %v12961_v43  ;;  %v14493_v55 = vor.u32 %v17828_v15, %v14490_v32  ;;  %9863 = vmatpush.bf16.msra.mxu1 %v15069_v61  ;;  %v13280_v15 = vld [vmem:[#allocation11 + $0x638] sm:$0xf] }
 0x50e   :  { %v16026_v57 = vld [vmem:[#allocation11 + $0x1bf0] sm:$0xf0]  ;;  %9825 = vmatmul.bf16.vlgmr.msrb.gmra.mxu2 %v18907_v44  ;;  %v17533_v32 = vld [vmem:[#allocation11 + $0x674] sm:$0xf0] }
 0x50f   :  { %v16029_v49 = vor.u32 %v18212_v5, %v16026_v57  ;;  %v17812_v11 = vld [vmem:[#allocation11 + $0xf34] sm:$0xf]  ;;  %9830 = vmatpush.bf16.msrb.mxu3 %v14493_v55  ;;  %v12704_v5 = vld [vmem:[#allocation11 + $0x1b8] sm:$0xf]  ;;  %v13281_v4 = vor.u32 %v17533_v32, %v13280_v15 }
 0x510   :  { %v14426_v16 = vld [vmem:[#allocation11 + $0xf70] sm:$0xf0]  ;;  %9864 = vmatmul.bf16.vlgmr.msra.gmra.mxu1 %v18920_v54  ;;  %v17389_v57 = vld [vmem:[#allocation11 + $0x1f4] sm:$0xf0] }
 0x511   :  { %v18196_v2 = vld [vmem:[#allocation11 + $0x1b34] sm:$0xf]  ;;  %9869 = vmatpush.bf16.msra.mxu2 %v16029_v49  ;;  %v14429_v12 = vor.u32 %v17812_v11, %v14426_v16  ;;  %9908 = vmatpush.bf16.msrb.mxu1 %v13473_v59  ;;  %v12705_v61 = vor.u32 %v17389_v57, %v12704_v5  ;;  %v13216_v11 = vld [vmem:[#allocation11 + $0x5b8] sm:$0xf]  ;;  %v9659_v10 = vpop.f32.mrf.mxu1 }
 0x512   :  { %v15962_v0 = vld [vmem:[#allocation11 + $0x1b70] sm:$0xf0]  ;;  %9896 = vmatpush.bf16.msrb.mxu0 %v12897_v20  ;;  %v17517_v16 = vld [vmem:[#allocation11 + $0x5f4] sm:$0xf0] }
 0x513   :  { %v15965_v21 = vor.u32 %v18196_v2, %v15962_v0  ;;  %v17796_v17 = vld [vmem:[#allocation11 + $0xeb4] sm:$0xf]  ;;  %9831 = vmatpush.bf16.msrb.mxu3 %v14429_v12  ;;  %v12640_v59 = vld [vmem:[#allocation11 + $0x138] sm:$0xf]  ;;  %v9646_v2 = vpop.f32.mrf.mxu0  ;;  %v13217_v56 = vor.u32 %v17517_v16, %v13216_v11  ;;  %v9579_v12 = vpop.f32.mrf.mxu3 }
 0x514   :  { %v14362_v6 = vld [vmem:[#allocation11 + $0xef0] sm:$0xf0]  ;;  %v17373_v20 = vld [vmem:[#allocation11 + $0x174] sm:$0xf0] }
 0x515   :  { %v18180_v13 = vld [vmem:[#allocation11 + $0x1ab4] sm:$0xf]  ;;  %9870 = vmatpush.bf16.msra.mxu2 %v15965_v21  ;;  %v14365_v46 = vor.u32 %v17796_v17, %v14362_v6  ;;  %9909 = vmatpush.bf16.msrb.mxu1 %v13409_v39  ;;  %v9618_v21 = vpop.f32.mrf.mxu2  ;;  %v12641_v17 = vor.u32 %v17373_v20, %v12640_v59  ;;  %v17485_v15 = vld [vmem:[#allocation11 + $0x4f4] sm:$0xf0] }
 0x516   :  { %v15898_v7 = vld [vmem:[#allocation11 + $0x1af0] sm:$0xf0]  ;;  %9897 = vmatpush.bf16.msrb.mxu0 %v12833_v18  ;;  %v13152_v18 = vld [vmem:[#allocation11 + $0x538] sm:$0xf] }
 0x517   :  { %v15901_v30 = vor.u32 %v18180_v13, %v15898_v7  ;;  %v17780_v37 = vld [vmem:[#allocation11 + $0xe34] sm:$0xf]  ;;  %9832 = vmatpush.bf16.msrb.mxu3 %v14365_v46  ;;  %v19247_v13 = vadd.f32 %v9579_v12, %v19236_v63  ;;  %v19250_v7 = vadd.f32 %v9618_v21, %v19231_v19  ;;  %v12512_v19 = vld [vmem:[#allocation11 + $0x38] sm:$0xf] }
 0x518   :  { %v14298_v45 = vld [vmem:[#allocation11 + $0xe70] sm:$0xf0]  ;;  %v17341_v32 = vld [vmem:[#allocation11 + $0x74] sm:$0xf0] }
 0x519   :  { %v18164_v43 = vld [vmem:[#allocation11 + $0x1a34] sm:$0xf]  ;;  %9871 = vmatpush.bf16.msra.mxu2 %v15901_v30  ;;  %v14301_v35 = vor.u32 %v17780_v37, %v14298_v45  ;;  %9910 = vmatpush.bf16.msrb.mxu1 %v13345_v36  ;;  %v13153_v36 = vor.u32 %v17501_v24, %v13152_v18  ;;  %v15008_v5 = vld [vmem:[#allocation11 + $0x13b8] sm:$0xf] }
 0x51a   :  { %v15834_v34 = vld [vmem:[#allocation11 + $0x1a70] sm:$0xf0]  ;;  %9898 = vmatpush.bf16.msrb.mxu0 %v12769_v40  ;;  %v12577_v40 = vor.u32 %v17357_v41, %v12576_v22  ;;  %v17965_v57 = vld [vmem:[#allocation11 + $0x13f4] sm:$0xf0] }
 0x51b   :  { %v15837_v31 = vor.u32 %v18164_v43, %v15834_v34  ;;  %v17764_v23 = vld [vmem:[#allocation11 + $0xdb4] sm:$0xf]  ;;  %9833 = vmatpush.bf16.msrb.mxu3 %v14301_v35  ;;  %v13088_v34 = vld [vmem:[#allocation11 + $0x4b8] sm:$0xf]  ;;  %v15009_v20 = vor.u32 %v17965_v57, %v15008_v5 }
 0x51c   :  { %v14234_v51 = vld [vmem:[#allocation11 + $0xdf0] sm:$0xf0]  ;;  %v13024_v59 = vld [vmem:[#allocation11 + $0x438] sm:$0xf] }
 0x51d   :  { %v18148_v55 = vld [vmem:[#allocation11 + $0x19b4] sm:$0xf]  ;;  %9872 = vmatpush.bf16.msra.mxu2 %v15837_v31  ;;  %v14237_v0 = vor.u32 %v17764_v23, %v14234_v51  ;;  %9911 = vmatpush.bf16.msrb.mxu1 %v13281_v4  ;;  %v13089_v4 = vor.u32 %v17485_v15, %v13088_v34  ;;  %v17469_v2 = vld [vmem:[#allocation11 + $0x474] sm:$0xf0] }
 0x51e   :  { %v15770_v49 = vld [vmem:[#allocation11 + $0x19f0] sm:$0xf0]  ;;  %9899 = vmatpush.bf16.msrb.mxu0 %v12705_v61  ;;  %v9581_v61 = vpop.f32.mrf.mxu3  ;;  %v13025_v18 = vor.u32 %v17469_v2, %v13024_v59 }
 0x51f   :  { %v15773_v47 = vor.u32 %v18148_v55, %v15770_v49  ;;  %v17748_v53 = vld [vmem:[#allocation11 + $0xd34] sm:$0xf]  ;;  %9834 = vmatpush.bf16.msrb.mxu3 %v14237_v0  ;;  %v9620_v55 = vpop.f32.mrf.mxu2  ;;  %v12513_v49 = vor.u32 %v17341_v32, %v12512_v19  ;;  %v19253_v19 = vld [vmem:[#allocation13 + $0x8] sm:$0xff]  ;;  %v18061_v61 = vld [vmem:[#allocation11 + $0x16f4] sm:$0xf0] }
 0x520   :  { %v14170_v8 = vld [vmem:[#allocation11 + $0xd70] sm:$0xf0]  ;;  %v3299_v32 = vperm.slane %v19253_v19, 4  ;;  %v14816_v55 = vld [vmem:[#allocation11 + $0x1238] sm:$0xf] }
 0x521   :  { %v18132_v6 = vld [vmem:[#allocation11 + $0x1934] sm:$0xf]  ;;  %9873 = vmatpush.bf16.msra.mxu2 %v15773_v47  ;;  %v14173_v46 = vor.u32 %v17748_v53, %v14170_v8  ;;  %9912 = vmatpush.bf16.msrb.mxu1 %v13217_v56  ;;  %v13984_v53 = vld [vmem:[#allocation11 + $0xbb8] sm:$0xf] }
 0x522   :  { %v15706_v39 = vld [vmem:[#allocation11 + $0x1970] sm:$0xf0]  ;;  %9900 = vmatpush.bf16.msrb.mxu0 %v12641_v17  ;;  %v17709_v8 = vld [vmem:[#allocation11 + $0xbf4] sm:$0xf0] }
 0x523   :  { %v15709_v30 = vor.u32 %v18132_v6, %v15706_v39  ;;  %v17732_v37 = vld [vmem:[#allocation11 + $0xcb4] sm:$0xf]  ;;  %9835 = vmatpush.bf16.msrb.mxu3 %v14173_v46  ;;  %v15520_v56 = vld [vmem:[#allocation11 + $0x17b8] sm:$0xf]  ;;  %v13985_v22 = vor.u32 %v17709_v8, %v13984_v53 }
 0x524   :  { %v14106_v45 = vld [vmem:[#allocation11 + $0xcf0] sm:$0xf0]  ;;  %v18093_v17 = vld [vmem:[#allocation11 + $0x17f4] sm:$0xf0] }
 0x525   :  { %v18116_v43 = vld [vmem:[#allocation11 + $0x18b4] sm:$0xf]  ;;  %9874 = vmatpush.bf16.msra.mxu2 %v15709_v30  ;;  %v14109_v35 = vor.u32 %v17732_v37, %v14106_v45  ;;  %9913 = vmatpush.bf16.msrb.mxu1 %v13153_v36  ;;  %v14944_v6 = vld [vmem:[#allocation11 + $0x1338] sm:$0xf]  ;;  %v15521_v46 = vor.u32 %v18093_v17, %v15520_v56 }
 0x526   :  { %v15642_v63 = vld [vmem:[#allocation11 + $0x18f0] sm:$0xf0]  ;;  %9901 = vmatpush.bf16.msrb.mxu0 %v12577_v40  ;;  %v17949_v39 = vld [vmem:[#allocation11 + $0x1374] sm:$0xf0] }
 0x527   :  { %v15645_v31 = vor.u32 %v18116_v43, %v15642_v63  ;;  %v17716_v23 = vld [vmem:[#allocation11 + $0xc34] sm:$0xf]  ;;  %9836 = vmatpush.bf16.msrb.mxu3 %v14109_v35  ;;  %v14945_v30 = vor.u32 %v17949_v39, %v14944_v6  ;;  %v13920_v37 = vld [vmem:[#allocation11 + $0xb38] sm:$0xf] }
 0x528   :  { %v14042_v51 = vld [vmem:[#allocation11 + $0xc70] sm:$0xf0]  ;;  %v17693_v45 = vld [vmem:[#allocation11 + $0xb74] sm:$0xf0] }
 0x529   :  { %v18100_v11 = vld [vmem:[#allocation11 + $0x1834] sm:$0xf]  ;;  %9875 = vmatpush.bf16.msra.mxu2 %v15645_v31  ;;  %v14045_v12 = vor.u32 %v17716_v23, %v14042_v51  ;;  %9914 = vmatpush.bf16.msrb.mxu1 %v13089_v4  ;;  %v15456_v36 = vld [vmem:[#allocation11 + $0x1738] sm:$0xf]  ;;  %v13921_v15 = vor.u32 %v17693_v45, %v13920_v37 }
 0x52a   :  { %v15578_v16 = vld [vmem:[#allocation11 + $0x1870] sm:$0xf0]  ;;  %9902 = vmatpush.bf16.msrb.mxu0 %v12513_v49  ;;  %v18077_v40 = vld [vmem:[#allocation11 + $0x1774] sm:$0xf0]  ;;  %v9709_v39 = vpop.f32.mrf.mxu1 }
 0x52b   :  { %v18340_v0 = vld [vmem:[#allocation11 + $0x1fb4] sm:$0xf]  ;;  %v15581_v21 = vor.u32 %v18100_v11, %v15578_v16  ;;  %9837 = vmatpush.bf16.msrb.mxu3 %v14045_v12  ;;  %v14880_v43 = vld [vmem:[#allocation11 + $0x12b8] sm:$0xf]  ;;  %v15457_v35 = vor.u32 %v18077_v40, %v15456_v36  ;;  %v9696_v11 = vpop.f32.mrf.mxu0 }
 0x52c   :  { %v16538_v47 = vld [vmem:[#allocation11 + $0x1ff0] sm:$0xf0]  ;;  %v17933_v63 = vld [vmem:[#allocation11 + $0x12f4] sm:$0xf0] }
 0x52d   :  { %v16541_v24 = vor.u32 %v18340_v0, %v16538_v47  ;;  %v18324_v41 = vld [vmem:[#allocation11 + $0x1f34] sm:$0xf]  ;;  %9876 = vmatpush.bf16.msra.mxu2 %v15581_v21  ;;  %9903 = vmatmul.bf16.vlgmr.msrb.gmra.mxu0 %v18901_v25  ;;  %v14881_v31 = vor.u32 %v17933_v63, %v14880_v43  ;;  %v13856_v23 = vld [vmem:[#allocation11 + $0xab8] sm:$0xf]  ;;  %v9697_v0 = vadd.f32 %v9696_v11, %v3299_v32 }
 0x52e   :  { %9947 = vmatpush.bf16.msra.mxu0 %v15009_v20  ;;  %v16474_v10 = vld [vmem:[#allocation11 + $0x1f70] sm:$0xf0]  ;;  %9915 = vmatpush.bf16.msrb.mxu1 %v13025_v18  ;;  %v17677_v51 = vld [vmem:[#allocation11 + $0xaf4] sm:$0xf0] }
 0x52f   :  { %9882 = vmatpush.bf16.msra.mxu3 %v16541_v24  ;;  %v16477_v34 = vor.u32 %v18324_v41, %v16474_v10  ;;  %v18308_v5 = vld [vmem:[#allocation11 + $0x1eb4] sm:$0xf]  ;;  %v15392_v4 = vld [vmem:[#allocation11 + $0x16b8] sm:$0xf]  ;;  %v13857_v59 = vor.u32 %v17677_v51, %v13856_v23  ;;  %v19259_v10 = vadd.f32 %v9709_v39, %v9697_v0  ;;  %v9670_v23 = vpop.f32.mrf.mxu2 }
 0x530   :  { %v16410_v57 = vld [vmem:[#allocation11 + $0x1ef0] sm:$0xf0]  ;;  %9838 = vmatmul.bf16.vlgmr.msrb.gmra.mxu3 %v18909_v50  ;;  %9877 = vmatmul.bf16.vlgmr.msra.gmra.mxu2 %v18926_v28  ;;  %v17917_v49 = vld [vmem:[#allocation11 + $0x1274] sm:$0xf0]  ;;  %v15393_v47 = vor.u32 %v18061_v61, %v15392_v4 }
 0x531   :  { %9921 = vmatpush.bf16.msrb.mxu2 %v13985_v22  ;;  %9916 = vmatmul.bf16.vlgmr.msrb.gmra.mxu1 %v18903_v27  ;;  %v16413_v16 = vor.u32 %v18308_v5, %v16410_v57  ;;  %v18292_v20 = vld [vmem:[#allocation11 + $0x1e34] sm:$0xf]  ;;  %v14817_v53 = vor.u32 %v17917_v49, %v14816_v55  ;;  %v13792_v8 = vld [vmem:[#allocation11 + $0xa38] sm:$0xf] }
 0x532   :  { %9960 = vmatpush.bf16.msra.mxu1 %v15521_v46  ;;  %9948 = vmatpush.bf16.msra.mxu0 %v14945_v30  ;;  %v16346_v2 = vld [vmem:[#allocation11 + $0x1e70] sm:$0xf0]  ;;  %v17661_v56 = vld [vmem:[#allocation11 + $0xa74] sm:$0xf0] }
 0x533   :  { %9883 = vmatpush.bf16.msra.mxu3 %v16477_v34  ;;  %v15328_v12 = vld [vmem:[#allocation11 + $0x1638] sm:$0xf]  ;;  %v16349_v18 = vor.u32 %v18292_v20, %v16346_v2  ;;  %v13793_v24 = vor.u32 %v17661_v56, %v13792_v8  ;;  %v18276_v22 = vld [vmem:[#allocation11 + $0x1db4] sm:$0xf]  ;;  %v9698_v34 = vpop.f32.mrf.mxu0  ;;  %v9711_v2 = vpop.f32.mrf.mxu1 }
 0x534   :  { %v18045_v21 = vld [vmem:[#allocation11 + $0x1674] sm:$0xf0]  ;;  %v16282_v41 = vld [vmem:[#allocation11 + $0x1df0] sm:$0xf0] }
 0x535   :  { %9922 = vmatpush.bf16.msrb.mxu2 %v13921_v15  ;;  %v14752_v17 = vld [vmem:[#allocation11 + $0x11b8] sm:$0xf]  ;;  %v15329_v46 = vor.u32 %v18045_v21, %v15328_v12  ;;  %v16285_v15 = vor.u32 %v18276_v22, %v16282_v41  ;;  %v18260_v5 = vld [vmem:[#allocation11 + $0x1d34] sm:$0xf]  ;;  %v17445_v22 = vld [vmem:[#allocation11 + $0x3bc] sm:$0xf] }
 0x536   :  { %9961 = vmatpush.bf16.msra.mxu1 %v15457_v35  ;;  %9949 = vmatpush.bf16.msra.mxu0 %v14881_v31  ;;  %v17901_v6 = vld [vmem:[#allocation11 + $0x11f4] sm:$0xf0]  ;;  %v16218_v57 = vld [vmem:[#allocation11 + $0x1d70] sm:$0xf0]  ;;  %v9631_v31 = vpop.f32.mrf.mxu3  ;;  %v12962_v41 = vld [vmem:[#allocation11 + $0x3f8] sm:$0xf0] }
 0x537   :  { %9884 = vmatpush.bf16.msra.mxu3 %v16413_v16  ;;  %v14753_v30 = vor.u32 %v17901_v6, %v14752_v17  ;;  %v13728_v37 = vld [vmem:[#allocation11 + $0x9b8] sm:$0xf]  ;;  %v9632_v49 = vadd.f32 %v9631_v31, %v19250_v7  ;;  %v16221_v0 = vor.u32 %v18260_v5, %v16218_v57  ;;  %v16154_v8 = vld [vmem:[#allocation11 + $0x1cf0] sm:$0xf0] }
 0x538   :  { %v17645_v45 = vld [vmem:[#allocation11 + $0x9f4] sm:$0xf0] }
 0x539   :  { %9923 = vmatpush.bf16.msrb.mxu2 %v13857_v59  ;;  %v15264_v36 = vld [vmem:[#allocation11 + $0x15b8] sm:$0xf]  ;;  %v13729_v32 = vor.u32 %v17645_v45, %v13728_v37  ;;  %v9645_v20 = vadd.f32 %v19242_v29, %v9632_v49  ;;  %v18228_v37 = vld [vmem:[#allocation11 + $0x1c34] sm:$0xf]  ;;  %v17429_v49 = vld [vmem:[#allocation11 + $0x33c] sm:$0xf] }
 0x53a   :  { %9962 = vmatpush.bf16.msra.mxu1 %v15393_v47  ;;  %9950 = vmatpush.bf16.msra.mxu0 %v14817_v53  ;;  %v18029_v40 = vld [vmem:[#allocation11 + $0x15f4] sm:$0xf0]  ;;  %v18244_v53 = vld [vmem:[#allocation11 + $0x1cb4] sm:$0xf] }
 0x53b   :  { %v14688_v43 = vld [vmem:[#allocation11 + $0x1138] sm:$0xf]  ;;  %9885 = vmatpush.bf16.msra.mxu3 %v16349_v18  ;;  %v15265_v35 = vor.u32 %v18029_v40, %v15264_v36  ;;  %v9658_v7 = vadd.f32 %v19244_v52, %v9645_v20  ;;  %v16090_v45 = vld [vmem:[#allocation11 + $0x1c70] sm:$0xf0] }
 0x53c   :  { %v17885_v63 = vld [vmem:[#allocation11 + $0x1174] sm:$0xf0] }
 0x53d   :  { %9924 = vmatpush.bf16.msrb.mxu2 %v13793_v24  ;;  %v14689_v51 = vor.u32 %v17885_v63, %v14688_v43  ;;  %v13664_v4 = vld [vmem:[#allocation11 + $0x938] sm:$0xf]  ;;  %v19264_v29 = vadd.f32 %v9670_v23, %v9658_v7  ;;  %v9672_v43 = vpop.f32.mrf.mxu2 }
 0x53e   :  { %9963 = vmatpush.bf16.msra.mxu1 %v15329_v46  ;;  %9951 = vmatpush.bf16.msra.mxu0 %v14753_v30  ;;  %v17629_v61 = vld [vmem:[#allocation11 + $0x974] sm:$0xf0]  ;;  %v16157_v46 = vor.u32 %v18244_v53, %v16154_v8  ;;  %v9633_v40 = vpop.f32.mrf.mxu3 }
 0x53f   :  { %v15200_v55 = vld [vmem:[#allocation11 + $0x1538] sm:$0xf]  ;;  %9886 = vmatpush.bf16.msra.mxu3 %v16285_v15  ;;  %v13665_v47 = vor.u32 %v17629_v61, %v13664_v4  ;;  %v16093_v4 = vor.u32 %v18228_v37, %v16090_v45  ;;  %v17541_v37 = vld [vmem:[#allocation11 + $0x6bc] sm:$0xf] }
 0x540   :  { %v18013_v11 = vld [vmem:[#allocation11 + $0x1574] sm:$0xf0]  ;;  %v13346_v45 = vld [vmem:[#allocation11 + $0x6f8] sm:$0xf0] }
 0x541   :  { %v14624_v16 = vld [vmem:[#allocation11 + $0x10b8] sm:$0xf]  ;;  %9925 = vmatpush.bf16.msrb.mxu2 %v13729_v32  ;;  %v15201_v56 = vor.u32 %v18013_v11, %v15200_v55  ;;  %v12965_v32 = vor.u32 %v17445_v22, %v12962_v41  ;;  %v13474_v55 = vld [vmem:[#allocation11 + $0x7f8] sm:$0xf0] }
 0x542   :  { %v17869_v59 = vld [vmem:[#allocation11 + $0x10f4] sm:$0xf0]  ;;  %9964 = vmatpush.bf16.msra.mxu1 %v15265_v35  ;;  %9952 = vmatpush.bf16.msra.mxu0 %v14689_v51  ;;  %v17573_v51 = vld [vmem:[#allocation11 + $0x7bc] sm:$0xf] }
 0x543   :  { %v14625_v12 = vor.u32 %v17869_v59, %v14624_v16  ;;  %v13600_v21 = vld [vmem:[#allocation11 + $0x8b8] sm:$0xf]  ;;  %9887 = vmatpush.bf16.msra.mxu3 %v16221_v0  ;;  %v12898_v11 = vld [vmem:[#allocation11 + $0x378] sm:$0xf0] }
 0x544   :  { %v17613_v17 = vld [vmem:[#allocation11 + $0x8f4] sm:$0xf0]  ;;  %v12901_v53 = vor.u32 %v17429_v49, %v12898_v11  ;;  %v12770_v40 = vld [vmem:[#allocation11 + $0x278] sm:$0xf0] }
 0x545   :  { %v15136_v6 = vld [vmem:[#allocation11 + $0x14b8] sm:$0xf]  ;;  %9926 = vmatpush.bf16.msrb.mxu2 %v13665_v47  ;;  %v13601_v30 = vor.u32 %v17613_v17, %v13600_v21  ;;  %v13477_v47 = vor.u32 %v17573_v51, %v13474_v55  ;;  %v13410_v21 = vld [vmem:[#allocation11 + $0x778] sm:$0xf0] }
 0x546   :  { %v17997_v39 = vld [vmem:[#allocation11 + $0x14f4] sm:$0xf0]  ;;  %9965 = vmatpush.bf16.msra.mxu1 %v15201_v56  ;;  %9953 = vmatpush.bf16.msra.mxu0 %v14625_v12  ;;  %v17557_v12 = vld [vmem:[#allocation11 + $0x73c] sm:$0xf] }
 0x547   :  { %v14560_v18 = vld [vmem:[#allocation11 + $0x1038] sm:$0xf]  ;;  %v15137_v36 = vor.u32 %v17997_v39, %v15136_v6  ;;  %9888 = vmatpush.bf16.msra.mxu3 %v16157_v46  ;;  %v17413_v17 = vld [vmem:[#allocation11 + $0x2bc] sm:$0xf]  ;;  %v13413_v22 = vor.u32 %v17557_v12, %v13410_v21  ;;  %v19270_v43 = vpop.f32.mrf.mxu0 }
 0x548   :  { %v17853_v24 = vld [vmem:[#allocation11 + $0x1074] sm:$0xf0]  ;;  %v12834_v6 = vld [vmem:[#allocation11 + $0x2f8] sm:$0xf0] }
 0x549   :  { %v14561_v63 = vor.u32 %v17853_v24, %v14560_v18  ;;  %v13536_v52 = vld [vmem:[#allocation11 + $0x838] sm:$0xf]  ;;  %9927 = vmatpush.bf16.msrb.mxu2 %v13601_v30  ;;  %v12837_v41 = vor.u32 %v17413_v17, %v12834_v6  ;;  %v17381_v51 = vld [vmem:[#allocation11 + $0x1bc] sm:$0xf] }
 0x54a   :  { %v17597_v34 = vld [vmem:[#allocation11 + $0x874] sm:$0xf0]  ;;  %9966 = vmatpush.bf16.msra.mxu1 %v15137_v36  ;;  %v17397_v36 = vld [vmem:[#allocation11 + $0x23c] sm:$0xf] }
 0x54b   :  { %v15072_v15 = vld [vmem:[#allocation11 + $0x1438] sm:$0xf]  ;;  %v13537_v61 = vor.u32 %v17597_v34, %v13536_v52  ;;  %9954 = vmatpush.bf16.msra.mxu0 %v14561_v63  ;;  %9889 = vmatpush.bf16.msra.mxu3 %v16093_v4  ;;  %v12706_v4 = vld [vmem:[#allocation11 + $0x1f8] sm:$0xf0] }
 0x54c   :  { %v17981_v5 = vld [vmem:[#allocation11 + $0x1474] sm:$0xf0] }
 0x54d   :  { %v14496_v57 = vld [vmem:[#allocation11 + $0xfb8] sm:$0xf]  ;;  %v15073_v16 = vor.u32 %v17981_v5, %v15072_v15  ;;  %9928 = vmatpush.bf16.msrb.mxu2 %v13537_v61  ;;  %v12773_v5 = vor.u32 %v17397_v36, %v12770_v40  ;;  %v19272_v61 = vpop.f32.mrf.mxu1  ;;  %v13154_v36 = vld [vmem:[#allocation11 + $0x578] sm:$0xf0] }
 0x54e   :  { %v17837_v35 = vld [vmem:[#allocation11 + $0xff4] sm:$0xf0]  ;;  %9955 = vmatmul.bf16.vlgmr.msra.gmra.mxu0 %v18914_v3  ;;  %9890 = vmatmul.bf16.vlgmr.msra.gmra.mxu3 %v18933_v58  ;;  %v17349_v40 = vld [vmem:[#allocation11 + $0xbc] sm:$0xf] }
 0x54f   :  { %v16032_v31 = vld [vmem:[#allocation11 + $0x1bb8] sm:$0xf]  ;;  %9999 = vmatpush.bf16.msrb.mxu0 %v12965_v32  ;;  %v14497_v59 = vor.u32 %v17837_v35, %v14496_v57  ;;  %9967 = vmatpush.bf16.msra.mxu1 %v15073_v16  ;;  %v13349_v32 = vor.u32 %v17541_v37, %v13346_v45  ;;  %v9750_v12 = vpop.f32.mrf.mxu0 }
 0x550   :  { %v18221_v23 = vld [vmem:[#allocation11 + $0x1bf4] sm:$0xf0]  ;;  %9929 = vmatmul.bf16.vlgmr.msrb.gmra.mxu2 %v18907_v44  ;;  %v17461_v12 = vld [vmem:[#allocation11 + $0x43c] sm:$0xf] }
 0x551   :  { %v16033_v20 = vor.u32 %v18221_v23, %v16032_v31  ;;  %v14432_v2 = vld [vmem:[#allocation11 + $0xf38] sm:$0xf]  ;;  %9934 = vmatpush.bf16.msrb.mxu3 %v14497_v59  ;;  %v17525_v31 = vld [vmem:[#allocation11 + $0x63c] sm:$0xf] }
 0x552   :  { %v17821_v0 = vld [vmem:[#allocation11 + $0xf74] sm:$0xf0]  ;;  %9968 = vmatmul.bf16.vlgmr.msra.gmra.mxu1 %v18920_v54  ;;  %v13282_v23 = vld [vmem:[#allocation11 + $0x678] sm:$0xf0] }
 0x553   :  { %v15968_v8 = vld [vmem:[#allocation11 + $0x1b38] sm:$0xf]  ;;  %9973 = vmatpush.bf16.msra.mxu2 %v16033_v20  ;;  %v14433_v7 = vor.u32 %v17821_v0, %v14432_v2  ;;  %10012 = vmatpush.bf16.msrb.mxu1 %v13477_v47  ;;  %v13285_v59 = vor.u32 %v17525_v31, %v13282_v23  ;;  %v12709_v20 = vor.u32 %v17381_v51, %v12706_v4  ;;  %v17509_v47 = vld [vmem:[#allocation11 + $0x5bc] sm:$0xf] }
 0x554   :  { %v18205_v56 = vld [vmem:[#allocation11 + $0x1b74] sm:$0xf0]  ;;  %10000 = vmatpush.bf16.msrb.mxu0 %v12901_v53  ;;  %v13218_v53 = vld [vmem:[#allocation11 + $0x5f8] sm:$0xf0] }
 0x555   :  { %v15969_v39 = vor.u32 %v18205_v56, %v15968_v8  ;;  %v14368_v18 = vld [vmem:[#allocation11 + $0xeb8] sm:$0xf]  ;;  %9935 = vmatpush.bf16.msrb.mxu3 %v14433_v7  ;;  %v17365_v8 = vld [vmem:[#allocation11 + $0x13c] sm:$0xf] }
 0x556   :  { %v17805_v24 = vld [vmem:[#allocation11 + $0xef4] sm:$0xf0]  ;;  %v12642_v56 = vld [vmem:[#allocation11 + $0x178] sm:$0xf0] }
 0x557   :  { %v15904_v46 = vld [vmem:[#allocation11 + $0x1ab8] sm:$0xf]  ;;  %9974 = vmatpush.bf16.msra.mxu2 %v15969_v39  ;;  %v14369_v63 = vor.u32 %v17805_v24, %v14368_v18  ;;  %10013 = vmatpush.bf16.msrb.mxu1 %v13413_v22  ;;  %v13221_v39 = vor.u32 %v17509_v47, %v13218_v53  ;;  %v9683_v18 = vpop.f32.mrf.mxu3  ;;  %v9722_v24 = vpop.f32.mrf.mxu2  ;;  %v12645_v22 = vor.u32 %v17365_v8, %v12642_v56  ;;  %v17477_v23 = vld [vmem:[#allocation11 + $0x4bc] sm:$0xf] }
 0x558   :  { %v18189_v30 = vld [vmem:[#allocation11 + $0x1af4] sm:$0xf0]  ;;  %10001 = vmatpush.bf16.msrb.mxu0 %v12837_v41  ;;  %v19275_v37 = vadd.f32 %v9683_v18, %v19264_v29  ;;  %v19278_v45 = vadd.f32 %v9722_v24, %v19259_v10  ;;  %v13090_v51 = vld [vmem:[#allocation11 + $0x4f8] sm:$0xf0] }
 0x559   :  { %v15905_v52 = vor.u32 %v18189_v30, %v15904_v46  ;;  %v14304_v34 = vld [vmem:[#allocation11 + $0xe38] sm:$0xf]  ;;  %9936 = vmatpush.bf16.msrb.mxu3 %v14369_v63  ;;  %v17493_v30 = vld [vmem:[#allocation11 + $0x53c] sm:$0xf] }
 0x55a   :  { %v17789_v15 = vld [vmem:[#allocation11 + $0xe74] sm:$0xf0]  ;;  %v12578_v63 = vld [vmem:[#allocation11 + $0xf8] sm:$0xf0] }
 0x55b   :  { %v15840_v57 = vld [vmem:[#allocation11 + $0x1a38] sm:$0xf]  ;;  %9975 = vmatpush.bf16.msra.mxu2 %v15905_v52  ;;  %v14305_v55 = vor.u32 %v17789_v15, %v14304_v34  ;;  %10014 = vmatpush.bf16.msrb.mxu1 %v13349_v32  ;;  %v9763_v52 = vpop.f32.mrf.mxu1  ;;  %v17333_v10 = vld [vmem:[#allocation11 + $0x3c] sm:$0xf] }
 0x55c   :  { %v18173_v35 = vld [vmem:[#allocation11 + $0x1a74] sm:$0xf0]  ;;  %10002 = vmatpush.bf16.msrb.mxu0 %v12773_v5  ;;  %v12514_v4 = vld [vmem:[#allocation11 + $0x78] sm:$0xf0] }
 0x55d   :  { %v15841_v49 = vor.u32 %v18173_v35, %v15840_v57  ;;  %v14240_v11 = vld [vmem:[#allocation11 + $0xdb8] sm:$0xf]  ;;  %9937 = vmatpush.bf16.msrb.mxu3 %v14305_v55  ;;  %v13157_v57 = vor.u32 %v17493_v30, %v13154_v36  ;;  %v12581_v35 = vor.u32 %v17349_v40, %v12578_v63  ;;  %v17957_v55 = vld [vmem:[#allocation11 + $0x13bc] sm:$0xf]  ;;  %v12517_v53 = vor.u32 %v17333_v10, %v12514_v4 }
 0x55e   :  { %v17773_v16 = vld [vmem:[#allocation11 + $0xdf4] sm:$0xf0]  ;;  %v13986_v18 = vld [vmem:[#allocation11 + $0xbf8] sm:$0xf0] }
 0x55f   :  { %v15776_v2 = vld [vmem:[#allocation11 + $0x19b8] sm:$0xf]  ;;  %9976 = vmatpush.bf16.msra.mxu2 %v15841_v49  ;;  %v14241_v21 = vor.u32 %v17773_v16, %v14240_v11  ;;  %10015 = vmatpush.bf16.msrb.mxu1 %v13285_v59  ;;  %v15010_v49 = vld [vmem:[#allocation11 + $0x13f8] sm:$0xf0]  ;;  %v9724_v47 = vpop.f32.mrf.mxu2 }
 0x560   :  { %v18157_v0 = vld [vmem:[#allocation11 + $0x19f4] sm:$0xf0]  ;;  %10003 = vmatpush.bf16.msrb.mxu0 %v12709_v20  ;;  %v18085_v24 = vld [vmem:[#allocation11 + $0x17bc] sm:$0xf] }
 0x561   :  { %v15777_v17 = vor.u32 %v18157_v0, %v15776_v2  ;;  %v14176_v6 = vld [vmem:[#allocation11 + $0xd38] sm:$0xf]  ;;  %9938 = vmatpush.bf16.msrb.mxu3 %v14241_v21  ;;  %v13093_v2 = vor.u32 %v17477_v23, %v13090_v51  ;;  %v9685_v0 = vpop.f32.mrf.mxu3  ;;  %v15013_v21 = vor.u32 %v17957_v55, %v15010_v49  ;;  %v17941_v30 = vld [vmem:[#allocation11 + $0x133c] sm:$0xf]  ;;  %v3300_v55 = vperm.slane %v19253_v19, 5 }
 0x562   :  { %v17757_v7 = vld [vmem:[#allocation11 + $0xd74] sm:$0xf0]  ;;  %v14946_v36 = vld [vmem:[#allocation11 + $0x1378] sm:$0xf0] }
 0x563   :  { %v15712_v41 = vld [vmem:[#allocation11 + $0x1938] sm:$0xf]  ;;  %9977 = vmatpush.bf16.msra.mxu2 %v15777_v17  ;;  %v14177_v34 = vor.u32 %v17757_v7, %v14176_v6  ;;  %10016 = vmatpush.bf16.msrb.mxu1 %v13221_v39  ;;  %v13026_v17 = vld [vmem:[#allocation11 + $0x478] sm:$0xf0] }
 0x564   :  { %v18141_v46 = vld [vmem:[#allocation11 + $0x1974] sm:$0xf0]  ;;  %10004 = vmatpush.bf16.msrb.mxu0 %v12645_v22  ;;  %v17701_v39 = vld [vmem:[#allocation11 + $0xbbc] sm:$0xf]  ;;  %v13029_v40 = vor.u32 %v17461_v12, %v13026_v17 }
 0x565   :  { %v15713_v15 = vor.u32 %v18141_v46, %v15712_v41  ;;  %v14112_v32 = vld [vmem:[#allocation11 + $0xcb8] sm:$0xf]  ;;  %9939 = vmatpush.bf16.msrb.mxu3 %v14177_v34  ;;  %v15522_v46 = vld [vmem:[#allocation11 + $0x17f8] sm:$0xf0]  ;;  %v13989_v52 = vor.u32 %v17701_v39, %v13986_v18 }
 0x566   :  { %v17741_v5 = vld [vmem:[#allocation11 + $0xcf4] sm:$0xf0]  ;;  %v17925_v23 = vld [vmem:[#allocation11 + $0x12bc] sm:$0xf] }
 0x567   :  { %v15648_v31 = vld [vmem:[#allocation11 + $0x18b8] sm:$0xf]  ;;  %9978 = vmatpush.bf16.msra.mxu2 %v15713_v15  ;;  %v14113_v11 = vor.u32 %v17741_v5, %v14112_v32  ;;  %10017 = vmatpush.bf16.msrb.mxu1 %v13157_v57  ;;  %v15525_v32 = vor.u32 %v18085_v24, %v15522_v46  ;;  %v14949_v5 = vor.u32 %v17941_v30, %v14946_v36  ;;  %v17685_v57 = vld [vmem:[#allocation11 + $0xb3c] sm:$0xf] }
 0x568   :  { %v18125_v29 = vld [vmem:[#allocation11 + $0x18f4] sm:$0xf0]  ;;  %10005 = vmatpush.bf16.msrb.mxu0 %v12581_v35  ;;  %v13922_v35 = vld [vmem:[#allocation11 + $0xb78] sm:$0xf0]  ;;  %v9800_v19 = vpop.f32.mrf.mxu0 }
 0x569   :  { %v15649_v16 = vor.u32 %v18125_v29, %v15648_v31  ;;  %v14048_v59 = vld [vmem:[#allocation11 + $0xc38] sm:$0xf]  ;;  %9940 = vmatpush.bf16.msrb.mxu3 %v14113_v11  ;;  %v18069_v31 = vld [vmem:[#allocation11 + $0x173c] sm:$0xf]  ;;  %v13925_v4 = vor.u32 %v17685_v57, %v13922_v35  ;;  %v9801_v17 = vadd.f32 %v9800_v19, %v3300_v55 }
 0x56a   :  { %v17725_v20 = vld [vmem:[#allocation11 + $0xc74] sm:$0xf0]  ;;  %v15458_v29 = vld [vmem:[#allocation11 + $0x1778] sm:$0xf0] }
 0x56b   :  { %v15584_v8 = vld [vmem:[#allocation11 + $0x1838] sm:$0xf]  ;;  %9979 = vmatpush.bf16.msra.mxu2 %v15649_v16  ;;  %v14049_v22 = vor.u32 %v17725_v20, %v14048_v59  ;;  %10018 = vmatpush.bf16.msrb.mxu1 %v13093_v2  ;;  %v14882_v51 = vld [vmem:[#allocation11 + $0x12f8] sm:$0xf0]  ;;  %v15461_v16 = vor.u32 %v18069_v31, %v15458_v29 }
 0x56c   :  { %v18109_v56 = vld [vmem:[#allocation11 + $0x1874] sm:$0xf0]  ;;  %10006 = vmatpush.bf16.msrb.mxu0 %v12517_v53  ;;  %v14885_v59 = vor.u32 %v17925_v23, %v14882_v51  ;;  %v17669_v20 = vld [vmem:[#allocation11 + $0xabc] sm:$0xf] }
 0x56d   :  { %v16544_v6 = vld [vmem:[#allocation11 + $0x1fb8] sm:$0xf]  ;;  %v15585_v41 = vor.u32 %v18109_v56, %v15584_v8  ;;  %9941 = vmatpush.bf16.msrb.mxu3 %v14049_v22  ;;  %v13858_v2 = vld [vmem:[#allocation11 + $0xaf8] sm:$0xf0] }
 0x56e   :  { %v18349_v7 = vld [vmem:[#allocation11 + $0x1ff4] sm:$0xf0]  ;;  %v18053_v0 = vld [vmem:[#allocation11 + $0x16bc] sm:$0xf]  ;;  %v13861_v56 = vor.u32 %v17669_v20, %v13858_v2 }
 0x56f   :  { %v16545_v63 = vor.u32 %v18349_v7, %v16544_v6  ;;  %v16480_v34 = vld [vmem:[#allocation11 + $0x1f38] sm:$0xf]  ;;  %9980 = vmatpush.bf16.msra.mxu2 %v15585_v41  ;;  %10007 = vmatmul.bf16.vlgmr.msrb.gmra.mxu0 %v18901_v25  ;;  %v15394_v25 = vld [vmem:[#allocation11 + $0x16f8] sm:$0xf0] }
 0x570   :  { %10051 = vmatpush.bf16.msra.mxu0 %v15013_v21  ;;  %v18333_v15 = vld [vmem:[#allocation11 + $0x1f74] sm:$0xf0]  ;;  %10019 = vmatpush.bf16.msrb.mxu1 %v13029_v40  ;;  %v17909_v47 = vld [vmem:[#allocation11 + $0x123c] sm:$0xf]  ;;  %v15397_v6 = vor.u32 %v18053_v0, %v15394_v25  ;;  %v9802_v23 = vpop.f32.mrf.mxu0 }
 0x571   :  { %9986 = vmatpush.bf16.msra.mxu3 %v16545_v63  ;;  %v16481_v10 = vor.u32 %v18333_v15, %v16480_v34  ;;  %v16416_v49 = vld [vmem:[#allocation11 + $0x1eb8] sm:$0xf]  ;;  %v14818_v53 = vld [vmem:[#allocation11 + $0x1278] sm:$0xf0] }
 0x572   :  { %v18317_v11 = vld [vmem:[#allocation11 + $0x1ef4] sm:$0xf0]  ;;  %9942 = vmatmul.bf16.vlgmr.msrb.gmra.mxu3 %v18909_v50  ;;  %9981 = vmatmul.bf16.vlgmr.msra.gmra.mxu2 %v18926_v28  ;;  %v14821_v7 = vor.u32 %v17909_v47, %v14818_v53  ;;  %v17653_v39 = vld [vmem:[#allocation11 + $0xa3c] sm:$0xf] }
 0x573   :  { %10025 = vmatpush.bf16.msrb.mxu2 %v13989_v52  ;;  %10020 = vmatmul.bf16.vlgmr.msrb.gmra.mxu1 %v18903_v27  ;;  %v16417_v8 = vor.u32 %v18317_v11, %v16416_v49  ;;  %v16352_v12 = vld [vmem:[#allocation11 + $0x1e38] sm:$0xf]  ;;  %v13794_v18 = vld [vmem:[#allocation11 + $0xa78] sm:$0xf0]  ;;  %v9813_v27 = vpop.f32.mrf.mxu1  ;;  %v9735_v11 = vpop.f32.mrf.mxu3 }
 0x574   :  { %10064 = vmatpush.bf16.msra.mxu1 %v15525_v32  ;;  %10052 = vmatpush.bf16.msra.mxu0 %v14949_v5  ;;  %v18301_v21 = vld [vmem:[#allocation11 + $0x1e74] sm:$0xf0]  ;;  %v18037_v24 = vld [vmem:[#allocation11 + $0x163c] sm:$0xf]  ;;  %v13797_v36 = vor.u32 %v17653_v39, %v13794_v18  ;;  %v19285_v52 = vadd.f32 %v9813_v27, %v9801_v17  ;;  %v9736_v25 = vadd.f32 %v9735_v11, %v19278_v45 }
 0x575   :  { %9987 = vmatpush.bf16.msra.mxu3 %v16481_v10  ;;  %v15330_v22 = vld [vmem:[#allocation11 + $0x1678] sm:$0xf0]  ;;  %v16353_v30 = vor.u32 %v18301_v21, %v16352_v12  ;;  %v16288_v40 = vld [vmem:[#allocation11 + $0x1db8] sm:$0xf] }
 0x576   :  { %v17893_v41 = vld [vmem:[#allocation11 + $0x11bc] sm:$0xf]  ;;  %v18285_v63 = vld [vmem:[#allocation11 + $0x1df4] sm:$0xf0]  ;;  %v15333_v34 = vor.u32 %v18037_v24, %v15330_v22 }
 0x577   :  { %10026 = vmatpush.bf16.msrb.mxu2 %v13925_v4  ;;  %v14754_v46 = vld [vmem:[#allocation11 + $0x11f8] sm:$0xf0]  ;;  %v16289_v51 = vor.u32 %v18285_v63, %v16288_v40  ;;  %v16224_v4 = vld [vmem:[#allocation11 + $0x1d38] sm:$0xf]  ;;  %v18357_v40 = vld [vmem:[%s19753_s7 + $0x38] sm:$0xff] }
 0x578   :  { %10065 = vmatpush.bf16.msra.mxu1 %v15461_v16  ;;  %10053 = vmatpush.bf16.msra.mxu0 %v14885_v59  ;;  %v14757_v15 = vor.u32 %v17893_v41, %v14754_v46  ;;  %v17637_v32 = vld [vmem:[#allocation11 + $0x9bc] sm:$0xf]  ;;  %v18269_v55 = vld [vmem:[#allocation11 + $0x1d74] sm:$0xf0]  ;;  %v9774_v16 = vpop.f32.mrf.mxu2 }
 0x579   :  { %9988 = vmatpush.bf16.msra.mxu3 %v16417_v8  ;;  %v13730_v5 = vld [vmem:[#allocation11 + $0x9f8] sm:$0xf0]  ;;  %v9749_v8 = vadd.f32 %v19270_v43, %v9736_v25  ;;  %v16225_v12 = vor.u32 %v18269_v55, %v16224_v4  ;;  %v16160_v17 = vld [vmem:[#allocation11 + $0x1cb8] sm:$0xf] }
 0x57a   :  { %v18021_v57 = vld [vmem:[#allocation11 + $0x15bc] sm:$0xf]  ;;  %v13733_v10 = vor.u32 %v17637_v32, %v13730_v5  ;;  %v16096_v63 = vld [vmem:[#allocation11 + $0x1c38] sm:$0xf] }
 0x57b   :  { %10027 = vmatpush.bf16.msrb.mxu2 %v13861_v56  ;;  %v15266_v35 = vld [vmem:[#allocation11 + $0x15f8] sm:$0xf0]  ;;  %v9815_v56 = vpop.f32.mrf.mxu1  ;;  %v9762_v45 = vadd.f32 %v19272_v61, %v9749_v8  ;;  %v18237_v5 = vld [vmem:[#allocation11 + $0x1c74] sm:$0xf0] }
 0x57c   :  { %10066 = vmatpush.bf16.msra.mxu1 %v15397_v6  ;;  %10054 = vmatpush.bf16.msra.mxu0 %v14821_v7  ;;  %v17877_v31 = vld [vmem:[#allocation11 + $0x113c] sm:$0xf]  ;;  %v15269_v49 = vor.u32 %v18021_v57, %v15266_v35  ;;  %v18253_v6 = vld [vmem:[#allocation11 + $0x1cf4] sm:$0xf0]  ;;  %v16097_v55 = vor.u32 %v18237_v5, %v16096_v63 }
 0x57d   :  { %v14690_v29 = vld [vmem:[#allocation11 + $0x1178] sm:$0xf0]  ;;  %9989 = vmatpush.bf16.msra.mxu3 %v16353_v30  ;;  %v19290_v30 = vadd.f32 %v9774_v16, %v9762_v45  ;;  %v16161_v43 = vor.u32 %v18253_v6, %v16160_v17 }
 0x57e   :  { %v14693_v59 = vor.u32 %v17877_v31, %v14690_v29  ;;  %v17621_v20 = vld [vmem:[#allocation11 + $0x93c] sm:$0xf] }
 0x57f   :  { %10028 = vmatpush.bf16.msrb.mxu2 %v13797_v36  ;;  %v13666_v2 = vld [vmem:[#allocation11 + $0x978] sm:$0xf0] }
 0x580   :  { %10067 = vmatpush.bf16.msra.mxu1 %v15333_v34  ;;  %10055 = vmatpush.bf16.msra.mxu0 %v14757_v15  ;;  %v18005_v0 = vld [vmem:[#allocation11 + $0x153c] sm:$0xf]  ;;  %v13669_v21 = vor.u32 %v17621_v20, %v13666_v2  ;;  %v9737_v15 = vpop.f32.mrf.mxu3  ;;  %v9776_v32 = vpop.f32.mrf.mxu2  ;;  %v18365_v20 = vld [vmem:[%s19753_s7 + $0x78] sm:$0xff] }
 0x581   :  { %v15202_v47 = vld [vmem:[#allocation11 + $0x1578] sm:$0xf0]  ;;  %9990 = vmatpush.bf16.msra.mxu3 %v16289_v51 }
 0x582   :  { %v17861_v53 = vld [vmem:[#allocation11 + $0x10bc] sm:$0xf]  ;;  %v15205_v7 = vor.u32 %v18005_v0, %v15202_v47 }
 0x583   :  { %v14626_v19 = vld [vmem:[#allocation11 + $0x10f8] sm:$0xf0]  ;;  %10029 = vmatpush.bf16.msrb.mxu2 %v13733_v10 }
 0x584   :  { %10068 = vmatpush.bf16.msra.mxu1 %v15269_v49  ;;  %10056 = vmatpush.bf16.msra.mxu0 %v14693_v59  ;;  %v14629_v39 = vor.u32 %v17861_v53, %v14626_v19  ;;  %v17605_v18 = vld [vmem:[#allocation11 + $0x8bc] sm:$0xf] }
 0x585   :  { %v13602_v24 = vld [vmem:[#allocation11 + $0x8f8] sm:$0xf0]  ;;  %9991 = vmatpush.bf16.msra.mxu3 %v16225_v12  ;;  %v18355_v12 = vld [vmem:[%s19753_s7 + $0x28] sm:$0xff] }
 0x586   :  { %v17989_v22 = vld [vmem:[#allocation11 + $0x14bc] sm:$0xf]  ;;  %v13605_v36 = vor.u32 %v17605_v18, %v13602_v24  ;;  %v18363_v24 = vld [vmem:[%s19753_s7 + $0x68] sm:$0xff] }
 0x587   :  { %v15138_v41 = vld [vmem:[#allocation11 + $0x14f8] sm:$0xf0]  ;;  %10030 = vmatpush.bf16.msrb.mxu2 %v13669_v21 }
 0x588   :  { %v17845_v46 = vld [vmem:[#allocation11 + $0x103c] sm:$0xf]  ;;  %10069 = vmatpush.bf16.msra.mxu1 %v15205_v7  ;;  %10057 = vmatpush.bf16.msra.mxu0 %v14629_v39  ;;  %v15141_v34 = vor.u32 %v17989_v22, %v15138_v41  ;;  %v18354_v22 = vld [vmem:[%s19753_s7 + $0x20] sm:$0xff] }
 0x589   :  { %v14562_v27 = vld [vmem:[#allocation11 + $0x1078] sm:$0xf0]  ;;  %9992 = vmatpush.bf16.msra.mxu3 %v16161_v43 }
 0x58a   :  { %v14565_v61 = vor.u32 %v17845_v46, %v14562_v27  ;;  %v17589_v57 = vld [vmem:[#allocation11 + $0x83c] sm:$0xf] }
 0x58b   :  { %v13538_v35 = vld [vmem:[#allocation11 + $0x878] sm:$0xf0]  ;;  %10031 = vmatpush.bf16.msrb.mxu2 %v13605_v36  ;;  %v18362_v36 = vld [vmem:[%s19753_s7 + $0x60] sm:$0xff] }
 0x58c   :  { %v17973_v31 = vld [vmem:[#allocation11 + $0x143c] sm:$0xf]  ;;  %v13541_v49 = vor.u32 %v17589_v57, %v13538_v35  ;;  %10070 = vmatpush.bf16.msra.mxu1 %v15141_v34  ;;  %10058 = vmatpush.bf16.msra.mxu0 %v14565_v61  ;;  %v18361_v35 = vld [vmem:[%s19753_s7 + $0x58] sm:$0xff] }
 0x58d   :  { %v15074_v29 = vld [vmem:[#allocation11 + $0x1478] sm:$0xf0]  ;;  %9993 = vmatpush.bf16.msra.mxu3 %v16097_v55  ;;  %v19319_v46 = vpop.f32.mrf.mxu1 }
 0x58e   :  { %v17829_v23 = vld [vmem:[#allocation11 + $0xfbc] sm:$0xf]  ;;  %v15077_v11 = vor.u32 %v17973_v31, %v15074_v29 }
 0x58f   :  { %v14498_v51 = vld [vmem:[#allocation11 + $0xff8] sm:$0xf0]  ;;  %10032 = vmatpush.bf16.msrb.mxu2 %v13541_v49  ;;  %10059 = vmatmul.bf16.vlgmr.msra.gmra.mxu0 %v18914_v3  ;;  %v19311_v3 = vpop.f32.mrf.mxu0 }
 0x590   :  { %v18213_v10 = vld [vmem:[#allocation11 + $0x1bbc] sm:$0xf]  ;;  %11163 = vmatpush.bf16.msrb.mxu0 %v18357_v40  ;;  %v14501_v16 = vor.u32 %v17829_v23, %v14498_v51  ;;  %10071 = vmatpush.bf16.msra.mxu1 %v15077_v11  ;;  %v18353_v40 = vld [vmem:[%s19753_s7 + $0x18] sm:$0xff]  ;;  %v9787_v23 = vpop.f32.mrf.mxu3 }
 0x591   :  { %v16034_v4 = vld [vmem:[#allocation11 + $0x1bf8] sm:$0xf0]  ;;  %9994 = vmatmul.bf16.vlgmr.msra.gmra.mxu3 %v18933_v58  ;;  %v9826_v51 = vpop.f32.mrf.mxu2  ;;  %v19334_v49 = vadd.f32 %v9787_v23, %v19290_v30 }
 0x592   :  { %v16037_v59 = vor.u32 %v18213_v10, %v16034_v4  ;;  %v18356_v2 = vld [vmem:[%s19753_s7 + $0x30] sm:$0xff]  ;;  %10038 = vmatpush.bf16.msrb.mxu3 %v14501_v16  ;;  %10033 = vmatmul.bf16.vlgmr.msrb.gmra.mxu2 %v18907_v44  ;;  %v19337_v11 = vadd.f32 %v9826_v51, %v19285_v52 }
 0x593   :  { %v17813_v0 = vld [vmem:[#allocation11 + $0xf3c] sm:$0xf]  ;;  %10072 = vmatmul.bf16.vlgmr.msra.gmra.mxu1 %v18920_v54 }
 0x594   :  { %v14434_v25 = vld [vmem:[#allocation11 + $0xf78] sm:$0xf0]  ;;  %10077 = vmatpush.bf16.msra.mxu2 %v16037_v59  ;;  %11176 = vmatpush.bf16.msrb.mxu1 %v18365_v20 }
 0x595   :  { %v18197_v47 = vld [vmem:[#allocation11 + $0x1b3c] sm:$0xf]  ;;  %v14437_v19 = vor.u32 %v17813_v0, %v14434_v25  ;;  %11164 = vmatpush.bf16.msrb.mxu0 %v18356_v2  ;;  %v9867_v16 = vpop.f32.mrf.mxu1  ;;  %v18351_v0 = vld [vmem:[%s19753_s7 + $0x8] sm:$0xff] }
 0x596   :  { %v15970_v53 = vld [vmem:[#allocation11 + $0x1b78] sm:$0xf0] }
 0x597   :  { %v15973_v8 = vor.u32 %v18197_v47, %v15970_v53  ;;  %v18364_v56 = vld [vmem:[%s19753_s7 + $0x70] sm:$0xff]  ;;  %10039 = vmatpush.bf16.msrb.mxu3 %v14437_v19  ;;  %v9854_v61 = vpop.f32.mrf.mxu0 }
 0x598   :  { %v17797_v21 = vld [vmem:[#allocation11 + $0xebc] sm:$0xf]  ;;  %11177 = vmatpush.bf16.msrb.mxu1 %v18364_v56  ;;  %v18350_v56 = vld [vmem:[%s19753_s7] sm:$0xff] }
 0x599   :  { %v14370_v17 = vld [vmem:[#allocation11 + $0xef8] sm:$0xf0]  ;;  %10078 = vmatpush.bf16.msra.mxu2 %v15973_v8  ;;  %11165 = vmatpush.bf16.msrb.mxu0 %v18355_v12  ;;  %v18359_v8 = vld [vmem:[%s19753_s7 + $0x48] sm:$0xff] }
 0x59a   :  { %v18181_v6 = vld [vmem:[#allocation11 + $0x1abc] sm:$0xf]  ;;  %v14373_v39 = vor.u32 %v17797_v21, %v14370_v17  ;;  %v9789_v21 = vpop.f32.mrf.mxu3  ;;  %v9828_v17 = vpop.f32.mrf.mxu2 }
 0x59b   :  { %v15906_v7 = vld [vmem:[#allocation11 + $0x1af8] sm:$0xf0] }
 0x59c   :  { %v15909_v18 = vor.u32 %v18181_v6, %v15906_v7  ;;  %v17781_v45 = vld [vmem:[#allocation11 + $0xe3c] sm:$0xf]  ;;  %10040 = vmatpush.bf16.msrb.mxu3 %v14373_v39  ;;  %11178 = vmatpush.bf16.msrb.mxu1 %v18363_v24  ;;  %v10103_v24 = vmax.f32 %v18989_v60, 0.0  ;;  %v18397_v60 = vld [vmem:[%s19753_s7 + $0x178] sm:$0xff] }
 0x59d   :  { %v14306_v44 = vld [vmem:[#allocation11 + $0xe78] sm:$0xf0]  ;;  %11166 = vmatpush.bf16.msrb.mxu0 %v18354_v22 }
 0x59e   :  { %v18165_v41 = vld [vmem:[#allocation11 + $0x1a3c] sm:$0xf]  ;;  %10079 = vmatpush.bf16.msra.mxu2 %v15909_v18  ;;  %v14309_v27 = vor.u32 %v17781_v45, %v14306_v44  ;;  %v18389_v18 = vld [vmem:[%s19753_s7 + $0x138] sm:$0xff] }
 0x59f   :  { %v15842_v54 = vld [vmem:[#allocation11 + $0x1a78] sm:$0xf0] }
 0x5a0   :  { %v15845_v43 = vor.u32 %v18165_v41, %v15842_v54  ;;  %v17765_v63 = vld [vmem:[#allocation11 + $0xdbc] sm:$0xf]  ;;  %10041 = vmatpush.bf16.msrb.mxu3 %v14309_v27  ;;  %11179 = vmatpush.bf16.msrb.mxu1 %v18362_v36  ;;  %v18358_v54 = vld [vmem:[%s19753_s7 + $0x40] sm:$0xff]  ;;  %v10119_v36 = vpack.c.bf16 %v10103_v24, %v10103_v24 }
 0x5a1   :  { %v14242_v34 = vld [vmem:[#allocation11 + $0xdf8] sm:$0xf0]  ;;  %11167 = vmatpush.bf16.msrb.mxu0 %v18353_v40  ;;  %v10104_v40 = vmax.f32 %v19008_v42, 0.0 }
 0x5a2   :  { %v18149_v15 = vld [vmem:[#allocation11 + $0x19bc] sm:$0xf]  ;;  %10080 = vmatpush.bf16.msra.mxu2 %v15845_v43  ;;  %v14245_v5 = vor.u32 %v17765_v63, %v14242_v34  ;;  %v18373_v43 = vld [vmem:[%s19753_s7 + $0xb8] sm:$0xff] }
 0x5a3   :  { %v15778_v32 = vld [vmem:[#allocation11 + $0x19f8] sm:$0xf0] }
 0x5a4   :  { %v15781_v57 = vor.u32 %v18149_v15, %v15778_v32  ;;  %v18352_v31 = vld [vmem:[%s19753_s7 + $0x10] sm:$0xff]  ;;  %10042 = vmatpush.bf16.msrb.mxu3 %v14245_v5  ;;  %11180 = vmatpush.bf16.msrb.mxu1 %v18361_v35  ;;  %v10120_v5 = vpack.c.bf16 %v10104_v40, %v10104_v40  ;;  %v19377_v35 = vld [vmem:[#allocation13 + $0x8] sm:$0xff]  ;;  %v18391_v40 = vld [vmem:[%s19753_s7 + $0x148] sm:$0xff] }
 0x5a5   :  { %v17749_v29 = vld [vmem:[#allocation11 + $0xd3c] sm:$0xf]  ;;  %11168 = vmatpush.bf16.msrb.mxu0 %v18352_v31  ;;  %v3301_v31 = vperm.slane %v19377_v35, 6 }
 0x5a6   :  { %v14178_v10 = vld [vmem:[#allocation11 + $0xd78] sm:$0xf0]  ;;  %10081 = vmatpush.bf16.msra.mxu2 %v15781_v57  ;;  %v18387_v57 = vld [vmem:[%s19753_s7 + $0x128] sm:$0xff] }
 0x5a7   :  { %v18133_v4 = vld [vmem:[#allocation11 + $0x193c] sm:$0xf]  ;;  %v14181_v59 = vor.u32 %v17749_v29, %v14178_v10 }
 0x5a8   :  { %v15714_v55 = vld [vmem:[#allocation11 + $0x1978] sm:$0xf0] }
 0x5a9   :  { %v15717_v20 = vor.u32 %v18133_v4, %v15714_v55  ;;  %v18360_v2 = vld [vmem:[%s19753_s7 + $0x50] sm:$0xff]  ;;  %10043 = vmatpush.bf16.msrb.mxu3 %v14181_v59  ;;  %11169 = vmatpush.bf16.msrb.mxu0 %v18351_v0  ;;  %v18371_v4 = vld [vmem:[%s19753_s7 + $0xa8] sm:$0xff]  ;;  %v18370_v0 = vld [vmem:[%s19753_s7 + $0xa0] sm:$0xff] }
 0x5aa   :  { %v17733_v25 = vld [vmem:[#allocation11 + $0xcbc] sm:$0xf]  ;;  %11181 = vmatpush.bf16.msrb.mxu1 %v18360_v2  ;;  %v9904_v51 = vpop.f32.mrf.mxu0  ;;  %v18395_v55 = vld [vmem:[%s19753_s7 + $0x168] sm:$0xff] }
 0x5ab   :  { %v14114_v30 = vld [vmem:[#allocation11 + $0xcf8] sm:$0xf0]  ;;  %10082 = vmatpush.bf16.msra.mxu2 %v15717_v20  ;;  %v9905_v16 = vadd.f32 %v9904_v51, %v3301_v31  ;;  %v18390_v31 = vld [vmem:[%s19753_s7 + $0x140] sm:$0xff] }
 0x5ac   :  { %v18117_v47 = vld [vmem:[#allocation11 + $0x18bc] sm:$0xf]  ;;  %v14117_v53 = vor.u32 %v17733_v25, %v14114_v30  ;;  %v18394_v25 = vld [vmem:[%s19753_s7 + $0x160] sm:$0xff] }
 0x5ad   :  { %v15650_v52 = vld [vmem:[#allocation11 + $0x18f8] sm:$0xf0]  ;;  %11170 = vmatpush.bf16.msrb.mxu0 %v18350_v56  ;;  %v18369_v56 = vld [vmem:[%s19753_s7 + $0x98] sm:$0xff] }
 0x5ae   :  { %v15653_v19 = vor.u32 %v18117_v47, %v15650_v52  ;;  %v17717_v12 = vld [vmem:[#allocation11 + $0xc3c] sm:$0xf]  ;;  %10044 = vmatpush.bf16.msrb.mxu3 %v14117_v53  ;;  %11182 = vmatpush.bf16.msrb.mxu1 %v18359_v8  ;;  %v9917_v20 = vpop.f32.mrf.mxu1  ;;  %v18385_v47 = vld [vmem:[%s19753_s7 + $0x118] sm:$0xff] }
 0x5af   :  { %v14050_v6 = vld [vmem:[#allocation11 + $0xc78] sm:$0xf0]  ;;  %v19397_v30 = vadd.f32 %v9917_v20, %v9905_v16 }
 0x5b0   :  { %v18101_v7 = vld [vmem:[#allocation11 + $0x183c] sm:$0xf]  ;;  %10083 = vmatpush.bf16.msra.mxu2 %v15653_v19  ;;  %v14053_v44 = vor.u32 %v17717_v12, %v14050_v6  ;;  %11171 = vmatmul.bf16.vlgmr.msrb.gmra.mxu0 %v10119_v36  ;;  %v18393_v12 = vld [vmem:[%s19753_s7 + $0x158] sm:$0xff]  ;;  %v18367_v36 = vld [vmem:[%s19753_s7 + $0x88] sm:$0xff] }
 0x5b1   :  { %v15586_v39 = vld [vmem:[#allocation11 + $0x1878] sm:$0xf0]  ;;  %11215 = vmatpush.bf16.msra.mxu0 %v18389_v18 }
 0x5b2   :  { %v18341_v22 = vld [vmem:[#allocation11 + $0x1fbc] sm:$0xf]  ;;  %v15589_v41 = vor.u32 %v18101_v7, %v15586_v39  ;;  %10045 = vmatpush.bf16.msrb.mxu3 %v14053_v44  ;;  %11183 = vmatpush.bf16.msrb.mxu1 %v18358_v54  ;;  %v9906_v19 = vpop.f32.mrf.mxu0 }
 0x5b3   :  { %v16546_v45 = vld [vmem:[#allocation11 + $0x1ff8] sm:$0xf0]  ;;  %v9839_v21 = vpop.f32.mrf.mxu3  ;;  %v9878_v17 = vpop.f32.mrf.mxu2  ;;  %v18426_v19 = vld [vmem:[%s19753_s7 + $0x260] sm:$0xff] }
 0x5b4   :  { %v16549_v27 = vor.u32 %v18341_v22, %v16546_v45  ;;  %v18388_v63 = vld [vmem:[%s19753_s7 + $0x130] sm:$0xff]  ;;  %10084 = vmatpush.bf16.msra.mxu2 %v15589_v41  ;;  %v9840_v18 = vadd.f32 %v9839_v21, %v19337_v11  ;;  %v18383_v11 = vld [vmem:[%s19753_s7 + $0x108] sm:$0xff]  ;;  %v18401_v21 = vld [vmem:[%s19753_s7 + $0x198] sm:$0xff] }
 0x5b5   :  { %v18325_v34 = vld [vmem:[#allocation11 + $0x1f3c] sm:$0xf]  ;;  %11216 = vmatpush.bf16.msra.mxu0 %v18388_v63  ;;  %10046 = vmatmul.bf16.vlgmr.msrb.gmra.mxu3 %v18909_v50  ;;  %v18386_v50 = vld [vmem:[%s19753_s7 + $0x120] sm:$0xff] }
 0x5b6   :  { %v16482_v15 = vld [vmem:[#allocation11 + $0x1f78] sm:$0xf0]  ;;  %10090 = vmatpush.bf16.msra.mxu3 %v16549_v27  ;;  %11228 = vmatpush.bf16.msra.mxu1 %v18397_v60  ;;  %v9853_v24 = vadd.f32 %v19311_v3, %v9840_v18  ;;  %v9919_v22 = vpop.f32.mrf.mxu1 }
 0x5b7   :  { %v16485_v32 = vor.u32 %v18325_v34, %v16482_v15  ;;  %v18372_v61 = vld [vmem:[%s19753_s7 + $0xb0] sm:$0xff]  ;;  %10085 = vmatmul.bf16.vlgmr.msra.gmra.mxu2 %v18926_v28  ;;  %11184 = vmatmul.bf16.vlgmr.msrb.gmra.mxu1 %v10120_v5 }
 0x5b8   :  { %11189 = vmatpush.bf16.msrb.mxu2 %v18373_v43  ;;  %v18396_v42 = vld [vmem:[%s19753_s7 + $0x170] sm:$0xff]  ;;  %v9866_v3 = vadd.f32 %v19319_v46, %v9853_v24  ;;  %v18382_v46 = vld [vmem:[%s19753_s7 + $0x100] sm:$0xff] }
 0x5b9   :  { %v18309_v29 = vld [vmem:[#allocation11 + $0x1ebc] sm:$0xf]  ;;  %11217 = vmatpush.bf16.msra.mxu0 %v18387_v57  ;;  %v18366_v57 = vld [vmem:[%s19753_s7 + $0x80] sm:$0xff] }
 0x5ba   :  { %v16418_v23 = vld [vmem:[#allocation11 + $0x1ef8] sm:$0xf0]  ;;  %10091 = vmatpush.bf16.msra.mxu3 %v16485_v32  ;;  %11229 = vmatpush.bf16.msra.mxu1 %v18396_v42  ;;  %v19423_v43 = vadd.f32 %v9878_v17, %v9866_v3  ;;  %v10107_v42 = vmax.f32 %v19085_v62, 0.0  ;;  %v18381_v62 = vld [vmem:[%s19753_s7 + $0xf8] sm:$0xff] }
 0x5bb   :  { %v16421_v10 = vor.u32 %v18309_v29, %v16418_v23  ;;  %v18293_v28 = vld [vmem:[#allocation11 + $0x1e3c] sm:$0xf]  ;;  %v9841_v63 = vpop.f32.mrf.mxu3  ;;  %v9880_v34 = vpop.f32.mrf.mxu2  ;;  %v10105_v29 = vmax.f32 %v19031_v14, 0.0  ;;  %v18405_v23 = vld [vmem:[%s19753_s7 + $0x1b8] sm:$0xff] }
 0x5bc   :  { %11190 = vmatpush.bf16.msrb.mxu2 %v18372_v61  ;;  %v16354_v59 = vld [vmem:[#allocation11 + $0x1e78] sm:$0xf0]  ;;  %v18421_v61 = vld [vmem:[%s19753_s7 + $0x238] sm:$0xff]  ;;  %v10123_v51 = vpack.c.bf16 %v10107_v42, %v10107_v42  ;;  %v18374_v63 = vld [vmem:[%s19753_s7 + $0xc0] sm:$0xff] }
 0x5bd   :  { %v16357_v2 = vor.u32 %v18293_v28, %v16354_v59  ;;  %11218 = vmatpush.bf16.msra.mxu0 %v18386_v50  ;;  %v18277_v52 = vld [vmem:[#allocation11 + $0x1dbc] sm:$0xf]  ;;  %v18419_v59 = vld [vmem:[%s19753_s7 + $0x228] sm:$0xff]  ;;  %v18425_v17 = vld [vmem:[%s19753_s7 + $0x258] sm:$0xff] }
 0x5be   :  { %10092 = vmatpush.bf16.msra.mxu3 %v16421_v10  ;;  %11230 = vmatpush.bf16.msra.mxu1 %v18395_v55  ;;  %v16290_v53 = vld [vmem:[#allocation11 + $0x1df8] sm:$0xf0]  ;;  %v10108_v10 = vmax.f32 %v19113_v26, 0.0  ;;  %v10121_v55 = vpack.c.bf16 %v10105_v29, %v10105_v29  ;;  %v18398_v34 = vld [vmem:[%s19753_s7 + $0x180] sm:$0xff] }
 0x5bf   :  { %v16293_v8 = vor.u32 %v18277_v52, %v16290_v53  ;;  %v18384_v6 = vld [vmem:[%s19753_s7 + $0x110] sm:$0xff]  ;;  %v18378_v52 = vld [vmem:[%s19753_s7 + $0xe0] sm:$0xff] }
 0x5c0   :  { %11191 = vmatpush.bf16.msrb.mxu2 %v18371_v4  ;;  %v18261_v7 = vld [vmem:[#allocation11 + $0x1d3c] sm:$0xf]  ;;  %v18429_v4 = vld [vmem:[%s19753_s7 + $0x278] sm:$0xff]  ;;  %v10124_v50 = vpack.c.bf16 %v10108_v10, %v10108_v10  ;;  %v18402_v53 = vld [vmem:[%s19753_s7 + $0x1a0] sm:$0xff]  ;;  %v3302_v10 = vperm.slane %v19377_v35, 7 }
 0x5c1   :  { %11219 = vmatpush.bf16.msra.mxu0 %v18385_v47  ;;  %v16226_v39 = vld [vmem:[#allocation11 + $0x1d78] sm:$0xf0]  ;;  %v18459_v35 = vld [vmem:[%s19753_s7 + $0x368] sm:$0xff] }
 0x5c2   :  { %10093 = vmatpush.bf16.msra.mxu3 %v16357_v2  ;;  %11231 = vmatpush.bf16.msra.mxu1 %v18394_v25  ;;  %v16229_v45 = vor.u32 %v18261_v7, %v16226_v39  ;;  %v18368_v44 = vld [vmem:[%s19753_s7 + $0x90] sm:$0xff]  ;;  %v18379_v2 = vld [vmem:[%s19753_s7 + $0xe8] sm:$0xff]  ;;  %v18418_v25 = vld [vmem:[%s19753_s7 + $0x220] sm:$0xff] }
 0x5c3   :  { %v18392_v41 = vld [vmem:[%s19753_s7 + $0x150] sm:$0xff] }
 0x5c4   :  { %11192 = vmatpush.bf16.msrb.mxu2 %v18370_v0  ;;  %v18245_v54 = vld [vmem:[#allocation11 + $0x1cbc] sm:$0xf]  ;;  %v18403_v0 = vld [vmem:[%s19753_s7 + $0x1a8] sm:$0xff] }
 0x5c5   :  { %11220 = vmatpush.bf16.msra.mxu0 %v18384_v6  ;;  %v16162_v27 = vld [vmem:[#allocation11 + $0x1cf8] sm:$0xf0] }
 0x5c6   :  { %10094 = vmatpush.bf16.msra.mxu3 %v16293_v8  ;;  %11232 = vmatpush.bf16.msra.mxu1 %v18393_v12  ;;  %v16165_v60 = vor.u32 %v18245_v54, %v16162_v27  ;;  %v18229_v15 = vld [vmem:[#allocation11 + $0x1c3c] sm:$0xf]  ;;  %v18417_v8 = vld [vmem:[%s19753_s7 + $0x218] sm:$0xff]  ;;  %v18423_v54 = vld [vmem:[%s19753_s7 + $0x248] sm:$0xff] }
 0x5c7   :  { %v16098_v32 = vld [vmem:[#allocation11 + $0x1c78] sm:$0xf0]  ;;  %v18377_v12 = vld [vmem:[%s19753_s7 + $0xd8] sm:$0xff] }
 0x5c8   :  { %11193 = vmatpush.bf16.msrb.mxu2 %v18369_v56  ;;  %v16101_v5 = vor.u32 %v18229_v15, %v16098_v32  ;;  %v18420_v14 = vld [vmem:[%s19753_s7 + $0x230] sm:$0xff]  ;;  %v10106_v15 = vmax.f32 %v19059_v33, 0.0  ;;  %v18413_v32 = vld [vmem:[%s19753_s7 + $0x1f8] sm:$0xff] }
 0x5c9   :  { %11221 = vmatpush.bf16.msra.mxu0 %v18383_v11  ;;  %v18380_v16 = vld [vmem:[%s19753_s7 + $0xf0] sm:$0xff]  ;;  %v18399_v11 = vld [vmem:[%s19753_s7 + $0x188] sm:$0xff] }
 0x5ca   :  { %10095 = vmatpush.bf16.msra.mxu3 %v16229_v45  ;;  %11233 = vmatpush.bf16.msra.mxu1 %v18392_v41  ;;  %v18404_v26 = vld [vmem:[%s19753_s7 + $0x1b0] sm:$0xff]  ;;  %v18375_v41 = vld [vmem:[%s19753_s7 + $0xc8] sm:$0xff] }
 0x5cb   :  { %v18428_v28 = vld [vmem:[%s19753_s7 + $0x270] sm:$0xff]  ;;  %v19471_v20 = vpop.f32.mrf.mxu0 }
 0x5cc   :  { %11194 = vmatpush.bf16.msrb.mxu2 %v18368_v44  ;;  %v18416_v39 = vld [vmem:[%s19753_s7 + $0x210] sm:$0xff]  ;;  %v18415_v44 = vld [vmem:[%s19753_s7 + $0x208] sm:$0xff] }
 0x5cd   :  { %11222 = vmatpush.bf16.msra.mxu0 %v18382_v46  ;;  %v18376_v24 = vld [vmem:[%s19753_s7 + $0xd0] sm:$0xff]  ;;  %v18422_v46 = vld [vmem:[%s19753_s7 + $0x240] sm:$0xff] }
 0x5ce   :  { %10096 = vmatpush.bf16.msra.mxu3 %v16165_v60  ;;  %11234 = vmatpush.bf16.msra.mxu1 %v18391_v40  ;;  %v18400_v22 = vld [vmem:[%s19753_s7 + $0x190] sm:$0xff]  ;;  %v18414_v60 = vld [vmem:[%s19753_s7 + $0x200] sm:$0xff]  ;;  %v10111_v40 = vmax.f32 %v19193_v9, 0.0  ;;  %v10109_v9 = vmax.f32 %v19139_v38, 0.0  ;;  %v10122_v38 = vpack.c.bf16 %v10106_v15, %v10106_v15 }
 0x5cf   :  { %v19485_v47 = vpop.f32.mrf.mxu1  ;;  %v18424_v45 = vld [vmem:[%s19753_s7 + $0x250] sm:$0xff] }
 0x5d0   :  { %11195 = vmatpush.bf16.msrb.mxu2 %v18367_v36  ;;  %11223 = vmatmul.bf16.vlgmr.msra.gmra.mxu0 %v10123_v51  ;;  %v18453_v36 = vld [vmem:[%s19753_s7 + $0x338] sm:$0xff]  ;;  %v10127_v42 = vpack.c.bf16 %v10111_v40, %v10111_v40  ;;  %v18452_v33 = vld [vmem:[%s19753_s7 + $0x330] sm:$0xff]  ;;  %v18451_v51 = vld [vmem:[%s19753_s7 + $0x328] sm:$0xff]  ;;  %v10110_v40 = vmax.f32 %v19167_v1, 0.0 }
 0x5d1   :  { %11267 = vmatpush.bf16.msrb.mxu0 %v18421_v61  ;;  %v19508_v6 = vpop.f32.mrf.mxu3  ;;  %v18437_v61 = vld [vmem:[%s19753_s7 + $0x2b8] sm:$0xff]  ;;  %v18436_v29 = vld [vmem:[%s19753_s7 + $0x2b0] sm:$0xff] }
 0x5d2   :  { %10097 = vmatpush.bf16.msra.mxu3 %v16101_v5  ;;  %11235 = vmatpush.bf16.msra.mxu1 %v18390_v31  ;;  %v10112_v5 = vmax.f32 %v19221_v48, 0.0  ;;  %v10125_v31 = vpack.c.bf16 %v10109_v9, %v10109_v9  ;;  %v18412_v48 = vld [vmem:[%s19753_s7 + $0x1f0] sm:$0xff]  ;;  %v10126_v1 = vpack.c.bf16 %v10110_v40, %v10110_v40 }
 0x5d3   :  { %v9958_v56 = vpop.f32.mrf.mxu0  ;;  %v19510_v7 = vpop.f32.mrf.mxu2  ;;  %v18444_v9 = vld [vmem:[%s19753_s7 + $0x2f0] sm:$0xff] }
 0x5d4   :  { %11196 = vmatpush.bf16.msrb.mxu2 %v18366_v57  ;;  %v18461_v57 = vld [vmem:[%s19753_s7 + $0x378] sm:$0xff] }
 0x5d5   :  { %11268 = vmatpush.bf16.msrb.mxu0 %v18420_v14  ;;  %10098 = vmatmul.bf16.vlgmr.msra.gmra.mxu3 %v18933_v58  ;;  %v18427_v58 = vld [vmem:[%s19753_s7 + $0x268] sm:$0xff] }
 0x5d6   :  { %11202 = vmatpush.bf16.msrb.mxu3 %v18381_v62  ;;  %11280 = vmatpush.bf16.msrb.mxu1 %v18429_v4  ;;  %v10128_v62 = vpack.c.bf16 %v10112_v5, %v10112_v5  ;;  %v18411_v14 = vld [vmem:[%s19753_s7 + $0x1e8] sm:$0xff] }
 0x5d7   :  { %11197 = vmatmul.bf16.vlgmr.msrb.gmra.mxu2 %v10121_v55  ;;  %11236 = vmatmul.bf16.vlgmr.msra.gmra.mxu1 %v10124_v50  ;;  %v9971_v18 = vpop.f32.mrf.mxu1  ;;  %v18435_v55 = vld [vmem:[%s19753_s7 + $0x2a8] sm:$0xff] }
 0x5d8   :  { %11241 = vmatpush.bf16.msra.mxu2 %v18405_v23  ;;  %v18460_v23 = vld [vmem:[%s19753_s7 + $0x370] sm:$0xff]  ;;  %v18467_v5 = vld [vmem:[%s19753_s7 + $0x3a8] sm:$0xff] }
 0x5d9   :  { %11269 = vmatpush.bf16.msrb.mxu0 %v18419_v59  ;;  %v9893_v27 = vpop.f32.mrf.mxu3  ;;  %v18434_v59 = vld [vmem:[%s19753_s7 + $0x2a0] sm:$0xff]  ;;  %v18432_v18 = vld [vmem:[%s19753_s7 + $0x290] sm:$0xff] }
 0x5da   :  { %11203 = vmatpush.bf16.msrb.mxu3 %v18380_v16  ;;  %11281 = vmatpush.bf16.msrb.mxu1 %v18428_v28  ;;  %v18410_v28 = vld [vmem:[%s19753_s7 + $0x1e0] sm:$0xff]  ;;  %v9892_v27 = vadd.f32 %v19508_v6, %v19423_v43  ;;  %v18445_v6 = vld [vmem:[%s19753_s7 + $0x2f8] sm:$0xff] }
 0x5db   :  { %v9932_v3 = vpop.f32.mrf.mxu2 }
 0x5dc   :  { %11242 = vmatpush.bf16.msra.mxu2 %v18404_v26  ;;  %v18450_v26 = vld [vmem:[%s19753_s7 + $0x320] sm:$0xff]  ;;  %v10115_v3 = vmax.f32 %v19334_v49, 0.0  ;;  %v10116_v43 = vmax.f32 %v9892_v27, 0.0 }
 0x5dd   :  { %11270 = vmatpush.bf16.msrb.mxu0 %v18418_v25  ;;  %v9931_v25 = vadd.f32 %v19510_v7, %v19397_v30  ;;  %v18448_v30 = vld [vmem:[%s19753_s7 + $0x310] sm:$0xff]  ;;  %v18454_v49 = vld [vmem:[%s19753_s7 + $0x340] sm:$0xff] }
 0x5de   :  { %11204 = vmatpush.bf16.msrb.mxu3 %v18379_v2  ;;  %11282 = vmatpush.bf16.msrb.mxu1 %v18427_v58  ;;  %v18449_v58 = vld [vmem:[%s19753_s7 + $0x318] sm:$0xff]  ;;  %v10132_v15 = vpack.c.bf16 %v10116_v43, %v10116_v43 }
 0x5e0   :  { %11243 = vmatpush.bf16.msra.mxu2 %v18403_v0  ;;  %v18458_v0 = vld [vmem:[%s19753_s7 + $0x360] sm:$0xff] }
 0x5e1   :  { %11271 = vmatpush.bf16.msrb.mxu0 %v18417_v8  ;;  %v18457_v8 = vld [vmem:[%s19753_s7 + $0x358] sm:$0xff] }
 0x5e2   :  { %11205 = vmatpush.bf16.msrb.mxu3 %v18378_v52  ;;  %11283 = vmatpush.bf16.msrb.mxu1 %v18426_v19  ;;  %v18433_v19 = vld [vmem:[%s19753_s7 + $0x298] sm:$0xff] }
 0x5e4   :  { %11244 = vmatpush.bf16.msra.mxu2 %v18402_v53  ;;  %v18409_v53 = vld [vmem:[%s19753_s7 + $0x1d8] sm:$0xff] }
 0x5e5   :  { %11272 = vmatpush.bf16.msrb.mxu0 %v18416_v39  ;;  %v18408_v39 = vld [vmem:[%s19753_s7 + $0x1d0] sm:$0xff] }
 0x5e6   :  { %11206 = vmatpush.bf16.msrb.mxu3 %v18377_v12  ;;  %11284 = vmatpush.bf16.msrb.mxu1 %v18425_v17 }
 0x5e8   :  { %11245 = vmatpush.bf16.msra.mxu2 %v18401_v21 }
 0x5e9   :  { %11273 = vmatpush.bf16.msrb.mxu0 %v18415_v44  ;;  %v18431_v44 = vld [vmem:[%s19753_s7 + $0x288] sm:$0xff] }
 0x5ea   :  { %11207 = vmatpush.bf16.msrb.mxu3 %v18376_v24  ;;  %11285 = vmatpush.bf16.msrb.mxu1 %v18424_v45  ;;  %v18456_v24 = vld [vmem:[%s19753_s7 + $0x350] sm:$0xff]  ;;  %v18407_v45 = vld [vmem:[%s19753_s7 + $0x1c8] sm:$0xff] }
 0x5ec   :  { %11246 = vmatpush.bf16.msra.mxu2 %v18400_v22  ;;  %v10008_v4 = vpop.f32.mrf.mxu0  ;;  %v18447_v22 = vld [vmem:[%s19753_s7 + $0x308] sm:$0xff] }
 0x5ed   :  { %11274 = vmatpush.bf16.msrb.mxu0 %v18414_v60  ;;  %v10009_v16 = vadd.f32 %v10008_v4, %v3302_v10  ;;  %v18406_v60 = vld [vmem:[%s19753_s7 + $0x1c0] sm:$0xff]  ;;  %v18440_v10 = vld [vmem:[%s19753_s7 + $0x2d0] sm:$0xff] }
 0x5ee   :  { %11208 = vmatpush.bf16.msrb.mxu3 %v18375_v41  ;;  %11286 = vmatpush.bf16.msrb.mxu1 %v18423_v54  ;;  %v18455_v41 = vld [vmem:[%s19753_s7 + $0x348] sm:$0xff]  ;;  %v18464_v4 = vld [vmem:[%s19753_s7 + $0x390] sm:$0xff] }
 0x5f0   :  { %11247 = vmatpush.bf16.msra.mxu2 %v18399_v11  ;;  %11275 = vmatmul.bf16.vlgmr.msrb.gmra.mxu0 %v10127_v42  ;;  %v10021_v50 = vpop.f32.mrf.mxu1  ;;  %v18443_v42 = vld [vmem:[%s19753_s7 + $0x2e8] sm:$0xff] }
 0x5f1   :  { %11319 = vmatpush.bf16.msra.mxu0 %v18453_v36  ;;  %v19598_v2 = vadd.f32 %v10021_v50, %v10009_v16  ;;  %v18430_v36 = vld [vmem:[%s19753_s7 + $0x280] sm:$0xff]  ;;  %v18463_v16 = vld [vmem:[%s19753_s7 + $0x388] sm:$0xff] }
 0x5f2   :  { %11209 = vmatpush.bf16.msrb.mxu3 %v18374_v63  ;;  %11287 = vmatpush.bf16.msrb.mxu1 %v18422_v46  ;;  %v10113_v63 = vmax.f32 %v19247_v13, 0.0  ;;  %v10131_v46 = vpack.c.bf16 %v10115_v3, %v10115_v3 }
 0x5f4   :  { %11248 = vmatpush.bf16.msra.mxu2 %v18398_v34  ;;  %v10010_v52 = vpop.f32.mrf.mxu0  ;;  %v18469_v34 = vld [vmem:[%s19753_s7 + $0x3b8] sm:$0xff]  ;;  %v10129_v13 = vpack.c.bf16 %v10113_v63, %v10113_v63 }
 0x5f5   :  { %11320 = vmatpush.bf16.msra.mxu0 %v18452_v33  ;;  %11210 = vmatmul.bf16.vlgmr.msrb.gmra.mxu3 %v10122_v38  ;;  %v9943_v56 = vpop.f32.mrf.mxu3  ;;  %v19617_v12 = vpop.f32.mrf.mxu2  ;;  %v18442_v33 = vld [vmem:[%s19753_s7 + $0x2e0] sm:$0xff] }
 0x5f6   :  { %11254 = vmatpush.bf16.msra.mxu3 %v18413_v32  ;;  %11332 = vmatpush.bf16.msra.mxu1 %v18461_v57  ;;  %v9944_v21 = vadd.f32 %v9943_v56, %v9931_v25  ;;  %v18468_v32 = vld [vmem:[%s19753_s7 + $0x3b0] sm:$0xff]  ;;  %v18466_v38 = vld [vmem:[%s19753_s7 + $0x3a0] sm:$0xff]  ;;  %v18477_v25 = vld [vmem:[%s19753_s7 + $0x3f8] sm:$0xff] }
 0x5f7   :  { %11249 = vmatmul.bf16.vlgmr.msra.gmra.mxu2 %v10125_v31  ;;  %11288 = vmatmul.bf16.vlgmr.msrb.gmra.mxu1 %v10128_v62 }
 0x5f8   :  { %11293 = vmatpush.bf16.msrb.mxu2 %v18437_v61  ;;  %v9957_v17 = vadd.f32 %v19471_v20, %v9944_v21  ;;  %v10023_v7 = vpop.f32.mrf.mxu1 }
 0x5f9   :  { %11321 = vmatpush.bf16.msra.mxu0 %v18451_v51  ;;  %v18473_v7 = vld [vmem:[%s19753_s7 + $0x3d8] sm:$0xff] }
 0x5fa   :  { %11255 = vmatpush.bf16.msra.mxu3 %v18412_v48  ;;  %11333 = vmatpush.bf16.msra.mxu1 %v18460_v23  ;;  %v9970_v20 = vadd.f32 %v19485_v47, %v9957_v17  ;;  %v18446_v47 = vld [vmem:[%s19753_s7 + $0x300] sm:$0xff]  ;;  %v18441_v48 = vld [vmem:[%s19753_s7 + $0x2d8] sm:$0xff] }
 0x5fc   :  { %11294 = vmatpush.bf16.msrb.mxu2 %v18436_v29  ;;  %v18465_v29 = vld [vmem:[%s19753_s7 + $0x398] sm:$0xff] }
 0x5fd   :  { %11322 = vmatpush.bf16.msra.mxu0 %v18450_v26  ;;  %v9945_v11 = vpop.f32.mrf.mxu3  ;;  %v9984_v54 = vpop.f32.mrf.mxu2 }
 0x5fe   :  { %11256 = vmatpush.bf16.msra.mxu3 %v18411_v14  ;;  %11334 = vmatpush.bf16.msra.mxu1 %v18459_v35  ;;  %v9983_v14 = vadd.f32 %v19617_v12, %v9970_v20  ;;  %v18470_v11 = vld [vmem:[%s19753_s7 + $0x3c0] sm:$0xff] }
 0x600   :  { %11295 = vmatpush.bf16.msrb.mxu2 %v18435_v55  ;;  %v18439_v55 = vld [vmem:[%s19753_s7 + $0x2c8] sm:$0xff] }
 0x601   :  { %11323 = vmatpush.bf16.msra.mxu0 %v18449_v58 }
 0x602   :  { %11257 = vmatpush.bf16.msra.mxu3 %v18410_v28  ;;  %11335 = vmatpush.bf16.msra.mxu1 %v18458_v0  ;;  %v18438_v28 = vld [vmem:[%s19753_s7 + $0x2c0] sm:$0xff]  ;;  %v10114_v0 = vmax.f32 %v19275_v37, 0.0  ;;  %v18475_v37 = vld [vmem:[%s19753_s7 + $0x3e8] sm:$0xff] }
 0x604   :  { %11296 = vmatpush.bf16.msrb.mxu2 %v18434_v59  ;;  %v18462_v59 = vld [vmem:[%s19753_s7 + $0x380] sm:$0xff]  ;;  %v10130_v52 = vpack.c.bf16 %v10114_v0, %v10114_v0 }
 0x605   :  { %11324 = vmatpush.bf16.msra.mxu0 %v18448_v30  ;;  %v18474_v30 = vld [vmem:[%s19753_s7 + $0x3e0] sm:$0xff] }
 0x606   :  { %11258 = vmatpush.bf16.msra.mxu3 %v18409_v53  ;;  %11336 = vmatpush.bf16.msra.mxu1 %v18457_v8  ;;  %v18493_v8 = vld [vmem:[#allocation14] ss:$0 sm:$0xff] }
 0x608   :  { %11297 = vmatpush.bf16.msrb.mxu2 %v18433_v19  ;;  %v18476_v19 = vld [vmem:[%s19753_s7 + $0x3f0] sm:$0xff] }
 0x609   :  { %11325 = vmatpush.bf16.msra.mxu0 %v18447_v22  ;;  %v18472_v22 = vld [vmem:[%s19753_s7 + $0x3d0] sm:$0xff] }
 0x60a   :  { %11259 = vmatpush.bf16.msra.mxu3 %v18408_v39  ;;  %11337 = vmatpush.bf16.msra.mxu1 %v18456_v24 }
 0x60c   :  { %11298 = vmatpush.bf16.msrb.mxu2 %v18432_v18  ;;  %v19674_v61 = vpop.f32.mrf.mxu0 }
 0x60d   :  { %11326 = vmatpush.bf16.msra.mxu0 %v18446_v47 }
 0x60e   :  { %11260 = vmatpush.bf16.msra.mxu3 %v18407_v45  ;;  %11338 = vmatpush.bf16.msra.mxu1 %v18455_v41  ;;  %v18471_v45 = vld [vmem:[%s19753_s7 + $0x3c8] sm:$0xff]  ;;  %s18743_s7 = smov [#allocation16]  }
 0x60f   :  { %s11378_s23 = sshll.u32 %s18743_s7, 4  ;;  %s11379_s23 = int_to_ptr.vmem [resolvable:$true] %s11378_s23 }
 0x610   :  { %11299 = vmatpush.bf16.msrb.mxu2 %v18431_v44  ;;  %11327 = vmatmul.bf16.vlgmr.msra.gmra.mxu0 %v10131_v46  ;;  %v19682_v57 = vpop.f32.mrf.mxu1 }
 0x612   :  { %11261 = vmatpush.bf16.msra.mxu3 %v18406_v60  ;;  %11339 = vmatpush.bf16.msra.mxu1 %v18454_v49 }
 0x614   :  { %11300 = vmatpush.bf16.msrb.mxu2 %v18430_v36  ;;  %v10062_v31 = vpop.f32.mrf.mxu0  ;;  %v9995_v62 = vpop.f32.mrf.mxu3 }
 0x615   :  { %11262 = vmatmul.bf16.vlgmr.msra.gmra.mxu3 %v10126_v1  ;;  %11340 = vmatmul.bf16.vlgmr.msra.gmra.mxu1 %v10132_v15  ;;  %v10034_v23 = vpop.f32.mrf.mxu2  ;;  %v9996_v35 = vadd.f32 %v9995_v62, %v9983_v14 }
 0x616   :  { %11306 = vmatpush.bf16.msrb.mxu3 %v18445_v6  ;;  %v10035_v54 = vadd.f32 %v10034_v23, %v19598_v2 }
 0x617   :  { %11301 = vmatmul.bf16.vlgmr.msrb.gmra.mxu2 %v10129_v13  ;;  %v10117_v58 = vmax.f32 %v9996_v35, 0.0 }
 0x618   :  { %11345 = vmatpush.bf16.msra.mxu2 %v18469_v34  ;;  %v10075_v51 = vpop.f32.mrf.mxu1 }
 0x619   :  { %v10133_v53 = vpack.c.bf16 %v10117_v58, %v10117_v58 }
 0x61a   :  { %11307 = vmatpush.bf16.msrb.mxu3 %v18444_v9 }
 0x61c   :  { %11346 = vmatpush.bf16.msra.mxu2 %v18468_v32  ;;  %v9997_v26 = vpop.f32.mrf.mxu3 }
 0x61d   :  { %v10036_v50 = vpop.f32.mrf.mxu2 }
 0x61e   :  { %11308 = vmatpush.bf16.msrb.mxu3 %v18443_v42 }
 0x620   :  { %11347 = vmatpush.bf16.msra.mxu2 %v18467_v5 }
 0x622   :  { %11309 = vmatpush.bf16.msrb.mxu3 %v18442_v33 }
 0x624   :  { %11348 = vmatpush.bf16.msra.mxu2 %v18466_v38 }
 0x626   :  { %11310 = vmatpush.bf16.msrb.mxu3 %v18441_v48 }
 0x628   :  { %11349 = vmatpush.bf16.msra.mxu2 %v18465_v29 }
 0x62a   :  { %11311 = vmatpush.bf16.msrb.mxu3 %v18440_v10 }
 0x62c   :  { %11350 = vmatpush.bf16.msra.mxu2 %v18464_v4 }
 0x62d   :  { %v11172_v56 = vpop.f32.mrf.mxu0 }
 0x62e   :  { %11312 = vmatpush.bf16.msrb.mxu3 %v18439_v55  ;;  %v11173_v12 = vadd.f32 %v18493_v8, %v11172_v56 }
 0x630   :  { %11351 = vmatpush.bf16.msra.mxu2 %v18463_v16 }
 0x632   :  { %11313 = vmatpush.bf16.msrb.mxu3 %v18438_v28 }
 0x634   :  { %11352 = vmatpush.bf16.msra.mxu2 %v18462_v59  ;;  %v11185_v21 = vpop.f32.mrf.mxu1 }
 0x635   :  { %11314 = vmatmul.bf16.vlgmr.msrb.gmra.mxu3 %v10130_v52  ;;  %v11186_v17 = vadd.f32 %v11185_v21, %v11173_v12  ;;  %v11174_v39 = vpop.f32.mrf.mxu0 }
 0x636   :  { %11358 = vmatpush.bf16.msra.mxu3 %v18477_v25 }
 0x637   :  { %11353 = vmatmul.bf16.vlgmr.msra.gmra.mxu2 %v10133_v53 }
 0x638   :  { %v10047_v18 = vpop.f32.mrf.mxu3 }
 0x639   :  { %v10048_v47 = vadd.f32 %v10047_v18, %v10035_v54 }
 0x63a   :  { %11359 = vmatpush.bf16.msra.mxu3 %v18476_v19  ;;  %v10086_v24 = vpop.f32.mrf.mxu2 }
 0x63b   :  { %v10061_v27 = vadd.f32 %v19674_v61, %v10048_v47 }
 0x63c   :  { %v11187_v20 = vpop.f32.mrf.mxu1 }
 0x63d   :  { %v10074_v60 = vadd.f32 %v19682_v57, %v10061_v27 }
 0x63e   :  { %11360 = vmatpush.bf16.msra.mxu3 %v18475_v37 }
 0x63f   :  { %v10087_v40 = vadd.f32 %v10086_v24, %v10074_v60 }
 0x640   :  { %v10049_v44 = vpop.f32.mrf.mxu3 }
 0x642   :  { %11361 = vmatpush.bf16.msra.mxu3 %v18474_v30  ;;  %v10088_v41 = vpop.f32.mrf.mxu2 }
 0x646   :  { %11362 = vmatpush.bf16.msra.mxu3 %v18473_v7 }
 0x64a   :  { %11363 = vmatpush.bf16.msra.mxu3 %v18472_v22 }
 0x64d   :  { %v11224_v3 = vpop.f32.mrf.mxu0 }
 0x64e   :  { %11364 = vmatpush.bf16.msra.mxu3 %v18471_v45 }
 0x652   :  { %11365 = vmatpush.bf16.msra.mxu3 %v18470_v11 }
 0x654   :  { %v11237_v36 = vpop.f32.mrf.mxu1 }
 0x655   :  { %v11226_v63 = vpop.f32.mrf.mxu0 }
 0x658   :  { %v10099_v49 = vpop.f32.mrf.mxu3 }
 0x659   :  { %v10100_v6 = vadd.f32 %v10099_v49, %v10087_v40 }
 0x65a   :  { %v11198_v43 = vpop.f32.mrf.mxu2 }
 0x65b   :  { %v11199_v34 = vadd.f32 %v11198_v43, %v11186_v17  ;;  %v10118_v46 = vmax.f32 %v10100_v6, 0.0 }
 0x65c   :  { %v11239_v1 = vpop.f32.mrf.mxu1 }
 0x65d   :  { %v10134_v13 = vpack.c.bf16 %v10118_v46, %v10118_v46 }
 0x65f   :  { %11366 = vmatmul.bf16.vlgmr.msra.gmra.mxu3 %v10134_v13 }
 0x660   :  { %v10101_v15 = vpop.f32.mrf.mxu3 }
 0x662   :  { %v11200_v9 = vpop.f32.mrf.mxu2 }
 0x66d   :  { %v11276_v2 = vpop.f32.mrf.mxu0 }
 0x674   :  { %v11289_v32 = vpop.f32.mrf.mxu1 }
 0x675   :  { %v11278_v42 = vpop.f32.mrf.mxu0 }
 0x678   :  { %v11211_v61 = vpop.f32.mrf.mxu3 }
 0x679   :  { %v11212_v33 = vadd.f32 %v11211_v61, %v11199_v34 }
 0x67a   :  { %v11250_v5 = vpop.f32.mrf.mxu2 }
 0x67b   :  { %v11225_v57 = vadd.f32 %v11224_v3, %v11212_v33 }
 0x67c   :  { %v11291_v38 = vpop.f32.mrf.mxu1 }
 0x67d   :  { %v11238_v31 = vadd.f32 %v11237_v36, %v11225_v57 }
 0x67f   :  { %v11251_v48 = vadd.f32 %v11250_v5, %v11238_v31 }
 0x680   :  { %v11213_v29 = vpop.f32.mrf.mxu3 }
 0x682   :  { %v11252_v62 = vpop.f32.mrf.mxu2 }
 0x68d   :  { %v11328_v23 = vpop.f32.mrf.mxu0 }
 0x692   :  { %v11341_v51 = vpop.f32.mrf.mxu1 }
 0x695   :  { %v11330_v10 = vpop.f32.mrf.mxu0 }
 0x698   :  { %v11263_v4 = vpop.f32.mrf.mxu3 }
 0x699   :  { %v11264_v14 = vadd.f32 %v11263_v4, %v11251_v48 }
 0x69a   :  { %v11302_v55 = vpop.f32.mrf.mxu2  ;;  %v11343_v35 = vpop.f32.mrf.mxu1 }
 0x69b   :  { %v11277_v16 = vadd.f32 %v11276_v2, %v11264_v14 }
 0x69d   :  { %v11290_v26 = vadd.f32 %v11289_v32, %v11277_v16 }
 0x69f   :  { %v11303_v50 = vadd.f32 %v11302_v55, %v11290_v26 }
 0x6a0   :  { %v11265_v28 = vpop.f32.mrf.mxu3 }
 0x6a2   :  { %v11304_v59 = vpop.f32.mrf.mxu2 }
 0x6b8   :  { %v11315_v0 = vpop.f32.mrf.mxu3 }
 0x6b9   :  { %v11316_v25 = vadd.f32 %v11315_v0, %v11303_v50 }
 0x6ba   :  { %v11354_v58 = vpop.f32.mrf.mxu2 }
 0x6bb   :  { %v11329_v52 = vadd.f32 %v11328_v23, %v11316_v25 }
 0x6bd   :  { %v11342_v53 = vadd.f32 %v11341_v51, %v11329_v52 }
 0x6bf   :  { %v11355_v37 = vadd.f32 %v11354_v58, %v11342_v53 }
 0x6c0   :  { %v11317_v19 = vpop.f32.mrf.mxu3 }
 0x6c2   :  { %v11356_v8 = vpop.f32.mrf.mxu2 }
 0x6e2   :  { %v11367_v56 = vpop.f32.mrf.mxu3 }
 0x6e3   :  { %v11368_v12 = vadd.f32 %v11367_v56, %v11355_v37 }
 0x6e5   :  { %11372 = vst.msk [vmem:[#allocation16] sm:$0xff] %vm11371_vm1, %v11368_v12 }
 0x6e6   :  { %11383 = dma.vmem_to_hbm [thread:$0]  %s11379_s23, 128, %s11381_s25, [#allocation4]  }
 0x6ea   :  { %v11369_v30 = vpop.f32.mrf.mxu3 }
 0x6eb   :  { %18727 = dma.done.wait [#allocation4], 128  }
 0x6ec   :  { %18728 = vsyncadd [#allocation4], 4294967168 }
 0x6ed   :  { %11388 = vsyncpa [#allocation3], 1 }
 0x6ee   :  { %11389 = vsyncpa [#allocation6], 1 }
 0x6ef   :  { %11390 = vsyncpa [#allocation9], 1 }
 0x6f0   :  { %11391 = vsyncpa [#allocation12], 1 }
 0x6f1   :  { %11392 = vsyncpa [#allocation15], 1 }
 0x6f2   :  { %11393 = vsyncpa [#allocation4], 1 }

</bundles_post_ra>
